<compile_context>
chip_gen: v5e
topology: v5e:2x2
jax: 0.10.0
libtpu: 0.0.40
codegen_flags: <defaults>
</compile_context>

<pallas_src>
import numpy as np
import jax
import jax.numpy as jnp
from jax.experimental import pallas as pl
from jax.experimental.pallas import tpu as pltpu

# ---------------- model hyper-parameters (mirrors NGPNeRFNetwork.__init__) ---
NUM_LEVELS = 16
COARSE_RES = 16
TABLE_F = 2                      # features per level
LOG2_T = 19                      # tcnn default hashmap size
TABLE_T = 1 << LOG2_T
SCALE = 0.5
AABB_MIN = -SCALE                # scale * [-1,-1,-1]
AABB_MAX = SCALE
DENSITY_HIDDEN = 64              # CutlassMLP n_neurons
DENSITY_OUT = 16
COLOR_HIDDEN = 64
SH_DIM = 16                      # degree 4 -> 16 coefficients
ENC_DIM = NUM_LEVELS * TABLE_F   # 32
COLOR_IN = SH_DIM + DENSITY_OUT  # 32
FUSED_W = 128                    # lane-padded width of the fused density/color stage
PER_LEVEL_SCALE = float(np.exp(np.log(2048 * SCALE / COARSE_RES) / (NUM_LEVELS - 1)))
RES_PER_LEVEL = tuple(int(np.floor(COARSE_RES * PER_LEVEL_SCALE ** lvl))
                      for lvl in range(NUM_LEVELS))

TILE_N = 1024                    # points per grid step (adaptive fallback below)


# ---------------------------- Pallas kernel ---------------------------------
def _ngp_kernel(feat_ref, sh_ref, w0_ref, w1c_ref, c0sh_ref, c1_ref, c2_ref,
                out_ref):
    # feat: (T, 32) bf16 hash-grid features; sh: (T, 16) bf16 SH basis values.

    # --- density MLP layer 1 (bf16 x bf16 on MXU, f32 accumulate) -----------
    h = jnp.maximum(
        jnp.dot(feat_ref[...], w0_ref[...], preferred_element_type=jnp.float32),
        0.0).astype(jnp.bfloat16)                                 # (T, 64)

    # --- fused: density layer 2 + full first color layer (both halves) ------
    # w1c  (64,128): cols 0..63 = w1 @ c0[16:, :], col 64 = w1[:, 0] (sigma
    #                logit), cols 65..127 = 0.
    # c0sh (16,128): cols 0..63 = c0[:16, :] (SH half), cols 64..127 = 0.
    t = (jnp.dot(h, w1c_ref[...], preferred_element_type=jnp.float32)
         + jnp.dot(sh_ref[...], c0sh_ref[...],
                   preferred_element_type=jnp.float32))           # (T, 128) f32

    # --- sigma = TruncExp(density logit)  (forward is plain exp) ------------
    sigma = jnp.exp(t[:, COLOR_HIDDEN:COLOR_HIDDEN + 1])          # (T, 1) f32

    # --- color MLP tail: relu -> 64 -> 4 -------------------------------------
    # c1 is zero-padded to (128, 64): rows >= 64 kill the logit/zero columns,
    # so no masked lane-slice of t is needed.
    c = jnp.maximum(t, 0.0).astype(jnp.bfloat16)                  # (T, 128)
    c = jnp.maximum(
        jnp.dot(c, c1_ref[...], preferred_element_type=jnp.float32),
        0.0).astype(jnp.bfloat16)                                 # (T, 64)
    raw = jnp.dot(c, c2_ref[...], preferred_element_type=jnp.float32)  # (T, 4)

    # --- fused output: cols 1..3 = sigmoid(color), col 0 overwritten = sigma -
    out_ref[...] = jax.nn.sigmoid(raw)
    out_ref[:, 0:1] = sigma


def _full_spec(shape):
    # weights: one block covering the whole array, same block every grid step
    return pl.BlockSpec(shape, lambda i: (0,) * len(shape))


def _pick_tile(n):
    # Keep >= 2 grid steps where possible so v7x's two TensorCores both get
    # work on the 'parallel' axis, while amortizing per-step overhead.
    t = TILE_N
    while t > 256 and n < 2 * t:
        t //= 2
    return t


def ngp_forward_pallas(feat, sh, params):
    """feat: (N,32) bf16 hash features, sh: (N,16) bf16 SH -> (sigma, color)."""
    N = feat.shape[0]
    tile = _pick_tile(N)
    n_pad = (-N) % tile
    if n_pad:
        feat = jnp.pad(feat, ((0, n_pad), (0, 0)))
        sh = jnp.pad(sh, ((0, n_pad), (0, 0)))
    n_tot = feat.shape[0]

    # --- host-side weight fusion / packing (cheap, inside jit) --------------
    w1, c0, c1, c2 = params["w1"], params["c0"], params["c1"], params["c2"]
    w0b = params["w0"].astype(jnp.bfloat16)                              # (32, 64)
    # fused density-out + density-half-of-color-layer-0 (sigma logit in col 64)
    w1c = jnp.concatenate([jnp.dot(w1, c0[SH_DIM:, :]), w1[:, 0:1]], axis=1)
    w1c = jnp.pad(w1c, ((0, 0), (0, FUSED_W - w1c.shape[1]))
                  ).astype(jnp.bfloat16)                                 # (64, 128)
    c0sh = jnp.pad(c0[:SH_DIM, :], ((0, 0), (0, FUSED_W - COLOR_HIDDEN))
                   ).astype(jnp.bfloat16)                                # (16, 128)
    c1p = jnp.pad(c1, ((0, FUSED_W - COLOR_HIDDEN), (0, 0))
                  ).astype(jnp.bfloat16)                                 # (128, 64)
    c2p = jnp.concatenate(
        [jnp.zeros((COLOR_HIDDEN, 1), c2.dtype), c2], axis=1
    ).astype(jnp.bfloat16)                                               # (64, 4)

    # advisory cost so XLA can overlap the hash gather with this kernel
    flops_pp = 2 * (ENC_DIM * DENSITY_HIDDEN + DENSITY_HIDDEN * FUSED_W
                    + SH_DIM * FUSED_W + FUSED_W * COLOR_HIDDEN
                    + COLOR_HIDDEN * 4)
    weight_bytes = 2 * (ENC_DIM * DENSITY_HIDDEN + DENSITY_HIDDEN * FUSED_W
                        + SH_DIM * FUSED_W + FUSED_W * COLOR_HIDDEN
                        + COLOR_HIDDEN * 4)
    cost = pl.CostEstimate(
        flops=n_tot * flops_pp,
        transcendentals=n_tot * 5,
        bytes_accessed=n_tot * (ENC_DIM * 2 + SH_DIM * 2 + 4 * 4) + weight_bytes,
    )

    out = pl.pallas_call(
        _ngp_kernel,
        out_shape=jax.ShapeDtypeStruct((n_tot, 4), jnp.float32),
        grid_spec=pl.GridSpec(
            grid=(n_tot // tile,),
            in_specs=[
                pl.BlockSpec((tile, ENC_DIM), lambda i: (i, 0)),
                pl.BlockSpec((tile, SH_DIM), lambda i: (i, 0)),
                _full_spec(w0b.shape),
                _full_spec(w1c.shape),
                _full_spec(c0sh.shape),
                _full_spec(c1p.shape),
                _full_spec(c2p.shape),
            ],
            out_specs=pl.BlockSpec((tile, 4), lambda i: (i, 0)),
        ),
        compiler_params=pltpu.CompilerParams(dimension_semantics=("parallel",)),
        cost_estimate=cost,
    )(feat, sh, w0b, w1c, c0sh, c1p, c2p)

    out = out[:N]
    return out[:, 0], out[:, 1:4]


# ----------------- SH degree-4 direction encoding (XLA precompute) ----------
def sh_encode(d):
    """d: (N, 3) raw directions -> (N, 16) SH basis values (f32).

    tcnn's SphericalHarmonics encoding receives (d+1)/2 and maps back to
    2*x-1 internally, i.e. this is SH of the normalized direction.
    """
    d = d * jax.lax.rsqrt(jnp.sum(d * d, axis=-1, keepdims=True) + 1e-20)
    x, y, z = d[:, 0], d[:, 1], d[:, 2]
    xx, yy, zz = x * x, y * y, z * z
    xy, yz, xz = x * y, y * z, x * z
    return jnp.stack([
        0.28209479177387814 * jnp.ones_like(x),
        -0.48860251190291987 * y,
        0.48860251190291987 * z,
        -0.48860251190291987 * x,
        1.0925484305920792 * xy,
        -1.0925484305920792 * yz,
        0.94617469575755997 * zz - 0.31539156525251999,
        -1.0925484305920792 * xz,
        0.54627421529603959 * (xx - yy),
        0.59004358992664352 * y * (-3.0 * xx + yy),
        2.8906114426405538 * xy * z,
        0.45704579946446572 * y * (1.0 - 5.0 * zz),
        0.3731763325901154 * z * (5.0 * zz - 3.0),
        0.45704579946446572 * x * (1.0 - 5.0 * zz),
        1.4453057213202769 * z * (xx - yy),
        0.59004358992664352 * x * (-xx + 3.0 * yy),
    ], axis=-1)


# ------------------- multi-resolution hash-grid encoding (JAX glue) ---------
def hash_encode(xn, table):
    """xn: (N, 3) in [0, 1]; table: (NUM_LEVELS, TABLE_T, TABLE_F) -> (N, 32).

    Vectorized over all levels: 8 corner gathers total instead of 16*8.
    """
    n = xn.shape[0]
    primes = (jnp.uint32(1), jnp.uint32(2654435761), jnp.uint32(805459861))
    res = jnp.asarray(RES_PER_LEVEL, jnp.float32)                  # (L,)
    pos = xn[:, None, :] * res[None, :, None]                      # (N, L, 3)
    pos0f = jnp.floor(pos)
    w = pos - pos0f                                                # trilinear wts
    pos0 = pos0f.astype(jnp.uint32)
    lvl_off = (jnp.arange(NUM_LEVELS, dtype=jnp.uint32)
               * jnp.uint32(TABLE_T))[None, :]                     # (1, L)
    flat_table = table.reshape(NUM_LEVELS * TABLE_T, TABLE_F)

    acc = jnp.zeros((n, NUM_LEVELS, TABLE_F), jnp.float32)
    for corner in range(8):
        off = np.array([(corner >> 0) & 1, (corner >> 1) & 1, (corner >> 2) & 1])
        c = pos0 + jnp.asarray(off, jnp.uint32)                    # (N, L, 3)
        idx = (c[..., 0] * primes[0]) ^ (c[..., 1] * primes[1]) \
              ^ (c[..., 2] * primes[2])
        idx = (idx & jnp.uint32(TABLE_T - 1)) + lvl_off            # (N, L)
        cw = jnp.prod(jnp.where(jnp.asarray(off, bool), w, 1.0 - w),
                      axis=-1, keepdims=True)                      # (N, L, 1)
        acc = acc + cw * flat_table[idx]
    return acc.reshape(n, NUM_LEVELS * TABLE_F)


# --------------------------- full forward ------------------------------------
def ngp_nerf_forward(params, x, d):
    # aabb normalization: (x - aabb_min) / (aabb_max - aabb_min)
    xn = (x - AABB_MIN) / (AABB_MAX - AABB_MIN)
    feat = hash_encode(xn, params["table"]).astype(jnp.bfloat16)
    sh = sh_encode(d).astype(jnp.bfloat16)
    return ngp_forward_pallas(feat, sh, params)


def init_params(key):
    ks = jax.random.split(key, 6)
    def w(k, shape, scale=0.1):
        return (scale * jax.random.normal(k, shape)).astype(jnp.float32)
    return {
        # hash table: tcnn-style small uniform init
        "table": jax.random.uniform(ks[0], (NUM_LEVELS, TABLE_T, TABLE_F),
                                    jnp.float32, minval=-1e-1, maxval=1e-1),
        # density MLP: 32 -> 64 -> 16 (bias-free, like tcnn CutlassMLP)
        "w0": w(ks[1], (ENC_DIM, DENSITY_HIDDEN)),
        "w1": w(ks[2], (DENSITY_HIDDEN, DENSITY_OUT)),
        # color MLP: 32 -> 64 -> 64 -> 3 (bias-free)
        "c0": w(ks[3], (COLOR_IN, COLOR_HIDDEN)),
        "c1": w(ks[4], (COLOR_HIDDEN, COLOR_HIDDEN)),
        "c2": w(ks[5], (COLOR_HIDDEN, 3)),
    }


if __name__ == "__main__":
    key = jax.random.PRNGKey(0)
    k_x, k_d, k_p = jax.random.split(key, 3)
    N = 2048  # number of sample points (2 grid steps of 1024 each)
    x = jax.random.uniform(k_x, (N, 3), jnp.float32, minval=AABB_MIN, maxval=AABB_MAX)
    d = jax.random.normal(k_d, (N, 3), jnp.float32)
    params = init_params(k_p)

    sigma, color = jax.jit(ngp_nerf_forward)(params, x, d)
    jax.block_until_ready((sigma, color))

    assert sigma.shape == (N,) and color.shape == (N, 3)
    assert bool(jnp.all(jnp.isfinite(sigma))) and bool(jnp.all(jnp.isfinite(color)))
    assert bool(jnp.all(sigma > 0.0))                       # exp output
    assert bool(jnp.all((color >= 0.0) & (color <= 1.0)))   # sigmoid output
    print("KERNEL_OK")
</pallas_src>

<mosaic_0001>
module attributes {stable_mosaic.version = 11 : i64} {
  func.func @_ngp_kernel(%arg0: i32, %arg1: memref<1024x32xbf16, #tpu.memory_space<vmem>>, %arg2: memref<1024x16xbf16, #tpu.memory_space<vmem>>, %arg3: memref<32x64xbf16, #tpu.memory_space<vmem>>, %arg4: memref<64x128xbf16, #tpu.memory_space<vmem>>, %arg5: memref<16x128xbf16, #tpu.memory_space<vmem>>, %arg6: memref<128x64xbf16, #tpu.memory_space<vmem>>, %arg7: memref<64x4xbf16, #tpu.memory_space<vmem>>, %arg8: memref<1024x4xf32, #tpu.memory_space<vmem>>) attributes {dimension_semantics = [#tpu.dimension_semantics<parallel>], iteration_bounds = array<i64: 2>, scalar_prefetch = 0 : i64, scratch_operands = 0 : i64, tpu.core_type = #tpu.core_type<tc>, window_params = [{transform_indices = @transform_0, window_bounds = array<i64: 1024, 32>}, {transform_indices = @transform_1, window_bounds = array<i64: 1024, 16>}, {pipeline_mode = #tpu.pipeline_mode<synchronous>, transform_indices = @transform_2, window_bounds = array<i64: 32, 64>}, {pipeline_mode = #tpu.pipeline_mode<synchronous>, transform_indices = @transform_3, window_bounds = array<i64: 64, 128>}, {pipeline_mode = #tpu.pipeline_mode<synchronous>, transform_indices = @transform_4, window_bounds = array<i64: 16, 128>}, {pipeline_mode = #tpu.pipeline_mode<synchronous>, transform_indices = @transform_5, window_bounds = array<i64: 128, 64>}, {pipeline_mode = #tpu.pipeline_mode<synchronous>, transform_indices = @transform_6, window_bounds = array<i64: 64, 4>}, {transform_indices = @transform_7, window_bounds = array<i64: 1024, 4>}]} {
    %c0 = arith.constant 0 : index
    %c0_0 = arith.constant 0 : index
    %0 = vector.load %arg1[%c0, %c0_0] : memref<1024x32xbf16, #tpu.memory_space<vmem>>, vector<1024x32xbf16>
    %c0_1 = arith.constant 0 : index
    %c0_2 = arith.constant 0 : index
    %1 = vector.load %arg3[%c0_1, %c0_2] : memref<32x64xbf16, #tpu.memory_space<vmem>>, vector<32x64xbf16>
    %cst = arith.constant dense<0.000000e+00> : vector<1024x64xf32>
    %2 = tpu.matmul %0, %1, %cst {dimension_numbers = #tpu.dot_dimension_numbers<[1], [0], [0], [1], [0, 0, 1, 1], [], []>} : vector<1024x32xbf16>, vector<32x64xbf16>, vector<1024x64xf32> -> vector<1024x64xf32>
    %cst_3 = arith.constant 0.000000e+00 : f32
    %3 = vector.broadcast %cst_3 : f32 to vector<1024x64xf32>
    %4 = arith.maximumf %2, %3 : vector<1024x64xf32>
    %5 = arith.truncf %4 : vector<1024x64xf32> to vector<1024x64xbf16>
    %c0_4 = arith.constant 0 : index
    %c0_5 = arith.constant 0 : index
    %6 = vector.load %arg4[%c0_4, %c0_5] : memref<64x128xbf16, #tpu.memory_space<vmem>>, vector<64x128xbf16>
    %cst_6 = arith.constant dense<0.000000e+00> : vector<1024x128xf32>
    %7 = tpu.matmul %5, %6, %cst_6 {dimension_numbers = #tpu.dot_dimension_numbers<[1], [0], [0], [1], [0, 0, 1, 1], [], []>} : vector<1024x64xbf16>, vector<64x128xbf16>, vector<1024x128xf32> -> vector<1024x128xf32>
    %c0_7 = arith.constant 0 : index
    %c0_8 = arith.constant 0 : index
    %8 = vector.load %arg2[%c0_7, %c0_8] : memref<1024x16xbf16, #tpu.memory_space<vmem>>, vector<1024x16xbf16>
    %c0_9 = arith.constant 0 : index
    %c0_10 = arith.constant 0 : index
    %9 = vector.load %arg5[%c0_9, %c0_10] : memref<16x128xbf16, #tpu.memory_space<vmem>>, vector<16x128xbf16>
    %cst_11 = arith.constant dense<0.000000e+00> : vector<1024x128xf32>
    %10 = tpu.matmul %8, %9, %cst_11 {dimension_numbers = #tpu.dot_dimension_numbers<[1], [0], [0], [1], [0, 0, 1, 1], [], []>} : vector<1024x16xbf16>, vector<16x128xbf16>, vector<1024x128xf32> -> vector<1024x128xf32>
    %11 = arith.addf %7, %10 : vector<1024x128xf32>
    %12 = vector.extract_strided_slice %11 {offsets = [0, 64], sizes = [1024, 1], strides = [1, 1]} : vector<1024x128xf32> to vector<1024x1xf32>
    %13 = math.exp %12 : vector<1024x1xf32>
    %cst_12 = arith.constant 0.000000e+00 : f32
    %14 = vector.broadcast %cst_12 : f32 to vector<1024x128xf32>
    %15 = arith.maximumf %11, %14 : vector<1024x128xf32>
    %16 = arith.truncf %15 : vector<1024x128xf32> to vector<1024x128xbf16>
    %c0_13 = arith.constant 0 : index
    %c0_14 = arith.constant 0 : index
    %17 = vector.load %arg6[%c0_13, %c0_14] : memref<128x64xbf16, #tpu.memory_space<vmem>>, vector<128x64xbf16>
    %cst_15 = arith.constant dense<0.000000e+00> : vector<1024x64xf32>
    %18 = tpu.matmul %16, %17, %cst_15 {dimension_numbers = #tpu.dot_dimension_numbers<[1], [0], [0], [1], [0, 0, 1, 1], [], []>} : vector<1024x128xbf16>, vector<128x64xbf16>, vector<1024x64xf32> -> vector<1024x64xf32>
    %cst_16 = arith.constant 0.000000e+00 : f32
    %19 = vector.broadcast %cst_16 : f32 to vector<1024x64xf32>
    %20 = arith.maximumf %18, %19 : vector<1024x64xf32>
    %21 = arith.truncf %20 : vector<1024x64xf32> to vector<1024x64xbf16>
    %c0_17 = arith.constant 0 : index
    %c0_18 = arith.constant 0 : index
    %22 = vector.load %arg7[%c0_17, %c0_18] : memref<64x4xbf16, #tpu.memory_space<vmem>>, vector<64x4xbf16>
    %cst_19 = arith.constant dense<0.000000e+00> : vector<1024x4xf32>
    %23 = tpu.matmul %21, %22, %cst_19 {dimension_numbers = #tpu.dot_dimension_numbers<[1], [0], [0], [1], [0, 0, 1, 1], [], []>} : vector<1024x64xbf16>, vector<64x4xbf16>, vector<1024x4xf32> -> vector<1024x4xf32>
    %24 = arith.negf %23 : vector<1024x4xf32>
    %25 = math.exp %24 : vector<1024x4xf32>
    %cst_20 = arith.constant 1.000000e+00 : f32
    %26 = vector.broadcast %cst_20 : f32 to vector<1024x4xf32>
    %27 = arith.addf %26, %25 : vector<1024x4xf32>
    %28 = arith.divf %26, %27 : vector<1024x4xf32>
    %c0_21 = arith.constant 0 : index
    %c0_22 = arith.constant 0 : index
    %29 = vector.load %arg8[%c0_21, %c0_22] : memref<1024x4xf32, #tpu.memory_space<vmem>>, vector<1024x4xf32>
    tpu.vector_store %arg8[%c0_21, %c0_22], %28 {strides = array<i32>} : memref<1024x4xf32, #tpu.memory_space<vmem>>, vector<1024x4xf32>,
    %c0_23 = arith.constant 0 : index
    %c0_24 = arith.constant 0 : index
    %30 = vector.load %arg8[%c0_23, %c0_24] : memref<1024x4xf32, #tpu.memory_space<vmem>>, vector<1024x1xf32>
    tpu.vector_store %arg8[%c0_23, %c0_24], %13 {strides = array<i32>} : memref<1024x4xf32, #tpu.memory_space<vmem>>, vector<1024x1xf32>,
    return
  }
  func.func @transform_0(%arg0: i32) -> (i32, i32) {
    %c0_i32 = arith.constant 0 : i32
    %c0_i32_0 = arith.constant 0 : i32
    return %arg0, %c0_i32 : i32, i32
  }
  func.func @transform_1(%arg0: i32) -> (i32, i32) {
    %c0_i32 = arith.constant 0 : i32
    %c0_i32_0 = arith.constant 0 : i32
    return %arg0, %c0_i32 : i32, i32
  }
  func.func @transform_2(%arg0: i32) -> (i32, i32) {
    %c0_i32 = arith.constant 0 : i32
    %c0_i32_0 = arith.constant 0 : i32
    %c0_i32_1 = arith.constant 0 : i32
    return %c0_i32, %c0_i32_0 : i32, i32
  }
  func.func @transform_3(%arg0: i32) -> (i32, i32) {
    %c0_i32 = arith.constant 0 : i32
    %c0_i32_0 = arith.constant 0 : i32
    %c0_i32_1 = arith.constant 0 : i32
    return %c0_i32, %c0_i32_0 : i32, i32
  }
  func.func @transform_4(%arg0: i32) -> (i32, i32) {
    %c0_i32 = arith.constant 0 : i32
    %c0_i32_0 = arith.constant 0 : i32
    %c0_i32_1 = arith.constant 0 : i32
    return %c0_i32, %c0_i32_0 : i32, i32
  }
  func.func @transform_5(%arg0: i32) -> (i32, i32) {
    %c0_i32 = arith.constant 0 : i32
    %c0_i32_0 = arith.constant 0 : i32
    %c0_i32_1 = arith.constant 0 : i32
    return %c0_i32, %c0_i32_0 : i32, i32
  }
  func.func @transform_6(%arg0: i32) -> (i32, i32) {
    %c0_i32 = arith.constant 0 : i32
    %c0_i32_0 = arith.constant 0 : i32
    %c0_i32_1 = arith.constant 0 : i32
    return %c0_i32, %c0_i32_0 : i32, i32
  }
  func.func @transform_7(%arg0: i32) -> (i32, i32) {
    %c0_i32 = arith.constant 0 : i32
    %c0_i32_0 = arith.constant 0 : i32
    return %arg0, %c0_i32 : i32, i32
  }
}

</mosaic_0001>

<bundles_post_ra>
// kernel: ngp_nerf_forward.1
= control target key start
LH: loop header
LB: loop body
LE: loop exit
PB: predicated region body
PF: predicated region fallthrough
CT: control target
= control target key end

     0   :  { %s9834_s24 = smov 0   ;;  %s11830_s0 = inlined_call_operand.vmem [shape: bf16[2048,32], index: 0, kind: input, shape index: {}]   ;;  %s11831_s1 = inlined_call_operand.vmem [shape: bf16[2048,16], index: 1, kind: input, shape index: {}]   ;;  %s11832_s2 = inlined_call_operand.vmem [shape: bf16[32,64], index: 2, kind: input, shape index: {}]   ;;  %s11833_s3 = inlined_call_operand.vmem [shape: bf16[64,128], index: 3, kind: input, shape index: {}]   ;;  %s11834_s4 = inlined_call_operand.vmem [shape: bf16[16,128], index: 4, kind: input, shape index: {}]   ;;  %s11835_s5 = inlined_call_operand.vmem [shape: bf16[128,64], index: 5, kind: input, shape index: {}]   ;;  %s11836_s6 = inlined_call_operand.vmem [shape: bf16[64,4], index: 6, kind: input, shape index: {}]   ;;  %s11837_s7 = inlined_call_operand.vmem [shape: f32[2048,4], index: 7, kind: output, shape index: {}]  }
   0x1 LB: > { %s7871_s25 = sadd.s32 4294967295, %s9791_s24   ;;  %p7875_p0 = scmp.ge.s32.totalorder %s9791_s24, 1  ;;  %s9791_s24 = sphi %s9834_s24, %s17_s24  }
   0x2   : > { %p249_p1 = scmp.lt.s32.totalorder %s9791_s24, 3 }
   0x4   : > { %p250_p2 = pnand %p7875_p0, %p249_p1 }
   0x6   : > { %253 = sbr.rel (%p250_p2) target bundleno = 2483 (0x9b3), region = 48 }
   0xb   : > { %v8921_v0 = vld [vmem:[%s11832_s2 + $0x8] sm:$0xff]  ;;  %v8990_v1 = vld [vmem:[%s11834_s4] sm:$0xff]  ;;  %s7876_s30 = sshll.u32 %s7871_s25, 7  ;;  %vm769_vm0 = vcmask 261120   ;;  %vm1947_vm1 = vcmask 130048   ;;  %vm2493_vm2 = vcmask 523264  }
   0xc   : > { %p287_p3 = scmp.lt.s32.totalorder %s7876_s30, 255  ;;  %968 = vmatpush.bf16.msra.mxu0 %v8921_v0  ;;  %v8920_v2 = vld [vmem:[%s11832_s2] sm:$0xff]  ;;  %9006 = vmatpush.bf16.msra.mxu2 %v8990_v1  ;;  %s9793_s26 = smov 64   ;;  %vm7033_vm6 = vcmask 31744   ;;  %vm7674_vm7 = vcmask 7168  }
   0xd   : > { %9005 = vmatpush.bf16.msra.mxu1 %v8990_v1  ;;  %9003 = vmatpush.bf16.msra.mxu3 %v8921_v0 }
   0xe   : > { %s12081_s30 = smov (!%p287_p3, %s7876_s30), 255 }
   0xf   : > { %s7877_s10 = sshll.u32 %s12081_s30, 2 }
  0x10   : > { %969 = vmatpush.bf16.msra.mxu0 %v8920_v2  ;;  %s9857_s13 = scalar_lea.vmem %s11830_s0, %s7877_s10  ;;  %s9862_s16 = scalar_lea.vmem %s11831_s1, %s7877_s10 }
  0x11   : > { %v8856_v3 = vld [vmem:[%s9857_s13] sm:$0xff]  ;;  %v8960_v4 = vld [vmem:[%s9862_s16 + $0x110] sm:$0xff]  ;;  %9004 = vmatpush.bf16.msra.mxu3 %v8920_v2  ;;  %v8857_v5 = vld [vmem:[%s9857_s13 + $0x8] sm:$0xff] }
  0x12   : > { %8504 = vmatmul.msk.bf16.vlgmr.msra.gmra.mxu2 %vm1947_vm1, %v8960_v4  ;;  %v8961_v6 = vld [vmem:[%s9862_s16 + $0x118] sm:$0xff]  ;;  %v8858_v7 = vld [vmem:[%s9857_s13 + $0x10] sm:$0xff]  ;;  %v8962_v8 = vld [vmem:[%s9862_s16 + $0x120] sm:$0xff] }
  0x13   : > { %8146 = vmatmul.msk.bf16.vlgmr.msra.gmra.mxu0 %vm769_vm0, %v8856_v3  ;;  %v8859_v9 = vld [vmem:[%s9857_s13 + $0x18] sm:$0xff]  ;;  %v8963_v10 = vld [vmem:[%s9862_s16 + $0x128] sm:$0xff]  ;;  %v8860_v11 = vld [vmem:[%s9857_s13 + $0x20] sm:$0xff] }
  0x14   : > { %2147 = vmatpush.bf16.msrb.mxu0 %v8990_v1  ;;  %v8964_v12 = vld [vmem:[%s9862_s16 + $0x130] sm:$0xff]  ;;  %v8861_v13 = vld [vmem:[%s9857_s13 + $0x28] sm:$0xff]  ;;  %v8965_v14 = vld [vmem:[%s9862_s16 + $0x138] sm:$0xff] }
  0x15   : > { %9007 = vmatpush.bf16.msrb.mxu3 %v8990_v1  ;;  %v8862_v15 = vld [vmem:[%s9857_s13 + $0x30] sm:$0xff]  ;;  %v8966_v16 = vld [vmem:[%s9862_s16 + $0x140] sm:$0xff]  ;;  %v8863_v17 = vld [vmem:[%s9857_s13 + $0x38] sm:$0xff] }
  0x16   : > { %v8967_v18 = vld [vmem:[%s9862_s16 + $0x148] sm:$0xff]  ;;  %v8864_v19 = vld [vmem:[%s9857_s13 + $0x40] sm:$0xff]  ;;  %v8968_v20 = vld [vmem:[%s9862_s16 + $0x150] sm:$0xff] }
  0x17   : > { %v8865_v28 = vld [vmem:[%s9857_s13 + $0x48] sm:$0xff]  ;;  %v8969_v29 = vld [vmem:[%s9862_s16 + $0x158] sm:$0xff]  ;;  %v8866_v37 = vld [vmem:[%s9857_s13 + $0x50] sm:$0xff] }
  0x18   : > { %v8970_v38 = vld [vmem:[%s9862_s16 + $0x160] sm:$0xff]  ;;  %v8867_v46 = vld [vmem:[%s9857_s13 + $0x58] sm:$0xff]  ;;  %v8971_v47 = vld [vmem:[%s9862_s16 + $0x168] sm:$0xff] }
  0x19   : > { %v8868_v55 = vld [vmem:[%s9857_s13 + $0x60] sm:$0xff]  ;;  %v8972_v56 = vld [vmem:[%s9862_s16 + $0x170] sm:$0xff]  ;;  %v8869_v0 = vld [vmem:[%s9857_s13 + $0x68] sm:$0xff] }
  0x1a   : > { %v8973_v1 = vld [vmem:[%s9862_s16 + $0x178] sm:$0xff] }
  0x22   : > { %8505 = vmatmul.msk.bf16.gmra.mxu2 %vm1947_vm1, %v8961_v6 }
  0x23   : > { %8147 = vmatmul.msk.bf16.gmra.mxu0 %vm769_vm0, %v8857_v5 }
  0x32   : > { %8506 = vmatmul.msk.bf16.gmra.mxu2 %vm1947_vm1, %v8962_v8 }
  0x33   : > { %8148 = vmatmul.msk.bf16.gmra.mxu0 %vm769_vm0, %v8858_v7 }
  0x42   : > { %8507 = vmatmul.msk.bf16.gmra.mxu2 %vm1947_vm1, %v8963_v10  ;;  %v8974_v10 = vld [vmem:[%s9862_s16 + $0x180] sm:$0xff] }
  0x43   : > { %8149 = vmatmul.msk.bf16.gmra.mxu0 %vm769_vm0, %v8859_v9  ;;  %v8870_v9 = vld [vmem:[%s9857_s13 + $0x70] sm:$0xff] }
  0x52   : > { %8508 = vmatmul.msk.bf16.gmra.mxu2 %vm1947_vm1, %v8964_v12  ;;  %v8925_v12 = vld [vmem:[%s11833_s3 + $0x18] sm:$0xff] }
  0x53   : > { %8150 = vmatmul.msk.bf16.gmra.mxu0 %vm769_vm0, %v8860_v11  ;;  %2690 = vmatpush.bf16.msrb.mxu2 %v8925_v12 }
  0x62   : > { %8509 = vmatmul.msk.bf16.gmra.mxu2 %vm1947_vm1, %v8965_v14  ;;  %v8924_v14 = vld [vmem:[%s11833_s3 + $0x10] sm:$0xff] }
  0x63   : > { %8151 = vmatmul.msk.bf16.gmra.mxu0 %vm769_vm0, %v8861_v13  ;;  %2691 = vmatpush.bf16.msrb.mxu2 %v8924_v14 }
  0x72   : > { %8510 = vmatmul.msk.bf16.gmra.mxu2 %vm1947_vm1, %v8966_v16 }
  0x73   : > { %8152 = vmatmul.msk.bf16.gmra.mxu0 %vm769_vm0, %v8862_v15 }
  0x82   : > { %8511 = vmatmul.msk.bf16.gmra.mxu2 %vm1947_vm1, %v8967_v18  ;;  %v8923_v18 = vld [vmem:[%s11833_s3 + $0x8] sm:$0xff] }
  0x83   : > { %8153 = vmatmul.msk.bf16.gmra.mxu0 %vm769_vm0, %v8863_v17  ;;  %2692 = vmatpush.bf16.msrb.mxu2 %v8923_v18 }
  0x90   : > { %v971_v21 = vpop.f32.mrf.mxu0 }
  0x91   : > { %v1291_v24 = vmax.f32 %v971_v21, 0.0  ;;  %v8922_v21 = vld [vmem:[%s11833_s3] sm:$0xff] }
  0x92   : > { %8512 = vmatmul.msk.bf16.gmra.mxu2 %vm1947_vm1, %v8968_v20 }
  0x93   : > { %8154 = vmatmul.msk.bf16.gmra.mxu0 %vm769_vm0, %v8864_v19  ;;  %2693 = vmatpush.bf16.msrb.mxu2 %v8922_v21 }
  0x95   : > { %v9900_v22 = vpop.f32.mrf.mxu2 }
  0x98   : > { %v973_v23 = vpop.f32.mrf.mxu0 }
  0x99   : > { %v1292_v25 = vmax.f32 %v973_v23, 0.0  ;;  %v8871_v23 = vld [vmem:[%s9857_s13 + $0x78] sm:$0xff] }
  0x9b   : > { %v9902_v26 = vpack.c.bf16 %v1292_v25, %v1291_v24  ;;  %v8975_v24 = vld [vmem:[%s9862_s16 + $0x188] sm:$0xff] }
  0x9d   : > { %v9904_v27 = vpop.f32.mrf.mxu2 }
  0xa0   : > { %v976_v30 = vpop.f32.mrf.mxu0 }
  0xa1   : > { %v1293_v33 = vmax.f32 %v976_v30, 0.0 }
  0xa2   : > { %8513 = vmatmul.msk.bf16.gmra.mxu2 %vm1947_vm1, %v8969_v29 }
  0xa3   : > { %8155 = vmatmul.msk.bf16.gmra.mxu0 %vm769_vm0, %v8865_v28 }
  0xa5   : > { %v9910_v31 = vpop.f32.mrf.mxu2 }
  0xa8   : > { %v978_v32 = vpop.f32.mrf.mxu0 }
  0xa9   : > { %v1294_v34 = vmax.f32 %v978_v32, 0.0 }
  0xab   : > { %v9912_v35 = vpack.c.bf16 %v1294_v34, %v1293_v33 }
  0xad   : > { %v9914_v36 = vpop.f32.mrf.mxu2 }
  0xb0   : > { %v981_v39 = vpop.f32.mrf.mxu0 }
  0xb1   : > { %v1295_v42 = vmax.f32 %v981_v39, 0.0 }
  0xb2   : > { %8514 = vmatmul.msk.bf16.gmra.mxu2 %vm1947_vm1, %v8970_v38  ;;  %v8976_v38 = vld [vmem:[%s9862_s16 + $0x190] sm:$0xff] }
  0xb3   : > { %8156 = vmatmul.msk.bf16.gmra.mxu0 %vm769_vm0, %v8866_v37  ;;  %v8872_v37 = vld [vmem:[%s9857_s13 + $0x80] sm:$0xff] }
  0xb5   : > { %v9920_v40 = vpop.f32.mrf.mxu2 }
  0xb8   : > { %v983_v41 = vpop.f32.mrf.mxu0 }
  0xb9   : > { %v1296_v43 = vmax.f32 %v983_v41, 0.0 }
  0xbb   : > { %v9922_v44 = vpack.c.bf16 %v1296_v43, %v1295_v42 }
  0xbd   : > { %v9924_v45 = vpop.f32.mrf.mxu2 }
  0xc0   : > { %v986_v48 = vpop.f32.mrf.mxu0 }
  0xc1   : > { %v1297_v51 = vmax.f32 %v986_v48, 0.0 }
  0xc2   : > { %8515 = vmatmul.msk.bf16.gmra.mxu2 %vm1947_vm1, %v8971_v47 }
  0xc3   : > { %8157 = vmatmul.msk.bf16.gmra.mxu0 %vm769_vm0, %v8867_v46 }
  0xc5   : > { %v9930_v49 = vpop.f32.mrf.mxu2 }
  0xc8   : > { %v988_v50 = vpop.f32.mrf.mxu0 }
  0xc9   : > { %v1298_v52 = vmax.f32 %v988_v50, 0.0  ;;  %v8873_v50 = vld [vmem:[%s9857_s13 + $0x88] sm:$0xff] }
  0xcb   : > { %v9932_v53 = vpack.c.bf16 %v1298_v52, %v1297_v51 }
  0xcd   : > { %v9934_v54 = vpop.f32.mrf.mxu2 }
  0xd0   : > { %v991_v57 = vpop.f32.mrf.mxu0 }
  0xd1   : > { %v1299_v60 = vmax.f32 %v991_v57, 0.0 }
  0xd2   : > { %8516 = vmatmul.msk.bf16.gmra.mxu2 %vm1947_vm1, %v8972_v56 }
  0xd3   : > { %8158 = vmatmul.msk.bf16.gmra.mxu0 %vm769_vm0, %v8868_v55 }
  0xd5   : > { %v9940_v58 = vpop.f32.mrf.mxu2 }
  0xd8   : > { %v993_v59 = vpop.f32.mrf.mxu0 }
  0xd9   : > { %v1300_v61 = vmax.f32 %v993_v59, 0.0 }
  0xdb   : > { %v9942_v62 = vpack.c.bf16 %v1300_v61, %v1299_v60  ;;  %v8874_v61 = vld [vmem:[%s9857_s13 + $0x90] sm:$0xff] }
  0xdd   : > { %v9944_v63 = vpop.f32.mrf.mxu2 }
  0xe0   : > { %v996_v2 = vpop.f32.mrf.mxu0 }
  0xe1   : > { %v1301_v5 = vmax.f32 %v996_v2, 0.0 }
  0xe2   : > { %8517 = vmatmul.msk.bf16.gmra.mxu2 %vm1947_vm1, %v8973_v1 }
  0xe3   : > { %8159 = vmatmul.msk.bf16.gmra.mxu0 %vm769_vm0, %v8869_v0 }
  0xe5   : > { %v9950_v3 = vpop.f32.mrf.mxu2 }
  0xe8   : > { %v998_v4 = vpop.f32.mrf.mxu0 }
  0xe9   : > { %v1302_v6 = vmax.f32 %v998_v4, 0.0 }
  0xeb   : > { %v9952_v7 = vpack.c.bf16 %v1302_v6, %v1301_v5 }
  0xed   : > { %v9954_v8 = vpop.f32.mrf.mxu2 }
  0xf0   : > { %v1001_v11 = vpop.f32.mrf.mxu0 }
  0xf1   : > { %v1303_v16 = vmax.f32 %v1001_v11, 0.0 }
  0xf2   : > { %8518 = vmatmul.msk.bf16.gmra.mxu2 %vm1947_vm1, %v8974_v10 }
  0xf3   : > { %8160 = vmatmul.msk.bf16.gmra.mxu0 %vm769_vm0, %v8870_v9  ;;  %v8875_v9 = vld [vmem:[%s9857_s13 + $0x98] sm:$0xff] }
  0xf5   : > { %v9963_v13 = vpop.f32.mrf.mxu2 }
  0xf8   : > { %v1003_v15 = vpop.f32.mrf.mxu0 }
  0xf9   : > { %v1304_v17 = vmax.f32 %v1003_v15, 0.0 }
  0xfb   : > { %v9971_v19 = vpack.c.bf16 %v1304_v17, %v1303_v16  ;;  %v8876_v17 = vld [vmem:[%s9857_s13 + $0xa0] sm:$0xff] }
  0xfd   : > { %v9973_v20 = vpop.f32.mrf.mxu2 }
 0x100   : > { %v1006_v25 = vpop.f32.mrf.mxu0 }
 0x101   : > { %v1305_v30 = vmax.f32 %v1006_v25, 0.0 }
 0x102   : > { %8519 = vmatmul.msk.bf16.gmra.mxu2 %vm1947_vm1, %v8975_v24 }
 0x103   : > { %8161 = vmatmul.msk.bf16.gmra.mxu0 %vm769_vm0, %v8871_v23 }
 0x105   : > { %v9982_v28 = vpop.f32.mrf.mxu2 }
 0x108   : > { %v1008_v29 = vpop.f32.mrf.mxu0 }
 0x109   : > { %v1306_v32 = vmax.f32 %v1008_v29, 0.0 }
 0x10b   : > { %v9984_v33 = vpack.c.bf16 %v1306_v32, %v1305_v30  ;;  %v8877_v30 = vld [vmem:[%s9857_s13 + $0xa8] sm:$0xff] }
 0x10d   : > { %v9986_v34 = vpop.f32.mrf.mxu2 }
 0x110   : > { %v1011_v39 = vpop.f32.mrf.mxu0 }
 0x111   : > { %v1307_v43 = vmax.f32 %v1011_v39, 0.0 }
 0x112   : > { %8520 = vmatmul.msk.bf16.gmra.mxu2 %vm1947_vm1, %v8976_v38 }
 0x113   : > { %8162 = vmatmul.msk.bf16.gmra.mxu0 %vm769_vm0, %v8872_v37 }
 0x115   : > { %v9992_v41 = vpop.f32.mrf.mxu2 }
 0x118   : > { %v1013_v42 = vpop.f32.mrf.mxu0 }
 0x119   : > { %v1308_v46 = vmax.f32 %v1013_v42, 0.0 }
 0x11b   : > { %v9994_v47 = vpack.c.bf16 %v1308_v46, %v1307_v43  ;;  %v8878_v46 = vld [vmem:[%s9857_s13 + $0xb0] sm:$0xff] }
 0x11d   : > { %v9996_v48 = vpop.f32.mrf.mxu2 }
 0x120   : > { %v1016_v51 = vpop.f32.mrf.mxu0 }
 0x121   : > { %v1309_v56 = vmax.f32 %v1016_v51, 0.0 }
 0x122   : > { %8550 = vmatmul.msk.bf16.vlgmr.msrb.gmra.mxu2 %vm2493_vm2, %v9902_v26 }
 0x123   : > { %8163 = vmatmul.msk.bf16.gmra.mxu0 %vm769_vm0, %v8873_v50 }
 0x125   : > { %v10002_v52 = vpop.f32.mrf.mxu2 }
 0x128   : > { %v1018_v55 = vpop.f32.mrf.mxu0 }
 0x129   : > { %v1310_v57 = vmax.f32 %v1018_v55, 0.0 }
 0x12b   : > { %v10004_v59 = vpack.c.bf16 %v1310_v57, %v1309_v56 }
 0x12d   : > { %v10006_v60 = vpop.f32.mrf.mxu2 }
 0x130   : > { %v1021_v0 = vpop.f32.mrf.mxu0 }
 0x131   : > { %v1311_v2 = vmax.f32 %v1021_v0, 0.0  ;;  %v8879_v0 = vld [vmem:[%s9857_s13 + $0xb8] sm:$0xff] }
 0x132   : > { %8551 = vmatmul.msk.bf16.gmra.mxu2 %vm2493_vm2, %v9912_v35 }
 0x133   : > { %8164 = vmatmul.msk.bf16.gmra.mxu0 %vm769_vm0, %v8874_v61 }
 0x135   : > { %v10012_v1 = vpop.f32.mrf.mxu2 }
 0x138   : > { %v1023_v26 = vpop.f32.mrf.mxu0 }
 0x139   : > { %v1312_v4 = vmax.f32 %v1023_v26, 0.0 }
 0x13b   : > { %v10014_v5 = vpack.c.bf16 %v1312_v4, %v1311_v2 }
 0x13d   : > { %v10016_v6 = vpop.f32.mrf.mxu2 }
 0x140   : > { %v1026_v10 = vpop.f32.mrf.mxu0 }
 0x141   : > { %v1313_v12 = vmax.f32 %v1026_v10, 0.0 }
 0x142   : > { %8552 = vmatmul.msk.bf16.gmra.mxu2 %vm2493_vm2, %v9922_v44 }
 0x143   : > { %8165 = vmatmul.msk.bf16.gmra.mxu0 %vm769_vm0, %v8875_v9 }
 0x145   : > { %v10022_v11 = vpop.f32.mrf.mxu2 }
 0x148   : > { %v1028_v35 = vpop.f32.mrf.mxu0 }
 0x149   : > { %v1314_v14 = vmax.f32 %v1028_v35, 0.0 }
 0x14b   : > { %v10024_v15 = vpack.c.bf16 %v1314_v14, %v1313_v12  ;;  %v8880_v12 = vld [vmem:[%s9857_s13 + $0xc0] sm:$0xff] }
 0x14d   : > { %v10026_v16 = vpop.f32.mrf.mxu2 }
 0x150   : > { %v1031_v18 = vpop.f32.mrf.mxu0 }
 0x151   : > { %v1315_v23 = vmax.f32 %v1031_v18, 0.0 }
 0x152   : > { %8553 = vmatmul.msk.bf16.gmra.mxu2 %vm2493_vm2, %v9932_v53 }
 0x153   : > { %8166 = vmatmul.msk.bf16.gmra.mxu0 %vm769_vm0, %v8876_v17 }
 0x155   : > { %v10032_v21 = vpop.f32.mrf.mxu2 }
 0x158   : > { %v1033_v44 = vpop.f32.mrf.mxu0 }
 0x159   : > { %v1316_v24 = vmax.f32 %v1033_v44, 0.0 }
 0x15b   : > { %v10034_v25 = vpack.c.bf16 %v1316_v24, %v1315_v23 }
 0x15d   : > { %v10036_v29 = vpop.f32.mrf.mxu2 }
 0x160   : > { %v1036_v32 = vpop.f32.mrf.mxu0 }
 0x161   : > { %v1317_v38 = vmax.f32 %v1036_v32, 0.0 }
 0x162   : > { %8554 = vmatmul.msk.bf16.gmra.mxu2 %vm2493_vm2, %v9942_v62 }
 0x163   : > { %8167 = vmatmul.msk.bf16.gmra.mxu0 %vm769_vm0, %v8877_v30  ;;  %v8881_v30 = vld [vmem:[%s9857_s13 + $0xc8] sm:$0xff] }
 0x165   : > { %v10042_v37 = vpop.f32.mrf.mxu2 }
 0x168   : > { %v1038_v53 = vpop.f32.mrf.mxu0 }
 0x169   : > { %v1318_v39 = vmax.f32 %v1038_v53, 0.0 }
 0x16b   : > { %v10044_v42 = vpack.c.bf16 %v1318_v39, %v1317_v38 }
 0x16d   : > { %v10046_v43 = vpop.f32.mrf.mxu2 }
 0x170   : > { %v1041_v50 = vpop.f32.mrf.mxu0 }
 0x171   : > { %v1319_v55 = vmax.f32 %v1041_v50, 0.0 }
 0x172   : > { %8555 = vmatmul.msk.bf16.gmra.mxu2 %vm2493_vm2, %v9952_v7 }
 0x173   : > { %8168 = vmatmul.msk.bf16.gmra.mxu0 %vm769_vm0, %v8878_v46 }
 0x175   : > { %v10052_v51 = vpop.f32.mrf.mxu2 }
 0x176   : > { %11838 = vst [vmem:[#allocation2_spill] sm:$0xff] %v10052_v51 }
 0x178   : > { %v1043_v62 = vpop.f32.mrf.mxu0 }
 0x179   : > { %v1320_v56 = vmax.f32 %v1043_v62, 0.0  ;;  %v8882_v62 = vld [vmem:[%s9857_s13 + $0xd0] sm:$0xff] }
 0x17b   : > { %v10054_v57 = vpack.c.bf16 %v1320_v56, %v1319_v55 }
 0x17d   : > { %v10056_v61 = vpop.f32.mrf.mxu2 }
 0x17e   : > { %11839 = vst [vmem:[#allocation3_spill] sm:$0xff] %v10056_v61 }
 0x180   : > { %v1046_v26 = vpop.f32.mrf.mxu0 }
 0x181   : > { %v1321_v4 = vmax.f32 %v1046_v26, 0.0 }
 0x182   : > { %8556 = vmatmul.msk.bf16.gmra.mxu2 %vm2493_vm2, %v9971_v19 }
 0x183   : > { %8169 = vmatmul.msk.bf16.gmra.mxu0 %vm769_vm0, %v8879_v0 }
 0x185   : > { %v10062_v2 = vpop.f32.mrf.mxu2 }
 0x186   : > { %11840 = vst [vmem:[#allocation4_spill] sm:$0xff] %v10062_v2  ;;  %v8899_v2 = vld [vmem:[%s9857_s13 + $0x158] sm:$0xff] }
 0x188   : > { %v1048_v7 = vpop.f32.mrf.mxu0 }
 0x189   : > { %v1322_v9 = vmax.f32 %v1048_v7, 0.0 }
 0x18b   : > { %v10064_v10 = vpack.c.bf16 %v1322_v9, %v1321_v4  ;;  %v8883_v9 = vld [vmem:[%s9857_s13 + $0xd8] sm:$0xff] }
 0x18d   : > { %v10066_v35 = vpop.f32.mrf.mxu2 }
 0x18e   : > { %11841 = vst [vmem:[#allocation5_spill] sm:$0xff] %v10066_v35 }
 0x190   : > { %v1051_v14 = vpop.f32.mrf.mxu0 }
 0x191   : > { %v1323_v18 = vmax.f32 %v1051_v14, 0.0 }
 0x192   : > { %8557 = vmatmul.msk.bf16.gmra.mxu2 %vm2493_vm2, %v9984_v33 }
 0x193   : > { %8170 = vmatmul.msk.bf16.gmra.mxu0 %vm769_vm0, %v8880_v12 }
 0x195   : > { %v10072_v17 = vpop.f32.mrf.mxu2 }
 0x196   : > { %11842 = vst [vmem:[#allocation6_spill] sm:$0xff] %v10072_v17  ;;  %v8898_v17 = vld [vmem:[%s9857_s13 + $0x150] sm:$0xff] }
 0x198   : > { %v1053_v19 = vpop.f32.mrf.mxu0 }
 0x199   : > { %v1324_v44 = vmax.f32 %v1053_v19, 0.0 }
 0x19b   : > { %v10074_v23 = vpack.c.bf16 %v1324_v44, %v1323_v18 }
 0x19d   : > { %v10076_v24 = vpop.f32.mrf.mxu2 }
 0x19e   : > { %11843 = vst [vmem:[#allocation7_spill] sm:$0xff] %v10076_v24 }
 0x1a0   : > { %v1056_v32 = vpop.f32.mrf.mxu0 }
 0x1a1   : > { %v1325_v38 = vmax.f32 %v1056_v32, 0.0  ;;  %v8884_v32 = vld [vmem:[%s9857_s13 + $0xe0] sm:$0xff] }
 0x1a2   : > { %8558 = vmatmul.msk.bf16.gmra.mxu2 %vm2493_vm2, %v9994_v47 }
 0x1a3   : > { %8171 = vmatmul.msk.bf16.gmra.mxu0 %vm769_vm0, %v8881_v30 }
 0x1a5   : > { %v10082_v53 = vpop.f32.mrf.mxu2 }
 0x1a8   : > { %v1058_v33 = vpop.f32.mrf.mxu0 }
 0x1a9   : > { %v1326_v39 = vmax.f32 %v1058_v33, 0.0 }
 0x1ab   : > { %v10084_v46 = vpack.c.bf16 %v1326_v39, %v1325_v38 }
 0x1ad   : > { %v10086_v50 = vpop.f32.mrf.mxu2 }
 0x1b0   : > { %v1061_v55 = vpop.f32.mrf.mxu0 }
 0x1b1   : > { %v1327_v0 = vmax.f32 %v1061_v55, 0.0 }
 0x1b2   : > { %8559 = vmatmul.msk.bf16.gmra.mxu2 %vm2493_vm2, %v10004_v59 }
 0x1b3   : > { %8172 = vmatmul.msk.bf16.gmra.mxu0 %vm769_vm0, %v8882_v62 }
 0x1b5   : > { %v10092_v56 = vpop.f32.mrf.mxu2 }
 0x1b8   : > { %v1063_v47 = vpop.f32.mrf.mxu0 }
 0x1b9   : > { %v1328_v26 = vmax.f32 %v1063_v47, 0.0 }
 0x1bb   : > { %v10094_v7 = vpack.c.bf16 %v1328_v26, %v1327_v0  ;;  %v8885_v0 = vld [vmem:[%s9857_s13 + $0xe8] sm:$0xff] }
 0x1bd   : > { %v10096_v4 = vpop.f32.mrf.mxu2 }
 0x1c0   : > { %v1066_v12 = vpop.f32.mrf.mxu0 }
 0x1c1   : > { %v1329_v19 = vmax.f32 %v1066_v12, 0.0 }
 0x1c2   : > { %8560 = vmatmul.msk.bf16.gmra.mxu2 %vm2493_vm2, %v10014_v5 }
 0x1c3   : > { %8173 = vmatmul.msk.bf16.gmra.mxu0 %vm769_vm0, %v8883_v9 }
 0x1c5   : > { %v10102_v14 = vpop.f32.mrf.mxu2 }
 0x1c8   : > { %v1068_v59 = vpop.f32.mrf.mxu0 }
 0x1c9   : > { %v1330_v18 = vmax.f32 %v1068_v59, 0.0 }
 0x1cb   : > { %v10104_v44 = vpack.c.bf16 %v1330_v18, %v1329_v19 }
 0x1cd   : > { %v10106_v30 = vpop.f32.mrf.mxu2 }
 0x1ce   : > { %11844 = vst [vmem:[#allocation8_spill] sm:$0xff] %v10106_v30 }
 0x1d0   : > { %v1071_v33 = vpop.f32.mrf.mxu0 }
 0x1d1   : > { %v1331_v39 = vmax.f32 %v1071_v33, 0.0 }
 0x1d2   : > { %8561 = vmatmul.msk.bf16.gmra.mxu2 %vm2493_vm2, %v10024_v15 }
 0x1d3   : > { %8174 = vmatmul.msk.bf16.gmra.mxu0 %vm769_vm0, %v8884_v32  ;;  %v8886_v32 = vld [vmem:[%s9857_s13 + $0xf0] sm:$0xff] }
 0x1d5   : > { %v10112_v38 = vpop.f32.mrf.mxu2 }
 0x1d6   : > { %11845 = vst [vmem:[#allocation9_spill] sm:$0xff] %v10112_v38 }
 0x1d8   : > { %v1073_v5 = vpop.f32.mrf.mxu0 }
 0x1d9   : > { %v1332_v62 = vmax.f32 %v1073_v5, 0.0 }
 0x1db   : > { %v10114_v55 = vpack.c.bf16 %v1332_v62, %v1331_v39 }
 0x1dd   : > { %v10116_v47 = vpop.f32.mrf.mxu2 }
 0x1de   : > { %11846 = vst [vmem:[#allocation10_spill] sm:$0xff] %v10116_v47 }
 0x1e0   : > { %v1076_v26 = vpop.f32.mrf.mxu0 }
 0x1e1   : > { %v1333_v12 = vmax.f32 %v1076_v26, 0.0 }
 0x1e2   : > { %8562 = vmatmul.msk.bf16.gmra.mxu2 %vm2493_vm2, %v10034_v25 }
 0x1e3   : > { %8175 = vmatmul.msk.bf16.gmra.mxu0 %vm769_vm0, %v8885_v0 }
 0x1e5   : > { %v10122_v9 = vpop.f32.mrf.mxu2 }
 0x1e6   : > { %11847 = vst [vmem:[#allocation11_spill] sm:$0xff] %v10122_v9 }
 0x1e8   : > { %v1078_v15 = vpop.f32.mrf.mxu0 }
 0x1e9   : > { %v1334_v59 = vmax.f32 %v1078_v15, 0.0  ;;  %v8887_v15 = vld [vmem:[%s9857_s13 + $0xf8] sm:$0xff] }
 0x1eb   : > { %v10124_v19 = vpack.c.bf16 %v1334_v59, %v1333_v12 }
 0x1ed   : > { %v10126_v18 = vpop.f32.mrf.mxu2 }
 0x1ee   : > { %11848 = vst [vmem:[#allocation12_spill] sm:$0xff] %v10126_v18 }
 0x1f0   : > { %v1081_v33 = vpop.f32.mrf.mxu0 }
 0x1f1   : > { %v1335_v39 = vmax.f32 %v1081_v33, 0.0 }
 0x1f2   : > { %8563 = vmatmul.msk.bf16.gmra.mxu2 %vm2493_vm2, %v10044_v42 }
 0x1f3   : > { %8176 = vmatmul.msk.bf16.gmra.mxu0 %vm769_vm0, %v8886_v32 }
 0x1f5   : > { %v10132_v5 = vpop.f32.mrf.mxu2 }
 0x1f6   : > { %11849 = vst [vmem:[#allocation13_spill] sm:$0xff] %v10132_v5 }
 0x1f8   : > { %v1083_v25 = vpop.f32.mrf.mxu0 }
 0x1f9   : > { %v1336_v62 = vmax.f32 %v1083_v25, 0.0 }
 0x1fb   : > { %v10134_v0 = vpack.c.bf16 %v1336_v62, %v1335_v39  ;;  %v8888_v39 = vld [vmem:[%s9857_s13 + $0x100] sm:$0xff] }
 0x1fd   : > { %v10136_v26 = vpop.f32.mrf.mxu2 }
 0x1fe   : > { %11850 = vst [vmem:[#allocation14_spill] sm:$0xff] %v10136_v26 }
 0x200   : > { %v1086_v12 = vpop.f32.mrf.mxu0 }
 0x201   : > { %v1337_v32 = vmax.f32 %v1086_v12, 0.0 }
 0x202   : > { %8564 = vmatmul.msk.bf16.gmra.mxu2 %vm2493_vm2, %v10054_v57  ;;  %v8943_v57 = vld [vmem:[%s9862_s16 + $0x88] sm:$0xff] }
 0x203   : > { %8177 = vmatmul.msk.bf16.gmra.mxu0 %vm769_vm0, %v8887_v15  ;;  %8487 = vmatmul.msk.bf16.vlgmr.msra.gmra.mxu1 %vm1947_vm1, %v8943_v57 }
 0x205   : > { %v10142_v59 = vpop.f32.mrf.mxu2 }
 0x206   : > { %11851 = vst [vmem:[#allocation15_spill] sm:$0xff] %v10142_v59 }
 0x208   : > { %v1088_v42 = vpop.f32.mrf.mxu0 }
 0x209   : > { %v1338_v5 = vmax.f32 %v1088_v42, 0.0 }
 0x20b   : > { %v10144_v33 = vpack.c.bf16 %v1338_v5, %v1337_v32  ;;  %v8889_v32 = vld [vmem:[%s9857_s13 + $0x108] sm:$0xff] }
 0x20d   : > { %v10146_v25 = vpop.f32.mrf.mxu2 }
 0x20e   : > { %11852 = vst [vmem:[#allocation16_spill] sm:$0xff] %v10146_v25 }
 0x210   : > { %v1091_v62 = vpop.f32.mrf.mxu0 }
 0x211   : > { %v1339_v26 = vmax.f32 %v1091_v62, 0.0 }
 0x212   : > { %8565 = vmatmul.msk.bf16.gmra.mxu2 %vm2493_vm2, %v10064_v10 }
 0x213   : > { %8178 = vmatmul.msk.bf16.gmra.mxu0 %vm769_vm0, %v8888_v39  ;;  %v8944_v39 = vld [vmem:[%s9862_s16 + $0x90] sm:$0xff] }
 0x214   : > { %8488 = vmatmul.msk.bf16.gmra.mxu1 %vm1947_vm1, %v8944_v39 }
 0x215   : > { %v10152_v15 = vpop.f32.mrf.mxu2 }
 0x216   : > { %11853 = vst [vmem:[#allocation17_spill] sm:$0xff] %v10152_v15 }
 0x218   : > { %v1093_v59 = vpop.f32.mrf.mxu0 }
 0x219   : > { %v1340_v12 = vmax.f32 %v1093_v59, 0.0 }
 0x21b   : > { %v10156_v5 = vpack.c.bf16 %v1340_v12, %v1339_v26  ;;  %v8890_v12 = vld [vmem:[%s9857_s13 + $0x110] sm:$0xff] }
 0x21d   : > { %v10158_v42 = vpop.f32.mrf.mxu2 }
 0x21e   : > { %11854 = vst [vmem:[#allocation18_spill] sm:$0xff] %v10158_v42 }
 0x220   : > { %v1096_v25 = vpop.f32.mrf.mxu0 }
 0x221   : > { %v1341_v59 = vmax.f32 %v1096_v25, 0.0 }
 0x222   : > { %8566 = vmatmul.msk.bf16.gmra.mxu2 %vm2493_vm2, %v10074_v23 }
 0x223   : > { %8179 = vmatmul.msk.bf16.gmra.mxu0 %vm769_vm0, %v8889_v32  ;;  %v8945_v32 = vld [vmem:[%s9862_s16 + $0x98] sm:$0xff] }
 0x224   : > { %8489 = vmatmul.msk.bf16.gmra.mxu1 %vm1947_vm1, %v8945_v32 }
 0x225   : > { %v10164_v10 = vpop.f32.mrf.mxu2 }
 0x226   : > { %11855 = vst [vmem:[#allocation19_spill] sm:$0xff] %v10164_v10 }
 0x228   : > { %v1098_v62 = vpop.f32.mrf.mxu0 }
 0x229   : > { %v1342_v15 = vmax.f32 %v1098_v62, 0.0 }
 0x22b   : > { %v10168_v26 = vpack.c.bf16 %v1342_v15, %v1341_v59  ;;  %v8891_v59 = vld [vmem:[%s9857_s13 + $0x118] sm:$0xff] }
 0x22d   : > { %v10170_v57 = vpop.f32.mrf.mxu2 }
 0x22e   : > { %11856 = vst [vmem:[#allocation20_spill] sm:$0xff] %v10170_v57 }
 0x230   : > { %v1101_v42 = vpop.f32.mrf.mxu0 }
 0x231   : > { %v1343_v62 = vmax.f32 %v1101_v42, 0.0 }
 0x232   : > { %8567 = vmatmul.msk.bf16.gmra.mxu2 %vm2493_vm2, %v10084_v46 }
 0x233   : > { %8180 = vmatmul.msk.bf16.gmra.mxu0 %vm769_vm0, %v8890_v12  ;;  %v8946_v12 = vld [vmem:[%s9862_s16 + $0xa0] sm:$0xff] }
 0x234   : > { %8490 = vmatmul.msk.bf16.gmra.mxu1 %vm1947_vm1, %v8946_v12 }
 0x235   : > { %v10176_v23 = vpop.f32.mrf.mxu2 }
 0x236   : > { %11857 = vst [vmem:[#allocation21_spill] sm:$0xff] %v10176_v23 }
 0x238   : > { %v1103_v25 = vpop.f32.mrf.mxu0 }
 0x239   : > { %v1344_v10 = vmax.f32 %v1103_v25, 0.0 }
 0x23b   : > { %v10180_v15 = vpack.c.bf16 %v1344_v10, %v1343_v62  ;;  %v8892_v62 = vld [vmem:[%s9857_s13 + $0x120] sm:$0xff] }
 0x23d   : > { %v10182_v39 = vpop.f32.mrf.mxu2 }
 0x23e   : > { %11858 = vst [vmem:[#allocation22_spill] sm:$0xff] %v10182_v39 }
 0x240   : > { %v1106_v57 = vpop.f32.mrf.mxu0 }
 0x241   : > { %v1345_v25 = vmax.f32 %v1106_v57, 0.0 }
 0x242   : > { %8568 = vmatmul.msk.bf16.gmra.mxu2 %vm2493_vm2, %v10094_v7 }
 0x243   : > { %8181 = vmatmul.msk.bf16.gmra.mxu0 %vm769_vm0, %v8891_v59  ;;  %v8947_v59 = vld [vmem:[%s9862_s16 + $0xa8] sm:$0xff] }
 0x244   : > { %8491 = vmatmul.msk.bf16.gmra.mxu1 %vm1947_vm1, %v8947_v59 }
 0x245   : > { %v10188_v46 = vpop.f32.mrf.mxu2 }
 0x246   : > { %11859 = vst [vmem:[#allocation23_spill] sm:$0xff] %v10188_v46 }
 0x248   : > { %v1108_v42 = vpop.f32.mrf.mxu0 }
 0x249   : > { %v1346_v23 = vmax.f32 %v1108_v42, 0.0 }
 0x24b   : > { %v10192_v10 = vpack.c.bf16 %v1346_v23, %v1345_v25  ;;  %v8893_v25 = vld [vmem:[%s9857_s13 + $0x128] sm:$0xff] }
 0x24d   : > { %v10194_v32 = vpop.f32.mrf.mxu2 }
 0x24e   : > { %11860 = vst [vmem:[#allocation24_spill] sm:$0xff] %v10194_v32 }
 0x250   : > { %v1111_v39 = vpop.f32.mrf.mxu0 }
 0x251   : > { %v1347_v42 = vmax.f32 %v1111_v39, 0.0 }
 0x252   : > { %8569 = vmatmul.msk.bf16.gmra.mxu2 %vm2493_vm2, %v10104_v44 }
 0x253   : > { %8182 = vmatmul.msk.bf16.gmra.mxu0 %vm769_vm0, %v8892_v62  ;;  %v8948_v62 = vld [vmem:[%s9862_s16 + $0xb0] sm:$0xff] }
 0x254   : > { %8492 = vmatmul.msk.bf16.gmra.mxu1 %vm1947_vm1, %v8948_v62 }
 0x255   : > { %v10200_v7 = vpop.f32.mrf.mxu2 }
 0x256   : > { %11861 = vst [vmem:[#allocation25_spill] sm:$0xff] %v10200_v7 }
 0x258   : > { %v1113_v57 = vpop.f32.mrf.mxu0 }
 0x259   : > { %v1348_v46 = vmax.f32 %v1113_v57, 0.0 }
 0x25b   : > { %v10204_v23 = vpack.c.bf16 %v1348_v46, %v1347_v42  ;;  %v8894_v42 = vld [vmem:[%s9857_s13 + $0x130] sm:$0xff] }
 0x25d   : > { %v10206_v12 = vpop.f32.mrf.mxu2 }
 0x25e   : > { %11862 = vst [vmem:[#allocation26_spill] sm:$0xff] %v10206_v12 }
 0x260   : > { %v1116_v32 = vpop.f32.mrf.mxu0 }
 0x261   : > { %v1349_v57 = vmax.f32 %v1116_v32, 0.0 }
 0x262   : > { %8570 = vmatmul.msk.bf16.gmra.mxu2 %vm2493_vm2, %v10114_v55 }
 0x263   : > { %8183 = vmatmul.msk.bf16.gmra.mxu0 %vm769_vm0, %v8893_v25  ;;  %v8949_v25 = vld [vmem:[%s9862_s16 + $0xb8] sm:$0xff] }
 0x264   : > { %8493 = vmatmul.msk.bf16.gmra.mxu1 %vm1947_vm1, %v8949_v25 }
 0x265   : > { %v10212_v44 = vpop.f32.mrf.mxu2 }
 0x266   : > { %11863 = vst [vmem:[#allocation27_spill] sm:$0xff] %v10212_v44 }
 0x268   : > { %v1118_v39 = vpop.f32.mrf.mxu0 }
 0x269   : > { %v1350_v7 = vmax.f32 %v1118_v39, 0.0 }
 0x26b   : > { %v10216_v46 = vpack.c.bf16 %v1350_v7, %v1349_v57  ;;  %v8895_v57 = vld [vmem:[%s9857_s13 + $0x138] sm:$0xff] }
 0x26d   : > { %v10218_v59 = vpop.f32.mrf.mxu2 }
 0x26e   : > { %11864 = vst [vmem:[#allocation28_spill] sm:$0xff] %v10218_v59 }
 0x270   : > { %v1121_v12 = vpop.f32.mrf.mxu0 }
 0x271   : > { %v1351_v39 = vmax.f32 %v1121_v12, 0.0 }
 0x272   : > { %8571 = vmatmul.msk.bf16.gmra.mxu2 %vm2493_vm2, %v10124_v19 }
 0x273   : > { %8184 = vmatmul.msk.bf16.gmra.mxu0 %vm769_vm0, %v8894_v42  ;;  %v8950_v42 = vld [vmem:[%s9862_s16 + $0xc0] sm:$0xff] }
 0x274   : > { %8494 = vmatmul.msk.bf16.gmra.mxu1 %vm1947_vm1, %v8950_v42 }
 0x275   : > { %v10224_v55 = vpop.f32.mrf.mxu2 }
 0x276   : > { %11865 = vst [vmem:[#allocation29_spill] sm:$0xff] %v10224_v55 }
 0x278   : > { %v1123_v32 = vpop.f32.mrf.mxu0 }
 0x279   : > { %v1352_v44 = vmax.f32 %v1123_v32, 0.0 }
 0x27b   : > { %v10228_v7 = vpack.c.bf16 %v1352_v44, %v1351_v39  ;;  %v8896_v39 = vld [vmem:[%s9857_s13 + $0x140] sm:$0xff] }
 0x27d   : > { %v10230_v62 = vpop.f32.mrf.mxu2 }
 0x27e   : > { %11866 = vst [vmem:[#allocation30_spill] sm:$0xff] %v10230_v62 }
 0x280   : > { %v1126_v59 = vpop.f32.mrf.mxu0 }
 0x281   : > { %v1353_v32 = vmax.f32 %v1126_v59, 0.0  ;;  %v8951_v59 = vld [vmem:[%s9862_s16 + $0xc8] sm:$0xff] }
 0x282   : > { %8572 = vmatmul.msk.bf16.gmra.mxu2 %vm2493_vm2, %v10134_v0 }
 0x283   : > { %8185 = vmatmul.msk.bf16.gmra.mxu0 %vm769_vm0, %v8895_v57  ;;  %v2234_v57 = vpop.f32.mrf.mxu1 }
 0x284   : > { %8495 = vmatmul.msk.bf16.gmra.mxu1 %vm1947_vm1, %v8951_v59 }
 0x285   : > { %v10236_v19 = vpop.f32.mrf.mxu2 }
 0x286   : > { %11867 = vst [vmem:[#allocation31_spill] sm:$0xff] %v10236_v19 }
 0x288   : > { %v1128_v12 = vpop.f32.mrf.mxu0 }
 0x289   : > { %v1354_v55 = vmax.f32 %v1128_v12, 0.0 }
 0x28b   : > { %v10240_v44 = vpack.c.bf16 %v1354_v55, %v1353_v32 }
 0x28d   : > { %v10242_v25 = vpop.f32.mrf.mxu2 }
 0x28e   : > { %11868 = vst [vmem:[#allocation32_spill] sm:$0xff] %v10242_v25  ;;  %v2236_v25 = vpop.f32.mrf.mxu1 }
 0x290   : > { %v1131_v62 = vpop.f32.mrf.mxu0 }
 0x291   : > { %v1355_v19 = vmax.f32 %v1131_v62, 0.0  ;;  %v8952_v62 = vld [vmem:[%s9862_s16 + $0xd0] sm:$0xff] }
 0x292   : > { %8573 = vmatmul.msk.bf16.gmra.mxu2 %vm2493_vm2, %v10144_v33 }
 0x293   : > { %8186 = vmatmul.msk.bf16.gmra.mxu0 %vm769_vm0, %v8896_v39  ;;  %v8897_v39 = vld [vmem:[%s9857_s13 + $0x148] sm:$0xff] }
 0x294   : > { %8496 = vmatmul.msk.bf16.gmra.mxu1 %vm1947_vm1, %v8952_v62 }
 0x295   : > { %v10248_v0 = vpop.f32.mrf.mxu2 }
 0x296   : > { %11869 = vst [vmem:[#allocation33_spill] sm:$0xff] %v10248_v0  ;;  %v2239_v0 = vpop.f32.mrf.mxu1 }
 0x298   : > { %v1133_v12 = vpop.f32.mrf.mxu0 }
 0x299   : > { %v1356_v42 = vmax.f32 %v1133_v12, 0.0 }
 0x29b   : > { %v10252_v55 = vpack.c.bf16 %v1356_v42, %v1355_v19 }
 0x29d   : > { %v10254_v32 = vpop.f32.mrf.mxu2 }
 0x29e   : > { %11870 = vst [vmem:[#allocation34_spill] sm:$0xff] %v10254_v32  ;;  %v2241_v18 = vpop.f32.mrf.mxu1 }
 0x2a0   : > { %v1136_v24 = vpop.f32.mrf.mxu0 }
 0x2a1   : > { %v1357_v59 = vmax.f32 %v1136_v24, 0.0  ;;  %v8953_v24 = vld [vmem:[%s9862_s16 + $0xd8] sm:$0xff] }
 0x2a2   : > { %8574 = vmatmul.msk.bf16.gmra.mxu2 %vm2493_vm2, %v10156_v5 }
 0x2a3   : > { %8187 = vmatmul.msk.bf16.gmra.mxu0 %vm769_vm0, %v8897_v39 }
 0x2a4   : > { %8497 = vmatmul.msk.bf16.gmra.mxu1 %vm1947_vm1, %v8953_v24 }
 0x2a5   : > { %v10260_v33 = vpop.f32.mrf.mxu2 }
 0x2a6   : > { %11871 = vst [vmem:[#allocation35_spill] sm:$0xff] %v10260_v33  ;;  %v2244_v33 = vpop.f32.mrf.mxu1 }
 0x2a8   : > { %v1138_v12 = vpop.f32.mrf.mxu0 }
 0x2a9   : > { %v1358_v19 = vmax.f32 %v1138_v12, 0.0 }
 0x2ab   : > { %v10264_v42 = vpack.c.bf16 %v1358_v19, %v1357_v59 }
 0x2ad   : > { %v10266_v32 = vpop.f32.mrf.mxu2 }
 0x2ae   : > { %11872 = vst [vmem:[#allocation36_spill] sm:$0xff] %v10266_v32  ;;  %v2246_v47 = vpop.f32.mrf.mxu1 }
 0x2b0   : > { %v1141_v39 = vpop.f32.mrf.mxu0 }
 0x2b1   : > { %v1359_v35 = vmax.f32 %v1141_v39, 0.0 }
 0x2b2   : > { %8575 = vmatmul.msk.bf16.gmra.mxu2 %vm2493_vm2, %v10168_v26 }
 0x2b3   : > { %8188 = vmatmul.msk.bf16.gmra.mxu0 %vm769_vm0, %v8898_v17 }
 0x2b5   : > { %v2780_v5 = vpop.f32.mrf.mxu2 }
 0x2b6   : > { %v2781_v9 = vadd.f32 %v2780_v5, %v2234_v57  ;;  %v8954_v5 = vld [vmem:[%s9862_s16 + $0xe0] sm:$0xff] }
 0x2b7   : > { %8498 = vmatmul.msk.bf16.gmra.mxu1 %vm1947_vm1, %v8954_v5 }
 0x2b8   : > { %v1143_v12 = vpop.f32.mrf.mxu0  ;;  %v3083_v62 = vmul.f32 1.442695, %v2781_v9  ;;  %v3305_v61 = vmax.f32 %v2781_v9, 0.0 }
 0x2b9   : > { %v1360_v59 = vmax.f32 %v1143_v12, 0.0 }
 0x2ba   : > { %9017 = vpow2.f32 %v3083_v62 }
 0x2bb   : > { %v10274_v19 = vpack.c.bf16 %v1360_v59, %v1359_v35 }
 0x2bd   : > { %v2782_v32 = vpop.f32.mrf.mxu2 }
 0x2be   : > { %v2783_v17 = vadd.f32 %v2782_v32, %v2236_v25  ;;  %v2249_v25 = vpop.f32.mrf.mxu1 }
 0x2c0   : > { %v1146_v38 = vpop.f32.mrf.mxu0  ;;  %v9018_v26 = vpop.eup %9017  ;;  %v3085_v30 = vmul.f32 1.442695, %v2783_v17  ;;  %v3306_v57 = vmax.f32 %v2783_v17, 0.0  ;;  %v8900_v17 = vld [vmem:[%s9857_s13 + $0x160] sm:$0xff] }
 0x2c1   : > { %7358 = vrot.lane.b32.xlu1 %v9018_v26, %s9793_s26  ;;  %v1361_v12 = vmax.f32 %v1146_v38, 0.0 }
 0x2c2   : > { %9019 = vpow2.f32 %v3085_v30  ;;  %8576 = vmatmul.msk.bf16.gmra.mxu2 %vm2493_vm2, %v10180_v15  ;;  %v10281_v35 = vpack.c.bf16 %v3306_v57, %v3305_v61 }
 0x2c3   : > { %8189 = vmatmul.msk.bf16.gmra.mxu0 %vm769_vm0, %v8899_v2 }
 0x2c4   : > { %11873 = vst [vmem:[#allocation37_spill] sm:$0xff] %v10281_v35 }
 0x2c5   : > { %v2785_v39 = vpop.f32.mrf.mxu2 }
 0x2c6   : > { %v2786_v32 = vadd.f32 %v2785_v39, %v2239_v0  ;;  %v2251_v61 = vpop.f32.mrf.mxu1 }
 0x2c8   : > { %v1148_v24 = vpop.f32.mrf.mxu0  ;;  %v9020_v9 = vpop.eup %9019  ;;  %v3087_v62 = vmul.f32 1.442695, %v2786_v32  ;;  %v3307_v57 = vmax.f32 %v2786_v32, 0.0 }
 0x2c9   : > { %v1362_v59 = vmax.f32 %v1148_v24, 0.0  ;;  %7360 = vrot.lane.b32.xlu2 %v9020_v9, %s9793_s26  ;;  %v8955_v9 = vld [vmem:[%s9862_s16 + $0xe8] sm:$0xff] }
 0x2ca   : > { %9021 = vpow2.f32 %v3087_v62  ;;  %8499 = vmatmul.msk.bf16.gmra.mxu1 %vm1947_vm1, %v8955_v9 }
 0x2cb   : > { %v10286_v2 = vpack.c.bf16 %v1362_v59, %v1361_v12 }
 0x2cd   : > { %v2787_v30 = vpop.f32.mrf.mxu2 }
 0x2ce   : > { %v2788_v15 = vadd.f32 %v2787_v30, %v2241_v18  ;;  %v2254_v24 = vpop.f32.mrf.mxu1 }
 0x2d0   : > { %v1151_v26 = vpop.f32.mrf.mxu0  ;;  %v9022_v0 = vpop.eup %9021  ;;  %v3089_v39 = vmul.f32 1.442695, %v2788_v15  ;;  %v3308_v35 = vmax.f32 %v2788_v15, 0.0 }
 0x2d1   : > { %7362 = vrot.lane.b32.xlu0 %v9022_v0, %s9793_s26  ;;  %v1363_v32 = vmax.f32 %v1151_v26, 0.0  ;;  %v8901_v0 = vld [vmem:[%s9857_s13 + $0x168] sm:$0xff] }
 0x2d2   : > { %9023 = vpow2.f32 %v3089_v39  ;;  %8577 = vmatmul.msk.bf16.gmra.mxu2 %vm2493_vm2, %v10192_v10  ;;  %v10293_v38 = vpack.c.bf16 %v3308_v35, %v3307_v57 }
 0x2d3   : > { %8190 = vmatmul.msk.bf16.gmra.mxu0 %vm769_vm0, %v8900_v17 }
 0x2d4   : > { %11874 = vst [vmem:[#allocation38_spill] sm:$0xff] %v10293_v38 }
 0x2d5   : > { %v2790_v5 = vpop.f32.mrf.mxu2 }
 0x2d6   : > { %v2791_v18 = vadd.f32 %v2790_v5, %v2244_v33  ;;  %v2256_v35 = vpop.f32.mrf.mxu1 }
 0x2d8   : > { %v1153_v12 = vpop.f32.mrf.mxu0  ;;  %v9024_v62 = vpop.eup %9023  ;;  %v3091_v59 = vmul.f32 1.442695, %v2791_v18  ;;  %v3309_v39 = vmax.f32 %v2791_v18, 0.0 }
 0x2d9   : > { %v1364_v30 = vmax.f32 %v1153_v12, 0.0  ;;  %7364 = vrot.lane.b32.xlu1 %v9024_v62, %s9793_s26  ;;  %v8956_v62 = vld [vmem:[%s9862_s16 + $0xf0] sm:$0xff] }
 0x2da   : > { %9025 = vpow2.f32 %v3091_v59  ;;  %8500 = vmatmul.msk.bf16.gmra.mxu1 %vm1947_vm1, %v8956_v62 }
 0x2db   : > { %v10298_v15 = vpack.c.bf16 %v1364_v30, %v1363_v32 }
 0x2dd   : > { %v2792_v10 = vpop.f32.mrf.mxu2 }
 0x2de   : > { %v2793_v17 = vadd.f32 %v2792_v10, %v2246_v47  ;;  %v2259_v12 = vpop.f32.mrf.mxu1 }
 0x2e0   : > { %v1156_v57 = vpop.f32.mrf.mxu0  ;;  %v9026_v33 = vpop.eup %9025  ;;  %v3093_v5 = vmul.f32 1.442695, %v2793_v17  ;;  %v3310_v38 = vmax.f32 %v2793_v17, 0.0 }
 0x2e1   : > { %7366 = vrot.lane.b32.xlu2 %v9026_v33, %s9793_s26  ;;  %v1365_v18 = vmax.f32 %v1156_v57, 0.0  ;;  %v8902_v33 = vld [vmem:[%s9857_s13 + $0x170] sm:$0xff] }
 0x2e2   : > { %9027 = vpow2.f32 %v3093_v5  ;;  %8578 = vmatmul.msk.bf16.gmra.mxu2 %vm2493_vm2, %v10204_v23  ;;  %v10305_v26 = vpack.c.bf16 %v3310_v38, %v3309_v39 }
 0x2e3   : > { %8191 = vmatmul.msk.bf16.gmra.mxu0 %vm769_vm0, %v8901_v0 }
 0x2e4   : > { %11875 = vst [vmem:[#allocation39_spill] sm:$0xff] %v10305_v26 }
 0x2e5   : > { %v2795_v9 = vpop.f32.mrf.mxu2 }
 0x2e6   : > { %v2796_v47 = vadd.f32 %v2795_v9, %v2249_v25  ;;  %v2261_v38 = vpop.f32.mrf.mxu1 }
 0x2e8   : > { %v1158_v32 = vpop.f32.mrf.mxu0  ;;  %v9028_v59 = vpop.eup %9027  ;;  %v3095_v30 = vmul.f32 1.442695, %v2796_v47  ;;  %v3311_v5 = vmax.f32 %v2796_v47, 0.0 }
 0x2e9   : > { %v1366_v10 = vmax.f32 %v1158_v32, 0.0  ;;  %7368 = vrot.lane.b32.xlu0 %v9028_v59, %s9793_s26  ;;  %v8957_v59 = vld [vmem:[%s9862_s16 + $0xf8] sm:$0xff] }
 0x2ea   : > { %9029 = vpow2.f32 %v3095_v30  ;;  %8501 = vmatmul.msk.bf16.gmra.mxu1 %vm1947_vm1, %v8957_v59 }
 0x2eb   : > { %v10310_v17 = vpack.c.bf16 %v1366_v10, %v1365_v18 }
 0x2ed   : > { %v2797_v23 = vpop.f32.mrf.mxu2 }
 0x2ee   : > { %v2798_v0 = vadd.f32 %v2797_v23, %v2251_v61  ;;  %v2264_v32 = vpop.f32.mrf.mxu1 }
 0x2f0   : > { %v1161_v39 = vpop.f32.mrf.mxu0  ;;  %v9030_v25 = vpop.eup %9029  ;;  %v3097_v9 = vmul.f32 1.442695, %v2798_v0  ;;  %v3312_v26 = vmax.f32 %v2798_v0, 0.0 }
 0x2f1   : > { %7370 = vrot.lane.b32.xlu1 %v9030_v25, %s9793_s26  ;;  %v1367_v47 = vmax.f32 %v1161_v39, 0.0  ;;  %v8903_v25 = vld [vmem:[%s9857_s13 + $0x178] sm:$0xff] }
 0x2f2   : > { %9031 = vpow2.f32 %v3097_v9  ;;  %8579 = vmatmul.msk.bf16.gmra.mxu2 %vm2493_vm2, %v10216_v46  ;;  %v10317_v57 = vpack.c.bf16 %v3312_v26, %v3311_v5 }
 0x2f3   : > { %8192 = vmatmul.msk.bf16.gmra.mxu0 %vm769_vm0, %v8902_v33 }
 0x2f4   : > { %11876 = vst [vmem:[#allocation40_spill] sm:$0xff] %v10317_v57 }
 0x2f5   : > { %v2800_v62 = vpop.f32.mrf.mxu2 }
 0x2f6   : > { %v2801_v61 = vadd.f32 %v2800_v62, %v2254_v24  ;;  %v2266_v26 = vpop.f32.mrf.mxu1 }
 0x2f8   : > { %v1163_v18 = vpop.f32.mrf.mxu0  ;;  %v9032_v30 = vpop.eup %9031  ;;  %v3099_v10 = vmul.f32 1.442695, %v2801_v61  ;;  %v3313_v9 = vmax.f32 %v2801_v61, 0.0 }
 0x2f9   : > { %v1368_v23 = vmax.f32 %v1163_v18, 0.0  ;;  %7372 = vrot.lane.b32.xlu2 %v9032_v30, %s9793_s26  ;;  %v8958_v30 = vld [vmem:[%s9862_s16 + $0x100] sm:$0xff] }
 0x2fa   : > { %9033 = vpow2.f32 %v3099_v10  ;;  %8502 = vmatmul.msk.bf16.gmra.mxu1 %vm1947_vm1, %v8958_v30 }
 0x2fb   : > { %v10322_v0 = vpack.c.bf16 %v1368_v23, %v1367_v47 }
 0x2fd   : > { %v2802_v46 = vpop.f32.mrf.mxu2 }
 0x2fe   : > { %v2803_v33 = vadd.f32 %v2802_v46, %v2256_v35  ;;  %v2269_v18 = vpop.f32.mrf.mxu1 }
 0x300   : > { %v1166_v5 = vpop.f32.mrf.mxu0  ;;  %v9034_v24 = vpop.eup %9033  ;;  %v3101_v62 = vmul.f32 1.442695, %v2803_v33  ;;  %v3314_v57 = vmax.f32 %v2803_v33, 0.0 }
 0x301   : > { %7374 = vrot.lane.b32.xlu0 %v9034_v24, %s9793_s26  ;;  %v1369_v61 = vmax.f32 %v1166_v5, 0.0  ;;  %v8904_v24 = vld [vmem:[%s9857_s13 + $0x180] sm:$0xff] }
 0x302   : > { %9035 = vpow2.f32 %v3101_v62  ;;  %8580 = vmatmul.msk.bf16.gmra.mxu2 %vm2493_vm2, %v10228_v7  ;;  %v10329_v39 = vpack.c.bf16 %v3314_v57, %v3313_v9 }
 0x303   : > { %8193 = vmatmul.msk.bf16.gmra.mxu0 %vm769_vm0, %v8903_v25 }
 0x304   : > { %11877 = vst [vmem:[#allocation41_spill] sm:$0xff] %v10329_v39 }
 0x305   : > { %v2805_v59 = vpop.f32.mrf.mxu2 }
 0x306   : > { %v2806_v35 = vadd.f32 %v2805_v59, %v2259_v12  ;;  %v2271_v57 = vpop.f32.mrf.mxu1 }
 0x308   : > { %v1168_v47 = vpop.f32.mrf.mxu0  ;;  %v9036_v10 = vpop.eup %9035  ;;  %v3103_v23 = vmul.f32 1.442695, %v2806_v35  ;;  %v3315_v62 = vmax.f32 %v2806_v35, 0.0 }
 0x309   : > { %v1370_v46 = vmax.f32 %v1168_v47, 0.0  ;;  %7376 = vrot.lane.b32.xlu1 %v9036_v10, %s9793_s26  ;;  %v8959_v10 = vld [vmem:[%s9862_s16 + $0x108] sm:$0xff] }
 0x30a   : > { %9037 = vpow2.f32 %v3103_v23  ;;  %8503 = vmatmul.msk.bf16.gmra.mxu1 %vm1947_vm1, %v8959_v10 }
 0x30b   : > { %v10334_v33 = vpack.c.bf16 %v1370_v46, %v1369_v61 }
 0x30d   : > { %v2807_v7 = vpop.f32.mrf.mxu2 }
 0x30e   : > { %v2808_v25 = vadd.f32 %v2807_v7, %v2261_v38  ;;  %v2274_v47 = vpop.f32.mrf.mxu1 }
 0x310   : > { %v1171_v9 = vpop.f32.mrf.mxu0  ;;  %v9038_v12 = vpop.eup %9037  ;;  %v3105_v59 = vmul.f32 1.442695, %v2808_v25  ;;  %v3316_v39 = vmax.f32 %v2808_v25, 0.0 }
 0x311   : > { %7378 = vrot.lane.b32.xlu2 %v9038_v12, %s9793_s26  ;;  %v1371_v35 = vmax.f32 %v1171_v9, 0.0  ;;  %v8905_v12 = vld [vmem:[%s9857_s13 + $0x188] sm:$0xff] }
 0x312   : > { %9039 = vpow2.f32 %v3105_v59  ;;  %8581 = vmatmul.msk.bf16.gmra.mxu2 %vm2493_vm2, %v10240_v44  ;;  %v10341_v5 = vpack.c.bf16 %v3316_v39, %v3315_v62 }
 0x313   : > { %8194 = vmatmul.msk.bf16.gmra.mxu0 %vm769_vm0, %v8904_v24 }
 0x314   : > { %11878 = vst [vmem:[#allocation42_spill] sm:$0xff] %v10341_v5 }
 0x315   : > { %v2810_v30 = vpop.f32.mrf.mxu2 }
 0x316   : > { %v2811_v38 = vadd.f32 %v2810_v30, %v2264_v32  ;;  %v2276_v39 = vpop.f32.mrf.mxu1 }
 0x318   : > { %v1173_v61 = vpop.f32.mrf.mxu0  ;;  %v9040_v23 = vpop.eup %9039  ;;  %v3107_v46 = vmul.f32 1.442695, %v2811_v38  ;;  %v3317_v32 = vmax.f32 %v2811_v38, 0.0 }
 0x319   : > { %v1372_v7 = vmax.f32 %v1173_v61, 0.0  ;;  %7380 = vrot.lane.b32.xlu0 %v9040_v23, %s9793_s26 }
 0x31a   : > { %9041 = vpow2.f32 %v3107_v46 }
 0x31b   : > { %v10346_v25 = vpack.c.bf16 %v1372_v7, %v1371_v35 }
 0x31d   : > { %v2812_v44 = vpop.f32.mrf.mxu2 }
 0x31e   : > { %v2813_v24 = vadd.f32 %v2812_v44, %v2266_v26  ;;  %v2279_v61 = vpop.f32.mrf.mxu1 }
 0x320   : > { %v1176_v62 = vpop.f32.mrf.mxu0  ;;  %v9042_v59 = vpop.eup %9041  ;;  %v3109_v30 = vmul.f32 1.442695, %v2813_v24  ;;  %v3318_v5 = vmax.f32 %v2813_v24, 0.0 }
 0x321   : > { %7382 = vrot.lane.b32.xlu1 %v9042_v59, %s9793_s26  ;;  %v1373_v46 = vmax.f32 %v1176_v62, 0.0  ;;  %v8906_v59 = vld [vmem:[%s9857_s13 + $0x190] sm:$0xff] }
 0x322   : > { %9043 = vpow2.f32 %v3109_v30  ;;  %8582 = vmatmul.msk.bf16.gmra.mxu2 %vm2493_vm2, %v10252_v55  ;;  %v10353_v9 = vpack.c.bf16 %v3318_v5, %v3317_v32 }
 0x323   : > { %8195 = vmatmul.msk.bf16.gmra.mxu0 %vm769_vm0, %v8905_v12 }
 0x324   : > { %11879 = vst [vmem:[#allocation43_spill] sm:$0xff] %v10353_v9 }
 0x325   : > { %v2815_v10 = vpop.f32.mrf.mxu2 }
 0x326   : > { %v2816_v26 = vadd.f32 %v2815_v10, %v2269_v18  ;;  %v2281_v55 = vpop.f32.mrf.mxu1 }
 0x328   : > { %v1178_v23 = vpop.f32.mrf.mxu0  ;;  %v9044_v35 = vpop.eup %9043  ;;  %v3111_v38 = vmul.f32 1.442695, %v2816_v26  ;;  %v3319_v32 = vmax.f32 %v2816_v26, 0.0 }
 0x329   : > { %v1374_v7 = vmax.f32 %v1178_v23, 0.0  ;;  %7384 = vrot.lane.b32.xlu2 %v9044_v35, %s9793_s26 }
 0x32a   : > { %9045 = vpow2.f32 %v3111_v38 }
 0x32b   : > { %v10356_v44 = vpack.c.bf16 %v1374_v7, %v1373_v46 }
 0x32d   : > { %v2817_v24 = vpop.f32.mrf.mxu2 }
 0x32e   : > { %v2818_v12 = vadd.f32 %v2817_v24, %v2271_v57  ;;  %v2284_v38 = vpop.f32.mrf.mxu1 }
 0x330   : > { %v1181_v30 = vpop.f32.mrf.mxu0  ;;  %v9046_v5 = vpop.eup %9045  ;;  %v3113_v9 = vmul.f32 1.442695, %v2818_v12  ;;  %v3320_v51 = vmax.f32 %v2818_v12, 0.0  ;;  %v8907_v12 = vld [vmem:[%s9857_s13 + $0x198] sm:$0xff] }
 0x331   : > { %7386 = vrot.lane.b32.xlu0 %v9046_v5, %s9793_s26  ;;  %v1375_v35 = vmax.f32 %v1181_v30, 0.0 }
 0x332   : > { %9047 = vpow2.f32 %v3113_v9  ;;  %8583 = vmatmul.msk.bf16.gmra.mxu2 %vm2493_vm2, %v10264_v42  ;;  %v10363_v18 = vpack.c.bf16 %v3320_v51, %v3319_v32 }
 0x333   : > { %8196 = vmatmul.msk.bf16.gmra.mxu0 %vm769_vm0, %v8906_v59 }
 0x335   : > { %v2820_v62 = vpop.f32.mrf.mxu2 }
 0x336   : > { %v2821_v57 = vadd.f32 %v2820_v62, %v2274_v47  ;;  %v2286_v30 = vpop.f32.mrf.mxu1 }
 0x338   : > { %v1183_v10 = vpop.f32.mrf.mxu0  ;;  %v9048_v23 = vpop.eup %9047  ;;  %v3115_v46 = vmul.f32 1.442695, %v2821_v57  ;;  %v3321_v51 = vmax.f32 %v2821_v57, 0.0 }
 0x339   : > { %v1376_v26 = vmax.f32 %v1183_v10, 0.0  ;;  %7388 = vrot.lane.b32.xlu1 %v9048_v23, %s9793_s26 }
 0x33a   : > { %9049 = vpow2.f32 %v3115_v46 }
 0x33b   : > { %v10366_v9 = vpack.c.bf16 %v1376_v26, %v1375_v35 }
 0x33d   : > { %v2822_v7 = vpop.f32.mrf.mxu2 }
 0x33e   : > { %v2823_v24 = vadd.f32 %v2822_v7, %v2276_v39 }
 0x340   : > { %v1186_v59 = vpop.f32.mrf.mxu0  ;;  %v9050_v42 = vpop.eup %9049  ;;  %v3117_v5 = vmul.f32 1.442695, %v2823_v24  ;;  %v3322_v32 = vmax.f32 %v2823_v24, 0.0 }
 0x341   : > { %7390 = vrot.lane.b32.xlu2 %v9050_v42, %s9793_s26  ;;  %v1377_v35 = vmax.f32 %v1186_v59, 0.0  ;;  %v2289_v24 = vpop.f32.mrf.mxu1 }
 0x342   : > { %9051 = vpow2.f32 %v3117_v5  ;;  %8584 = vmatmul.msk.bf16.gmra.mxu2 %vm2493_vm2, %v10274_v19  ;;  %v10373_v47 = vpack.c.bf16 %v3322_v32, %v3321_v51  ;;  %v8908_v19 = vld [vmem:[%s9857_s13 + $0x1a0] sm:$0xff] }
 0x343   : > { %8197 = vmatmul.msk.bf16.gmra.mxu0 %vm769_vm0, %v8907_v12 }
 0x344   : > { %11880 = vst [vmem:[#allocation44_spill] sm:$0xff] %v10373_v47 }
 0x345   : > { %v2825_v62 = vpop.f32.mrf.mxu2 }
 0x346   : > { %v2826_v39 = vadd.f32 %v2825_v62, %v2279_v61 }
 0x348   : > { %v1188_v10 = vpop.f32.mrf.mxu0  ;;  %v9052_v23 = vpop.eup %9051  ;;  %v3119_v57 = vmul.f32 1.442695, %v2826_v39  ;;  %v3323_v5 = vmax.f32 %v2826_v39, 0.0 }
 0x349   : > { %v1378_v46 = vmax.f32 %v1188_v10, 0.0  ;;  %7392 = vrot.lane.b32.xlu0 %v9052_v23, %s9793_s26  ;;  %v2291_v10 = vpop.f32.mrf.mxu1 }
 0x34a   : > { %9053 = vpow2.f32 %v3119_v57 }
 0x34b   : > { %v10376_v26 = vpack.c.bf16 %v1378_v46, %v1377_v35 }
 0x34d   : > { %v2827_v7 = vpop.f32.mrf.mxu2 }
 0x34e   : > { %v2828_v12 = vadd.f32 %v2827_v7, %v2281_v55 }
 0x350   : > { %v1191_v42 = vpop.f32.mrf.mxu0  ;;  %v9054_v51 = vpop.eup %9053  ;;  %v3121_v32 = vmul.f32 1.442695, %v2828_v12  ;;  %v3324_v47 = vmax.f32 %v2828_v12, 0.0 }
 0x351   : > { %7394 = vrot.lane.b32.xlu1 %v9054_v51, %s9793_s26  ;;  %v1379_v35 = vmax.f32 %v1191_v42, 0.0 }
 0x352   : > { %9055 = vpow2.f32 %v3121_v32  ;;  %8585 = vmatmul.msk.bf16.gmra.mxu2 %vm2493_vm2, %v10286_v2  ;;  %v10383_v61 = vpack.c.bf16 %v3324_v47, %v3323_v5 }
 0x353   : > { %8198 = vmatmul.msk.bf16.gmra.mxu0 %vm769_vm0, %v8908_v19  ;;  %v8909_v19 = vld [vmem:[%s9857_s13 + $0x1a8] sm:$0xff] }
 0x355   : > { %v2830_v59 = vpop.f32.mrf.mxu2 }
 0x356   : > { %v2831_v62 = vadd.f32 %v2830_v59, %v2284_v38  ;;  %v2294_v38 = vpop.f32.mrf.mxu1 }
 0x358   : > { %v1193_v55 = vpop.f32.mrf.mxu0  ;;  %v9056_v23 = vpop.eup %9055  ;;  %v3123_v39 = vmul.f32 1.442695, %v2831_v62  ;;  %v3325_v47 = vmax.f32 %v2831_v62, 0.0 }
 0x359   : > { %v1380_v57 = vmax.f32 %v1193_v55, 0.0  ;;  %7396 = vrot.lane.b32.xlu2 %v9056_v23, %s9793_s26 }
 0x35a   : > { %9057 = vpow2.f32 %v3123_v39 }
 0x35b   : > { %v10386_v46 = vpack.c.bf16 %v1380_v57, %v1379_v35 }
 0x35d   : > { %v2832_v7 = vpop.f32.mrf.mxu2 }
 0x35e   : > { %v2833_v12 = vadd.f32 %v2832_v7, %v2286_v30  ;;  %v2296_v7 = vpop.f32.mrf.mxu1 }
 0x360   : > { %v1196_v51 = vpop.f32.mrf.mxu0  ;;  %v9058_v2 = vpop.eup %9057  ;;  %v3125_v5 = vmul.f32 1.442695, %v2833_v12  ;;  %v3326_v32 = vmax.f32 %v2833_v12, 0.0 }
 0x361   : > { %7398 = vrot.lane.b32.xlu0 %v9058_v2, %s9793_s26  ;;  %v1381_v35 = vmax.f32 %v1196_v51, 0.0  ;;  %v8910_v2 = vld [vmem:[%s9857_s13 + $0x1b0] sm:$0xff] }
 0x362   : > { %9059 = vpow2.f32 %v3125_v5  ;;  %8586 = vmatmul.msk.bf16.gmra.mxu2 %vm2493_vm2, %v10298_v15  ;;  %v10393_v42 = vpack.c.bf16 %v3326_v32, %v3325_v47 }
 0x363   : > { %8199 = vmatmul.msk.bf16.gmra.mxu0 %vm769_vm0, %v8909_v19 }
 0x364   : > { %11881 = vst [vmem:[#allocation45_spill] sm:$0xff] %v10393_v42 }
 0x365   : > { %v2835_v59 = vpop.f32.mrf.mxu2 }
 0x366   : > { %v2836_v30 = vadd.f32 %v2835_v59, %v2289_v24  ;;  %v2299_v59 = vpop.f32.mrf.mxu1 }
 0x368   : > { %v1198_v55 = vpop.f32.mrf.mxu0  ;;  %v9060_v23 = vpop.eup %9059  ;;  %v3127_v62 = vmul.f32 1.442695, %v2836_v30  ;;  %v3327_v47 = vmax.f32 %v2836_v30, 0.0 }
 0x369   : > { %v1382_v39 = vmax.f32 %v1198_v55, 0.0  ;;  %7400 = vrot.lane.b32.xlu1 %v9060_v23, %s9793_s26 }
 0x36a   : > { %9061 = vpow2.f32 %v3127_v62 }
 0x36b   : > { %v10396_v57 = vpack.c.bf16 %v1382_v39, %v1381_v35 }
 0x36d   : > { %v2837_v12 = vpop.f32.mrf.mxu2 }
 0x36e   : > { %v2838_v19 = vadd.f32 %v2837_v12, %v2291_v10 }
 0x370   : > { %v1201_v5 = vpop.f32.mrf.mxu0  ;;  %v9062_v15 = vpop.eup %9061  ;;  %v3129_v32 = vmul.f32 1.442695, %v2838_v19  ;;  %v3328_v42 = vmax.f32 %v2838_v19, 0.0 }
 0x371   : > { %7402 = vrot.lane.b32.xlu2 %v9062_v15, %s9793_s26  ;;  %v1383_v35 = vmax.f32 %v1201_v5, 0.0 }
 0x372   : > { %9063 = vpow2.f32 %v3129_v32  ;;  %8587 = vmatmul.msk.bf16.gmra.mxu2 %vm2493_vm2, %v10310_v17  ;;  %v10403_v24 = vpack.c.bf16 %v3328_v42, %v3327_v47  ;;  %v2301_v42 = vpop.f32.mrf.mxu1 }
 0x373   : > { %8200 = vmatmul.msk.bf16.gmra.mxu0 %vm769_vm0, %v8910_v2  ;;  %v8911_v2 = vld [vmem:[%s9857_s13 + $0x1b8] sm:$0xff] }
 0x375   : > { %v2840_v51 = vpop.f32.mrf.mxu2 }
 0x376   : > { %v2841_v10 = vadd.f32 %v2840_v51, %v2294_v38  ;;  %v8919_v51 = vld [vmem:[%s9857_s13 + $0x1f8] sm:$0xff] }
 0x377   : > { %8209 = vmatmul.msk.bf16.vlgmr.msra.gmra.mxu3 %vm769_vm0, %v8919_v51 }
 0x378   : > { %v1203_v55 = vpop.f32.mrf.mxu0  ;;  %v9064_v23 = vpop.eup %9063  ;;  %v3131_v30 = vmul.f32 1.442695, %v2841_v10  ;;  %v3329_v47 = vmax.f32 %v2841_v10, 0.0 }
 0x379   : > { %v1384_v62 = vmax.f32 %v1203_v55, 0.0  ;;  %7404 = vrot.lane.b32.xlu0 %v9064_v23, %s9793_s26 }
 0x37a   : > { %9065 = vpow2.f32 %v3131_v30 }
 0x37b   : > { %v10406_v39 = vpack.c.bf16 %v1384_v62, %v1383_v35 }
 0x37d   : > { %v2842_v12 = vpop.f32.mrf.mxu2 }
 0x37e   : > { %v2843_v19 = vadd.f32 %v2842_v12, %v2296_v7  ;;  %v2304_v12 = vpop.f32.mrf.mxu1 }
 0x380   : > { %v1206_v17 = vpop.f32.mrf.mxu0  ;;  %v9066_v15 = vpop.eup %9065  ;;  %v3133_v32 = vmul.f32 1.442695, %v2843_v19  ;;  %v3330_v38 = vmax.f32 %v2843_v19, 0.0 }
 0x381   : > { %7406 = vrot.lane.b32.xlu1 %v9066_v15, %s9793_s26  ;;  %v1385_v35 = vmax.f32 %v1206_v17, 0.0  ;;  %v8912_v15 = vld [vmem:[%s9857_s13 + $0x1c0] sm:$0xff] }
 0x382   : > { %9067 = vpow2.f32 %v3133_v32  ;;  %8588 = vmatmul.msk.bf16.gmra.mxu2 %vm2493_vm2, %v10322_v0  ;;  %v10413_v5 = vpack.c.bf16 %v3330_v38, %v3329_v47 }
 0x383   : > { %8201 = vmatmul.msk.bf16.gmra.mxu0 %vm769_vm0, %v8911_v2 }
 0x385   : > { %v2845_v7 = vpop.f32.mrf.mxu2 }
 0x386   : > { %v2846_v55 = vadd.f32 %v2845_v7, %v2299_v59  ;;  %v2306_v7 = vpop.f32.mrf.mxu1 }
 0x388   : > { %v1208_v23 = vpop.f32.mrf.mxu0  ;;  %v9068_v10 = vpop.eup %9067  ;;  %v3135_v30 = vmul.f32 1.442695, %v2846_v55  ;;  %v3331_v59 = vmax.f32 %v2846_v55, 0.0 }
 0x389   : > { %v1386_v62 = vmax.f32 %v1208_v23, 0.0  ;;  %7408 = vrot.lane.b32.xlu2 %v9068_v10, %s9793_s26  ;;  %v8977_v23 = vld [vmem:[%s9862_s16 + $0x198] sm:$0xff] }
 0x38a   : > { %9069 = vpow2.f32 %v3135_v30  ;;  %8521 = vmatmul.msk.bf16.vlgmr.msrb.gmra.mxu3 %vm1947_vm1, %v8977_v23 }
 0x38b   : > { %v10418_v19 = vpack.c.bf16 %v1386_v62, %v1385_v35 }
 0x38d   : > { %v2847_v0 = vpop.f32.mrf.mxu2 }
 0x38e   : > { %v2848_v2 = vadd.f32 %v2847_v0, %v2301_v42 }
 0x390   : > { %v1211_v47 = vpop.f32.mrf.mxu0  ;;  %v9070_v32 = vpop.eup %9069  ;;  %v3137_v38 = vmul.f32 1.442695, %v2848_v2  ;;  %v3332_v51 = vmax.f32 %v2848_v2, 0.0 }
 0x391   : > { %7410 = vrot.lane.b32.xlu0 %v9070_v32, %s9793_s26  ;;  %v1387_v30 = vmax.f32 %v1211_v47, 0.0  ;;  %v8998_v47 = vld [vmem:[%s11835_s5 + $0x38] sm:$0xff] }
 0x392   : > { %9071 = vpow2.f32 %v3137_v38  ;;  %8589 = vmatmul.msk.bf16.gmra.mxu2 %vm2493_vm2, %v10334_v33  ;;  %v10425_v17 = vpack.c.bf16 %v3332_v51, %v3331_v59  ;;  %v8913_v59 = vld [vmem:[%s9857_s13 + $0x1c8] sm:$0xff]  ;;  %3527 = vmatpush.bf16.msra.mxu3 %v8998_v47 }
 0x393   : > { %8202 = vmatmul.msk.bf16.gmra.mxu0 %vm769_vm0, %v8912_v15  ;;  %v2309_v15 = vpop.f32.mrf.mxu1 }
 0x395   : > { %v2850_v42 = vpop.f32.mrf.mxu2 }
 0x396   : > { %v2851_v10 = vadd.f32 %v2850_v42, %v2304_v12 }
 0x398   : > { %v1213_v55 = vpop.f32.mrf.mxu0  ;;  %v9072_v35 = vpop.eup %9071  ;;  %v3139_v62 = vmul.f32 1.442695, %v2851_v10  ;;  %v3333_v12 = vmax.f32 %v2851_v10, 0.0 }
 0x399   : > { %v1388_v0 = vmax.f32 %v1213_v55, 0.0  ;;  %7412 = vrot.lane.b32.xlu1 %v9072_v35, %s9793_s26 }
 0x39a   : > { %9073 = vpow2.f32 %v3139_v62 }
 0x39b   : > { %v10430_v2 = vpack.c.bf16 %v1388_v0, %v1387_v30  ;;  %v2311_v62 = vpop.f32.mrf.mxu1 }
 0x39d   : > { %v2852_v33 = vpop.f32.mrf.mxu2 }
 0x39e   : > { %v2853_v32 = vadd.f32 %v2852_v33, %v2306_v7  ;;  %v8978_v7 = vld [vmem:[%s9862_s16 + $0x1a0] sm:$0xff] }
 0x39f   : > { %8522 = vmatmul.msk.bf16.gmra.mxu3 %vm1947_vm1, %v8978_v7 }
 0x3a0   : > { %v1216_v38 = vpop.f32.mrf.mxu0  ;;  %v9074_v51 = vpop.eup %9073  ;;  %v3141_v42 = vmul.f32 1.442695, %v2853_v32  ;;  %v3334_v23 = vmax.f32 %v2853_v32, 0.0 }
 0x3a1   : > { %7414 = vrot.lane.b32.xlu2 %v9074_v51, %s9793_s26  ;;  %v1389_v33 = vmax.f32 %v1216_v38, 0.0 }
 0x3a2   : > { %9075 = vpow2.f32 %v3141_v42  ;;  %8590 = vmatmul.msk.bf16.gmra.mxu2 %vm2493_vm2, %v10346_v25  ;;  %v10440_v55 = vpack.c.bf16 %v3334_v23, %v3333_v12  ;;  %v8914_v42 = vld [vmem:[%s9857_s13 + $0x1d0] sm:$0xff] }
 0x3a3   : > { %8203 = vmatmul.msk.bf16.gmra.mxu0 %vm769_vm0, %v8913_v59 }
 0x3a4   : > { %11882 = vst [vmem:[#allocation46_spill] sm:$0xff] %v10440_v55  ;;  %v2314_v55 = vpop.f32.mrf.mxu1 }
 0x3a5   : > { %v2855_v10 = vpop.f32.mrf.mxu2 }
 0x3a6   : > { %v2856_v35 = vadd.f32 %v2855_v10, %v2309_v15 }
 0x3a8   : > { %v1218_v30 = vpop.f32.mrf.mxu0  ;;  %v9076_v0 = vpop.eup %9075  ;;  %v3143_v32 = vmul.f32 1.442695, %v2856_v35  ;;  %v3335_v15 = vmax.f32 %v2856_v35, 0.0 }
 0x3a9   : > { %v1390_v59 = vmax.f32 %v1218_v30, 0.0  ;;  %7416 = vrot.lane.b32.xlu0 %v9076_v0, %s9793_s26  ;;  %v8979_v30 = vld [vmem:[%s9862_s16 + $0x1a8] sm:$0xff] }
 0x3aa   : > { %9077 = vpow2.f32 %v3143_v32 }
 0x3ab   : > { %v10445_v25 = vpack.c.bf16 %v1390_v59, %v1389_v33 }
 0x3ad   : > { %v2857_v51 = vpop.f32.mrf.mxu2 }
 0x3ae   : > { %v2858_v12 = vadd.f32 %v2857_v51, %v2311_v62 }
 0x3af   : > { %8523 = vmatmul.msk.bf16.gmra.mxu3 %vm1947_vm1, %v8979_v30 }
 0x3b0   : > { %v1221_v23 = vpop.f32.mrf.mxu0  ;;  %v9078_v47 = vpop.eup %9077  ;;  %v3145_v10 = vmul.f32 1.442695, %v2858_v12  ;;  %v3336_v7 = vmax.f32 %v2858_v12, 0.0 }
 0x3b1   : > { %7418 = vrot.lane.b32.xlu1 %v9078_v47, %s9793_s26  ;;  %v1391_v32 = vmax.f32 %v1221_v23, 0.0 }
 0x3b2   : > { %9079 = vpow2.f32 %v3145_v10  ;;  %8591 = vmatmul.msk.bf16.gmra.mxu2 %vm2493_vm2, %v10356_v44  ;;  %v10452_v38 = vpack.c.bf16 %v3336_v7, %v3335_v15  ;;  %v8997_v44 = vld [vmem:[%s11835_s5 + $0x30] sm:$0xff]  ;;  %v8915_v15 = vld [vmem:[%s9857_s13 + $0x1d8] sm:$0xff] }
 0x3b3   : > { %8204 = vmatmul.msk.bf16.gmra.mxu0 %vm769_vm0, %v8914_v42  ;;  %v2316_v42 = vpop.f32.mrf.mxu1  ;;  %3528 = vmatpush.bf16.msra.mxu3 %v8997_v44 }
 0x3b5   : > { %v2860_v0 = vpop.f32.mrf.mxu2 }
 0x3b6   : > { %v2861_v62 = vadd.f32 %v2860_v0, %v2314_v55 }
 0x3b8   : > { %v1223_v35 = vpop.f32.mrf.mxu0  ;;  %v9080_v33 = vpop.eup %9079  ;;  %v3147_v59 = vmul.f32 1.442695, %v2861_v62  ;;  %v3337_v23 = vmax.f32 %v2861_v62, 0.0 }
 0x3b9   : > { %v1392_v51 = vmax.f32 %v1223_v35, 0.0  ;;  %7420 = vrot.lane.b32.xlu2 %v9080_v33, %s9793_s26  ;;  %v8980_v33 = vld [vmem:[%s9862_s16 + $0x1b0] sm:$0xff] }
 0x3ba   : > { %9081 = vpow2.f32 %v3147_v59 }
 0x3bb   : > { %v10457_v12 = vpack.c.bf16 %v1392_v51, %v1391_v32 }
 0x3bd   : > { %v2862_v55 = vpop.f32.mrf.mxu2 }
 0x3be   : > { %v2863_v47 = vadd.f32 %v2862_v55, %v2316_v42 }
 0x3bf   : > { %8524 = vmatmul.msk.bf16.gmra.mxu3 %vm1947_vm1, %v8980_v33 }
 0x3c0   : > { %v1226_v10 = vpop.f32.mrf.mxu0  ;;  %v9082_v7 = vpop.eup %9081  ;;  %v3149_v30 = vmul.f32 1.442695, %v2863_v47  ;;  %v3338_v0 = vmax.f32 %v2863_v47, 0.0 }
 0x3c1   : > { %7422 = vrot.lane.b32.xlu0 %v9082_v7, %s9793_s26  ;;  %v1393_v44 = vmax.f32 %v1226_v10, 0.0  ;;  %v8916_v7 = vld [vmem:[%s9857_s13 + $0x1e0] sm:$0xff]  ;;  %v8996_v10 = vld [vmem:[%s11835_s5 + $0x28] sm:$0xff] }
 0x3c2   : > { %9083 = vpow2.f32 %v3149_v30  ;;  %8592 = vmatmul.msk.bf16.gmra.mxu2 %vm2493_vm2, %v10366_v9  ;;  %v10467_v35 = vpack.c.bf16 %v3338_v0, %v3337_v23  ;;  %3529 = vmatpush.bf16.msra.mxu3 %v8996_v10 }
 0x3c3   : > { %8205 = vmatmul.msk.bf16.gmra.mxu0 %vm769_vm0, %v8915_v15 }
 0x3c5   : > { %v2865_v32 = vpop.f32.mrf.mxu2 }
 0x3c6   : > { %v2866_v59 = vadd.f32 %v2865_v32, %v9900_v22 }
 0x3c8   : > { %v1228_v62 = vpop.f32.mrf.mxu0  ;;  %v9084_v51 = vpop.eup %9083  ;;  %v3151_v42 = vmul.f32 1.442695, %v2866_v59  ;;  %v3339_v22 = vmax.f32 %v2866_v59, 0.0 }
 0x3c9   : > { %v1394_v55 = vmax.f32 %v1228_v62, 0.0  ;;  %7424 = vrot.lane.b32.xlu1 %v9084_v51, %s9793_s26 }
 0x3ca   : > { %9085 = vpow2.f32 %v3151_v42 }
 0x3cb   : > { %v10473_v47 = vpack.c.bf16 %v1394_v55, %v1393_v44 }
 0x3cd   : > { %v2867_v9 = vpop.f32.mrf.mxu2 }
 0x3ce   : > { %v2868_v15 = vadd.f32 %v2867_v9, %v9904_v27  ;;  %v8981_v27 = vld [vmem:[%s9862_s16 + $0x1b8] sm:$0xff] }
 0x3cf   : > { %8525 = vmatmul.msk.bf16.gmra.mxu3 %vm1947_vm1, %v8981_v27  ;;  %v8982_v27 = vld [vmem:[%s9862_s16 + $0x1c0] sm:$0xff] }
 0x3d0   : > { %v1231_v23 = vpop.f32.mrf.mxu0  ;;  %v9086_v30 = vpop.eup %9085  ;;  %v3153_v0 = vmul.f32 1.442695, %v2868_v15  ;;  %v3340_v33 = vmax.f32 %v2868_v15, 0.0 }
 0x3d1   : > { %7426 = vrot.lane.b32.xlu2 %v9086_v30, %s9793_s26  ;;  %v1395_v42 = vmax.f32 %v1231_v23, 0.0  ;;  %v8917_v30 = vld [vmem:[%s9857_s13 + $0x1e8] sm:$0xff] }
 0x3d2   : > { %9087 = vpow2.f32 %v3153_v0  ;;  %8593 = vmatmul.msk.bf16.gmra.mxu2 %vm2493_vm2, %v10376_v26  ;;  %v10484_v32 = vpack.c.bf16 %v3340_v33, %v3339_v22 }
 0x3d3   : > { %8206 = vmatmul.msk.bf16.gmra.mxu0 %vm769_vm0, %v8916_v7 }
 0x3d5   : > { %v2870_v59 = vpop.f32.mrf.mxu2 }
 0x3d6   : > { %v2871_v62 = vadd.f32 %v2870_v59, %v9910_v31 }
 0x3d8   : > { %v1233_v51 = vpop.f32.mrf.mxu0  ;;  %v9088_v44 = vpop.eup %9087  ;;  %v3155_v55 = vmul.f32 1.442695, %v2871_v62  ;;  %v3341_v31 = vmax.f32 %v2871_v62, 0.0 }
 0x3d9   : > { %v1396_v9 = vmax.f32 %v1233_v51, 0.0  ;;  %7428 = vrot.lane.b32.xlu0 %v9088_v44, %s9793_s26 }
 0x3da   : > { %9089 = vpow2.f32 %v3155_v55 }
 0x3db   : > { %v10490_v26 = vpack.c.bf16 %v1396_v9, %v1395_v42 }
 0x3dd   : > { %v2872_v15 = vpop.f32.mrf.mxu2 }
 0x3de   : > { %v2873_v7 = vadd.f32 %v2872_v15, %v9914_v36 }
 0x3df   : > { %8526 = vmatmul.msk.bf16.gmra.mxu3 %vm1947_vm1, %v8982_v27 }
 0x3e0   : > { %v1236_v22 = vpop.f32.mrf.mxu0  ;;  %v9090_v0 = vpop.eup %9089  ;;  %v3157_v33 = vmul.f32 1.442695, %v2873_v7  ;;  %v3342_v10 = vmax.f32 %v2873_v7, 0.0  ;;  %v8918_v7 = vld [vmem:[%s9857_s13 + $0x1f0] sm:$0xff] }
 0x3e1   : > { %7430 = vrot.lane.b32.xlu1 %v9090_v0, %s9793_s26  ;;  %v1397_v44 = vmax.f32 %v1236_v22, 0.0 }
 0x3e2   : > { %9091 = vpow2.f32 %v3157_v33  ;;  %8594 = vmatmul.msk.bf16.gmra.mxu2 %vm2493_vm2, %v10386_v46  ;;  %v10498_v23 = vpack.c.bf16 %v3342_v10, %v3341_v31  ;;  %v8995_v46 = vld [vmem:[%s11835_s5 + $0x20] sm:$0xff]  ;;  %v9002_v10 = vld [vmem:[%s11836_s6 + $0x18] sm:$0xff] }
 0x3e3   : > { %8207 = vmatmul.msk.bf16.gmra.mxu0 %vm769_vm0, %v8917_v30  ;;  %3530 = vmatpush.bf16.msra.mxu3 %v8995_v46 }
 0x3e4   : > { %4276 = vmatpush.bf16.msrb.mxu1 %v9002_v10 }
 0x3e5   : > { %v2875_v59 = vpop.f32.mrf.mxu2 }
 0x3e6   : > { %v2876_v36 = vadd.f32 %v2875_v59, %v9920_v40 }
 0x3e8   : > { %v1238_v62 = vpop.f32.mrf.mxu0  ;;  %v9092_v51 = vpop.eup %9091  ;;  %v3159_v42 = vmul.f32 1.442695, %v2876_v36  ;;  %v3343_v22 = vmax.f32 %v2876_v36, 0.0 }
 0x3e9   : > { %v1398_v55 = vmax.f32 %v1238_v62, 0.0  ;;  %7432 = vrot.lane.b32.xlu2 %v9092_v51, %s9793_s26 }
 0x3ea   : > { %9093 = vpow2.f32 %v3159_v42 }
 0x3eb   : > { %v10504_v9 = vpack.c.bf16 %v1398_v55, %v1397_v44 }
 0x3ed   : > { %v2877_v15 = vpop.f32.mrf.mxu2 }
 0x3ee   : > { %v2878_v40 = vadd.f32 %v2877_v15, %v9924_v45  ;;  %v8983_v45 = vld [vmem:[%s9862_s16 + $0x1c8] sm:$0xff] }
 0x3ef   : > { %8527 = vmatmul.msk.bf16.gmra.mxu3 %vm1947_vm1, %v8983_v45 }
 0x3f0   : > { %v1241_v30 = vpop.f32.mrf.mxu0  ;;  %v9094_v0 = vpop.eup %9093  ;;  %v3161_v31 = vmul.f32 1.442695, %v2878_v40  ;;  %v3344_v33 = vmax.f32 %v2878_v40, 0.0  ;;  %v8926_v40 = vld [vmem:[%s9862_s16] sm:$0xff] }
 0x3f1   : > { %7434 = vrot.lane.b32.xlu0 %v9094_v0, %s9793_s26  ;;  %v1399_v44 = vmax.f32 %v1241_v30, 0.0 }
 0x3f2   : > { %9095 = vpow2.f32 %v3161_v31  ;;  %8595 = vmatmul.msk.bf16.gmra.mxu2 %vm2493_vm2, %v10396_v57  ;;  %v10518_v27 = vpack.c.bf16 %v3344_v33, %v3343_v22  ;;  %v8984_v33 = vld [vmem:[%s9862_s16 + $0x1d0] sm:$0xff] }
 0x3f3   : > { %8208 = vmatmul.msk.bf16.gmra.mxu0 %vm769_vm0, %v8918_v7 }
 0x3f5   : > { %v2880_v59 = vpop.f32.mrf.mxu2 }
 0x3f6   : > { %v2881_v36 = vadd.f32 %v2880_v59, %v9930_v49 }
 0x3f8   : > { %v1243_v62 = vpop.f32.mrf.mxu0  ;;  %v9096_v51 = vpop.eup %9095  ;;  %v3163_v42 = vmul.f32 1.442695, %v2881_v36  ;;  %v3345_v49 = vmax.f32 %v2881_v36, 0.0 }
 0x3f9   : > { %v1400_v55 = vmax.f32 %v1243_v62, 0.0  ;;  %7436 = vrot.lane.b32.xlu1 %v9096_v51, %s9793_s26 }
 0x3fa   : > { %9097 = vpow2.f32 %v3163_v42 }
 0x3fb   : > { %v10524_v57 = vpack.c.bf16 %v1400_v55, %v1399_v44  ;;  %v1286_v44 = vpop.f32.mrf.mxu3 }
 0x3fd   : > { %v2882_v46 = vpop.f32.mrf.mxu2 }
 0x3fe   : > { %v2883_v15 = vadd.f32 %v2882_v46, %v9934_v54  ;;  %v8927_v46 = vld [vmem:[%s9862_s16 + $0x8] sm:$0xff] }
 0x3ff   : > { %8528 = vmatmul.msk.bf16.gmra.mxu3 %vm1947_vm1, %v8984_v33 }
 0x400   : > { %v1246_v7 = vpop.f32.mrf.mxu0  ;;  %v9098_v0 = vpop.eup %9097  ;;  %v3165_v22 = vmul.f32 1.442695, %v2883_v15  ;;  %v3346_v31 = vmax.f32 %v2883_v15, 0.0 }
 0x401   : > { %7438 = vrot.lane.b32.xlu2 %v9098_v0, %s9793_s26  ;;  %v1401_v36 = vmax.f32 %v1246_v7, 0.0 }
 0x402   : > { %9099 = vpow2.f32 %v3165_v22  ;;  %8596 = vmatmul.msk.bf16.gmra.mxu2 %vm2493_vm2, %v10406_v39  ;;  %v10532_v30 = vpack.c.bf16 %v3346_v31, %v3345_v49  ;;  %v8994_v39 = vld [vmem:[%s11835_s5 + $0x18] sm:$0xff]  ;;  %v1417_v22 = vmax.f32 %v1286_v44, 0.0 }
 0x403   : > { %8470 = vmatmul.msk.bf16.vlgmr.msrb.gmra.mxu0 %vm1947_vm1, %v8926_v40  ;;  %3531 = vmatpush.bf16.msra.mxu3 %v8994_v39  ;;  %v1288_v31 = vpop.f32.mrf.mxu3 }
 0x404   : > { %v1418_v33 = vmax.f32 %v1288_v31, 0.0 }
 0x405   : > { %v2885_v10 = vpop.f32.mrf.mxu2 }
 0x406   : > { %v2886_v54 = vadd.f32 %v2885_v10, %v9940_v58 }
 0x408   : > { %v1248_v45 = vpop.f32.mrf.mxu0  ;;  %v9100_v59 = vpop.eup %9099  ;;  %v3167_v62 = vmul.f32 1.442695, %v2886_v54  ;;  %v3347_v7 = vmax.f32 %v2886_v54, 0.0 }
 0x409   : > { %v1402_v51 = vmax.f32 %v1248_v45, 0.0  ;;  %7440 = vrot.lane.b32.xlu0 %v9100_v59, %s9793_s26  ;;  %v8985_v45 = vld [vmem:[%s9862_s16 + $0x1d8] sm:$0xff] }
 0x40a   : > { %9101 = vpow2.f32 %v3167_v62 }
 0x40b   : > { %v10538_v42 = vpack.c.bf16 %v1402_v51, %v1401_v36 }
 0x40d   : > { %v2887_v55 = vpop.f32.mrf.mxu2 }
 0x40e   : > { %v2888_v58 = vadd.f32 %v2887_v55, %v9944_v63  ;;  %v10551_v63 = vpack.c.bf16 %v1418_v33, %v1417_v22  ;;  %v8986_v33 = vld [vmem:[%s9862_s16 + $0x1e0] sm:$0xff] }
 0x40f   : > { %8529 = vmatmul.msk.bf16.gmra.mxu3 %vm1947_vm1, %v8985_v45 }
 0x410   : > { %v1251_v15 = vpop.f32.mrf.mxu0  ;;  %v9102_v40 = vpop.eup %9101  ;;  %v3169_v0 = vmul.f32 1.442695, %v2888_v58  ;;  %v3348_v49 = vmax.f32 %v2888_v58, 0.0 }
 0x411   : > { %7442 = vrot.lane.b32.xlu1 %v9102_v40, %s9793_s26  ;;  %v1403_v51 = vmax.f32 %v1251_v15, 0.0  ;;  %v8928_v40 = vld [vmem:[%s9862_s16 + $0x10] sm:$0xff] }
 0x412   : > { %9103 = vpow2.f32 %v3169_v0  ;;  %8597 = vmatmul.msk.bf16.gmra.mxu2 %vm2493_vm2, %v10418_v19  ;;  %v10549_v10 = vpack.c.bf16 %v3348_v49, %v3347_v7  ;;  %v10557_v19 = vpop.f32.mrf.mxu3 }
 0x413   : > { %8471 = vmatmul.msk.bf16.gmra.mxu0 %vm1947_vm1, %v8927_v46 }
 0x415   : > { %v2890_v54 = vpop.f32.mrf.mxu2 }
 0x416   : > { %v2891_v59 = vadd.f32 %v2890_v54, %v9950_v3 }
 0x418   : > { %v1253_v36 = vpop.f32.mrf.mxu0  ;;  %v9104_v62 = vpop.eup %9103  ;;  %v3171_v44 = vmul.f32 1.442695, %v2891_v59  ;;  %v3349_v0 = vmax.f32 %v2891_v59, 0.0 }
 0x419   : > { %v1404_v39 = vmax.f32 %v1253_v36, 0.0  ;;  %7444 = vrot.lane.b32.xlu2 %v9104_v62, %s9793_s26 }
 0x41a   : > { %9105 = vpow2.f32 %v3171_v44  ;;  %v10564_v15 = vpop.f32.mrf.mxu3 }
 0x41b   : > { %v10559_v55 = vpack.c.bf16 %v1404_v39, %v1403_v51 }
 0x41d   : > { %v2892_v58 = vpop.f32.mrf.mxu2 }
 0x41e   : > { %v2893_v46 = vadd.f32 %v2892_v58, %v9954_v8  ;;  %v8993_v8 = vld [vmem:[%s11835_s5 + $0x10] sm:$0xff] }
 0x41f   : > { %3532 = vmatpush.bf16.msra.mxu3 %v8993_v8 }
 0x420   : > { %v1256_v3 = vpop.f32.mrf.mxu0  ;;  %v9106_v7 = vpop.eup %9105  ;;  %v3173_v49 = vmul.f32 1.442695, %v2893_v46  ;;  %v3350_v22 = vmax.f32 %v2893_v46, 0.0  ;;  %8530 = vmatmul.msk.bf16.gmra.mxu3 %vm1947_vm1, %v8986_v33  ;;  %v8987_v33 = vld [vmem:[%s9862_s16 + $0x1e8] sm:$0xff] }
 0x421   : > { %7446 = vrot.lane.b32.xlu0 %v9106_v7, %s9793_s26  ;;  %v1405_v62 = vmax.f32 %v1256_v3, 0.0 }
 0x422   : > { %9107 = vpow2.f32 %v3173_v49  ;;  %8598 = vmatmul.msk.bf16.gmra.mxu2 %vm2493_vm2, %v10430_v2  ;;  %v10572_v31 = vpack.c.bf16 %v3350_v22, %v3349_v0  ;;  %v10578_v2 = vpop.f32.mrf.mxu3 }
 0x423   : > { %8472 = vmatmul.msk.bf16.gmra.mxu0 %vm1947_vm1, %v8928_v40  ;;  %v8929_v40 = vld [vmem:[%s9862_s16 + $0x18] sm:$0xff] }
 0x425   : > { %v2895_v45 = vpop.f32.mrf.mxu2 }
 0x426   : > { %v2896_v54 = vadd.f32 %v2895_v45, %v9963_v13 }
 0x428   : > { %v1258_v59 = vpop.f32.mrf.mxu0  ;;  %v9108_v36 = vpop.eup %9107  ;;  %v3175_v51 = vmul.f32 1.442695, %v2896_v54  ;;  %v3351_v0 = vmax.f32 %v2896_v54, 0.0 }
 0x429   : > { %v1406_v44 = vmax.f32 %v1258_v59, 0.0  ;;  %7448 = vrot.lane.b32.xlu1 %v9108_v36, %s9793_s26 }
 0x42a   : > { %9109 = vpow2.f32 %v3175_v51  ;;  %v10585_v3 = vpop.f32.mrf.mxu3 }
 0x42b   : > { %v10580_v39 = vpack.c.bf16 %v1406_v44, %v1405_v62 }
 0x42d   : > { %v2897_v58 = vpop.f32.mrf.mxu2 }
 0x42e   : > { %v2898_v46 = vadd.f32 %v2897_v58, %v9973_v20  ;;  %v9001_v20 = vld [vmem:[%s11836_s6 + $0x10] sm:$0xff] }
 0x42f   : > { %4277 = vmatpush.bf16.msrb.mxu1 %v9001_v20 }
 0x430   : > { %v1261_v13 = vpop.f32.mrf.mxu0  ;;  %v9110_v7 = vpop.eup %9109  ;;  %v3177_v49 = vmul.f32 1.442695, %v2898_v46  ;;  %v3352_v22 = vmax.f32 %v2898_v46, 0.0  ;;  %8531 = vmatmul.msk.bf16.gmra.mxu3 %vm1947_vm1, %v8987_v33  ;;  %v8992_v46 = vld [vmem:[%s11835_s5 + $0x8] sm:$0xff] }
 0x431   : > { %7450 = vrot.lane.b32.xlu2 %v9110_v7, %s9793_s26  ;;  %v1407_v62 = vmax.f32 %v1261_v13, 0.0  ;;  %3533 = vmatpush.bf16.msra.mxu3 %v8992_v46  ;;  %v8930_v7 = vld [vmem:[%s9862_s16 + $0x20] sm:$0xff] }
 0x432   : > { %9111 = vpow2.f32 %v3177_v49  ;;  %8599 = vmatmul.msk.bf16.gmra.mxu2 %vm2493_vm2, %v10445_v25  ;;  %v10593_v8 = vpack.c.bf16 %v3352_v22, %v3351_v0  ;;  %v10599_v25 = vpop.f32.mrf.mxu3 }
 0x433   : > { %8473 = vmatmul.msk.bf16.gmra.mxu0 %vm1947_vm1, %v8929_v40 }
 0x435   : > { %v2900_v45 = vpop.f32.mrf.mxu2 }
 0x436   : > { %v2901_v54 = vadd.f32 %v2900_v45, %v9982_v28 }
 0x438   : > { %v1263_v59 = vpop.f32.mrf.mxu0  ;;  %v9112_v36 = vpop.eup %9111  ;;  %v3179_v51 = vmul.f32 1.442695, %v2901_v54  ;;  %v3353_v49 = vmax.f32 %v2901_v54, 0.0 }
 0x439   : > { %v1408_v44 = vmax.f32 %v1263_v59, 0.0  ;;  %7452 = vrot.lane.b32.xlu0 %v9112_v36, %s9793_s26 }
 0x43a   : > { %9113 = vpow2.f32 %v3179_v51  ;;  %v10609_v33 = vpop.f32.mrf.mxu3 }
 0x43b   : > { %v10601_v58 = vpack.c.bf16 %v1408_v44, %v1407_v62 }
 0x43d   : > { %v2902_v28 = vpop.f32.mrf.mxu2 }
 0x43e   : > { %v2903_v40 = vadd.f32 %v2902_v28, %v9986_v34  ;;  %v8988_v34 = vld [vmem:[%s9862_s16 + $0x1f0] sm:$0xff] }
 0x440   : > { %v1266_v13 = vpop.f32.mrf.mxu0  ;;  %v9114_v0 = vpop.eup %9113  ;;  %v3181_v22 = vmul.f32 1.442695, %v2903_v40  ;;  %v3354_v20 = vmax.f32 %v2903_v40, 0.0  ;;  %8532 = vmatmul.msk.bf16.gmra.mxu3 %vm1947_vm1, %v8988_v34 }
 0x441   : > { %7454 = vrot.lane.b32.xlu1 %v9114_v0, %s9793_s26  ;;  %v1409_v51 = vmax.f32 %v1266_v13, 0.0  ;;  %v8931_v0 = vld [vmem:[%s9862_s16 + $0x28] sm:$0xff] }
 0x442   : > { %9115 = vpow2.f32 %v3181_v22  ;;  %8600 = vmatmul.msk.bf16.gmra.mxu2 %vm2493_vm2, %v10457_v12  ;;  %v10614_v45 = vpack.c.bf16 %v3354_v20, %v3353_v49  ;;  %v10622_v12 = vpop.f32.mrf.mxu3 }
 0x443   : > { %8474 = vmatmul.msk.bf16.gmra.mxu0 %vm1947_vm1, %v8930_v7 }
 0x445   : > { %v2905_v59 = vpop.f32.mrf.mxu2 }
 0x446   : > { %v2906_v36 = vadd.f32 %v2905_v59, %v9992_v41  ;;  %v8989_v59 = vld [vmem:[%s9862_s16 + $0x1f8] sm:$0xff] }
 0x448   : > { %v1268_v54 = vpop.f32.mrf.mxu0  ;;  %v9116_v62 = vpop.eup %9115  ;;  %v3183_v44 = vmul.f32 1.442695, %v2906_v36  ;;  %v3355_v22 = vmax.f32 %v2906_v36, 0.0 }
 0x449   : > { %v1410_v46 = vmax.f32 %v1268_v54, 0.0  ;;  %7456 = vrot.lane.b32.xlu2 %v9116_v62, %s9793_s26 }
 0x44a   : > { %9117 = vpow2.f32 %v3183_v44  ;;  %v10636_v36 = vpop.f32.mrf.mxu3 }
 0x44b   : > { %v10620_v28 = vpack.c.bf16 %v1410_v46, %v1409_v51 }
 0x44d   : > { %v2907_v40 = vpop.f32.mrf.mxu2 }
 0x44e   : > { %v2908_v7 = vadd.f32 %v2907_v40, %v9996_v48  ;;  %v8991_v48 = vld [vmem:[%s11835_s5] sm:$0xff] }
 0x44f   : > { %3534 = vmatpush.bf16.msra.mxu3 %v8991_v48 }
 0x450   : > { %v1271_v41 = vpop.f32.mrf.mxu0  ;;  %v9118_v49 = vpop.eup %9117  ;;  %v3185_v20 = vmul.f32 1.442695, %v2908_v7  ;;  %v3356_v34 = vmax.f32 %v2908_v7, 0.0  ;;  %8533 = vmatmul.msk.bf16.gmra.mxu3 %vm1947_vm1, %v8989_v59 }
 0x451   : > { %7458 = vrot.lane.b32.xlu0 %v9118_v49, %s9793_s26  ;;  %v1411_v46 = vmax.f32 %v1271_v41, 0.0 }
 0x452   : > { %9119 = vpow2.f32 %v3185_v20  ;;  %8601 = vmatmul.msk.bf16.gmra.mxu2 %vm2493_vm2, %v10473_v47  ;;  %v10630_v13 = vpack.c.bf16 %v3356_v34, %v3355_v22  ;;  %v8932_v22 = vld [vmem:[%s9862_s16 + $0x30] sm:$0xff]  ;;  %v10645_v34 = vpop.f32.mrf.mxu3 }
 0x453   : > { %8475 = vmatmul.msk.bf16.gmra.mxu0 %vm1947_vm1, %v8931_v0 }
 0x455   : > { %v2910_v54 = vpop.f32.mrf.mxu2 }
 0x456   : > { %v2911_v62 = vadd.f32 %v2910_v54, %v10002_v52 }
 0x458   : > { %v1273_v51 = vpop.f32.mrf.mxu0  ;;  %v9120_v44 = vpop.eup %9119  ;;  %v3187_v47 = vmul.f32 1.442695, %v2911_v62  ;;  %v3357_v48 = vmax.f32 %v2911_v62, 0.0 }
 0x459   : > { %v1412_v40 = vmax.f32 %v1273_v51, 0.0  ;;  %7460 = vrot.lane.b32.xlu1 %v9120_v44, %s9793_s26 }
 0x45a   : > { %9121 = vpow2.f32 %v3187_v47 }
 0x45b   : > { %v10641_v7 = vpack.c.bf16 %v1412_v40, %v1411_v46 }
 0x45d   : > { %v2912_v0 = vpop.f32.mrf.mxu2 }
 0x45e   : > { %v2913_v49 = vadd.f32 %v2912_v0, %v10006_v60  ;;  %v10655_v0 = vpop.f32.mrf.mxu3 }
 0x460   : > { %v1276_v20 = vpop.f32.mrf.mxu0  ;;  %v9122_v52 = vpop.eup %9121  ;;  %v3189_v59 = vmul.f32 1.442695, %v2913_v49  ;;  %v3358_v54 = vmax.f32 %v2913_v49, 0.0 }
 0x461   : > { %7462 = vrot.lane.b32.xlu2 %v9122_v52, %s9793_s26  ;;  %v1413_v47 = vmax.f32 %v1276_v20, 0.0  ;;  %v8933_v52 = vld [vmem:[%s9862_s16 + $0x38] sm:$0xff] }
 0x462   : > { %9123 = vpow2.f32 %v3189_v59  ;;  %8602 = vmatmul.msk.bf16.gmra.mxu2 %vm2493_vm2, %v10490_v26  ;;  %v10651_v41 = vpack.c.bf16 %v3358_v54, %v3357_v48 }
 0x463   : > { %8476 = vmatmul.msk.bf16.gmra.mxu0 %vm1947_vm1, %v8932_v22 }
 0x465   : > { %v2915_v60 = vpop.f32.mrf.mxu2 }
 0x466   : > { %v2916_v51 = vadd.f32 %v2915_v60, %v10012_v1 }
 0x468   : > { %v1278_v44 = vpop.f32.mrf.mxu0  ;;  %v9124_v46 = vpop.eup %9123  ;;  %v3191_v62 = vmul.f32 1.442695, %v2916_v51  ;;  %v3359_v54 = vmax.f32 %v2916_v51, 0.0 }
 0x469   : > { %v1414_v40 = vmax.f32 %v1278_v44, 0.0  ;;  %7464 = vrot.lane.b32.xlu0 %v9124_v46, %s9793_s26  ;;  %v10667_v44 = vpop.f32.mrf.mxu3 }
 0x46a   : > { %9125 = vpow2.f32 %v3191_v62 }
 0x46b   : > { %v10657_v49 = vpack.c.bf16 %v1414_v40, %v1413_v47 }
 0x46d   : > { %v2917_v22 = vpop.f32.mrf.mxu2 }
 0x46e   : > { %v2918_v26 = vadd.f32 %v2917_v22, %v10016_v6 }
 0x470   : > { %v1281_v48 = vpop.f32.mrf.mxu0  ;;  %v9126_v59 = vpop.eup %9125  ;;  %v3193_v1 = vmul.f32 1.442695, %v2918_v26  ;;  %v3360_v60 = vmax.f32 %v2918_v26, 0.0 }
 0x471   : > { %7466 = vrot.lane.b32.xlu1 %v9126_v59, %s9793_s26  ;;  %v1415_v62 = vmax.f32 %v1281_v48, 0.0  ;;  %v10676_v59 = vpop.f32.mrf.mxu3 }
 0x472   : > { %9127 = vpow2.f32 %v3193_v1  ;;  %8603 = vmatmul.msk.bf16.gmra.mxu2 %vm2493_vm2, %v10504_v9  ;;  %v10665_v20 = vpack.c.bf16 %v3360_v60, %v3359_v54  ;;  %v9000_v9 = vld [vmem:[%s11836_s6 + $0x8] sm:$0xff]  ;;  %v8934_v54 = vld [vmem:[%s9862_s16 + $0x40] sm:$0xff] }
 0x473   : > { %8477 = vmatmul.msk.bf16.gmra.mxu0 %vm1947_vm1, %v8933_v52  ;;  %4278 = vmatpush.bf16.msrb.mxu1 %v9000_v9 }
 0x474   : > { %11883 = vst [vmem:[#allocation47_spill] sm:$0xff] %v10665_v20 }
 0x475   : > { %v2920_v6 = vpop.f32.mrf.mxu2 }
 0x476   : > { %v2921_v46 = vadd.f32 %v2920_v6, %v10022_v11 }
 0x478   : > { %v1283_v47 = vpop.f32.mrf.mxu0  ;;  %v9128_v51 = vpop.eup %9127  ;;  %v3195_v40 = vmul.f32 1.442695, %v2921_v46  ;;  %v3361_v60 = vmax.f32 %v2921_v46, 0.0 }
 0x479   : > { %v1416_v22 = vmax.f32 %v1283_v47, 0.0  ;;  %7468 = vrot.lane.b32.xlu2 %v9128_v51, %s9793_s26  ;;  %v10688_v9 = vpop.f32.mrf.mxu3 }
 0x47a   : > { %9129 = vpow2.f32 %v3195_v40 }
 0x47b   : > { %v10671_v26 = vpack.c.bf16 %v1416_v22, %v1415_v62 }
 0x47d   : > { %v2922_v52 = vpop.f32.mrf.mxu2 }
 0x47e   : > { %v2923_v11 = vadd.f32 %v2922_v52, %v10026_v16 }
 0x480   : > { %v2149_v1 = vpop.f32.mrf.mxu0  ;;  %v9130_v48 = vpop.eup %9129  ;;  %v3197_v6 = vmul.f32 1.442695, %v2923_v11  ;;  %v3362_v47 = vmax.f32 %v2923_v11, 0.0 }
 0x481   : > { %v2696_v51 = vadd.f32 %v10082_v53, %v2149_v1  ;;  %7470 = vrot.lane.b32.xlu0 %v9130_v48, %s9793_s26 }
 0x482   : > { %9131 = vpow2.f32 %v3197_v6  ;;  %8604 = vmatmul.msk.bf16.gmra.mxu2 %vm2493_vm2, %v10524_v57  ;;  %v10685_v40 = vpack.c.bf16 %v3362_v47, %v3361_v60  ;;  %v8935_v47 = vld [vmem:[%s9862_s16 + $0x48] sm:$0xff] }
 0x483   : > { %v3015_v62 = vmul.f32 1.442695, %v2696_v51  ;;  %8478 = vmatmul.msk.bf16.gmra.mxu0 %vm1947_vm1, %v8934_v54  ;;  %v3271_v1 = vmax.f32 %v2696_v51, 0.0  ;;  %v10697_v51 = vpop.f32.mrf.mxu3 }
 0x484   : > { %11884 = vst [vmem:[#allocation48_spill] sm:$0xff] %v10685_v40 }
 0x485   : > { %9133 = vpow2.f32 %v3015_v62  ;;  %v2925_v16 = vpop.f32.mrf.mxu2 }
 0x486   : > { %v2926_v22 = vadd.f32 %v2925_v16, %v10032_v21 }
 0x488   : > { %v2151_v46 = vpop.f32.mrf.mxu0  ;;  %v9132_v53 = vpop.eup %9131  ;;  %v3199_v52 = vmul.f32 1.442695, %v2926_v22  ;;  %v3363_v40 = vmax.f32 %v2926_v22, 0.0 }
 0x489   : > { %v2698_v11 = vadd.f32 %v10086_v50, %v2151_v46  ;;  %7472 = vrot.lane.b32.xlu1 %v9132_v53, %s9793_s26 }
 0x48a   : > { %9135 = vpow2.f32 %v3199_v52 }
 0x48b   : > { %v9134_v54 = vpop.eup %9133  ;;  %v3017_v57 = vmul.f32 1.442695, %v2698_v11  ;;  %v3272_v48 = vmax.f32 %v2698_v11, 0.0 }
 0x48c   : > { %7290 = vrot.lane.b32.xlu0 %v9134_v54, %s9793_s26 }
 0x48d   : > { %9137 = vpow2.f32 %v3017_v57  ;;  %v3399_v60 = vpack.c.bf16 %v3272_v48, %v3271_v1  ;;  %v2927_v21 = vpop.f32.mrf.mxu2 }
 0x48e   : > { %v2928_v6 = vadd.f32 %v2927_v21, %v10036_v29 }
 0x48f   : > { %3535 = vmatmul.bf16.vlgmr.msra.gmra.mxu3 %v3399_v60 }
 0x490   : > { %v2154_v62 = vpop.f32.mrf.mxu0  ;;  %v9136_v16 = vpop.eup %9135  ;;  %v3201_v50 = vmul.f32 1.442695, %v2928_v6  ;;  %v3364_v46 = vmax.f32 %v2928_v6, 0.0 }
 0x491   : > { %v2701_v53 = vadd.f32 %v10092_v56, %v2154_v62  ;;  %7474 = vrot.lane.b32.xlu2 %v9136_v16, %s9793_s26  ;;  %v8936_v62 = vld [vmem:[%s9862_s16 + $0x50] sm:$0xff] }
 0x492   : > { %8605 = vmatmul.msk.bf16.gmra.mxu2 %vm2493_vm2, %v10538_v42  ;;  %v10702_v29 = vpack.c.bf16 %v3364_v46, %v3363_v40  ;;  %9139 = vpow2.f32 %v3201_v50  ;;  %v10709_v42 = vpop.f32.mrf.mxu3 }
 0x493   : > { %v9138_v52 = vpop.eup %9137  ;;  %v3019_v11 = vmul.f32 1.442695, %v2701_v53  ;;  %8479 = vmatmul.msk.bf16.gmra.mxu0 %vm1947_vm1, %v8935_v47  ;;  %v3273_v21 = vmax.f32 %v2701_v53, 0.0 }
 0x494   : > { %11885 = vst [vmem:[#allocation49_spill] sm:$0xff] %v10702_v29  ;;  %7292 = vrot.lane.b32.xlu0 %v9138_v52, %s9793_s26 }
 0x495   : > { %9141 = vpow2.f32 %v3019_v11  ;;  %v2930_v22 = vpop.f32.mrf.mxu2 }
 0x496   : > { %v2931_v56 = vadd.f32 %v2930_v22, %v10042_v37 }
 0x498   : > { %v2156_v54 = vpop.f32.mrf.mxu0  ;;  %v3203_v1 = vmul.f32 1.442695, %v2931_v56  ;;  %v9140_v48 = vpop.eup %9139  ;;  %v3365_v50 = vmax.f32 %v2931_v56, 0.0 }
 0x499   : > { %v2703_v57 = vadd.f32 %v10096_v4, %v2156_v54 }
 0x49a   : > { %9143 = vpow2.f32 %v3203_v1  ;;  %v10720_v56 = vpop.f32.mrf.mxu3  ;;  %v11887_v1 = vld [vmem:[#allocation2_spill] sm:$0xff] }
 0x49b   : > { %v9142_v60 = vpop.eup %9141  ;;  %v3274_v6 = vmax.f32 %v2703_v57, 0.0  ;;  %v3021_v4 = vmul.f32 1.442695, %v2703_v57 }
 0x49c   : > { %7476 = vrot.lane.b32.xlu0 %v9140_v48, %s9793_s26  ;;  %7294 = vrot.lane.b32.xlu1 %v9142_v60, %s9793_s26 }
 0x49d   : > { %v3400_v40 = vpack.c.bf16 %v3274_v6, %v3273_v21  ;;  %v2932_v47 = vpop.f32.mrf.mxu2  ;;  %v11888_v21 = vld [vmem:[#allocation8_spill] sm:$0xff] }
 0x49e   : > { %v2933_v37 = vadd.f32 %v2932_v47, %v10046_v43 }
 0x49f   : > { %3540 = vmatmul.bf16.gmra.mxu3 %v3400_v40 }
 0x4a0   : > { %v2159_v16 = vpop.f32.mrf.mxu0  ;;  %v3205_v46 = vmul.f32 1.442695, %v2933_v37  ;;  %v3366_v52 = vmax.f32 %v2933_v37, 0.0  ;;  %v9144_v11 = vpop.eup %9143 }
 0x4a1   : > { %v2706_v53 = vadd.f32 %v10102_v14, %v2159_v16 }
 0x4a2   : > { %9145 = vpow2.f32 %v3205_v46  ;;  %8606 = vmatmul.msk.bf16.gmra.mxu2 %vm2493_vm2, %v10559_v55  ;;  %v10717_v22 = vpack.c.bf16 %v3366_v52, %v3365_v50  ;;  %v11889_v50 = vld [vmem:[#allocation3_spill] sm:$0xff]  ;;  %v8937_v46 = vld [vmem:[%s9862_s16 + $0x58] sm:$0xff] }
 0x4a3   : > { %8480 = vmatmul.msk.bf16.gmra.mxu0 %vm1947_vm1, %v8936_v62  ;;  %9147 = vpow2.f32 %v3021_v4  ;;  %v3023_v43 = vmul.f32 1.442695, %v2706_v53  ;;  %v3275_v40 = vmax.f32 %v2706_v53, 0.0  ;;  %v11890_v53 = vld [vmem:[#allocation9_spill] sm:$0xff] }
 0x4a4   : > { %11886 = vst [vmem:[#allocation50_spill] sm:$0xff] %v10717_v22  ;;  %7478 = vrot.lane.b32.xlu1 %v9144_v11, %s9793_s26 }
 0x4a5   : > { %v2935_v54 = vpop.f32.mrf.mxu2  ;;  %9149 = vpow2.f32 %v3023_v43 }
 0x4a6   : > { %v2936_v57 = vadd.f32 %v2935_v54, %v11887_v1  ;;  %v10728_v54 = vpop.f32.mrf.mxu3 }
 0x4a8   : > { %v2161_v48 = vpop.f32.mrf.mxu0  ;;  %v9146_v14 = vpop.eup %9145  ;;  %v3207_v60 = vmul.f32 1.442695, %v2936_v57  ;;  %v3367_v1 = vmax.f32 %v2936_v57, 0.0 }
 0x4a9   : > { %v2708_v6 = vadd.f32 %v11888_v21, %v2161_v48  ;;  %7480 = vrot.lane.b32.xlu2 %v9146_v14, %s9793_s26  ;;  %v9148_v55 = vpop.eup %9147 }
 0x4aa   : > { %9151 = vpow2.f32 %v3207_v60 }
 0x4ab   : > { %v3276_v47 = vmax.f32 %v2708_v6, 0.0  ;;  %v3025_v62 = vmul.f32 1.442695, %v2708_v6  ;;  %v9150_v52 = vpop.eup %9149 }
 0x4ac   : > { %7296 = vrot.lane.b32.xlu1 %v9148_v55, %s9793_s26  ;;  %v11892_v55 = vld [vmem:[#allocation4_spill] sm:$0xff] }
 0x4ad   : > { %v3401_v37 = vpack.c.bf16 %v3276_v47, %v3275_v40  ;;  %v2937_v16 = vpop.f32.mrf.mxu2  ;;  %9153 = vpow2.f32 %v3025_v62 }
 0x4ae   : > { %v2938_v4 = vadd.f32 %v2937_v16, %v11889_v50  ;;  %v11893_v50 = vld [vmem:[#allocation10_spill] sm:$0xff] }
 0x4af   : > { %3545 = vmatmul.bf16.gmra.mxu3 %v3401_v37 }
 0x4b0   : > { %v2164_v11 = vpop.f32.mrf.mxu0  ;;  %v9152_v43 = vpop.eup %9151  ;;  %v3209_v48 = vmul.f32 1.442695, %v2938_v4  ;;  %v3368_v14 = vmax.f32 %v2938_v4, 0.0 }
 0x4b1   : > { %v2711_v60 = vadd.f32 %v11890_v53, %v2164_v11  ;;  %7482 = vrot.lane.b32.xlu0 %v9152_v43, %s9793_s26  ;;  %7298 = vrot.lane.b32.xlu2 %v9150_v52, %s9793_s26  ;;  %v11894_v53 = vld [vmem:[#allocation5_spill] sm:$0xff] }
 0x4b2   : > { %9155 = vpow2.f32 %v3209_v48  ;;  %8607 = vmatmul.msk.bf16.gmra.mxu2 %vm2493_vm2, %v10580_v39  ;;  %v10736_v6 = vpack.c.bf16 %v3368_v14, %v3367_v1  ;;  %v8999_v48 = vld [vmem:[%s11836_s6] sm:$0xff] }
 0x4b3   : > { %v3027_v21 = vmul.f32 1.442695, %v2711_v60  ;;  %8481 = vmatmul.msk.bf16.gmra.mxu0 %vm1947_vm1, %v8937_v46  ;;  %v9154_v47 = vpop.eup %9153  ;;  %v10742_v46 = vpop.f32.mrf.mxu3  ;;  %v3277_v52 = vmax.f32 %v2711_v60, 0.0  ;;  %4279 = vmatpush.bf16.msrb.mxu1 %v8999_v48 }
 0x4b4   : > { %11891 = vst [vmem:[#allocation2_spill] sm:$0xff] %v10736_v6 }
 0x4b5   : > { %9157 = vpow2.f32 %v3027_v21  ;;  %v2940_v57 = vpop.f32.mrf.mxu2 }
 0x4b6   : > { %v2941_v40 = vadd.f32 %v2940_v57, %v11892_v55  ;;  %v8938_v57 = vld [vmem:[%s9862_s16 + $0x60] sm:$0xff] }
 0x4b8   : > { %v2166_v37 = vpop.f32.mrf.mxu0  ;;  %v9156_v62 = vpop.eup %9155  ;;  %v3211_v16 = vmul.f32 1.442695, %v2941_v40  ;;  %v3369_v60 = vmax.f32 %v2941_v40, 0.0 }
 0x4b9   : > { %v2713_v4 = vadd.f32 %v11893_v50, %v2166_v37  ;;  %7484 = vrot.lane.b32.xlu1 %v9156_v62, %s9793_s26  ;;  %7300 = vrot.lane.b32.xlu2 %v9154_v47, %s9793_s26 }
 0x4ba   : > { %9159 = vpow2.f32 %v3211_v16  ;;  %v11895_v16 = vld [vmem:[#allocation11_spill] sm:$0xff] }
 0x4bb   : > { %v9158_v39 = vpop.eup %9157  ;;  %v3029_v11 = vmul.f32 1.442695, %v2713_v4  ;;  %v3278_v43 = vmax.f32 %v2713_v4, 0.0 }
 0x4bc   : > { %7302 = vrot.lane.b32.xlu0 %v9158_v39, %s9793_s26 }
 0x4bd   : > { %9161 = vpow2.f32 %v3029_v11  ;;  %v3402_v1 = vpack.c.bf16 %v3278_v43, %v3277_v52  ;;  %v2942_v14 = vpop.f32.mrf.mxu2  ;;  %v10758_v11 = vpop.f32.mrf.mxu3  ;;  %v11897_v43 = vld [vmem:[#allocation6_spill] sm:$0xff] }
 0x4be   : > { %v2943_v21 = vadd.f32 %v2942_v14, %v11894_v53 }
 0x4bf   : > { %3550 = vmatmul.bf16.gmra.mxu3 %v3402_v1 }
 0x4c0   : > { %v2169_v55 = vpop.f32.mrf.mxu0  ;;  %v9160_v47 = vpop.eup %9159  ;;  %v3213_v37 = vmul.f32 1.442695, %v2943_v21  ;;  %v3370_v62 = vmax.f32 %v2943_v21, 0.0  ;;  %v11898_v21 = vld [vmem:[#allocation12_spill] sm:$0xff] }
 0x4c1   : > { %v2716_v50 = vadd.f32 %v11895_v16, %v2169_v55  ;;  %7486 = vrot.lane.b32.xlu2 %v9160_v47, %s9793_s26 }
 0x4c2   : > { %9163 = vpow2.f32 %v3213_v37  ;;  %8608 = vmatmul.msk.bf16.gmra.mxu2 %vm2493_vm2, %v10601_v58  ;;  %v10755_v52 = vpack.c.bf16 %v3370_v62, %v3369_v60 }
 0x4c3   : > { %v9162_v4 = vpop.eup %9161  ;;  %v3031_v39 = vmul.f32 1.442695, %v2716_v50  ;;  %8482 = vmatmul.msk.bf16.gmra.mxu0 %vm1947_vm1, %v8938_v57  ;;  %v3279_v58 = vmax.f32 %v2716_v50, 0.0  ;;  %v11900_v50 = vld [vmem:[#allocation13_spill] sm:$0xff] }
 0x4c4   : > { %11896 = vst [vmem:[#allocation8_spill] sm:$0xff] %v10755_v52  ;;  %7304 = vrot.lane.b32.xlu1 %v9162_v4, %s9793_s26  ;;  %v11899_v4 = vld [vmem:[#allocation7_spill] sm:$0xff] }
 0x4c5   : > { %9165 = vpow2.f32 %v3031_v39  ;;  %v2945_v40 = vpop.f32.mrf.mxu2  ;;  %v10764_v16 = vpop.f32.mrf.mxu3 }
 0x4c6   : > { %v2946_v1 = vadd.f32 %v2945_v40, %v11897_v43  ;;  %v8939_v40 = vld [vmem:[%s9862_s16 + $0x68] sm:$0xff] }
 0x4c8   : > { %v2171_v48 = vpop.f32.mrf.mxu0  ;;  %v9164_v14 = vpop.eup %9163  ;;  %v3215_v53 = vmul.f32 1.442695, %v2946_v1 }
 0x4c9   : > { %v2718_v55 = vadd.f32 %v11898_v21, %v2171_v48  ;;  %7488 = vrot.lane.b32.xlu0 %v9164_v14, %s9793_s26  ;;  %v3371_v21 = vmax.f32 %v2946_v1, 0.0 }
 0x4ca   : > { %9167 = vpow2.f32 %v3215_v53 }
 0x4cb   : > { %v9166_v57 = vpop.eup %9165  ;;  %v3033_v47 = vmul.f32 1.442695, %v2718_v55  ;;  %v3280_v60 = vmax.f32 %v2718_v55, 0.0 }
 0x4cc   : > { %7306 = vrot.lane.b32.xlu2 %v9166_v57, %s9793_s26 }
 0x4cd   : > { %9169 = vpow2.f32 %v3033_v47  ;;  %v3403_v37 = vpack.c.bf16 %v3280_v60, %v3279_v58  ;;  %v2947_v62 = vpop.f32.mrf.mxu2 }
 0x4ce   : > { %v2948_v39 = vadd.f32 %v2947_v62, %v11899_v4 }
 0x4cf   : > { %3555 = vmatmul.bf16.gmra.mxu3 %v3403_v37  ;;  %v10777_v37 = vpop.f32.mrf.mxu3 }
 0x4d0   : > { %v2174_v43 = vpop.f32.mrf.mxu0  ;;  %v9168_v48 = vpop.eup %9167  ;;  %v3217_v14 = vmul.f32 1.442695, %v2948_v39  ;;  %v3372_v52 = vmax.f32 %v2948_v39, 0.0  ;;  %v11902_v39 = vld [vmem:[#allocation14_spill] sm:$0xff] }
 0x4d1   : > { %v2721_v53 = vadd.f32 %v11900_v50, %v2174_v43  ;;  %7490 = vrot.lane.b32.xlu1 %v9168_v48, %s9793_s26  ;;  %v8940_v50 = vld [vmem:[%s9862_s16 + $0x70] sm:$0xff] }
 0x4d2   : > { %9171 = vpow2.f32 %v3217_v14  ;;  %8609 = vmatmul.msk.bf16.gmra.mxu2 %vm2493_vm2, %v10620_v28  ;;  %v10773_v58 = vpack.c.bf16 %v3372_v52, %v3371_v21 }
 0x4d3   : > { %v9170_v55 = vpop.eup %9169  ;;  %v3035_v57 = vmul.f32 1.442695, %v2721_v53  ;;  %8483 = vmatmul.msk.bf16.gmra.mxu0 %vm1947_vm1, %v8939_v40  ;;  %v3281_v28 = vmax.f32 %v2721_v53, 0.0 }
 0x4d4   : > { %11901 = vst [vmem:[#allocation3_spill] sm:$0xff] %v10773_v58  ;;  %7308 = vrot.lane.b32.xlu0 %v9170_v55, %s9793_s26 }
 0x4d5   : > { %9173 = vpow2.f32 %v3035_v57  ;;  %v2950_v1 = vpop.f32.mrf.mxu2 }
 0x4d6   : > { %v2951_v47 = vadd.f32 %v2950_v1, %v10557_v19 }
 0x4d7   : > { %v10785_v53 = vpop.f32.mrf.mxu3 }
 0x4d8   : > { %v2176_v60 = vpop.f32.mrf.mxu0  ;;  %v9172_v62 = vpop.eup %9171  ;;  %v3219_v4 = vmul.f32 1.442695, %v2951_v47  ;;  %v3373_v1 = vmax.f32 %v2951_v47, 0.0 }
 0x4d9   : > { %v2723_v43 = vadd.f32 %v11902_v39, %v2176_v60  ;;  %7492 = vrot.lane.b32.xlu2 %v9172_v62, %s9793_s26  ;;  %v11903_v62 = vld [vmem:[#allocation15_spill] sm:$0xff] }
 0x4da   : > { %9175 = vpow2.f32 %v3219_v4 }
 0x4db   : > { %v9174_v40 = vpop.eup %9173  ;;  %v3037_v52 = vmul.f32 1.442695, %v2723_v43  ;;  %v3282_v48 = vmax.f32 %v2723_v43, 0.0 }
 0x4dc   : > { %7310 = vrot.lane.b32.xlu1 %v9174_v40, %s9793_s26 }
 0x4dd   : > { %9177 = vpow2.f32 %v3037_v52  ;;  %v3404_v21 = vpack.c.bf16 %v3282_v48, %v3281_v28  ;;  %v2952_v19 = vpop.f32.mrf.mxu2 }
 0x4de   : > { %v2953_v14 = vadd.f32 %v2952_v19, %v10564_v15 }
 0x4df   : > { %3560 = vmatmul.bf16.gmra.mxu3 %v3404_v21  ;;  %v11905_v21 = vld [vmem:[#allocation16_spill] sm:$0xff] }
 0x4e0   : > { %v2179_v55 = vpop.f32.mrf.mxu0  ;;  %v9176_v57 = vpop.eup %9175  ;;  %v3221_v60 = vmul.f32 1.442695, %v2953_v14  ;;  %v3374_v39 = vmax.f32 %v2953_v14, 0.0 }
 0x4e1   : > { %v2726_v58 = vadd.f32 %v11903_v62, %v2179_v55  ;;  %7494 = vrot.lane.b32.xlu0 %v9176_v57, %s9793_s26  ;;  %v10797_v57 = vpop.f32.mrf.mxu3 }
 0x4e2   : > { %9179 = vpow2.f32 %v3221_v60  ;;  %8610 = vmatmul.msk.bf16.gmra.mxu2 %vm2493_vm2, %v10641_v7  ;;  %v10791_v15 = vpack.c.bf16 %v3374_v39, %v3373_v1  ;;  %v8941_v39 = vld [vmem:[%s9862_s16 + $0x78] sm:$0xff] }
 0x4e3   : > { %v9178_v4 = vpop.eup %9177  ;;  %v3039_v43 = vmul.f32 1.442695, %v2726_v58  ;;  %8484 = vmatmul.msk.bf16.gmra.mxu0 %vm1947_vm1, %v8940_v50  ;;  %v3283_v50 = vmax.f32 %v2726_v58, 0.0  ;;  %v11906_v58 = vld [vmem:[#allocation17_spill] sm:$0xff] }
 0x4e4   : > { %11904 = vst [vmem:[#allocation9_spill] sm:$0xff] %v10791_v15  ;;  %7312 = vrot.lane.b32.xlu2 %v9178_v4, %s9793_s26 }
 0x4e5   : > { %9181 = vpow2.f32 %v3039_v43  ;;  %v2955_v47 = vpop.f32.mrf.mxu2 }
 0x4e6   : > { %v2956_v40 = vadd.f32 %v2955_v47, %v10578_v2 }
 0x4e8   : > { %v2181_v28 = vpop.f32.mrf.mxu0  ;;  %v9180_v52 = vpop.eup %9179  ;;  %v3223_v48 = vmul.f32 1.442695, %v2956_v40  ;;  %v3375_v43 = vmax.f32 %v2956_v40, 0.0 }
 0x4e9   : > { %v2728_v19 = vadd.f32 %v11905_v21, %v2181_v28  ;;  %7496 = vrot.lane.b32.xlu1 %v9180_v52, %s9793_s26  ;;  %v10810_v40 = vpop.f32.mrf.mxu3 }
 0x4ea   : > { %9183 = vpow2.f32 %v3223_v48 }
 0x4eb   : > { %v9182_v14 = vpop.eup %9181  ;;  %v3041_v7 = vmul.f32 1.442695, %v2728_v19  ;;  %v3284_v55 = vmax.f32 %v2728_v19, 0.0 }
 0x4ec   : > { %7314 = vrot.lane.b32.xlu0 %v9182_v14, %s9793_s26 }
 0x4ed   : > { %9185 = vpow2.f32 %v3041_v7  ;;  %v3405_v1 = vpack.c.bf16 %v3284_v55, %v3283_v50  ;;  %v2957_v2 = vpop.f32.mrf.mxu2 }
 0x4ee   : > { %v2958_v60 = vadd.f32 %v2957_v2, %v10585_v3 }
 0x4ef   : > { %3565 = vmatmul.bf16.gmra.mxu3 %v3405_v1  ;;  %v11908_v1 = vld [vmem:[#allocation18_spill] sm:$0xff] }
 0x4f0   : > { %v2184_v62 = vpop.f32.mrf.mxu0  ;;  %v9184_v4 = vpop.eup %9183  ;;  %v3225_v47 = vmul.f32 1.442695, %v2958_v60  ;;  %v3376_v28 = vmax.f32 %v2958_v60, 0.0 }
 0x4f1   : > { %v2731_v52 = vadd.f32 %v11906_v58, %v2184_v62  ;;  %7498 = vrot.lane.b32.xlu2 %v9184_v4, %s9793_s26 }
 0x4f2   : > { %9187 = vpow2.f32 %v3225_v47  ;;  %8611 = vmatmul.msk.bf16.gmra.mxu2 %vm2493_vm2, %v10657_v49  ;;  %v10807_v3 = vpack.c.bf16 %v3376_v28, %v3375_v43  ;;  %v8942_v47 = vld [vmem:[%s9862_s16 + $0x80] sm:$0xff]  ;;  %v10818_v28 = vpop.f32.mrf.mxu3  ;;  %s7881_s16 = sshll.u32 %s12081_s30, 3 }
 0x4f3   : > { %v9186_v48 = vpop.eup %9185  ;;  %v3043_v21 = vmul.f32 1.442695, %v2731_v52  ;;  %8485 = vmatmul.msk.bf16.gmra.mxu0 %vm1947_vm1, %v8941_v39  ;;  %v3285_v49 = vmax.f32 %v2731_v52, 0.0  ;;  %v11909_v52 = vld [vmem:[#allocation19_spill] sm:$0xff]  ;;  %s11058_s11 = scalar_lea.vmem %s11837_s7, %s7881_s16 }
 0x4f4   : > { %11907 = vst [vmem:[#allocation4_spill] sm:$0xff] %v10807_v3  ;;  %7316 = vrot.lane.b32.xlu1 %v9186_v48, %s9793_s26 }
 0x4f5   : > { %9189 = vpow2.f32 %v3043_v21  ;;  %v2960_v19 = vpop.f32.mrf.mxu2 }
 0x4f6   : > { %v2961_v14 = vadd.f32 %v2960_v19, %v10599_v25 }
 0x4f8   : > { %v2186_v50 = vpop.f32.mrf.mxu0  ;;  %v9188_v7 = vpop.eup %9187  ;;  %v3227_v55 = vmul.f32 1.442695, %v2961_v14  ;;  %v3377_v21 = vmax.f32 %v2961_v14, 0.0 }
 0x4f9   : > { %v2733_v2 = vadd.f32 %v11908_v1, %v2186_v50  ;;  %7500 = vrot.lane.b32.xlu0 %v9188_v7, %s9793_s26 }
 0x4fa   : > { %9191 = vpow2.f32 %v3227_v55 }
 0x4fb   : > { %v9190_v60 = vpop.eup %9189  ;;  %v3045_v39 = vmul.f32 1.442695, %v2733_v2  ;;  %v3286_v62 = vmax.f32 %v2733_v2, 0.0 }
 0x4fc   : > { %7318 = vrot.lane.b32.xlu2 %v9190_v60, %s9793_s26 }
 0x4fd   : > { %9193 = vpow2.f32 %v3045_v39  ;;  %v3406_v4 = vpack.c.bf16 %v3286_v62, %v3285_v49  ;;  %v2962_v43 = vpop.f32.mrf.mxu2  ;;  %v11911_v62 = vld [vmem:[#allocation20_spill] sm:$0xff] }
 0x4fe   : > { %v2963_v25 = vadd.f32 %v2962_v43, %v10609_v33  ;;  %v10830_v43 = vpop.f32.mrf.mxu3 }
 0x4ff   : > { %3570 = vmatmul.bf16.gmra.mxu3 %v3406_v4 }
 0x500   : > { %v2189_v58 = vpop.f32.mrf.mxu0  ;;  %v9192_v48 = vpop.eup %9191  ;;  %v3229_v19 = vmul.f32 1.442695, %v2963_v25  ;;  %v3378_v50 = vmax.f32 %v2963_v25, 0.0 }
 0x501   : > { %v2736_v7 = vadd.f32 %v11909_v52, %v2189_v58  ;;  %7502 = vrot.lane.b32.xlu1 %v9192_v48, %s9793_s26 }
 0x502   : > { %9195 = vpow2.f32 %v3229_v19  ;;  %8612 = vmatmul.msk.bf16.gmra.mxu2 %vm2493_vm2, %v10671_v26  ;;  %v10825_v33 = vpack.c.bf16 %v3378_v50, %v3377_v21 }
 0x503   : > { %v9194_v55 = vpop.eup %9193  ;;  %v3047_v1 = vmul.f32 1.442695, %v2736_v7  ;;  %8486 = vmatmul.msk.bf16.gmra.mxu0 %vm1947_vm1, %v8942_v47  ;;  %v3287_v47 = vmax.f32 %v2736_v7, 0.0 }
 0x504   : > { %11910 = vst [vmem:[#allocation10_spill] sm:$0xff] %v10825_v33  ;;  %7320 = vrot.lane.b32.xlu0 %v9194_v55, %s9793_s26 }
 0x505   : > { %9197 = vpow2.f32 %v3047_v1  ;;  %v2965_v14 = vpop.f32.mrf.mxu2  ;;  %v11912_v1 = vld [vmem:[#allocation21_spill] sm:$0xff] }
 0x506   : > { %v2966_v2 = vadd.f32 %v2965_v14, %v10622_v12 }
 0x508   : > { %v2191_v60 = vpop.f32.mrf.mxu0  ;;  %v9196_v49 = vpop.eup %9195  ;;  %v3231_v39 = vmul.f32 1.442695, %v2966_v2 }
 0x509   : > { %v2738_v4 = vadd.f32 %v11911_v62, %v2191_v60  ;;  %7504 = vrot.lane.b32.xlu2 %v9196_v49, %s9793_s26  ;;  %v3379_v60 = vmax.f32 %v2966_v2, 0.0 }
 0x50a   : > { %9199 = vpow2.f32 %v3231_v39 }
 0x50b   : > { %v9198_v25 = vpop.eup %9197  ;;  %v3049_v26 = vmul.f32 1.442695, %v2738_v4  ;;  %v3288_v58 = vmax.f32 %v2738_v4, 0.0 }
 0x50c   : > { %7322 = vrot.lane.b32.xlu1 %v9198_v25, %s9793_s26 }
 0x50d   : > { %9201 = vpow2.f32 %v3049_v26  ;;  %v3407_v48 = vpack.c.bf16 %v3288_v58, %v3287_v47  ;;  %v2967_v21 = vpop.f32.mrf.mxu2  ;;  %v11914_v26 = vld [vmem:[#allocation22_spill] sm:$0xff] }
 0x50e   : > { %v2968_v12 = vadd.f32 %v2967_v21, %v10636_v36 }
 0x50f   : > { %3575 = vmatmul.bf16.gmra.mxu3 %v3407_v48 }
 0x510   : > { %v2194_v19 = vpop.f32.mrf.mxu0  ;;  %v9200_v50 = vpop.eup %9199  ;;  %v3233_v52 = vmul.f32 1.442695, %v2968_v12  ;;  %v3380_v55 = vmax.f32 %v2968_v12, 0.0 }
 0x511   : > { %v2741_v14 = vadd.f32 %v11912_v1, %v2194_v19  ;;  %7506 = vrot.lane.b32.xlu0 %v9200_v50, %s9793_s26 }
 0x512   : > { %v3536_v49 = vpop.f32.mrf.mxu3  ;;  %9203 = vpow2.f32 %v3233_v52  ;;  %8613 = vmatmul.msk.bf16.gmra.mxu2 %vm2493_vm2, %v10551_v63  ;;  %v10840_v36 = vpack.c.bf16 %v3380_v55, %v3379_v60  ;;  %v10846_v55 = vpop.permute.xlu1 %7358 }
 0x513   : > { %v9202_v7 = vpop.eup %9201  ;;  %v3051_v39 = vmul.f32 1.442695, %v2741_v14  ;;  %v3289_v48 = vmax.f32 %v2741_v14, 0.0  ;;  %v3856_v21 = vmax.f32 %v3536_v49, 0.0 }
 0x514   : > { %7324 = vrot.lane.b32.xlu2 %v9202_v7, %s9793_s26  ;;  %11913 = vst [vmem:[#allocation5_spill] sm:$0xff] %v10840_v36  ;;  %v10848_v7 = vpop.permute.xlu0 %7362 }
 0x515   : > { %9205 = vpow2.f32 %v3051_v39  ;;  %v2970_v62 = vpop.f32.mrf.mxu2 }
 0x516   : > { %v2971_v4 = vadd.f32 %v2970_v62, %v10645_v34 }
 0x518   : > { %v2196_v25 = vpop.f32.mrf.mxu0  ;;  %v9204_v47 = vpop.eup %9203  ;;  %v3235_v2 = vmul.f32 1.442695, %v2971_v4 }
 0x519   : > { %v2743_v58 = vadd.f32 %v11914_v26, %v2196_v25  ;;  %7508 = vrot.lane.b32.xlu1 %v9204_v47, %s9793_s26  ;;  %v11915_v47 = vld [vmem:[#allocation23_spill] sm:$0xff]  ;;  %v3381_v26 = vmax.f32 %v2971_v4, 0.0 }
 0x51a   : > { %v3538_v12 = vpop.f32.mrf.mxu3  ;;  %9207 = vpow2.f32 %v3235_v2 }
 0x51b   : > { %v9206_v19 = vpop.eup %9205  ;;  %v3053_v63 = vmul.f32 1.442695, %v2743_v58  ;;  %v3290_v50 = vmax.f32 %v2743_v58, 0.0  ;;  %v3857_v52 = vmax.f32 %v3538_v12, 0.0 }
 0x51c   : > { %7326 = vrot.lane.b32.xlu0 %v9206_v19, %s9793_s26 }
 0x51d   : > { %9209 = vpow2.f32 %v3053_v63  ;;  %v3984_v34 = vpack.c.bf16 %v3857_v52, %v3856_v21  ;;  %v3408_v1 = vpack.c.bf16 %v3290_v50, %v3289_v48  ;;  %v2972_v60 = vpop.f32.mrf.mxu2  ;;  %v10859_v63 = vpop.permute.xlu0 %7368 }
 0x51e   : > { %v2973_v14 = vadd.f32 %v2972_v60, %v10655_v0  ;;  %v10857_v0 = vpop.permute.xlu1 %7364 }
 0x51f   : > { %3580 = vmatmul.bf16.gmra.mxu3 %v3408_v1  ;;  %8662 = vmatmul.msk.bf16.vlgmr.msrb.gmra.mxu1 %vm2493_vm2, %v3984_v34  ;;  %v11917_v1 = vld [vmem:[#allocation24_spill] sm:$0xff] }
 0x520   : > { %v2199_v49 = vpop.f32.mrf.mxu0  ;;  %v9208_v39 = vpop.eup %9207  ;;  %v3237_v62 = vmul.f32 1.442695, %v2973_v14  ;;  %v3382_v25 = vmax.f32 %v2973_v14, 0.0 }
 0x521   : > { %v2746_v2 = vadd.f32 %v11915_v47, %v2199_v49  ;;  %7510 = vrot.lane.b32.xlu2 %v9208_v39, %s9793_s26 }
 0x522   : > { %v3541_v58 = vpop.f32.mrf.mxu3  ;;  %9211 = vpow2.f32 %v3237_v62  ;;  %v10855_v12 = vpack.c.bf16 %v3382_v25, %v3381_v26 }
 0x523   : > { %v9210_v21 = vpop.eup %9209  ;;  %v3055_v48 = vmul.f32 1.442695, %v2746_v2  ;;  %v3291_v14 = vmax.f32 %v2746_v2, 0.0  ;;  %v3858_v49 = vmax.f32 %v3541_v58, 0.0 }
 0x524   : > { %7328 = vrot.lane.b32.xlu1 %v9210_v21, %s9793_s26  ;;  %11916 = vst [vmem:[#allocation11_spill] sm:$0xff] %v10855_v12  ;;  %v10865_v21 = vpop.permute.xlu2 %7360 }
 0x525   : > { %9213 = vpow2.f32 %v3055_v48  ;;  %v2975_v19 = vpop.f32.mrf.mxu2  ;;  %v10869_v2 = vpop.permute.xlu0 %7374 }
 0x526   : > { %v2976_v50 = vadd.f32 %v2975_v19, %v10667_v44  ;;  %v10867_v44 = vpop.permute.xlu1 %7370 }
 0x528   : > { %v2201_v52 = vpop.f32.mrf.mxu0  ;;  %v9212_v4 = vpop.eup %9211  ;;  %v3239_v34 = vmul.f32 1.442695, %v2976_v50  ;;  %v3383_v12 = vmax.f32 %v2976_v50, 0.0 }
 0x529   : > { %v2748_v60 = vadd.f32 %v11917_v1, %v2201_v52  ;;  %7512 = vrot.lane.b32.xlu0 %v9212_v4, %s9793_s26 }
 0x52a   : > { %v3543_v39 = vpop.f32.mrf.mxu3  ;;  %9215 = vpow2.f32 %v3239_v34 }
 0x52b   : > { %v9214_v62 = vpop.eup %9213  ;;  %v3057_v25 = vmul.f32 1.442695, %v2748_v60  ;;  %v3292_v47 = vmax.f32 %v2748_v60, 0.0  ;;  %v3859_v26 = vmax.f32 %v3543_v39, 0.0  ;;  %v11918_v39 = vld [vmem:[#allocation25_spill] sm:$0xff] }
 0x52c   : > { %7330 = vrot.lane.b32.xlu2 %v9214_v62, %s9793_s26 }
 0x52d   : > { %9217 = vpow2.f32 %v3057_v25  ;;  %v3985_v48 = vpack.c.bf16 %v3859_v26, %v3858_v49  ;;  %v3409_v19 = vpack.c.bf16 %v3292_v47, %v3291_v14  ;;  %v2977_v52 = vpop.f32.mrf.mxu2 }
 0x52e   : > { %v2978_v58 = vadd.f32 %v2977_v52, %v10676_v59  ;;  %v10878_v59 = vpop.permute.xlu2 %7366  ;;  %v10880_v47 = vpop.permute.xlu1 %7376 }
 0x52f   : > { %3585 = vmatmul.bf16.gmra.mxu3 %v3409_v19  ;;  %8663 = vmatmul.msk.bf16.gmra.mxu1 %vm2493_vm2, %v3985_v48  ;;  %v10882_v48 = vpop.permute.xlu0 %7380 }
 0x530   : > { %v2204_v4 = vpop.f32.mrf.mxu0  ;;  %v9216_v34 = vpop.eup %9215  ;;  %v3241_v1 = vmul.f32 1.442695, %v2978_v58  ;;  %v3384_v60 = vmax.f32 %v2978_v58, 0.0 }
 0x531   : > { %v2751_v62 = vadd.f32 %v11918_v39, %v2204_v4  ;;  %7514 = vrot.lane.b32.xlu1 %v9216_v34, %s9793_s26  ;;  %v11920_v4 = vld [vmem:[#allocation26_spill] sm:$0xff] }
 0x532   : > { %v3546_v36 = vpop.f32.mrf.mxu3  ;;  %9219 = vpow2.f32 %v3241_v1  ;;  %v10876_v25 = vpack.c.bf16 %v3384_v60, %v3383_v12 }
 0x533   : > { %v9218_v49 = vpop.eup %9217  ;;  %v3059_v14 = vmul.f32 1.442695, %v2751_v62  ;;  %v3293_v1 = vmax.f32 %v2751_v62, 0.0  ;;  %v3860_v39 = vmax.f32 %v3546_v36, 0.0 }
 0x534   : > { %7332 = vrot.lane.b32.xlu0 %v9218_v49, %s9793_s26  ;;  %11919 = vst [vmem:[#allocation6_spill] sm:$0xff] %v10876_v25 }
 0x535   : > { %9221 = vpow2.f32 %v3059_v14  ;;  %v2980_v26 = vpop.f32.mrf.mxu2 }
 0x536   : > { %v2981_v50 = vadd.f32 %v2980_v26, %v10688_v9  ;;  %v10888_v33 = vpop.permute.xlu2 %7372  ;;  %v10890_v9 = vpop.permute.xlu1 %7382 }
 0x537   : > { %v10892_v62 = vpop.permute.xlu0 %7386 }
 0x538   : > { %v2206_v19 = vpop.f32.mrf.mxu0  ;;  %v9220_v52 = vpop.eup %9219  ;;  %v3243_v58 = vmul.f32 1.442695, %v2981_v50  ;;  %v3385_v15 = vmax.f32 %v2981_v50, 0.0 }
 0x539   : > { %v2753_v34 = vadd.f32 %v11920_v4, %v2206_v19  ;;  %7516 = vrot.lane.b32.xlu2 %v9220_v52, %s9793_s26 }
 0x53a   : > { %v3548_v49 = vpop.f32.mrf.mxu3  ;;  %9223 = vpow2.f32 %v3243_v58 }
 0x53b   : > { %v9222_v12 = vpop.eup %9221  ;;  %v3061_v60 = vmul.f32 1.442695, %v2753_v34  ;;  %v3294_v25 = vmax.f32 %v2753_v34, 0.0  ;;  %v3861_v14 = vmax.f32 %v3548_v49, 0.0  ;;  %v11921_v49 = vld [vmem:[#allocation27_spill] sm:$0xff] }
 0x53c   : > { %7334 = vrot.lane.b32.xlu1 %v9222_v12, %s9793_s26 }
 0x53d   : > { %9225 = vpow2.f32 %v3061_v60  ;;  %v3986_v26 = vpack.c.bf16 %v3861_v14, %v3860_v39  ;;  %v3410_v3 = vpack.c.bf16 %v3294_v25, %v3293_v1  ;;  %v2982_v19 = vpop.f32.mrf.mxu2 }
 0x53e   : > { %v2983_v36 = vadd.f32 %v2982_v19, %v10697_v51  ;;  %v10901_v51 = vpop.permute.xlu2 %7378 }
 0x53f   : > { %3590 = vmatmul.bf16.gmra.mxu3 %v3410_v3  ;;  %8664 = vmatmul.msk.bf16.gmra.mxu1 %vm2493_vm2, %v3986_v26  ;;  %v10903_v3 = vpop.permute.xlu1 %7388  ;;  %v10905_v14 = vpop.permute.xlu0 %7392 }
 0x540   : > { %v2209_v52 = vpop.f32.mrf.mxu0  ;;  %v9224_v58 = vpop.eup %9223  ;;  %v3245_v4 = vmul.f32 1.442695, %v2983_v36  ;;  %v3386_v34 = vmax.f32 %v2983_v36, 0.0  ;;  %11923 = vst [vmem:[#allocation7_spill] sm:$0xff] %v10905_v14 }
 0x541   : > { %v2756_v12 = vadd.f32 %v11921_v49, %v2209_v52  ;;  %7518 = vrot.lane.b32.xlu0 %v9224_v58, %s9793_s26  ;;  %v11924_v52 = vld [vmem:[#allocation28_spill] sm:$0xff] }
 0x542   : > { %v3551_v6 = vpop.f32.mrf.mxu3  ;;  %9227 = vpow2.f32 %v3245_v4  ;;  %v10899_v1 = vpack.c.bf16 %v3386_v34, %v3385_v15 }
 0x543   : > { %v9226_v39 = vpop.eup %9225  ;;  %v3063_v25 = vmul.f32 1.442695, %v2756_v12  ;;  %v3295_v4 = vmax.f32 %v2756_v12, 0.0  ;;  %v3862_v49 = vmax.f32 %v3551_v6, 0.0 }
 0x544   : > { %7336 = vrot.lane.b32.xlu2 %v9226_v39, %s9793_s26  ;;  %11922 = vst [vmem:[#allocation12_spill] sm:$0xff] %v10899_v1 }
 0x545   : > { %9229 = vpow2.f32 %v3063_v25  ;;  %v2985_v60 = vpop.f32.mrf.mxu2 }
 0x546   : > { %v2986_v50 = vadd.f32 %v2985_v60, %v10709_v42  ;;  %v10911_v22 = vpop.permute.xlu2 %7384 }
 0x547   : > { %v10913_v42 = vpop.permute.xlu1 %7394  ;;  %v10915_v12 = vpop.permute.xlu0 %7398 }
 0x548   : > { %v2211_v26 = vpop.f32.mrf.mxu0  ;;  %v9228_v19 = vpop.eup %9227  ;;  %v3247_v36 = vmul.f32 1.442695, %v2986_v50  ;;  %11925 = vst [vmem:[#allocation13_spill] sm:$0xff] %v10915_v12  ;;  %v3387_v14 = vmax.f32 %v2986_v50, 0.0 }
 0x549   : > { %v2758_v58 = vadd.f32 %v11924_v52, %v2211_v26  ;;  %7520 = vrot.lane.b32.xlu1 %v9228_v19, %s9793_s26 }
 0x54a   : > { %v3553_v39 = vpop.f32.mrf.mxu3  ;;  %9231 = vpow2.f32 %v3247_v36 }
 0x54b   : > { %v9230_v15 = vpop.eup %9229  ;;  %v3065_v34 = vmul.f32 1.442695, %v2758_v58  ;;  %v3296_v1 = vmax.f32 %v2758_v58, 0.0  ;;  %v3863_v25 = vmax.f32 %v3553_v39, 0.0  ;;  %v11926_v39 = vld [vmem:[#allocation29_spill] sm:$0xff] }
 0x54c   : > { %7338 = vrot.lane.b32.xlu0 %v9230_v15, %s9793_s26 }
 0x54d   : > { %9233 = vpow2.f32 %v3065_v34  ;;  %v3987_v60 = vpack.c.bf16 %v3863_v25, %v3862_v49  ;;  %v3411_v29 = vpack.c.bf16 %v3296_v1, %v3295_v4  ;;  %v2987_v26 = vpop.f32.mrf.mxu2 }
 0x54e   : > { %v2988_v6 = vadd.f32 %v2987_v26, %v10720_v56 }
 0x54f   : > { %3595 = vmatmul.bf16.gmra.mxu3 %v3411_v29  ;;  %8665 = vmatmul.msk.bf16.gmra.mxu1 %vm2493_vm2, %v3987_v60  ;;  %v10924_v29 = vpop.permute.xlu2 %7390  ;;  %v10926_v56 = vpop.permute.xlu1 %7400 }
 0x550   : > { %v2214_v19 = vpop.f32.mrf.mxu0  ;;  %v9232_v36 = vpop.eup %9231  ;;  %v3249_v52 = vmul.f32 1.442695, %v2988_v6  ;;  %v3388_v58 = vmax.f32 %v2988_v6, 0.0  ;;  %11928 = vst [vmem:[#allocation15_spill] sm:$0xff] %v10926_v56 }
 0x551   : > { %v2761_v15 = vadd.f32 %v11926_v39, %v2214_v19  ;;  %7522 = vrot.lane.b32.xlu2 %v9232_v36, %s9793_s26  ;;  %v10928_v25 = vpop.permute.xlu0 %7404  ;;  %v11930_v19 = vld [vmem:[#allocation30_spill] sm:$0xff] }
 0x552   : > { %v3556_v20 = vpop.f32.mrf.mxu3  ;;  %9235 = vpow2.f32 %v3249_v52  ;;  %v10922_v4 = vpack.c.bf16 %v3388_v58, %v3387_v14  ;;  %11929 = vst [vmem:[#allocation16_spill] sm:$0xff] %v10928_v25 }
 0x553   : > { %v9234_v49 = vpop.eup %9233  ;;  %v3067_v1 = vmul.f32 1.442695, %v2761_v15  ;;  %v3297_v52 = vmax.f32 %v2761_v15, 0.0  ;;  %v3864_v39 = vmax.f32 %v3556_v20, 0.0 }
 0x554   : > { %7340 = vrot.lane.b32.xlu1 %v9234_v49, %s9793_s26  ;;  %11927 = vst [vmem:[#allocation14_spill] sm:$0xff] %v10922_v4 }
 0x555   : > { %9237 = vpow2.f32 %v3067_v1  ;;  %v2990_v34 = vpop.f32.mrf.mxu2 }
 0x556   : > { %v2991_v50 = vadd.f32 %v2990_v34, %v10728_v54 }
 0x557   : > { %v10934_v25 = vpop.permute.xlu2 %7396  ;;  %v10936_v54 = vpop.permute.xlu1 %7406 }
 0x558   : > { %v2216_v60 = vpop.f32.mrf.mxu0  ;;  %v9236_v26 = vpop.eup %9235  ;;  %v3251_v6 = vmul.f32 1.442695, %v2991_v50  ;;  %11931 = vst [vmem:[#allocation17_spill] sm:$0xff] %v10934_v25  ;;  %v3389_v12 = vmax.f32 %v2991_v50, 0.0 }
 0x559   : > { %v2763_v36 = vadd.f32 %v11930_v19, %v2216_v60  ;;  %7524 = vrot.lane.b32.xlu0 %v9236_v26, %s9793_s26  ;;  %v10938_v15 = vpop.permute.xlu0 %7410 }
 0x55a   : > { %v3558_v49 = vpop.f32.mrf.mxu3  ;;  %9239 = vpow2.f32 %v3251_v6  ;;  %11932 = vst [vmem:[#allocation18_spill] sm:$0xff] %v10938_v15 }
 0x55b   : > { %v9238_v14 = vpop.eup %9237  ;;  %v3069_v58 = vmul.f32 1.442695, %v2763_v36  ;;  %v3298_v4 = vmax.f32 %v2763_v36, 0.0  ;;  %v3865_v1 = vmax.f32 %v3558_v49, 0.0  ;;  %v11933_v49 = vld [vmem:[#allocation31_spill] sm:$0xff] }
 0x55c   : > { %7342 = vrot.lane.b32.xlu2 %v9238_v14, %s9793_s26 }
 0x55d   : > { %9241 = vpow2.f32 %v3069_v58  ;;  %v3988_v34 = vpack.c.bf16 %v3865_v1, %v3864_v39  ;;  %v3412_v56 = vpack.c.bf16 %v3298_v4, %v3297_v52  ;;  %v2992_v60 = vpop.f32.mrf.mxu2 }
 0x55e   : > { %v2993_v20 = vadd.f32 %v2992_v60, %v10742_v46 }
 0x55f   : > { %3600 = vmatmul.bf16.gmra.mxu3 %v3412_v56  ;;  %8666 = vmatmul.msk.bf16.gmra.mxu1 %vm2493_vm2, %v3988_v34  ;;  %v10947_v46 = vpop.permute.xlu2 %7402  ;;  %v10949_v56 = vpop.permute.xlu1 %7412 }
 0x560   : > { %v2219_v26 = vpop.f32.mrf.mxu0  ;;  %v9240_v6 = vpop.eup %9239  ;;  %v3253_v19 = vmul.f32 1.442695, %v2993_v20  ;;  %v3390_v36 = vmax.f32 %v2993_v20, 0.0  ;;  %11935 = vst [vmem:[#allocation20_spill] sm:$0xff] %v10949_v56 }
 0x561   : > { %v2766_v14 = vadd.f32 %v11933_v49, %v2219_v26  ;;  %7526 = vrot.lane.b32.xlu1 %v9240_v6, %s9793_s26  ;;  %v10951_v1 = vpop.permute.xlu0 %7416  ;;  %v11937_v26 = vld [vmem:[#allocation32_spill] sm:$0xff] }
 0x562   : > { %v3561_v25 = vpop.f32.mrf.mxu3  ;;  %9243 = vpow2.f32 %v3253_v19  ;;  %v10945_v52 = vpack.c.bf16 %v3390_v36, %v3389_v12  ;;  %11936 = vst [vmem:[#allocation21_spill] sm:$0xff] %v10951_v1 }
 0x563   : > { %v9242_v39 = vpop.eup %9241  ;;  %v3071_v4 = vmul.f32 1.442695, %v2766_v14  ;;  %v3299_v19 = vmax.f32 %v2766_v14, 0.0  ;;  %v3866_v49 = vmax.f32 %v3561_v25, 0.0 }
 0x564   : > { %7344 = vrot.lane.b32.xlu0 %v9242_v39, %s9793_s26  ;;  %11934 = vst [vmem:[#allocation19_spill] sm:$0xff] %v10945_v52 }
 0x565   : > { %9245 = vpow2.f32 %v3071_v4  ;;  %v2995_v58 = vpop.f32.mrf.mxu2 }
 0x566   : > { %v2996_v50 = vadd.f32 %v2995_v58, %v10758_v11 }
 0x567   : > { %v10957_v1 = vpop.permute.xlu2 %7408  ;;  %v10959_v11 = vpop.permute.xlu1 %7418 }
 0x568   : > { %v2221_v34 = vpop.f32.mrf.mxu0  ;;  %v9244_v60 = vpop.eup %9243  ;;  %v3255_v20 = vmul.f32 1.442695, %v2996_v50  ;;  %11938 = vst [vmem:[#allocation22_spill] sm:$0xff] %v10957_v1  ;;  %v3391_v15 = vmax.f32 %v2996_v50, 0.0 }
 0x569   : > { %v2768_v6 = vadd.f32 %v11937_v26, %v2221_v34  ;;  %7528 = vrot.lane.b32.xlu2 %v9244_v60, %s9793_s26  ;;  %v10961_v14 = vpop.permute.xlu0 %7422 }
 0x56a   : > { %v3563_v39 = vpop.f32.mrf.mxu3  ;;  %9247 = vpow2.f32 %v3255_v20  ;;  %11939 = vst [vmem:[#allocation23_spill] sm:$0xff] %v10961_v14 }
 0x56b   : > { %v9246_v12 = vpop.eup %9245  ;;  %v3073_v36 = vmul.f32 1.442695, %v2768_v6  ;;  %v3300_v52 = vmax.f32 %v2768_v6, 0.0  ;;  %v3867_v4 = vmax.f32 %v3563_v39, 0.0  ;;  %v11940_v39 = vld [vmem:[#allocation33_spill] sm:$0xff] }
 0x56c   : > { %7346 = vrot.lane.b32.xlu1 %v9246_v12, %s9793_s26 }
 0x56d   : > { %9249 = vpow2.f32 %v3073_v36  ;;  %v3989_v58 = vpack.c.bf16 %v3867_v4, %v3866_v49  ;;  %v3413_v56 = vpack.c.bf16 %v3300_v52, %v3299_v19  ;;  %v2997_v34 = vpop.f32.mrf.mxu2 }
 0x56e   : > { %v2998_v25 = vadd.f32 %v2997_v34, %v10764_v16 }
 0x56f   : > { %3605 = vmatmul.bf16.gmra.mxu3 %v3413_v56  ;;  %8667 = vmatmul.msk.bf16.gmra.mxu1 %vm2493_vm2, %v3989_v58  ;;  %v10970_v16 = vpop.permute.xlu2 %7414  ;;  %v10972_v56 = vpop.permute.xlu1 %7424 }
 0x570   : > { %v2224_v60 = vpop.f32.mrf.mxu0  ;;  %v9248_v20 = vpop.eup %9247  ;;  %v3257_v26 = vmul.f32 1.442695, %v2998_v25  ;;  %v3392_v6 = vmax.f32 %v2998_v25, 0.0  ;;  %11942 = vst [vmem:[#allocation25_spill] sm:$0xff] %v10972_v56 }
 0x571   : > { %v2771_v12 = vadd.f32 %v11940_v39, %v2224_v60  ;;  %7530 = vrot.lane.b32.xlu0 %v9248_v20, %s9793_s26  ;;  %v10974_v4 = vpop.permute.xlu0 %7428  ;;  %v11944_v60 = vld [vmem:[#allocation34_spill] sm:$0xff] }
 0x572   : > { %v3566_v1 = vpop.f32.mrf.mxu3  ;;  %9251 = vpow2.f32 %v3257_v26  ;;  %v10968_v19 = vpack.c.bf16 %v3392_v6, %v3391_v15  ;;  %11943 = vst [vmem:[#allocation26_spill] sm:$0xff] %v10974_v4 }
 0x573   : > { %v9250_v49 = vpop.eup %9249  ;;  %v3075_v52 = vmul.f32 1.442695, %v2771_v12  ;;  %v3301_v26 = vmax.f32 %v2771_v12, 0.0  ;;  %v3868_v39 = vmax.f32 %v3566_v1, 0.0 }
 0x574   : > { %7348 = vrot.lane.b32.xlu2 %v9250_v49, %s9793_s26  ;;  %11941 = vst [vmem:[#allocation24_spill] sm:$0xff] %v10968_v19 }
 0x575   : > { %9253 = vpow2.f32 %v3075_v52  ;;  %v3000_v36 = vpop.f32.mrf.mxu2 }
 0x576   : > { %v3001_v50 = vadd.f32 %v3000_v36, %v10777_v37 }
 0x577   : > { %v10980_v4 = vpop.permute.xlu2 %7420  ;;  %v10982_v37 = vpop.permute.xlu1 %7430 }
 0x578   : > { %v2226_v58 = vpop.f32.mrf.mxu0  ;;  %v9252_v34 = vpop.eup %9251  ;;  %v3259_v25 = vmul.f32 1.442695, %v3001_v50  ;;  %11945 = vst [vmem:[#allocation27_spill] sm:$0xff] %v10980_v4  ;;  %v3393_v14 = vmax.f32 %v3001_v50, 0.0 }
 0x579   : > { %v2773_v20 = vadd.f32 %v11944_v60, %v2226_v58  ;;  %7532 = vrot.lane.b32.xlu1 %v9252_v34, %s9793_s26  ;;  %v10984_v12 = vpop.permute.xlu0 %7434 }
 0x57a   : > { %v3568_v49 = vpop.f32.mrf.mxu3  ;;  %9255 = vpow2.f32 %v3259_v25  ;;  %11946 = vst [vmem:[#allocation28_spill] sm:$0xff] %v10984_v12 }
 0x57b   : > { %v9254_v15 = vpop.eup %9253  ;;  %v3077_v6 = vmul.f32 1.442695, %v2773_v20  ;;  %v3302_v19 = vmax.f32 %v2773_v20, 0.0  ;;  %v3869_v52 = vmax.f32 %v3568_v49, 0.0  ;;  %v11947_v49 = vld [vmem:[#allocation35_spill] sm:$0xff] }
 0x57c   : > { %7350 = vrot.lane.b32.xlu0 %v9254_v15, %s9793_s26 }
 0x57d   : > { %9257 = vpow2.f32 %v3077_v6  ;;  %v3990_v36 = vpack.c.bf16 %v3869_v52, %v3868_v39  ;;  %v3414_v56 = vpack.c.bf16 %v3302_v19, %v3301_v26  ;;  %v3002_v58 = vpop.f32.mrf.mxu2 }
 0x57e   : > { %v3003_v1 = vadd.f32 %v3002_v58, %v10785_v53 }
 0x57f   : > { %3610 = vmatmul.bf16.gmra.mxu3 %v3414_v56  ;;  %8668 = vmatmul.msk.bf16.gmra.mxu1 %vm2493_vm2, %v3990_v36  ;;  %v10993_v53 = vpop.permute.xlu2 %7426  ;;  %v10995_v56 = vpop.permute.xlu1 %7436 }
 0x580   : > { %v2229_v34 = vpop.f32.mrf.mxu0  ;;  %v9256_v25 = vpop.eup %9255  ;;  %v3261_v60 = vmul.f32 1.442695, %v3003_v1  ;;  %v3394_v20 = vmax.f32 %v3003_v1, 0.0  ;;  %11949 = vst [vmem:[#allocation30_spill] sm:$0xff] %v10995_v56 }
 0x581   : > { %v2776_v15 = vadd.f32 %v11947_v49, %v2229_v34  ;;  %7534 = vrot.lane.b32.xlu2 %v9256_v25, %s9793_s26  ;;  %v10997_v52 = vpop.permute.xlu0 %7440  ;;  %v11951_v34 = vld [vmem:[#allocation36_spill] sm:$0xff] }
 0x582   : > { %v3571_v4 = vpop.f32.mrf.mxu3  ;;  %9259 = vpow2.f32 %v3261_v60  ;;  %v10991_v26 = vpack.c.bf16 %v3394_v20, %v3393_v14  ;;  %11950 = vst [vmem:[#allocation31_spill] sm:$0xff] %v10997_v52 }
 0x583   : > { %v9258_v39 = vpop.eup %9257  ;;  %v3079_v19 = vmul.f32 1.442695, %v2776_v15  ;;  %v3303_v60 = vmax.f32 %v2776_v15, 0.0  ;;  %v3870_v49 = vmax.f32 %v3571_v4, 0.0 }
 0x584   : > { %7352 = vrot.lane.b32.xlu1 %v9258_v39, %s9793_s26  ;;  %11948 = vst [vmem:[#allocation29_spill] sm:$0xff] %v10991_v26 }
 0x585   : > { %9261 = vpow2.f32 %v3079_v19  ;;  %v3005_v6 = vpop.f32.mrf.mxu2 }
 0x586   : > { %v3006_v50 = vadd.f32 %v3005_v6, %v10797_v57 }
 0x587   : > { %v11003_v52 = vpop.permute.xlu2 %7432  ;;  %v11005_v57 = vpop.permute.xlu1 %7442 }
 0x588   : > { %v2231_v36 = vpop.f32.mrf.mxu0  ;;  %v9260_v58 = vpop.eup %9259  ;;  %v3263_v1 = vmul.f32 1.442695, %v3006_v50  ;;  %11952 = vst [vmem:[#allocation32_spill] sm:$0xff] %v11005_v57 }
 0x589   : > { %v2778_v25 = vadd.f32 %v11951_v34, %v2231_v36  ;;  %7536 = vrot.lane.b32.xlu0 %v9260_v58, %s9793_s26  ;;  %v11007_v15 = vpop.permute.xlu0 %7446 }
 0x58a   : > { %v3573_v39 = vpop.f32.mrf.mxu3  ;;  %9263 = vpow2.f32 %v3263_v1  ;;  %11953 = vst [vmem:[#allocation33_spill] sm:$0xff] %v11007_v15  ;;  %v3395_v1 = vmax.f32 %v3006_v50, 0.0 }
 0x58b   : > { %v9262_v14 = vpop.eup %9261  ;;  %v3081_v20 = vmul.f32 1.442695, %v2778_v25  ;;  %v3304_v26 = vmax.f32 %v2778_v25, 0.0  ;;  %v3871_v19 = vmax.f32 %v3573_v39, 0.0 }
 0x58c   : > { %7354 = vrot.lane.b32.xlu2 %v9262_v14, %s9793_s26 }
 0x58d   : > { %9265 = vpow2.f32 %v3081_v20  ;;  %v3991_v6 = vpack.c.bf16 %v3871_v19, %v3870_v49  ;;  %v3415_v56 = vpack.c.bf16 %v3304_v26, %v3303_v60  ;;  %v3007_v36 = vpop.f32.mrf.mxu2 }
 0x58e   : > { %v3008_v4 = vadd.f32 %v3007_v36, %v10810_v40 }
 0x58f   : > { %3615 = vmatmul.bf16.gmra.mxu3 %v3415_v56  ;;  %8669 = vmatmul.msk.bf16.gmra.mxu1 %vm2493_vm2, %v3991_v6  ;;  %v11015_v26 = vpop.permute.xlu2 %7438  ;;  %v11017_v60 = vpop.permute.xlu1 %7448 }
 0x590   : > { %v9264_v58 = vpop.eup %9263  ;;  %v3265_v34 = vmul.f32 1.442695, %v3008_v4  ;;  %v3396_v25 = vmax.f32 %v3008_v4, 0.0  ;;  %11955 = vst [vmem:[#allocation35_spill] sm:$0xff] %v11015_v26 }
 0x591   : > { %7538 = vrot.lane.b32.xlu1 %v9264_v58, %s9793_s26  ;;  %11956 = vst [vmem:[#allocation36_spill] sm:$0xff] %v11017_v60  ;;  %v11019_v56 = vpop.permute.xlu0 %7452 }
 0x592   : > { %v3576_v39 = vpop.f32.mrf.mxu3  ;;  %9267 = vpow2.f32 %v3265_v34  ;;  %v11012_v20 = vpack.c.bf16 %v3396_v25, %v3395_v1  ;;  %11957 = vst [vmem:[#allocation51_spill] sm:$0xff] %v11019_v56 }
 0x593   : > { %v9266_v14 = vpop.eup %9265  ;;  %v3872_v36 = vmax.f32 %v3576_v39, 0.0 }
 0x594   : > { %11954 = vst [vmem:[#allocation34_spill] sm:$0xff] %v11012_v20  ;;  %7356 = vrot.lane.b32.xlu0 %v9266_v14, %s9793_s26 }
 0x595   : > { %v3010_v40 = vpop.f32.mrf.mxu2 }
 0x596   : > { %v3011_v50 = vadd.f32 %v3010_v40, %v10818_v28  ;;  %v11961_v40 = vld [vmem:[#allocation37_spill] sm:$0xff] }
 0x597   : > { %v11023_v1 = vpop.permute.xlu2 %7444  ;;  %v11025_v34 = vpop.permute.xlu1 %7454 }
 0x598   : > { %v9268_v49 = vpop.eup %9267  ;;  %v3267_v19 = vmul.f32 1.442695, %v3011_v50  ;;  %11958 = vst [vmem:[#allocation52_spill] sm:$0xff] %v11023_v1 }
 0x599   : > { %7540 = vrot.lane.b32.xlu2 %v9268_v49, %s9793_s26  ;;  %11959 = vst [vmem:[#allocation53_spill] sm:$0xff] %v11025_v34  ;;  %v11027_v60 = vpop.permute.xlu0 %7458  ;;  %v3397_v49 = vmax.f32 %v3011_v50, 0.0 }
 0x59a   : > { %v3578_v6 = vpop.f32.mrf.mxu3  ;;  %9269 = vpow2.f32 %v3267_v19  ;;  %11960 = vst [vmem:[#allocation54_spill] sm:$0xff] %v11027_v60 }
 0x59b   : > { %v3873_v4 = vmax.f32 %v3578_v6, 0.0 }
 0x59c   : > { %v4281_v58 = vpop.f32.mrf.mxu1 }
 0x59d   : > { %v3992_v25 = vpack.c.bf16 %v3873_v4, %v3872_v36  ;;  %v8726_v14 = vmul.f32 -1.442695, %v4281_v58  ;;  %v3012_v20 = vpop.f32.mrf.mxu2 }
 0x59e   : > { %v3013_v28 = vadd.f32 %v3012_v20, %v10830_v43 }
 0x59f   : > { %9271 = vpow2.f32 %v8726_v14  ;;  %3620 = vmatmul.bf16.gmra.mxu3 %v11961_v40  ;;  %8670 = vmatmul.msk.bf16.gmra.mxu1 %vm2493_vm2, %v3992_v25  ;;  %v11035_v60 = vpop.permute.xlu2 %7450  ;;  %v11037_v14 = vpop.permute.xlu1 %7460 }
 0x5a0   : > { %v9270_v39 = vpop.eup %9269  ;;  %v3269_v19 = vmul.f32 1.442695, %v3013_v28  ;;  %v3398_v6 = vmax.f32 %v3013_v28, 0.0  ;;  %11963 = vst [vmem:[#allocation55_spill] sm:$0xff] %v11035_v60  ;;  %v11969_v60 = vld [vmem:[#allocation38_spill] sm:$0xff] }
 0x5a1   : > { %7542 = vrot.lane.b32.xlu0 %v9270_v39, %s9793_s26  ;;  %11964 = vst [vmem:[#allocation56_spill] sm:$0xff] %v11037_v14  ;;  %v11039_v40 = vpop.permute.xlu0 %7464 }
 0x5a2   : > { %v3581_v56 = vpop.f32.mrf.mxu3  ;;  %9273 = vpow2.f32 %v3269_v19  ;;  %v11033_v36 = vpack.c.bf16 %v3398_v6, %v3397_v49  ;;  %11965 = vst [vmem:[#allocation57_spill] sm:$0xff] %v11039_v40 }
 0x5a3   : > { %v3874_v28 = vmax.f32 %v3581_v56, 0.0 }
 0x5a4   : > { %11962 = vst [vmem:[#allocation37_spill] sm:$0xff] %v11033_v36  ;;  %v4283_v4 = vpop.f32.mrf.mxu1 }
 0x5a5   : > { %v9272_v58 = vpop.eup %9271  ;;  %v8727_v43 = vmul.f32 -1.442695, %v4283_v4 }
 0x5a6   : > { %v4985_v20 = vadd.f32 1.0, %v9272_v58 }
 0x5a7   : > { %9275 = vpow2.f32 %v8727_v43  ;;  %v11042_v6 = vpop.permute.xlu2 %7456  ;;  %v11044_v36 = vpop.permute.xlu1 %7466 }
 0x5a8   : > { %9277 = vrcp.f32 %v4985_v20  ;;  %v9274_v50 = vpop.eup %9273  ;;  %11966 = vst [vmem:[#allocation58_spill] sm:$0xff] %v11042_v6  ;;  %vm5118_vm4 = vweird.f32 %v4985_v20 }
 0x5a9   : > { %7544 = vrot.lane.b32.xlu1 %v9274_v50, %s9793_s26  ;;  %11967 = vst [vmem:[#allocation59_spill] sm:$0xff] %v11044_v36  ;;  %v11046_v40 = vpop.permute.xlu0 %7470  ;;  %v5124_v50 = vand.u32 2147483648, %v4985_v20  ;;  %v5122_v36 = vand.u32 2147483647, %v4985_v20 }
 0x5aa   : > { %v3583_v25 = vpop.f32.mrf.mxu3  ;;  %11968 = vst [vmem:[#allocation60_spill] sm:$0xff] %v11046_v40 }
 0x5ab   : > { %v3875_v39 = vmax.f32 %v3583_v25, 0.0  ;;  %vm5123_vm8 = vcmp.eq.f32.partialorder %v5122_v36, 8.507059e+37 }
 0x5ac   : > { %v4286_v49 = vpop.f32.mrf.mxu1 }
 0x5ad   : > { %v9276_v19 = vpop.eup %9275  ;;  %v3993_v14 = vpack.c.bf16 %v3875_v39, %v3874_v28  ;;  %v8728_v4 = vmul.f32 -1.442695, %v4286_v49 }
 0x5ae   : > { %v9278_v58 = vpop.eup %9277  ;;  %v4986_v34 = vadd.f32 1.0, %v9276_v19 }
 0x5af   : > { %v5114_v43 = vmul.f32 %v9278_v58, %v4985_v20  ;;  %9279 = vpow2.f32 %v8728_v4  ;;  %3625 = vmatmul.bf16.gmra.mxu3 %v11969_v60  ;;  %8671 = vmatmul.msk.bf16.gmra.mxu1 %vm2493_vm2, %v3993_v14  ;;  %vm5119_vm3 = vweird.f32 %v9278_v58  ;;  %v11051_v49 = vpop.permute.xlu2 %7462  ;;  %v11053_v19 = vpop.permute.xlu1 %7472  ;;  %v5125_v14 = vor.u32 1.1754944e-38, %v5124_v50 }
 0x5b0   : > { %9281 = vrcp.f32 %v4986_v34  ;;  %11970 = vst [vmem:[#allocation38_spill] sm:$0xff] %v11051_v49  ;;  %vm5120_vm5 = vmor %vm5118_vm4, %vm5119_vm3  ;;  %v5139_v15 = vand.u32 2147483648, %v4986_v34  ;;  %vm5133_vm10 = vweird.f32 %v4986_v34 }
 0x5b1   : > { %v5115_v56 = vsub.f32 1.0, %v5114_v43  ;;  %11971 = vst [vmem:[#allocation61_spill] sm:$0xff] %v11053_v19 }
 0x5b2   : > { %v3586_v25 = vpop.f32.mrf.mxu3 }
 0x5b3   : > { %v5116_v6 = vmul.f32 %v9278_v58, %v5115_v56  ;;  %v7291_v56 = vpop.permute.xlu0 %7290  ;;  %v3876_v50 = vmax.f32 %v3586_v25, 0.0 }
 0x5b4   : > { %v4288_v28 = vpop.f32.mrf.mxu1 }
 0x5b5   : > { %v9280_v39 = vpop.eup %9279  ;;  %v5117_v40 = vadd.f32 %v9278_v58, %v5116_v6  ;;  %v8729_v4 = vmul.f32 -1.442695, %v4288_v28  ;;  %v5137_v28 = vand.u32 2147483647, %v4986_v34 }
 0x5b6   : > { %v9282_v60 = vpop.eup %9281  ;;  %v4987_v43 = vadd.f32 1.0, %v9280_v39 }
 0x5b7   : > { %v5121_v49 = vsel %vm5120_vm5, %v9278_v58, %v5117_v40  ;;  %v5129_v19 = vmul.f32 %v9282_v60, %v4986_v34  ;;  %9283 = vpow2.f32 %v8729_v4  ;;  %vm5134_vm9 = vweird.f32 %v9282_v60  ;;  %v11064_v40 = vpop.permute.xlu2 %7468  ;;  %v7295_v36 = vpop.permute.xlu1 %7294 }
 0x5b8   : > { %v5126_v20 = vsel %vm5123_vm8, %v5125_v14, %v5121_v49  ;;  %9285 = vrcp.f32 %v4987_v43  ;;  %11972 = vst [vmem:[#allocation62_spill] sm:$0xff] %v11064_v40  ;;  %vm5135_vm11 = vmor %vm5133_vm10, %vm5134_vm9  ;;  %v5140_v14 = vor.u32 1.1754944e-38, %v5139_v15  ;;  %vm5138_vm12 = vcmp.eq.f32.partialorder %v5137_v28, 8.507059e+37 }
 0x5b9   : > { %7034 = vst.msk [vmem:[%s11058_s11] sm:$0xff] %vm7033_vm6, %v5126_v20  ;;  %v5130_v6 = vsub.f32 1.0, %v5129_v19  ;;  %v5154_v34 = vand.u32 2147483648, %v4987_v43  ;;  %vm5148_vm14 = vweird.f32 %v4987_v43 }
 0x5ba   : > { %7675 = vst.msk [vmem:[%s11058_s11] sm:$0xff] %vm7674_vm7, %v7291_v56  ;;  %v3588_v1 = vpop.f32.mrf.mxu3 }
 0x5bb   : > { %v5131_v57 = vmul.f32 %v9282_v60, %v5130_v6  ;;  %v3877_v26 = vmax.f32 %v3588_v1, 0.0  ;;  %v11973_v1 = vld [vmem:[#allocation39_spill] sm:$0xff] }
 0x5bc   : > { %v4291_v39 = vpop.f32.mrf.mxu1 }
 0x5bd   : > { %v9284_v12 = vpop.eup %9283  ;;  %v5132_v58 = vadd.f32 %v9282_v60, %v5131_v57  ;;  %v3994_v49 = vpack.c.bf16 %v3877_v26, %v3876_v50  ;;  %v8730_v4 = vmul.f32 -1.442695, %v4291_v39  ;;  %v7293_v57 = vpop.permute.xlu0 %7292 }
 0x5be   : > { %v9286_v19 = vpop.eup %9285  ;;  %v4988_v56 = vadd.f32 1.0, %v9284_v12  ;;  %v5152_v12 = vand.u32 2147483647, %v4987_v43 }
 0x5bf   : > { %v5136_v20 = vsel %vm5135_vm11, %v9282_v60, %v5132_v58  ;;  %v5144_v6 = vmul.f32 %v9286_v19, %v4987_v43  ;;  %9287 = vpow2.f32 %v8730_v4  ;;  %3630 = vmatmul.bf16.gmra.mxu3 %v11973_v1  ;;  %8672 = vmatmul.msk.bf16.gmra.mxu1 %vm2493_vm2, %v3994_v49  ;;  %vm5149_vm13 = vweird.f32 %v9286_v19  ;;  %v11072_v39 = vpop.permute.xlu2 %7474 }
 0x5c0   : > { %v5141_v25 = vsel %vm5138_vm12, %v5140_v14, %v5136_v20  ;;  %9289 = vrcp.f32 %v4988_v56  ;;  %11974 = vst [vmem:[#allocation39_spill] sm:$0xff] %v11072_v39  ;;  %vm5150_vm15 = vmor %vm5148_vm14, %vm5149_vm13  ;;  %v5155_v14 = vor.u32 1.1754944e-38, %v5154_v34  ;;  %vm5153_vm0 = vcmp.eq.f32.partialorder %v5152_v12, 8.507059e+37 }
 0x5c1   : > { %7035 = vst.msk [vmem:[%s11058_s11 + $0x8] sm:$0xff] %vm7033_vm6, %v5141_v25  ;;  %v5145_v26 = vsub.f32 1.0, %v5144_v6  ;;  %v11074_v6 = vpop.permute.xlu1 %7478  ;;  %v5169_v43 = vand.u32 2147483648, %v4988_v56  ;;  %vm5163_vm3 = vweird.f32 %v4988_v56 }
 0x5c2   : > { %7676 = vst.msk [vmem:[%s11058_s11 + $0x8] sm:$0xff] %vm7674_vm7, %v7293_v57  ;;  %v3591_v50 = vpop.f32.mrf.mxu3 }
 0x5c3   : > { %v5146_v15 = vmul.f32 %v9286_v19, %v5145_v26  ;;  %11975 = vst [vmem:[#allocation63_spill] sm:$0xff] %v11074_v6  ;;  %v3878_v34 = vmax.f32 %v3591_v50, 0.0  ;;  %v11977_v50 = vld [vmem:[#allocation40_spill] sm:$0xff] }
 0x5c4   : > { %v4293_v60 = vpop.f32.mrf.mxu1 }
 0x5c5   : > { %v9288_v28 = vpop.eup %9287  ;;  %v5147_v58 = vadd.f32 %v9286_v19, %v5146_v15  ;;  %v8731_v49 = vmul.f32 -1.442695, %v4293_v60  ;;  %v5167_v15 = vand.u32 2147483647, %v4988_v56 }
 0x5c6   : > { %v9290_v4 = vpop.eup %9289  ;;  %v4989_v20 = vadd.f32 1.0, %v9288_v28 }
 0x5c7   : > { %v5151_v1 = vsel %vm5150_vm15, %v9286_v19, %v5147_v58  ;;  %v5159_v25 = vmul.f32 %v9290_v4, %v4988_v56  ;;  %9291 = vpow2.f32 %v8731_v49  ;;  %vm5164_vm1 = vweird.f32 %v9290_v4  ;;  %v11080_v19 = vpop.permute.xlu2 %7480 }
 0x5c8   : > { %v5156_v57 = vsel %vm5153_vm0, %v5155_v14, %v5151_v1  ;;  %9293 = vrcp.f32 %v4989_v20  ;;  %11976 = vst [vmem:[#allocation64_spill] sm:$0xff] %v11080_v19  ;;  %vm5165_vm4 = vmor %vm5163_vm3, %vm5164_vm1  ;;  %vm5168_vm5 = vcmp.eq.f32.partialorder %v5167_v15, 8.507059e+37  ;;  %vm5178_vm9 = vweird.f32 %v4989_v20 }
 0x5c9   : > { %7036 = vst.msk [vmem:[%s11058_s11 + $0x10] sm:$0xff] %vm7033_vm6, %v5156_v57  ;;  %v5160_v26 = vsub.f32 1.0, %v5159_v25 }
 0x5ca   : > { %7677 = vst.msk [vmem:[%s11058_s11 + $0x10] sm:$0xff] %vm7674_vm7, %v7295_v36  ;;  %v3593_v60 = vpop.f32.mrf.mxu3  ;;  %v5170_v36 = vor.u32 1.1754944e-38, %v5169_v43 }
 0x5cb   : > { %v5161_v39 = vmul.f32 %v9290_v4, %v5160_v26  ;;  %v3879_v28 = vmax.f32 %v3593_v60, 0.0 }
 0x5cc   : > { %v4296_v40 = vpop.f32.mrf.mxu1 }
 0x5cd   : > { %v9292_v6 = vpop.eup %9291  ;;  %v5162_v12 = vadd.f32 %v9290_v4, %v5161_v39  ;;  %v3995_v58 = vpack.c.bf16 %v3879_v28, %v3878_v34  ;;  %v8732_v49 = vmul.f32 -1.442695, %v4296_v40  ;;  %v7297_v39 = vpop.permute.xlu1 %7296  ;;  %v5184_v40 = vand.u32 2147483648, %v4989_v20 }
 0x5ce   : > { %v9294_v14 = vpop.eup %9293  ;;  %v4990_v1 = vadd.f32 1.0, %v9292_v6 }
 0x5cf   : > { %v5166_v25 = vsel %vm5165_vm4, %v9290_v4, %v5162_v12  ;;  %v5174_v57 = vmul.f32 %v9294_v14, %v4989_v20  ;;  %9295 = vpow2.f32 %v8732_v49  ;;  %3635 = vmatmul.bf16.gmra.mxu3 %v11977_v50  ;;  %8673 = vmatmul.msk.bf16.gmra.mxu1 %vm2493_vm2, %v3995_v58  ;;  %vm5179_vm8 = vweird.f32 %v9294_v14 }
 0x5d0   : > { %v5171_v26 = vsel %vm5168_vm5, %v5170_v36, %v5166_v25  ;;  %9297 = vrcp.f32 %v4990_v1  ;;  %v5182_v4 = vand.u32 2147483647, %v4989_v20  ;;  %vm5180_vm10 = vmor %vm5178_vm9, %vm5179_vm8  ;;  %v5185_v58 = vor.u32 1.1754944e-38, %v5184_v40  ;;  %v7299_v36 = vpop.permute.xlu2 %7298 }
 0x5d1   : > { %7037 = vst.msk [vmem:[%s11058_s11 + $0x18] sm:$0xff] %vm7033_vm6, %v5171_v26  ;;  %v5175_v56 = vsub.f32 1.0, %v5174_v57  ;;  %v11088_v26 = vpop.permute.xlu0 %7476  ;;  %v5197_v20 = vand.u32 2147483647, %v4990_v1  ;;  %vm5193_vm13 = vweird.f32 %v4990_v1 }
 0x5d2   : > { %7678 = vst.msk [vmem:[%s11058_s11 + $0x18] sm:$0xff] %vm7674_vm7, %v7297_v39  ;;  %v3596_v60 = vpop.f32.mrf.mxu3  ;;  %vm5183_vm11 = vcmp.eq.f32.partialorder %v5182_v4, 8.507059e+37 }
 0x5d3   : > { %v5176_v43 = vmul.f32 %v9294_v14, %v5175_v56  ;;  %v5199_v56 = vand.u32 2147483648, %v4990_v1  ;;  %v3880_v40 = vmax.f32 %v3596_v60, 0.0  ;;  %vm5198_vm15 = vcmp.eq.f32.partialorder %v5197_v20, 8.507059e+37 }
 0x5d4   : > { %v4298_v6 = vpop.f32.mrf.mxu1 }
 0x5d5   : > { %v9296_v15 = vpop.eup %9295  ;;  %v5177_v34 = vadd.f32 %v9294_v14, %v5176_v43  ;;  %v8733_v28 = vmul.f32 -1.442695, %v4298_v6 }
 0x5d6   : > { %v9298_v12 = vpop.eup %9297  ;;  %v4991_v49 = vadd.f32 1.0, %v9296_v15 }
 0x5d7   : > { %v5181_v25 = vsel %vm5180_vm10, %v9294_v14, %v5177_v34  ;;  %v5189_v57 = vmul.f32 %v9298_v12, %v4990_v1  ;;  %9299 = vpow2.f32 %v8733_v28  ;;  %vm5194_vm12 = vweird.f32 %v9298_v12 }
 0x5d8   : > { %v5186_v50 = vsel %vm5183_vm11, %v5185_v58, %v5181_v25  ;;  %9301 = vrcp.f32 %v4991_v49  ;;  %vm5195_vm14 = vmor %vm5193_vm13, %vm5194_vm12  ;;  %v5212_v20 = vand.u32 2147483647, %v4991_v49  ;;  %vm5208_vm1 = vweird.f32 %v4991_v49 }
 0x5d9   : > { %7038 = vst.msk [vmem:[%s11058_s11 + $0x20] sm:$0xff] %vm7033_vm6, %v5186_v50  ;;  %v5190_v39 = vsub.f32 1.0, %v5189_v57  ;;  %v5200_v57 = vor.u32 1.1754944e-38, %v5199_v56  ;;  %v11096_v1 = vpop.permute.xlu0 %7482  ;;  %v5214_v56 = vand.u32 2147483648, %v4991_v49 }
 0x5da   : > { %7679 = vst.msk [vmem:[%s11058_s11 + $0x20] sm:$0xff] %vm7674_vm7, %v7299_v36  ;;  %v3598_v43 = vpop.f32.mrf.mxu3  ;;  %vm5213_vm4 = vcmp.eq.f32.partialorder %v5212_v20, 8.507059e+37 }
 0x5db   : > { %v5191_v6 = vmul.f32 %v9298_v12, %v5190_v39  ;;  %v3881_v15 = vmax.f32 %v3598_v43, 0.0  ;;  %v11978_v39 = vld [vmem:[#allocation41_spill] sm:$0xff]  ;;  %v7301_v43 = vpop.permute.xlu2 %7300  ;;  %11979 = vst [vmem:[#allocation40_spill] sm:$0xff] %v11096_v1 }
 0x5dc   : > { %v4301_v14 = vpop.f32.mrf.mxu1 }
 0x5dd   : > { %v9300_v4 = vpop.eup %9299  ;;  %v5192_v34 = vadd.f32 %v9298_v12, %v5191_v6  ;;  %v3996_v28 = vpack.c.bf16 %v3881_v15, %v3880_v40  ;;  %v8734_v58 = vmul.f32 -1.442695, %v4301_v14 }
 0x5de   : > { %v9302_v25 = vpop.eup %9301  ;;  %v4992_v50 = vadd.f32 1.0, %v9300_v4 }
 0x5df   : > { %v5196_v36 = vsel %vm5195_vm14, %v9298_v12, %v5192_v34  ;;  %v5204_v19 = vmul.f32 %v9302_v25, %v4991_v49  ;;  %9303 = vpow2.f32 %v8734_v58  ;;  %3640 = vmatmul.bf16.gmra.mxu3 %v11978_v39  ;;  %8674 = vmatmul.msk.bf16.gmra.mxu1 %vm2493_vm2, %v3996_v28  ;;  %vm5209_vm0 = vweird.f32 %v9302_v25 }
 0x5e0   : > { %v5201_v60 = vsel %vm5198_vm15, %v5200_v57, %v5196_v36  ;;  %9305 = vrcp.f32 %v4992_v50  ;;  %vm5210_vm3 = vmor %vm5208_vm1, %vm5209_vm0  ;;  %v5215_v58 = vor.u32 1.1754944e-38, %v5214_v56  ;;  %v5227_v49 = vand.u32 2147483647, %v4992_v50 }
 0x5e1   : > { %7039 = vst.msk [vmem:[%s11058_s11 + $0x28] sm:$0xff] %vm7033_vm6, %v5201_v60  ;;  %v5205_v6 = vsub.f32 1.0, %v5204_v19  ;;  %v11102_v60 = vpop.permute.xlu1 %7484  ;;  %vm5223_vm8 = vweird.f32 %v4992_v50 }
 0x5e2   : > { %7680 = vst.msk [vmem:[%s11058_s11 + $0x28] sm:$0xff] %vm7674_vm7, %v7301_v43  ;;  %v3601_v40 = vpop.f32.mrf.mxu3  ;;  %v7303_v43 = vpop.permute.xlu0 %7302  ;;  %vm5228_vm10 = vcmp.eq.f32.partialorder %v5227_v49, 8.507059e+37 }
 0x5e3   : > { %v5206_v12 = vmul.f32 %v9302_v25, %v5205_v6  ;;  %11980 = vst [vmem:[#allocation41_spill] sm:$0xff] %v11102_v60  ;;  %v3882_v56 = vmax.f32 %v3601_v40, 0.0 }
 0x5e4   : > { %v4303_v15 = vpop.f32.mrf.mxu1 }
 0x5e5   : > { %v9304_v14 = vpop.eup %9303  ;;  %v5207_v4 = vadd.f32 %v9302_v25, %v5206_v12  ;;  %v8735_v34 = vmul.f32 -1.442695, %v4303_v15  ;;  %v5229_v12 = vand.u32 2147483648, %v4992_v50 }
 0x5e6   : > { %v9306_v28 = vpop.eup %9305  ;;  %v4993_v57 = vadd.f32 1.0, %v9304_v14 }
 0x5e7   : > { %v5211_v36 = vsel %vm5210_vm3, %v9302_v25, %v5207_v4  ;;  %v5219_v19 = vmul.f32 %v9306_v28, %v4992_v50  ;;  %9307 = vpow2.f32 %v8735_v34  ;;  %vm5224_vm5 = vweird.f32 %v9306_v28 }
 0x5e8   : > { %v5216_v39 = vsel %vm5213_vm4, %v5215_v58, %v5211_v36  ;;  %9309 = vrcp.f32 %v4993_v57  ;;  %vm5225_vm9 = vmor %vm5223_vm8, %vm5224_vm5  ;;  %v5242_v49 = vand.u32 2147483647, %v4993_v57  ;;  %vm5238_vm12 = vweird.f32 %v4993_v57 }
 0x5e9   : > { %7040 = vst.msk [vmem:[%s11058_s11 + $0x30] sm:$0xff] %vm7033_vm6, %v5216_v39  ;;  %v5220_v6 = vsub.f32 1.0, %v5219_v19  ;;  %v5230_v19 = vor.u32 1.1754944e-38, %v5229_v12  ;;  %v7305_v50 = vpop.permute.xlu1 %7304  ;;  %v5244_v12 = vand.u32 2147483648, %v4993_v57 }
 0x5ea   : > { %7681 = vst.msk [vmem:[%s11058_s11 + $0x30] sm:$0xff] %vm7674_vm7, %v7303_v43  ;;  %v3603_v15 = vpop.f32.mrf.mxu3  ;;  %vm5243_vm14 = vcmp.eq.f32.partialorder %v5242_v49, 8.507059e+37 }
 0x5eb   : > { %v5221_v1 = vmul.f32 %v9306_v28, %v5220_v6  ;;  %v3883_v25 = vmax.f32 %v3603_v15, 0.0  ;;  %v11981_v6 = vld [vmem:[#allocation42_spill] sm:$0xff] }
 0x5ec   : > { %v4306_v20 = vpop.f32.mrf.mxu1 }
 0x5ed   : > { %v9308_v14 = vpop.eup %9307  ;;  %v5222_v4 = vadd.f32 %v9306_v28, %v5221_v1  ;;  %v3997_v34 = vpack.c.bf16 %v3883_v25, %v3882_v56  ;;  %v8736_v58 = vmul.f32 -1.442695, %v4306_v20  ;;  %v11110_v1 = vpop.permute.xlu2 %7486 }
 0x5ee   : > { %v9310_v36 = vpop.eup %9309  ;;  %v4994_v39 = vadd.f32 1.0, %v9308_v14  ;;  %11982 = vst [vmem:[#allocation42_spill] sm:$0xff] %v11110_v1 }
 0x5ef   : > { %v5226_v43 = vsel %vm5225_vm9, %v9306_v28, %v5222_v4  ;;  %v5234_v60 = vmul.f32 %v9310_v36, %v4993_v57  ;;  %9311 = vpow2.f32 %v8736_v58  ;;  %3645 = vmatmul.bf16.gmra.mxu3 %v11981_v6  ;;  %8675 = vmatmul.msk.bf16.gmra.mxu1 %vm2493_vm2, %v3997_v34  ;;  %vm5239_vm11 = vweird.f32 %v9310_v36 }
 0x5f0   : > { %v5231_v40 = vsel %vm5228_vm10, %v5230_v19, %v5226_v43  ;;  %9313 = vrcp.f32 %v4994_v39  ;;  %vm5240_vm13 = vmor %vm5238_vm12, %vm5239_vm11  ;;  %v5245_v58 = vor.u32 1.1754944e-38, %v5244_v12  ;;  %v5257_v57 = vand.u32 2147483647, %v4994_v39 }
 0x5f1   : > { %7041 = vst.msk [vmem:[%s11058_s11 + $0x38] sm:$0xff] %vm7033_vm6, %v5231_v40  ;;  %v5235_v15 = vsub.f32 1.0, %v5234_v60  ;;  %vm5253_vm0 = vweird.f32 %v4994_v39 }
 0x5f2   : > { %7682 = vst.msk [vmem:[%s11058_s11 + $0x38] sm:$0xff] %vm7674_vm7, %v7305_v50  ;;  %v3606_v56 = vpop.f32.mrf.mxu3  ;;  %v11116_v50 = vpop.permute.xlu0 %7488  ;;  %vm5258_vm3 = vcmp.eq.f32.partialorder %v5257_v57, 8.507059e+37 }
 0x5f3   : > { %v5236_v28 = vmul.f32 %v9310_v36, %v5235_v15  ;;  %11983 = vst [vmem:[#allocation65_spill] sm:$0xff] %v11116_v50  ;;  %v3884_v12 = vmax.f32 %v3606_v56, 0.0 }
 0x5f4   : > { %v4308_v25 = vpop.f32.mrf.mxu1 }
 0x5f5   : > { %v9312_v20 = vpop.eup %9311  ;;  %v5237_v14 = vadd.f32 %v9310_v36, %v5236_v28  ;;  %v8737_v4 = vmul.f32 -1.442695, %v4308_v25  ;;  %v7307_v40 = vpop.permute.xlu2 %7306  ;;  %v5259_v28 = vand.u32 2147483648, %v4994_v39 }
 0x5f6   : > { %v9314_v34 = vpop.eup %9313  ;;  %v4995_v19 = vadd.f32 1.0, %v9312_v20 }
 0x5f7   : > { %v5241_v43 = vsel %vm5240_vm13, %v9310_v36, %v5237_v14  ;;  %v5249_v60 = vmul.f32 %v9314_v34, %v4994_v39  ;;  %9315 = vpow2.f32 %v8737_v4  ;;  %vm5254_vm15 = vweird.f32 %v9314_v34 }
 0x5f8   : > { %v5246_v6 = vsel %vm5243_vm14, %v5245_v58, %v5241_v43  ;;  %9317 = vrcp.f32 %v4995_v19  ;;  %vm5255_vm1 = vmor %vm5253_vm0, %vm5254_vm15  ;;  %v5272_v57 = vand.u32 2147483647, %v4995_v19  ;;  %vm5268_vm5 = vweird.f32 %v4995_v19 }
 0x5f9   : > { %7042 = vst.msk [vmem:[%s11058_s11 + $0x40] sm:$0xff] %vm7033_vm6, %v5246_v6  ;;  %v5250_v15 = vsub.f32 1.0, %v5249_v60  ;;  %v5260_v60 = vor.u32 1.1754944e-38, %v5259_v28  ;;  %v5274_v28 = vand.u32 2147483648, %v4995_v19 }
 0x5fa   : > { %7683 = vst.msk [vmem:[%s11058_s11 + $0x40] sm:$0xff] %vm7674_vm7, %v7307_v40  ;;  %v3608_v25 = vpop.f32.mrf.mxu3  ;;  %v7309_v39 = vpop.permute.xlu0 %7308  ;;  %vm5273_vm9 = vcmp.eq.f32.partialorder %v5272_v57, 8.507059e+37 }
 0x5fb   : > { %v5251_v1 = vmul.f32 %v9314_v34, %v5250_v15  ;;  %v3885_v36 = vmax.f32 %v3608_v25, 0.0  ;;  %v11984_v15 = vld [vmem:[#allocation43_spill] sm:$0xff] }
 0x5fc   : > { %v4311_v49 = vpop.f32.mrf.mxu1 }
 0x5fd   : > { %v9316_v20 = vpop.eup %9315  ;;  %v5252_v14 = vadd.f32 %v9314_v34, %v5251_v1  ;;  %v3998_v4 = vpack.c.bf16 %v3885_v36, %v3884_v12  ;;  %v8738_v58 = vmul.f32 -1.442695, %v4311_v49  ;;  %v11124_v1 = vpop.permute.xlu1 %7490 }
 0x5fe   : > { %v9318_v43 = vpop.eup %9317  ;;  %v4996_v6 = vadd.f32 1.0, %v9316_v20  ;;  %11985 = vst [vmem:[#allocation43_spill] sm:$0xff] %v11124_v1 }
 0x5ff   : > { %v5256_v40 = vsel %vm5255_vm1, %v9314_v34, %v5252_v14  ;;  %v5264_v50 = vmul.f32 %v9318_v43, %v4995_v19  ;;  %9319 = vpow2.f32 %v8738_v58  ;;  %3650 = vmatmul.bf16.gmra.mxu3 %v11984_v15  ;;  %8676 = vmatmul.msk.bf16.gmra.mxu1 %vm2493_vm2, %v3998_v4  ;;  %vm5269_vm4 = vweird.f32 %v9318_v43 }
 0x600   : > { %v5261_v56 = vsel %vm5258_vm3, %v5260_v60, %v5256_v40  ;;  %9321 = vrcp.f32 %v4996_v6  ;;  %vm5270_vm8 = vmor %vm5268_vm5, %vm5269_vm4  ;;  %v5275_v58 = vor.u32 1.1754944e-38, %v5274_v28  ;;  %v5287_v19 = vand.u32 2147483647, %v4996_v6 }
 0x601   : > { %7043 = vst.msk [vmem:[%s11058_s11 + $0x48] sm:$0xff] %vm7033_vm6, %v5261_v56  ;;  %v5265_v25 = vsub.f32 1.0, %v5264_v50  ;;  %v11130_v56 = vpop.permute.xlu2 %7492  ;;  %vm5283_vm11 = vweird.f32 %v4996_v6 }
 0x602   : > { %7684 = vst.msk [vmem:[%s11058_s11 + $0x48] sm:$0xff] %vm7674_vm7, %v7309_v39  ;;  %v3611_v12 = vpop.f32.mrf.mxu3  ;;  %vm5288_vm13 = vcmp.eq.f32.partialorder %v5287_v19, 8.507059e+37 }
 0x603   : > { %v5266_v34 = vmul.f32 %v9318_v43, %v5265_v25  ;;  %11986 = vst [vmem:[#allocation66_spill] sm:$0xff] %v11130_v56  ;;  %v3886_v28 = vmax.f32 %v3611_v12, 0.0 }
 0x604   : > { %v4313_v36 = vpop.f32.mrf.mxu1 }
 0x605   : > { %v9320_v49 = vpop.eup %9319  ;;  %v5267_v20 = vadd.f32 %v9318_v43, %v5266_v34  ;;  %v8739_v14 = vmul.f32 -1.442695, %v4313_v36  ;;  %v7311_v39 = vpop.permute.xlu1 %7310  ;;  %v5289_v34 = vand.u32 2147483648, %v4996_v6 }
 0x606   : > { %v9322_v4 = vpop.eup %9321  ;;  %v4997_v60 = vadd.f32 1.0, %v9320_v49 }
 0x607   : > { %v5271_v40 = vsel %vm5270_vm8, %v9318_v43, %v5267_v20  ;;  %v5279_v50 = vmul.f32 %v9322_v4, %v4996_v6  ;;  %9323 = vpow2.f32 %v8739_v14  ;;  %vm5284_vm10 = vweird.f32 %v9322_v4  ;;  %v11138_v6 = vpop.permute.xlu0 %7494 }
 0x608   : > { %v5276_v15 = vsel %vm5273_vm9, %v5275_v58, %v5271_v40  ;;  %9325 = vrcp.f32 %v4997_v60  ;;  %vm5285_vm12 = vmor %vm5283_vm11, %vm5284_vm10  ;;  %v5302_v19 = vand.u32 2147483647, %v4997_v60  ;;  %vm5298_vm15 = vweird.f32 %v4997_v60 }
 0x609   : > { %7044 = vst.msk [vmem:[%s11058_s11 + $0x50] sm:$0xff] %vm7033_vm6, %v5276_v15  ;;  %v5280_v25 = vsub.f32 1.0, %v5279_v50  ;;  %v5290_v50 = vor.u32 1.1754944e-38, %v5289_v34  ;;  %v5304_v34 = vand.u32 2147483648, %v4997_v60 }
 0x60a   : > { %7685 = vst.msk [vmem:[%s11058_s11 + $0x50] sm:$0xff] %vm7674_vm7, %v7311_v39  ;;  %v3613_v36 = vpop.f32.mrf.mxu3  ;;  %vm5303_vm1 = vcmp.eq.f32.partialorder %v5302_v19, 8.507059e+37 }
 0x60b   : > { %v5281_v1 = vmul.f32 %v9322_v4, %v5280_v25  ;;  %v3887_v43 = vmax.f32 %v3613_v36, 0.0 }
 0x60c   : > { %v4316_v57 = vpop.f32.mrf.mxu1 }
 0x60d   : > { %v9324_v49 = vpop.eup %9323  ;;  %v5282_v20 = vadd.f32 %v9322_v4, %v5281_v1  ;;  %v3999_v14 = vpack.c.bf16 %v3887_v43, %v3886_v28  ;;  %v8740_v58 = vmul.f32 -1.442695, %v4316_v57  ;;  %v7313_v1 = vpop.permute.xlu2 %7312 }
 0x60e   : > { %v9326_v40 = vpop.eup %9325  ;;  %v4998_v15 = vadd.f32 1.0, %v9324_v49 }
 0x60f   : > { %v5286_v39 = vsel %vm5285_vm12, %v9322_v4, %v5282_v20  ;;  %v5294_v56 = vmul.f32 %v9326_v40, %v4997_v60  ;;  %9327 = vpow2.f32 %v8740_v58  ;;  %3655 = vmatmul.bf16.gmra.mxu3 %v10363_v18  ;;  %8677 = vmatmul.msk.bf16.gmra.mxu1 %vm2493_vm2, %v3999_v14  ;;  %vm5299_vm14 = vweird.f32 %v9326_v40 }
 0x610   : > { %v5291_v12 = vsel %vm5288_vm13, %v5290_v50, %v5286_v39  ;;  %9329 = vrcp.f32 %v4998_v15  ;;  %vm5300_vm0 = vmor %vm5298_vm15, %vm5299_vm14  ;;  %v5305_v20 = vor.u32 1.1754944e-38, %v5304_v34  ;;  %v11144_v39 = vpop.permute.xlu1 %7496  ;;  %v5317_v60 = vand.u32 2147483647, %v4998_v15 }
 0x611   : > { %7045 = vst.msk [vmem:[%s11058_s11 + $0x58] sm:$0xff] %vm7033_vm6, %v5291_v12  ;;  %v5295_v25 = vsub.f32 1.0, %v5294_v56  ;;  %v7315_v12 = vpop.permute.xlu0 %7314  ;;  %vm5313_vm4 = vweird.f32 %v4998_v15 }
 0x612   : > { %7686 = vst.msk [vmem:[%s11058_s11 + $0x58] sm:$0xff] %vm7674_vm7, %v7313_v1  ;;  %v3616_v36 = vpop.f32.mrf.mxu3  ;;  %vm5318_vm8 = vcmp.eq.f32.partialorder %v5317_v60, 8.507059e+37 }
 0x613   : > { %v5296_v4 = vmul.f32 %v9326_v40, %v5295_v25  ;;  %11987 = vst [vmem:[#allocation67_spill] sm:$0xff] %v11144_v39  ;;  %v5319_v25 = vand.u32 2147483648, %v4998_v15  ;;  %v3888_v34 = vmax.f32 %v3616_v36, 0.0 }
 0x614   : > { %v4318_v28 = vpop.f32.mrf.mxu1 }
 0x615   : > { %v9328_v43 = vpop.eup %9327  ;;  %v5297_v18 = vadd.f32 %v9326_v40, %v5296_v4  ;;  %v8741_v57 = vmul.f32 -1.442695, %v4318_v28 }
 0x616   : > { %v9330_v49 = vpop.eup %9329  ;;  %v4999_v14 = vadd.f32 1.0, %v9328_v43 }
 0x617   : > { %v5301_v58 = vsel %vm5300_vm0, %v9326_v40, %v5297_v18  ;;  %v5309_v56 = vmul.f32 %v9330_v49, %v4998_v15  ;;  %9331 = vpow2.f32 %v8741_v57  ;;  %vm5314_vm3 = vweird.f32 %v9330_v49 }
 0x618   : > { %v5306_v50 = vsel %vm5303_vm1, %v5305_v20, %v5301_v58  ;;  %9333 = vrcp.f32 %v4999_v14  ;;  %vm5315_vm5 = vmor %vm5313_vm4, %vm5314_vm3  ;;  %v7317_v15 = vpop.permute.xlu1 %7316  ;;  %v5332_v60 = vand.u32 2147483647, %v4999_v14  ;;  %vm5328_vm10 = vweird.f32 %v4999_v14 }
 0x619   : > { %7046 = vst.msk [vmem:[%s11058_s11 + $0x60] sm:$0xff] %vm7033_vm6, %v5306_v50  ;;  %v5310_v1 = vsub.f32 1.0, %v5309_v56  ;;  %v5320_v56 = vor.u32 1.1754944e-38, %v5319_v25  ;;  %v5334_v25 = vand.u32 2147483648, %v4999_v14 }
 0x61a   : > { %7687 = vst.msk [vmem:[%s11058_s11 + $0x60] sm:$0xff] %vm7674_vm7, %v7315_v12  ;;  %v3618_v4 = vpop.f32.mrf.mxu3  ;;  %vm5333_vm12 = vcmp.eq.f32.partialorder %v5332_v60, 8.507059e+37 }
 0x61b   : > { %v5311_v28 = vmul.f32 %v9330_v49, %v5310_v1  ;;  %v3889_v40 = vmax.f32 %v3618_v4, 0.0  ;;  %v11988_v1 = vld [vmem:[#allocation44_spill] sm:$0xff]  ;;  %v11152_v4 = vpop.permute.xlu2 %7498 }
 0x61c   : > { %v4321_v19 = vpop.f32.mrf.mxu1  ;;  %11989 = vst [vmem:[#allocation44_spill] sm:$0xff] %v11152_v4 }
 0x61d   : > { %v9332_v43 = vpop.eup %9331  ;;  %v5312_v18 = vadd.f32 %v9330_v49, %v5311_v28  ;;  %v4000_v57 = vpack.c.bf16 %v3889_v40, %v3888_v34  ;;  %v8742_v20 = vmul.f32 -1.442695, %v4321_v19 }
 0x61e   : > { %v9334_v58 = vpop.eup %9333  ;;  %v5000_v50 = vadd.f32 1.0, %v9332_v43 }
 0x61f   : > { %v5316_v12 = vsel %vm5315_vm5, %v9330_v49, %v5312_v18  ;;  %v5324_v39 = vmul.f32 %v9334_v58, %v4999_v14  ;;  %9335 = vpow2.f32 %v8742_v20  ;;  %3660 = vmatmul.bf16.gmra.mxu3 %v11988_v1  ;;  %8678 = vmatmul.msk.bf16.gmra.mxu1 %vm2493_vm2, %v4000_v57  ;;  %vm5329_vm9 = vweird.f32 %v9334_v58 }
 0x620   : > { %v5321_v36 = vsel %vm5318_vm8, %v5320_v56, %v5316_v12  ;;  %9337 = vrcp.f32 %v5000_v50  ;;  %vm5330_vm11 = vmor %vm5328_vm10, %vm5329_vm9  ;;  %v5335_v20 = vor.u32 1.1754944e-38, %v5334_v25  ;;  %v5347_v14 = vand.u32 2147483647, %v5000_v50 }
 0x621   : > { %7047 = vst.msk [vmem:[%s11058_s11 + $0x68] sm:$0xff] %vm7033_vm6, %v5321_v36  ;;  %v5325_v28 = vsub.f32 1.0, %v5324_v39  ;;  %vm5343_vm14 = vweird.f32 %v5000_v50 }
 0x622   : > { %7688 = vst.msk [vmem:[%s11058_s11 + $0x68] sm:$0xff] %vm7674_vm7, %v7317_v15  ;;  %v3621_v34 = vpop.f32.mrf.mxu3  ;;  %v11158_v15 = vpop.permute.xlu0 %7500  ;;  %vm5348_vm0 = vcmp.eq.f32.partialorder %v5347_v14, 8.507059e+37 }
 0x623   : > { %v5326_v49 = vmul.f32 %v9334_v58, %v5325_v28  ;;  %v7319_v36 = vpop.permute.xlu2 %7318  ;;  %11990 = vst [vmem:[#allocation68_spill] sm:$0xff] %v11158_v15  ;;  %v3890_v25 = vmax.f32 %v3621_v34, 0.0 }
 0x624   : > { %v4323_v40 = vpop.f32.mrf.mxu1 }
 0x625   : > { %v9336_v19 = vpop.eup %9335  ;;  %v5327_v43 = vadd.f32 %v9334_v58, %v5326_v49  ;;  %v8743_v18 = vmul.f32 -1.442695, %v4323_v40  ;;  %v5349_v49 = vand.u32 2147483648, %v5000_v50 }
 0x626   : > { %v9338_v57 = vpop.eup %9337  ;;  %v5001_v56 = vadd.f32 1.0, %v9336_v19 }
 0x627   : > { %v5331_v12 = vsel %vm5330_vm11, %v9334_v58, %v5327_v43  ;;  %v5339_v39 = vmul.f32 %v9338_v57, %v5000_v50  ;;  %9339 = vpow2.f32 %v8743_v18  ;;  %vm5344_vm13 = vweird.f32 %v9338_v57 }
 0x628   : > { %v5336_v1 = vsel %vm5333_vm12, %v5335_v20, %v5331_v12  ;;  %9341 = vrcp.f32 %v5001_v56  ;;  %vm5345_vm15 = vmor %vm5343_vm14, %vm5344_vm13  ;;  %v5362_v14 = vand.u32 2147483647, %v5001_v56  ;;  %vm5358_vm3 = vweird.f32 %v5001_v56 }
 0x629   : > { %7048 = vst.msk [vmem:[%s11058_s11 + $0x70] sm:$0xff] %vm7033_vm6, %v5336_v1  ;;  %v5340_v28 = vsub.f32 1.0, %v5339_v39  ;;  %v5350_v39 = vor.u32 1.1754944e-38, %v5349_v49  ;;  %v5364_v49 = vand.u32 2147483648, %v5001_v56 }
 0x62a   : > { %7689 = vst.msk [vmem:[%s11058_s11 + $0x70] sm:$0xff] %vm7674_vm7, %v7319_v36  ;;  %v3623_v40 = vpop.f32.mrf.mxu3  ;;  %v7321_v50 = vpop.permute.xlu0 %7320  ;;  %vm5363_vm5 = vcmp.eq.f32.partialorder %v5362_v14, 8.507059e+37 }
 0x62b   : > { %v5341_v4 = vmul.f32 %v9338_v57, %v5340_v28  ;;  %v3891_v58 = vmax.f32 %v3623_v40, 0.0 }
 0x62c   : > { %v4326_v60 = vpop.f32.mrf.mxu1 }
 0x62d   : > { %v9340_v19 = vpop.eup %9339  ;;  %v5342_v43 = vadd.f32 %v9338_v57, %v5341_v4  ;;  %v4001_v18 = vpack.c.bf16 %v3891_v58, %v3890_v25  ;;  %v8744_v20 = vmul.f32 -1.442695, %v4326_v60  ;;  %v11166_v4 = vpop.permute.xlu1 %7502 }
 0x62e   : > { %v9342_v12 = vpop.eup %9341  ;;  %v5002_v1 = vadd.f32 1.0, %v9340_v19 }
 0x62f   : > { %v5346_v36 = vsel %vm5345_vm15, %v9338_v57, %v5342_v43  ;;  %v5354_v15 = vmul.f32 %v9342_v12, %v5001_v56  ;;  %9343 = vpow2.f32 %v8744_v20  ;;  %3665 = vmatmul.bf16.gmra.mxu3 %v10383_v61  ;;  %8679 = vmatmul.msk.bf16.gmra.mxu1 %vm2493_vm2, %v4001_v18  ;;  %vm5359_vm1 = vweird.f32 %v9342_v12 }
 0x630   : > { %v5351_v34 = vsel %vm5348_vm0, %v5350_v39, %v5346_v36  ;;  %9345 = vrcp.f32 %v5002_v1  ;;  %vm5360_vm4 = vmor %vm5358_vm3, %vm5359_vm1  ;;  %v5365_v43 = vor.u32 1.1754944e-38, %v5364_v49  ;;  %v11172_v36 = vpop.permute.xlu2 %7504  ;;  %v5377_v56 = vand.u32 2147483647, %v5002_v1 }
 0x631   : > { %7049 = vst.msk [vmem:[%s11058_s11 + $0x78] sm:$0xff] %vm7033_vm6, %v5351_v34  ;;  %v5355_v28 = vsub.f32 1.0, %v5354_v15  ;;  %vm5373_vm9 = vweird.f32 %v5002_v1 }
 0x632   : > { %7690 = vst.msk [vmem:[%s11058_s11 + $0x78] sm:$0xff] %vm7674_vm7, %v7321_v50  ;;  %v3626_v40 = vpop.f32.mrf.mxu3  ;;  %vm5378_vm11 = vcmp.eq.f32.partialorder %v5377_v56, 8.507059e+37 }
 0x633   : > { %v5356_v57 = vmul.f32 %v9342_v12, %v5355_v28  ;;  %11991 = vst [vmem:[#allocation69_spill] sm:$0xff] %v11172_v36  ;;  %v5379_v28 = vand.u32 2147483648, %v5002_v1  ;;  %v3892_v49 = vmax.f32 %v3626_v40, 0.0 }
 0x634   : > { %v4328_v25 = vpop.f32.mrf.mxu1 }
 0x635   : > { %v9344_v58 = vpop.eup %9343  ;;  %v5357_v61 = vadd.f32 %v9342_v12, %v5356_v57  ;;  %v8745_v60 = vmul.f32 -1.442695, %v4328_v25  ;;  %v7323_v34 = vpop.permute.xlu1 %7322 }
 0x636   : > { %v9346_v19 = vpop.eup %9345  ;;  %v5003_v18 = vadd.f32 1.0, %v9344_v58 }
 0x637   : > { %v5361_v20 = vsel %vm5360_vm4, %v9342_v12, %v5357_v61  ;;  %v5369_v15 = vmul.f32 %v9346_v19, %v5002_v1  ;;  %9347 = vpow2.f32 %v8745_v60  ;;  %vm5374_vm8 = vweird.f32 %v9346_v19  ;;  %v11180_v1 = vpop.permute.xlu0 %7506 }
 0x638   : > { %v5366_v39 = vsel %vm5363_vm5, %v5365_v43, %v5361_v20  ;;  %9349 = vrcp.f32 %v5003_v18  ;;  %vm5375_vm10 = vmor %vm5373_vm9, %vm5374_vm8  ;;  %v5392_v56 = vand.u32 2147483647, %v5003_v18  ;;  %vm5388_vm13 = vweird.f32 %v5003_v18 }
 0x639   : > { %7050 = vst.msk [vmem:[%s11058_s11 + $0x80] sm:$0xff] %vm7033_vm6, %v5366_v39  ;;  %v5370_v50 = vsub.f32 1.0, %v5369_v15  ;;  %v5380_v15 = vor.u32 1.1754944e-38, %v5379_v28  ;;  %v5394_v28 = vand.u32 2147483648, %v5003_v18 }
 0x63a   : > { %7691 = vst.msk [vmem:[%s11058_s11 + $0x80] sm:$0xff] %vm7674_vm7, %v7323_v34  ;;  %v3628_v57 = vpop.f32.mrf.mxu3  ;;  %vm5393_vm15 = vcmp.eq.f32.partialorder %v5392_v56, 8.507059e+37 }
 0x63b   : > { %v5371_v25 = vmul.f32 %v9346_v19, %v5370_v50  ;;  %v3893_v12 = vmax.f32 %v3628_v57, 0.0  ;;  %v11992_v50 = vld [vmem:[#allocation45_spill] sm:$0xff]  ;;  %v7325_v57 = vpop.permute.xlu2 %7324 }
 0x63c   : > { %v4331_v14 = vpop.f32.mrf.mxu1  ;;  %11993 = vst [vmem:[#allocation45_spill] sm:$0xff] %v11180_v1 }
 0x63d   : > { %v9348_v58 = vpop.eup %9347  ;;  %v5372_v61 = vadd.f32 %v9346_v19, %v5371_v25  ;;  %v4002_v60 = vpack.c.bf16 %v3893_v12, %v3892_v49  ;;  %v8746_v43 = vmul.f32 -1.442695, %v4331_v14 }
 0x63e   : > { %v9350_v20 = vpop.eup %9349  ;;  %v5004_v39 = vadd.f32 1.0, %v9348_v58 }
 0x63f   : > { %v5376_v34 = vsel %vm5375_vm10, %v9346_v19, %v5372_v61  ;;  %v5384_v36 = vmul.f32 %v9350_v20, %v5003_v18  ;;  %9351 = vpow2.f32 %v8746_v43  ;;  %3670 = vmatmul.bf16.gmra.mxu3 %v11992_v50  ;;  %8680 = vmatmul.msk.bf16.gmra.mxu1 %vm2493_vm2, %v4002_v60  ;;  %vm5389_vm12 = vweird.f32 %v9350_v20 }
 0x640   : > { %v5381_v40 = vsel %vm5378_vm11, %v5380_v15, %v5376_v34  ;;  %9353 = vrcp.f32 %v5004_v39  ;;  %vm5390_vm14 = vmor %vm5388_vm13, %vm5389_vm12  ;;  %v5395_v43 = vor.u32 1.1754944e-38, %v5394_v28  ;;  %v5407_v18 = vand.u32 2147483647, %v5004_v39 }
 0x641   : > { %7051 = vst.msk [vmem:[%s11058_s11 + $0x88] sm:$0xff] %vm7033_vm6, %v5381_v40  ;;  %v5385_v25 = vsub.f32 1.0, %v5384_v36  ;;  %v11186_v40 = vpop.permute.xlu1 %7508  ;;  %vm5403_vm1 = vweird.f32 %v5004_v39 }
 0x642   : > { %7692 = vst.msk [vmem:[%s11058_s11 + $0x88] sm:$0xff] %vm7674_vm7, %v7325_v57  ;;  %v3631_v49 = vpop.f32.mrf.mxu3  ;;  %v7327_v57 = vpop.permute.xlu0 %7326  ;;  %vm5408_vm4 = vcmp.eq.f32.partialorder %v5407_v18, 8.507059e+37 }
 0x643   : > { %v5386_v19 = vmul.f32 %v9350_v20, %v5385_v25  ;;  %11994 = vst [vmem:[#allocation70_spill] sm:$0xff] %v11186_v40  ;;  %v3894_v28 = vmax.f32 %v3631_v49, 0.0 }
 0x644   : > { %v4333_v12 = vpop.f32.mrf.mxu1 }
 0x645   : > { %v9352_v14 = vpop.eup %9351  ;;  %v5387_v58 = vadd.f32 %v9350_v20, %v5386_v19  ;;  %v8747_v61 = vmul.f32 -1.442695, %v4333_v12  ;;  %v5409_v19 = vand.u32 2147483648, %v5004_v39 }
 0x646   : > { %v9354_v60 = vpop.eup %9353  ;;  %v5005_v15 = vadd.f32 1.0, %v9352_v14 }
 0x647   : > { %v5391_v34 = vsel %vm5390_vm14, %v9350_v20, %v5387_v58  ;;  %v5399_v36 = vmul.f32 %v9354_v60, %v5004_v39  ;;  %9355 = vpow2.f32 %v8747_v61  ;;  %vm5404_vm0 = vweird.f32 %v9354_v60 }
 0x648   : > { %v5396_v50 = vsel %vm5393_vm15, %v5395_v43, %v5391_v34  ;;  %9357 = vrcp.f32 %v5005_v15  ;;  %vm5405_vm3 = vmor %vm5403_vm1, %vm5404_vm0  ;;  %v5422_v18 = vand.u32 2147483647, %v5005_v15  ;;  %vm5418_vm8 = vweird.f32 %v5005_v15 }
 0x649   : > { %7052 = vst.msk [vmem:[%s11058_s11 + $0x90] sm:$0xff] %vm7033_vm6, %v5396_v50  ;;  %v5400_v25 = vsub.f32 1.0, %v5399_v36  ;;  %v5410_v36 = vor.u32 1.1754944e-38, %v5409_v19  ;;  %v7329_v39 = vpop.permute.xlu1 %7328  ;;  %v5424_v19 = vand.u32 2147483648, %v5005_v15 }
 0x64a   : > { %7693 = vst.msk [vmem:[%s11058_s11 + $0x90] sm:$0xff] %vm7674_vm7, %v7327_v57  ;;  %v3633_v12 = vpop.f32.mrf.mxu3  ;;  %vm5423_vm10 = vcmp.eq.f32.partialorder %v5422_v18, 8.507059e+37 }
 0x64b   : > { %v5401_v1 = vmul.f32 %v9354_v60, %v5400_v25  ;;  %v3895_v20 = vmax.f32 %v3633_v12, 0.0 }
 0x64c   : > { %v4336_v56 = vpop.f32.mrf.mxu1 }
 0x64d   : > { %v9356_v14 = vpop.eup %9355  ;;  %v5402_v58 = vadd.f32 %v9354_v60, %v5401_v1  ;;  %v4003_v61 = vpack.c.bf16 %v3895_v20, %v3894_v28  ;;  %v8748_v43 = vmul.f32 -1.442695, %v4336_v56  ;;  %v11194_v1 = vpop.permute.xlu2 %7510 }
 0x64e   : > { %v9358_v34 = vpop.eup %9357  ;;  %v5006_v50 = vadd.f32 1.0, %v9356_v14 }
 0x64f   : > { %v5406_v57 = vsel %vm5405_vm3, %v9354_v60, %v5402_v58  ;;  %v5414_v40 = vmul.f32 %v9358_v34, %v5005_v15  ;;  %9359 = vpow2.f32 %v8748_v43  ;;  %3675 = vmatmul.bf16.gmra.mxu3 %v10403_v24  ;;  %8681 = vmatmul.msk.bf16.gmra.mxu1 %vm2493_vm2, %v4003_v61  ;;  %vm5419_vm5 = vweird.f32 %v9358_v34 }
 0x650   : > { %v5411_v49 = vsel %vm5408_vm4, %v5410_v36, %v5406_v57  ;;  %9361 = vrcp.f32 %v5006_v50  ;;  %vm5420_vm9 = vmor %vm5418_vm8, %vm5419_vm5  ;;  %v5425_v58 = vor.u32 1.1754944e-38, %v5424_v19  ;;  %v5437_v15 = vand.u32 2147483647, %v5006_v50 }
 0x651   : > { %7053 = vst.msk [vmem:[%s11058_s11 + $0x98] sm:$0xff] %vm7033_vm6, %v5411_v49  ;;  %v5415_v25 = vsub.f32 1.0, %v5414_v40  ;;  %v11200_v49 = vpop.permute.xlu0 %7512  ;;  %vm5433_vm12 = vweird.f32 %v5006_v50 }
 0x652   : > { %7694 = vst.msk [vmem:[%s11058_s11 + $0x98] sm:$0xff] %vm7674_vm7, %v7329_v39  ;;  %v3636_v12 = vpop.f32.mrf.mxu3  ;;  %vm5438_vm14 = vcmp.eq.f32.partialorder %v5437_v15, 8.507059e+37 }
 0x653   : > { %v5416_v60 = vmul.f32 %v9358_v34, %v5415_v25  ;;  %11995 = vst [vmem:[#allocation71_spill] sm:$0xff] %v11200_v49  ;;  %v5439_v25 = vand.u32 2147483648, %v5006_v50  ;;  %v3896_v19 = vmax.f32 %v3636_v12, 0.0 }
 0x654   : > { %v4338_v28 = vpop.f32.mrf.mxu1 }
 0x655   : > { %v9360_v20 = vpop.eup %9359  ;;  %v5417_v24 = vadd.f32 %v9358_v34, %v5416_v60  ;;  %v8749_v56 = vmul.f32 -1.442695, %v4338_v28  ;;  %v7331_v57 = vpop.permute.xlu2 %7330 }
 0x656   : > { %v9362_v14 = vpop.eup %9361  ;;  %v5007_v61 = vadd.f32 1.0, %v9360_v20 }
 0x657   : > { %v5421_v43 = vsel %vm5420_vm9, %v9358_v34, %v5417_v24  ;;  %v5429_v40 = vmul.f32 %v9362_v14, %v5006_v50  ;;  %9363 = vpow2.f32 %v8749_v56  ;;  %vm5434_vm11 = vweird.f32 %v9362_v14 }
 0x658   : > { %v5426_v36 = vsel %vm5423_vm10, %v5425_v58, %v5421_v43  ;;  %9365 = vrcp.f32 %v5007_v61  ;;  %vm5435_vm13 = vmor %vm5433_vm12, %vm5434_vm11  ;;  %v5452_v15 = vand.u32 2147483647, %v5007_v61  ;;  %vm5448_vm0 = vweird.f32 %v5007_v61 }
 0x659   : > { %7054 = vst.msk [vmem:[%s11058_s11 + $0xa0] sm:$0xff] %vm7033_vm6, %v5426_v36  ;;  %v5430_v39 = vsub.f32 1.0, %v5429_v40  ;;  %v5440_v40 = vor.u32 1.1754944e-38, %v5439_v25  ;;  %v7333_v50 = vpop.permute.xlu0 %7332  ;;  %v5454_v25 = vand.u32 2147483648, %v5007_v61 }
 0x65a   : > { %7695 = vst.msk [vmem:[%s11058_s11 + $0xa0] sm:$0xff] %vm7674_vm7, %v7331_v57  ;;  %v3638_v60 = vpop.f32.mrf.mxu3  ;;  %vm5453_vm3 = vcmp.eq.f32.partialorder %v5452_v15, 8.507059e+37 }
 0x65b   : > { %v5431_v28 = vmul.f32 %v9362_v14, %v5430_v39  ;;  %v3897_v34 = vmax.f32 %v3638_v60, 0.0  ;;  %v11208_v39 = vpop.permute.xlu1 %7514 }
 0x65c   : > { %v4341_v18 = vpop.f32.mrf.mxu1 }
 0x65d   : > { %v9364_v20 = vpop.eup %9363  ;;  %v5432_v24 = vadd.f32 %v9362_v14, %v5431_v28  ;;  %v4004_v56 = vpack.c.bf16 %v3897_v34, %v3896_v19  ;;  %v8750_v58 = vmul.f32 -1.442695, %v4341_v18 }
 0x65e   : > { %v9366_v43 = vpop.eup %9365  ;;  %v5008_v36 = vadd.f32 1.0, %v9364_v20 }
 0x65f   : > { %v5436_v57 = vsel %vm5435_vm13, %v9362_v14, %v5432_v24  ;;  %v5444_v49 = vmul.f32 %v9366_v43, %v5007_v61  ;;  %9367 = vpow2.f32 %v8750_v58  ;;  %3680 = vmatmul.bf16.gmra.mxu3 %v10413_v5  ;;  %8682 = vmatmul.msk.bf16.gmra.mxu1 %vm2493_vm2, %v4004_v56  ;;  %vm5449_vm15 = vweird.f32 %v9366_v43 }
 0x660   : > { %v5441_v12 = vsel %vm5438_vm14, %v5440_v40, %v5436_v57  ;;  %9369 = vrcp.f32 %v5008_v36  ;;  %vm5450_vm1 = vmor %vm5448_vm0, %vm5449_vm15  ;;  %v5455_v24 = vor.u32 1.1754944e-38, %v5454_v25  ;;  %v11214_v57 = vpop.permute.xlu2 %7516  ;;  %v5467_v61 = vand.u32 2147483647, %v5008_v36 }
 0x661   : > { %7055 = vst.msk [vmem:[%s11058_s11 + $0xa8] sm:$0xff] %vm7033_vm6, %v5441_v12  ;;  %v5445_v60 = vsub.f32 1.0, %v5444_v49  ;;  %vm5463_vm5 = vweird.f32 %v5008_v36 }
 0x662   : > { %7696 = vst.msk [vmem:[%s11058_s11 + $0xa8] sm:$0xff] %vm7674_vm7, %v7333_v50  ;;  %v3641_v28 = vpop.f32.mrf.mxu3  ;;  %vm5468_vm9 = vcmp.eq.f32.partialorder %v5467_v61, 8.507059e+37 }
 0x663   : > { %v5446_v14 = vmul.f32 %v9366_v43, %v5445_v60  ;;  %11996 = vst [vmem:[#allocation72_spill] sm:$0xff] %v11214_v57  ;;  %v7335_v12 = vpop.permute.xlu1 %7334  ;;  %v5469_v60 = vand.u32 2147483648, %v5008_v36  ;;  %v3898_v25 = vmax.f32 %v3641_v28, 0.0 }
 0x664   : > { %v4343_v19 = vpop.f32.mrf.mxu1 }
 0x665   : > { %v9368_v34 = vpop.eup %9367  ;;  %v5447_v5 = vadd.f32 %v9366_v43, %v5446_v14  ;;  %v8751_v18 = vmul.f32 -1.442695, %v4343_v19 }
 0x666   : > { %v9370_v20 = vpop.eup %9369  ;;  %v5009_v56 = vadd.f32 1.0, %v9368_v34 }
 0x667   : > { %v5451_v58 = vsel %vm5450_vm1, %v9366_v43, %v5447_v5  ;;  %v5459_v49 = vmul.f32 %v9370_v20, %v5008_v36  ;;  %9371 = vpow2.f32 %v8751_v18  ;;  %vm5464_vm4 = vweird.f32 %v9370_v20  ;;  %v11222_v36 = vpop.permute.xlu0 %7518 }
 0x668   : > { %v5456_v40 = vsel %vm5453_vm3, %v5455_v24, %v5451_v58  ;;  %9373 = vrcp.f32 %v5009_v56  ;;  %vm5465_vm8 = vmor %vm5463_vm5, %vm5464_vm4  ;;  %v5482_v61 = vand.u32 2147483647, %v5009_v56  ;;  %vm5478_vm11 = vweird.f32 %v5009_v56 }
 0x669   : > { %7056 = vst.msk [vmem:[%s11058_s11 + $0xb0] sm:$0xff] %vm7033_vm6, %v5456_v40  ;;  %v5460_v50 = vsub.f32 1.0, %v5459_v49  ;;  %v5470_v49 = vor.u32 1.1754944e-38, %v5469_v60  ;;  %v5484_v60 = vand.u32 2147483648, %v5009_v56 }
 0x66a   : > { %7697 = vst.msk [vmem:[%s11058_s11 + $0xb0] sm:$0xff] %vm7674_vm7, %v7335_v12  ;;  %v3643_v14 = vpop.f32.mrf.mxu3  ;;  %vm5483_vm13 = vcmp.eq.f32.partialorder %v5482_v61, 8.507059e+37 }
 0x66b   : > { %v5461_v19 = vmul.f32 %v9370_v20, %v5460_v50  ;;  %v3899_v43 = vmax.f32 %v3643_v14, 0.0  ;;  %v7337_v50 = vpop.permute.xlu2 %7336 }
 0x66c   : > { %v4346_v15 = vpop.f32.mrf.mxu1 }
 0x66d   : > { %v9372_v34 = vpop.eup %9371  ;;  %v5462_v5 = vadd.f32 %v9370_v20, %v5461_v19  ;;  %v4005_v18 = vpack.c.bf16 %v3899_v43, %v3898_v25  ;;  %v8752_v24 = vmul.f32 -1.442695, %v4346_v15 }
 0x66e   : > { %v9374_v58 = vpop.eup %9373  ;;  %v5010_v40 = vadd.f32 1.0, %v9372_v34 }
 0x66f   : > { %v5466_v12 = vsel %vm5465_vm8, %v9370_v20, %v5462_v5  ;;  %v5474_v57 = vmul.f32 %v9374_v58, %v5009_v56  ;;  %9375 = vpow2.f32 %v8752_v24  ;;  %3685 = vmatmul.bf16.gmra.mxu3 %v10425_v17  ;;  %8683 = vmatmul.msk.bf16.gmra.mxu1 %vm2493_vm2, %v4005_v18  ;;  %vm5479_vm10 = vweird.f32 %v9374_v58 }
 0x670   : > { %v5471_v28 = vsel %vm5468_vm9, %v5470_v49, %v5466_v12  ;;  %9377 = vrcp.f32 %v5010_v40  ;;  %vm5480_vm12 = vmor %vm5478_vm11, %vm5479_vm10  ;;  %v5485_v5 = vor.u32 1.1754944e-38, %v5484_v60  ;;  %v11228_v12 = vpop.permute.xlu1 %7520  ;;  %v5497_v56 = vand.u32 2147483647, %v5010_v40 }
 0x671   : > { %7057 = vst.msk [vmem:[%s11058_s11 + $0xb8] sm:$0xff] %vm7033_vm6, %v5471_v28  ;;  %v5475_v14 = vsub.f32 1.0, %v5474_v57  ;;  %v7339_v28 = vpop.permute.xlu0 %7338  ;;  %vm5493_vm15 = vweird.f32 %v5010_v40 }
 0x672   : > { %7698 = vst.msk [vmem:[%s11058_s11 + $0xb8] sm:$0xff] %vm7674_vm7, %v7337_v50  ;;  %v3646_v19 = vpop.f32.mrf.mxu3  ;;  %vm5498_vm1 = vcmp.eq.f32.partialorder %v5497_v56, 8.507059e+37 }
 0x673   : > { %v5476_v20 = vmul.f32 %v9374_v58, %v5475_v14  ;;  %11997 = vst [vmem:[#allocation73_spill] sm:$0xff] %v11228_v12  ;;  %v5499_v14 = vand.u32 2147483648, %v5010_v40  ;;  %v3900_v60 = vmax.f32 %v3646_v19, 0.0 }
 0x674   : > { %v4348_v25 = vpop.f32.mrf.mxu1 }
 0x675   : > { %v9376_v43 = vpop.eup %9375  ;;  %v5477_v17 = vadd.f32 %v9374_v58, %v5476_v20  ;;  %v8753_v15 = vmul.f32 -1.442695, %v4348_v25 }
 0x676   : > { %v9378_v34 = vpop.eup %9377  ;;  %v5011_v18 = vadd.f32 1.0, %v9376_v43 }
 0x677   : > { %v5481_v24 = vsel %vm5480_vm12, %v9374_v58, %v5477_v17  ;;  %v5489_v57 = vmul.f32 %v9378_v34, %v5010_v40  ;;  %9379 = vpow2.f32 %v8753_v15  ;;  %vm5494_vm14 = vweird.f32 %v9378_v34 }
 0x678   : > { %v5486_v49 = vsel %vm5483_vm13, %v5485_v5, %v5481_v24  ;;  %9381 = vrcp.f32 %v5011_v18  ;;  %vm5495_vm0 = vmor %vm5493_vm15, %vm5494_vm14  ;;  %v7341_v40 = vpop.permute.xlu1 %7340  ;;  %v5512_v56 = vand.u32 2147483647, %v5011_v18  ;;  %vm5508_vm4 = vweird.f32 %v5011_v18 }
 0x679   : > { %7058 = vst.msk [vmem:[%s11058_s11 + $0xc0] sm:$0xff] %vm7033_vm6, %v5486_v49  ;;  %v5490_v50 = vsub.f32 1.0, %v5489_v57  ;;  %v5500_v57 = vor.u32 1.1754944e-38, %v5499_v14  ;;  %v5514_v14 = vand.u32 2147483648, %v5011_v18 }
 0x67a   : > { %7699 = vst.msk [vmem:[%s11058_s11 + $0xc0] sm:$0xff] %vm7674_vm7, %v7339_v28  ;;  %v3648_v20 = vpop.f32.mrf.mxu3  ;;  %vm5513_vm8 = vcmp.eq.f32.partialorder %v5512_v56, 8.507059e+37 }
 0x67b   : > { %v5491_v25 = vmul.f32 %v9378_v34, %v5490_v50  ;;  %v3901_v58 = vmax.f32 %v3648_v20, 0.0  ;;  %v11998_v50 = vld [vmem:[#allocation46_spill] sm:$0xff]  ;;  %v11236_v20 = vpop.permute.xlu2 %7522 }
 0x67c   : > { %v4351_v61 = vpop.f32.mrf.mxu1  ;;  %11999 = vst [vmem:[#allocation46_spill] sm:$0xff] %v11236_v20 }
 0x67d   : > { %v9380_v43 = vpop.eup %9379  ;;  %v5492_v17 = vadd.f32 %v9378_v34, %v5491_v25  ;;  %v4006_v15 = vpack.c.bf16 %v3901_v58, %v3900_v60  ;;  %v8754_v5 = vmul.f32 -1.442695, %v4351_v61 }
 0x67e   : > { %v9382_v24 = vpop.eup %9381  ;;  %v5012_v49 = vadd.f32 1.0, %v9380_v43 }
 0x67f   : > { %v5496_v28 = vsel %vm5495_vm0, %v9378_v34, %v5492_v17  ;;  %v5504_v12 = vmul.f32 %v9382_v24, %v5011_v18  ;;  %9383 = vpow2.f32 %v8754_v5  ;;  %3690 = vmatmul.bf16.gmra.mxu3 %v11998_v50  ;;  %8684 = vmatmul.msk.bf16.gmra.mxu1 %vm2493_vm2, %v4006_v15  ;;  %vm5509_vm3 = vweird.f32 %v9382_v24 }
 0x680   : > { %v5501_v19 = vsel %vm5498_vm1, %v5500_v57, %v5496_v28  ;;  %9385 = vrcp.f32 %v5012_v49  ;;  %vm5510_vm5 = vmor %vm5508_vm4, %vm5509_vm3  ;;  %v5515_v5 = vor.u32 1.1754944e-38, %v5514_v14  ;;  %v5527_v18 = vand.u32 2147483647, %v5012_v49 }
 0x681   : > { %7059 = vst.msk [vmem:[%s11058_s11 + $0xc8] sm:$0xff] %vm7033_vm6, %v5501_v19  ;;  %v5505_v25 = vsub.f32 1.0, %v5504_v12  ;;  %vm5523_vm10 = vweird.f32 %v5012_v49 }
 0x682   : > { %7700 = vst.msk [vmem:[%s11058_s11 + $0xc8] sm:$0xff] %vm7674_vm7, %v7341_v40  ;;  %v3651_v60 = vpop.f32.mrf.mxu3  ;;  %v11242_v40 = vpop.permute.xlu0 %7524  ;;  %vm5528_vm12 = vcmp.eq.f32.partialorder %v5527_v18, 8.507059e+37 }
 0x683   : > { %v5506_v34 = vmul.f32 %v9382_v24, %v5505_v25  ;;  %v7343_v19 = vpop.permute.xlu2 %7342  ;;  %12000 = vst [vmem:[#allocation74_spill] sm:$0xff] %v11242_v40  ;;  %v3902_v14 = vmax.f32 %v3651_v60, 0.0 }
 0x684   : > { %v4353_v58 = vpop.f32.mrf.mxu1 }
 0x685   : > { %v9384_v61 = vpop.eup %9383  ;;  %v5507_v43 = vadd.f32 %v9382_v24, %v5506_v34  ;;  %v8755_v17 = vmul.f32 -1.442695, %v4353_v58  ;;  %v5529_v34 = vand.u32 2147483648, %v5012_v49 }
 0x686   : > { %v9386_v15 = vpop.eup %9385  ;;  %v5013_v57 = vadd.f32 1.0, %v9384_v61 }
 0x687   : > { %v5511_v28 = vsel %vm5510_vm5, %v9382_v24, %v5507_v43  ;;  %v5519_v12 = vmul.f32 %v9386_v15, %v5012_v49  ;;  %9387 = vpow2.f32 %v8755_v17  ;;  %vm5524_vm9 = vweird.f32 %v9386_v15 }
 0x688   : > { %v5516_v50 = vsel %vm5513_vm8, %v5515_v5, %v5511_v28  ;;  %9389 = vrcp.f32 %v5013_v57  ;;  %vm5525_vm11 = vmor %vm5523_vm10, %vm5524_vm9  ;;  %v5542_v18 = vand.u32 2147483647, %v5013_v57  ;;  %vm5538_vm14 = vweird.f32 %v5013_v57 }
 0x689   : > { %7060 = vst.msk [vmem:[%s11058_s11 + $0xd0] sm:$0xff] %vm7033_vm6, %v5516_v50  ;;  %v5520_v25 = vsub.f32 1.0, %v5519_v12  ;;  %v5530_v12 = vor.u32 1.1754944e-38, %v5529_v34  ;;  %v5544_v34 = vand.u32 2147483648, %v5013_v57 }
 0x68a   : > { %7701 = vst.msk [vmem:[%s11058_s11 + $0xd0] sm:$0xff] %vm7674_vm7, %v7343_v19  ;;  %v3653_v58 = vpop.f32.mrf.mxu3  ;;  %v7345_v49 = vpop.permute.xlu0 %7344  ;;  %vm5543_vm0 = vcmp.eq.f32.partialorder %v5542_v18, 8.507059e+37 }
 0x68b   : > { %v5521_v20 = vmul.f32 %v9386_v15, %v5520_v25  ;;  %v3903_v24 = vmax.f32 %v3653_v58, 0.0 }
 0x68c   : > { %v4356_v56 = vpop.f32.mrf.mxu1 }
 0x68d   : > { %v9388_v61 = vpop.eup %9387  ;;  %v5522_v43 = vadd.f32 %v9386_v15, %v5521_v20  ;;  %v4007_v17 = vpack.c.bf16 %v3903_v24, %v3902_v14  ;;  %v8756_v5 = vmul.f32 -1.442695, %v4356_v56  ;;  %v11250_v20 = vpop.permute.xlu1 %7526 }
 0x68e   : > { %v9390_v28 = vpop.eup %9389  ;;  %v5014_v50 = vadd.f32 1.0, %v9388_v61 }
 0x68f   : > { %v5526_v19 = vsel %vm5525_vm11, %v9386_v15, %v5522_v43  ;;  %v5534_v40 = vmul.f32 %v9390_v28, %v5013_v57  ;;  %9391 = vpow2.f32 %v8756_v5  ;;  %3695 = vmatmul.bf16.gmra.mxu3 %v10452_v38  ;;  %8685 = vmatmul.msk.bf16.gmra.mxu1 %vm2493_vm2, %v4007_v17  ;;  %vm5539_vm13 = vweird.f32 %v9390_v28 }
 0x690   : > { %v5531_v60 = vsel %vm5528_vm12, %v5530_v12, %v5526_v19  ;;  %9393 = vrcp.f32 %v5014_v50  ;;  %vm5540_vm15 = vmor %vm5538_vm14, %vm5539_vm13  ;;  %v5545_v43 = vor.u32 1.1754944e-38, %v5544_v34  ;;  %v11256_v19 = vpop.permute.xlu2 %7528  ;;  %v5557_v57 = vand.u32 2147483647, %v5014_v50 }
 0x691   : > { %7061 = vst.msk [vmem:[%s11058_s11 + $0xd8] sm:$0xff] %vm7033_vm6, %v5531_v60  ;;  %v5535_v25 = vsub.f32 1.0, %v5534_v40  ;;  %vm5553_vm3 = vweird.f32 %v5014_v50 }
 0x692   : > { %7702 = vst.msk [vmem:[%s11058_s11 + $0xd8] sm:$0xff] %vm7674_vm7, %v7345_v49  ;;  %v3656_v58 = vpop.f32.mrf.mxu3  ;;  %vm5558_vm5 = vcmp.eq.f32.partialorder %v5557_v57, 8.507059e+37 }
 0x693   : > { %v5536_v15 = vmul.f32 %v9390_v28, %v5535_v25  ;;  %12001 = vst [vmem:[#allocation75_spill] sm:$0xff] %v11256_v19  ;;  %v5559_v25 = vand.u32 2147483648, %v5014_v50  ;;  %v3904_v34 = vmax.f32 %v3656_v58, 0.0 }
 0x694   : > { %v4358_v14 = vpop.f32.mrf.mxu1 }
 0x695   : > { %v9392_v24 = vpop.eup %9391  ;;  %v5537_v38 = vadd.f32 %v9390_v28, %v5536_v15  ;;  %v8757_v56 = vmul.f32 -1.442695, %v4358_v14  ;;  %v7347_v60 = vpop.permute.xlu1 %7346 }
 0x696   : > { %v9394_v61 = vpop.eup %9393  ;;  %v5015_v17 = vadd.f32 1.0, %v9392_v24 }
 0x697   : > { %v5541_v5 = vsel %vm5540_vm15, %v9390_v28, %v5537_v38  ;;  %v5549_v40 = vmul.f32 %v9394_v61, %v5014_v50  ;;  %9395 = vpow2.f32 %v8757_v56  ;;  %vm5554_vm1 = vweird.f32 %v9394_v61  ;;  %v11264_v50 = vpop.permute.xlu0 %7530 }
 0x698   : > { %v5546_v12 = vsel %vm5543_vm0, %v5545_v43, %v5541_v5  ;;  %9397 = vrcp.f32 %v5015_v17  ;;  %vm5555_vm4 = vmor %vm5553_vm3, %vm5554_vm1  ;;  %v5572_v57 = vand.u32 2147483647, %v5015_v17  ;;  %vm5568_vm9 = vweird.f32 %v5015_v17 }
 0x699   : > { %7062 = vst.msk [vmem:[%s11058_s11 + $0xe0] sm:$0xff] %vm7033_vm6, %v5546_v12  ;;  %v5550_v49 = vsub.f32 1.0, %v5549_v40  ;;  %v5560_v40 = vor.u32 1.1754944e-38, %v5559_v25  ;;  %v5574_v25 = vand.u32 2147483648, %v5015_v17 }
 0x69a   : > { %7703 = vst.msk [vmem:[%s11058_s11 + $0xe0] sm:$0xff] %vm7674_vm7, %v7347_v60  ;;  %v3658_v15 = vpop.f32.mrf.mxu3  ;;  %vm5573_vm11 = vcmp.eq.f32.partialorder %v5572_v57, 8.507059e+37 }
 0x69b   : > { %v5551_v14 = vmul.f32 %v9394_v61, %v5550_v49  ;;  %v3905_v28 = vmax.f32 %v3658_v15, 0.0  ;;  %v7349_v49 = vpop.permute.xlu2 %7348 }
 0x69c   : > { %v4361_v18 = vpop.f32.mrf.mxu1 }
 0x69d   : > { %v9396_v24 = vpop.eup %9395  ;;  %v5552_v38 = vadd.f32 %v9394_v61, %v5551_v14  ;;  %v4008_v56 = vpack.c.bf16 %v3905_v28, %v3904_v34  ;;  %v8758_v43 = vmul.f32 -1.442695, %v4361_v18 }
 0x69e   : > { %v9398_v5 = vpop.eup %9397  ;;  %v5016_v12 = vadd.f32 1.0, %v9396_v24 }
 0x69f   : > { %v5556_v60 = vsel %vm5555_vm4, %v9394_v61, %v5552_v38  ;;  %v5564_v19 = vmul.f32 %v9398_v5, %v5015_v17  ;;  %9399 = vpow2.f32 %v8758_v43  ;;  %3700 = vmatmul.bf16.gmra.mxu3 %v10467_v35  ;;  %8686 = vmatmul.msk.bf16.gmra.mxu1 %vm2493_vm2, %v4008_v56  ;;  %vm5569_vm8 = vweird.f32 %v9398_v5 }
 0x6a0   : > { %v5561_v58 = vsel %vm5558_vm5, %v5560_v40, %v5556_v60  ;;  %9401 = vrcp.f32 %v5016_v12  ;;  %vm5570_vm10 = vmor %vm5568_vm9, %vm5569_vm8  ;;  %v5575_v38 = vor.u32 1.1754944e-38, %v5574_v25  ;;  %v11270_v60 = vpop.permute.xlu1 %7532  ;;  %v5587_v17 = vand.u32 2147483647, %v5016_v12 }
 0x6a1   : > { %7063 = vst.msk [vmem:[%s11058_s11 + $0xe8] sm:$0xff] %vm7033_vm6, %v5561_v58  ;;  %v5565_v15 = vsub.f32 1.0, %v5564_v19  ;;  %v7351_v58 = vpop.permute.xlu0 %7350  ;;  %vm5583_vm13 = vweird.f32 %v5016_v12 }
 0x6a2   : > { %7704 = vst.msk [vmem:[%s11058_s11 + $0xe8] sm:$0xff] %vm7674_vm7, %v7349_v49  ;;  %v3661_v14 = vpop.f32.mrf.mxu3  ;;  %vm5588_vm15 = vcmp.eq.f32.partialorder %v5587_v17, 8.507059e+37 }
 0x6a3   : > { %v5566_v61 = vmul.f32 %v9398_v5, %v5565_v15  ;;  %12002 = vst [vmem:[#allocation76_spill] sm:$0xff] %v11270_v60  ;;  %v5589_v15 = vand.u32 2147483648, %v5016_v12  ;;  %v3906_v25 = vmax.f32 %v3661_v14, 0.0 }
 0x6a4   : > { %v4363_v34 = vpop.f32.mrf.mxu1 }
 0x6a5   : > { %v9400_v28 = vpop.eup %9399  ;;  %v5567_v35 = vadd.f32 %v9398_v5, %v5566_v61  ;;  %v8759_v18 = vmul.f32 -1.442695, %v4363_v34 }
 0x6a6   : > { %v9402_v24 = vpop.eup %9401  ;;  %v5017_v56 = vadd.f32 1.0, %v9400_v28 }
 0x6a7   : > { %v5571_v43 = vsel %vm5570_vm10, %v9398_v5, %v5567_v35  ;;  %v5579_v19 = vmul.f32 %v9402_v24, %v5016_v12  ;;  %9403 = vpow2.f32 %v8759_v18  ;;  %vm5584_vm12 = vweird.f32 %v9402_v24 }
 0x6a8   : > { %v5576_v40 = vsel %vm5573_vm11, %v5575_v38, %v5571_v43  ;;  %9405 = vrcp.f32 %v5017_v56  ;;  %vm5585_vm14 = vmor %vm5583_vm13, %vm5584_vm12  ;;  %v7353_v12 = vpop.permute.xlu1 %7352  ;;  %v5602_v17 = vand.u32 2147483647, %v5017_v56  ;;  %vm5598_vm1 = vweird.f32 %v5017_v56 }
 0x6a9   : > { %7064 = vst.msk [vmem:[%s11058_s11 + $0xf0] sm:$0xff] %vm7033_vm6, %v5576_v40  ;;  %v5580_v49 = vsub.f32 1.0, %v5579_v19  ;;  %v5590_v19 = vor.u32 1.1754944e-38, %v5589_v15  ;;  %v5604_v15 = vand.u32 2147483648, %v5017_v56 }
 0x6aa   : > { %7705 = vst.msk [vmem:[%s11058_s11 + $0xf0] sm:$0xff] %vm7674_vm7, %v7351_v58  ;;  %v3663_v61 = vpop.f32.mrf.mxu3  ;;  %vm5603_vm4 = vcmp.eq.f32.partialorder %v5602_v17, 8.507059e+37 }
 0x6ab   : > { %v5581_v34 = vmul.f32 %v9402_v24, %v5580_v49  ;;  %v3907_v5 = vmax.f32 %v3663_v61, 0.0  ;;  %v11278_v49 = vpop.permute.xlu2 %7534 }
 0x6ac   : > { %v4366_v57 = vpop.f32.mrf.mxu1 }
 0x6ad   : > { %v9404_v28 = vpop.eup %9403  ;;  %v5582_v35 = vadd.f32 %v9402_v24, %v5581_v34  ;;  %v4009_v18 = vpack.c.bf16 %v3907_v5, %v3906_v25  ;;  %v8760_v38 = vmul.f32 -1.442695, %v4366_v57 }
 0x6ae   : > { %v9406_v43 = vpop.eup %9405  ;;  %v5018_v40 = vadd.f32 1.0, %v9404_v28 }
 0x6af   : > { %v5586_v58 = vsel %vm5585_vm14, %v9402_v24, %v5582_v35  ;;  %v5594_v60 = vmul.f32 %v9406_v43, %v5017_v56  ;;  %9407 = vpow2.f32 %v8760_v38  ;;  %3705 = vmatmul.bf16.gmra.mxu3 %v10484_v32  ;;  %8687 = vmatmul.msk.bf16.gmra.mxu1 %vm2493_vm2, %v4009_v18  ;;  %vm5599_vm0 = vweird.f32 %v9406_v43 }
 0x6b0   : > { %v5591_v14 = vsel %vm5588_vm15, %v5590_v19, %v5586_v58  ;;  %9409 = vrcp.f32 %v5018_v40  ;;  %vm5600_vm3 = vmor %vm5598_vm1, %vm5599_vm0  ;;  %v5605_v35 = vor.u32 1.1754944e-38, %v5604_v15  ;;  %v5617_v56 = vand.u32 2147483647, %v5018_v40 }
 0x6b1   : > { %7065 = vst.msk [vmem:[%s11058_s11 + $0xf8] sm:$0xff] %vm7033_vm6, %v5591_v14  ;;  %v5595_v61 = vsub.f32 1.0, %v5594_v60  ;;  %v11284_v14 = vpop.permute.xlu0 %7536  ;;  %vm5613_vm8 = vweird.f32 %v5018_v40 }
 0x6b2   : > { %7706 = vst.msk [vmem:[%s11058_s11 + $0xf8] sm:$0xff] %vm7674_vm7, %v7353_v12  ;;  %v3666_v34 = vpop.f32.mrf.mxu3  ;;  %vm5618_vm10 = vcmp.eq.f32.partialorder %v5617_v56, 8.507059e+37 }
 0x6b3   : > { %v5596_v24 = vmul.f32 %v9406_v43, %v5595_v61  ;;  %v7355_v58 = vpop.permute.xlu2 %7354  ;;  %12003 = vst [vmem:[#allocation77_spill] sm:$0xff] %v11284_v14  ;;  %v5619_v61 = vand.u32 2147483648, %v5018_v40  ;;  %v3908_v15 = vmax.f32 %v3666_v34, 0.0 }
 0x6b4   : > { %v4368_v25 = vpop.f32.mrf.mxu1 }
 0x6b5   : > { %v9408_v5 = vpop.eup %9407  ;;  %v5597_v32 = vadd.f32 %v9406_v43, %v5596_v24  ;;  %v8761_v57 = vmul.f32 -1.442695, %v4368_v25 }
 0x6b6   : > { %v9410_v28 = vpop.eup %9409  ;;  %v5019_v18 = vadd.f32 1.0, %v9408_v5 }
 0x6b7   : > { %v5601_v38 = vsel %vm5600_vm3, %v9406_v43, %v5597_v32  ;;  %v5609_v60 = vmul.f32 %v9410_v28, %v5018_v40  ;;  %9411 = vpow2.f32 %v8761_v57  ;;  %vm5614_vm5 = vweird.f32 %v9410_v28 }
 0x6b8   : > { %v5606_v19 = vsel %vm5603_vm4, %v5605_v35, %v5601_v38  ;;  %9413 = vrcp.f32 %v5019_v18  ;;  %vm5615_vm9 = vmor %vm5613_vm8, %vm5614_vm5  ;;  %vm5628_vm12 = vweird.f32 %v5019_v18 }
 0x6b9   : > { %7066 = vst.msk [vmem:[%s11058_s11 + $0x100] sm:$0xff] %vm7033_vm6, %v5606_v19  ;;  %v5610_v12 = vsub.f32 1.0, %v5609_v60  ;;  %v5620_v60 = vor.u32 1.1754944e-38, %v5619_v61 }
 0x6ba   : > { %7707 = vst.msk [vmem:[%s11058_s11 + $0x100] sm:$0xff] %vm7674_vm7, %v7355_v58  ;;  %v3668_v24 = vpop.f32.mrf.mxu3 }
 0x6bb   : > { %v5611_v25 = vmul.f32 %v9410_v28, %v5610_v12  ;;  %v3909_v43 = vmax.f32 %v3668_v24, 0.0  ;;  %v7357_v12 = vpop.permute.xlu0 %7356  ;;  %v5634_v24 = vand.u32 2147483648, %v5019_v18 }
 0x6bc   : > { %v4371_v17 = vpop.f32.mrf.mxu1 }
 0x6bd   : > { %v9412_v5 = vpop.eup %9411  ;;  %v5612_v32 = vadd.f32 %v9410_v28, %v5611_v25  ;;  %v4010_v57 = vpack.c.bf16 %v3909_v43, %v3908_v15  ;;  %v8762_v35 = vmul.f32 -1.442695, %v4371_v17 }
 0x6be   : > { %v9414_v38 = vpop.eup %9413  ;;  %v5020_v19 = vadd.f32 1.0, %v9412_v5  ;;  %v5635_v5 = vor.u32 1.1754944e-38, %v5634_v24 }
 0x6bf   : > { %v5616_v58 = vsel %vm5615_vm9, %v9410_v28, %v5612_v32  ;;  %v5624_v14 = vmul.f32 %v9414_v38, %v5019_v18  ;;  %9415 = vpow2.f32 %v8762_v35  ;;  %3710 = vmatmul.bf16.gmra.mxu3 %v10498_v23  ;;  %8688 = vmatmul.msk.bf16.gmra.mxu1 %vm2493_vm2, %v4010_v57  ;;  %vm5629_vm11 = vweird.f32 %v9414_v38 }
 0x6c0   : > { %v5621_v34 = vsel %vm5618_vm10, %v5620_v60, %v5616_v58  ;;  %9417 = vrcp.f32 %v5020_v19  ;;  %v5632_v28 = vand.u32 2147483647, %v5019_v18  ;;  %vm5630_vm13 = vmor %vm5628_vm12, %vm5629_vm11  ;;  %v5647_v58 = vand.u32 2147483647, %v5020_v19 }
 0x6c1   : > { %7067 = vst.msk [vmem:[%s11058_s11 + $0x108] sm:$0xff] %vm7033_vm6, %v5621_v34  ;;  %v5625_v40 = vsub.f32 1.0, %v5624_v14  ;;  %v5649_v34 = vand.u32 2147483648, %v5020_v19  ;;  %vm5643_vm0 = vweird.f32 %v5020_v19 }
 0x6c2   : > { %7708 = vst.msk [vmem:[%s11058_s11 + $0x108] sm:$0xff] %vm7674_vm7, %v7357_v12  ;;  %v3671_v25 = vpop.f32.mrf.mxu3  ;;  %vm5633_vm14 = vcmp.eq.f32.partialorder %v5632_v28, 8.507059e+37  ;;  %vm5648_vm3 = vcmp.eq.f32.partialorder %v5647_v58, 8.507059e+37 }
 0x6c3   : > { %v5626_v61 = vmul.f32 %v9414_v38, %v5625_v40  ;;  %v3910_v40 = vmax.f32 %v3671_v25, 0.0 }
 0x6c4   : > { %v4373_v56 = vpop.f32.mrf.mxu1 }
 0x6c5   : > { %v9416_v15 = vpop.eup %9415  ;;  %v5627_v23 = vadd.f32 %v9414_v38, %v5626_v61  ;;  %v8763_v43 = vmul.f32 -1.442695, %v4373_v56 }
 0x6c6   : > { %v9418_v17 = vpop.eup %9417  ;;  %v5021_v32 = vadd.f32 1.0, %v9416_v15 }
 0x6c7   : > { %v5631_v57 = vsel %vm5630_vm13, %v9414_v38, %v5627_v23  ;;  %v5639_v14 = vmul.f32 %v9418_v17, %v5020_v19  ;;  %9419 = vpow2.f32 %v8763_v43  ;;  %vm5644_vm15 = vweird.f32 %v9418_v17 }
 0x6c8   : > { %v5636_v35 = vsel %vm5633_vm14, %v5635_v5, %v5631_v57  ;;  %9421 = vrcp.f32 %v5021_v32  ;;  %vm5645_vm1 = vmor %vm5643_vm0, %vm5644_vm15  ;;  %v5650_v43 = vor.u32 1.1754944e-38, %v5649_v34  ;;  %vm5658_vm5 = vweird.f32 %v5021_v32 }
 0x6c9   : > { %7068 = vst.msk [vmem:[%s11058_s11 + $0x110] sm:$0xff] %vm7033_vm6, %v5636_v35  ;;  %v5640_v60 = vsub.f32 1.0, %v5639_v14  ;;  %v5664_v14 = vand.u32 2147483648, %v5021_v32 }
 0x6ca   : > { %7709 = vst.msk [vmem:[%s11058_s11 + $0x110] sm:$0xff] %vm7674_vm7, %v10846_v55  ;;  %v3673_v18 = vpop.f32.mrf.mxu3 }
 0x6cb   : > { %v5641_v12 = vmul.f32 %v9418_v17, %v5640_v60  ;;  %v3911_v24 = vmax.f32 %v3673_v18, 0.0 }
 0x6cc   : > { %v4376_v61 = vpop.f32.mrf.mxu1 }
 0x6cd   : > { %v9420_v38 = vpop.eup %9419  ;;  %v5642_v28 = vadd.f32 %v9418_v17, %v5641_v12  ;;  %v4011_v56 = vpack.c.bf16 %v3911_v24, %v3910_v40  ;;  %v8764_v15 = vmul.f32 -1.442695, %v4376_v61  ;;  %v5665_v40 = vor.u32 1.1754944e-38, %v5664_v14 }
 0x6ce   : > { %v9422_v23 = vpop.eup %9421  ;;  %v5022_v5 = vadd.f32 1.0, %v9420_v38 }
 0x6cf   : > { %v5646_v55 = vsel %vm5645_vm1, %v9418_v17, %v5642_v28  ;;  %v5654_v57 = vmul.f32 %v9422_v23, %v5021_v32  ;;  %9423 = vpow2.f32 %v8764_v15  ;;  %3715 = vmatmul.bf16.gmra.mxu3 %v10518_v27  ;;  %8689 = vmatmul.msk.bf16.gmra.mxu1 %vm2493_vm2, %v4011_v56  ;;  %vm5659_vm4 = vweird.f32 %v9422_v23 }
 0x6d0   : > { %v5651_v25 = vsel %vm5648_vm3, %v5650_v43, %v5646_v55  ;;  %9425 = vrcp.f32 %v5022_v5  ;;  %v5662_v17 = vand.u32 2147483647, %v5021_v32  ;;  %vm5660_vm8 = vmor %vm5658_vm5, %vm5659_vm4  ;;  %v5677_v56 = vand.u32 2147483647, %v5022_v5 }
 0x6d1   : > { %7069 = vst.msk [vmem:[%s11058_s11 + $0x118] sm:$0xff] %vm7033_vm6, %v5651_v25  ;;  %v5655_v19 = vsub.f32 1.0, %v5654_v57  ;;  %v5679_v15 = vand.u32 2147483648, %v5022_v5  ;;  %vm5673_vm11 = vweird.f32 %v5022_v5 }
 0x6d2   : > { %7710 = vst.msk [vmem:[%s11058_s11 + $0x118] sm:$0xff] %vm7674_vm7, %v10865_v21  ;;  %v3676_v35 = vpop.f32.mrf.mxu3  ;;  %vm5663_vm9 = vcmp.eq.f32.partialorder %v5662_v17, 8.507059e+37  ;;  %vm5678_vm13 = vcmp.eq.f32.partialorder %v5677_v56, 8.507059e+37 }
 0x6d3   : > { %v5656_v60 = vmul.f32 %v9422_v23, %v5655_v19  ;;  %v3912_v55 = vmax.f32 %v3676_v35, 0.0 }
 0x6d4   : > { %v4378_v58 = vpop.f32.mrf.mxu1 }
 0x6d5   : > { %v9424_v34 = vpop.eup %9423  ;;  %v5657_v27 = vadd.f32 %v9422_v23, %v5656_v60  ;;  %v8765_v18 = vmul.f32 -1.442695, %v4378_v58  ;;  %v5680_v58 = vor.u32 1.1754944e-38, %v5679_v15 }
 0x6d6   : > { %v9426_v12 = vpop.eup %9425  ;;  %v5023_v24 = vadd.f32 1.0, %v9424_v34 }
 0x6d7   : > { %v5661_v61 = vsel %vm5660_vm8, %v9422_v23, %v5657_v27  ;;  %v5669_v38 = vmul.f32 %v9426_v12, %v5022_v5  ;;  %9427 = vpow2.f32 %v8765_v18  ;;  %vm5674_vm10 = vweird.f32 %v9426_v12 }
 0x6d8   : > { %v5666_v21 = vsel %vm5663_vm9, %v5665_v40, %v5661_v61  ;;  %9429 = vrcp.f32 %v5023_v24  ;;  %vm5675_vm12 = vmor %vm5673_vm11, %vm5674_vm10  ;;  %v5694_v18 = vand.u32 2147483648, %v5023_v24  ;;  %vm5688_vm15 = vweird.f32 %v5023_v24 }
 0x6d9   : > { %7070 = vst.msk [vmem:[%s11058_s11 + $0x120] sm:$0xff] %vm7033_vm6, %v5666_v21  ;;  %v5670_v28 = vsub.f32 1.0, %v5669_v38 }
 0x6da   : > { %7711 = vst.msk [vmem:[%s11058_s11 + $0x120] sm:$0xff] %vm7674_vm7, %v10848_v7  ;;  %v3678_v32 = vpop.f32.mrf.mxu3  ;;  %v5695_v15 = vor.u32 1.1754944e-38, %v5694_v18 }
 0x6db   : > { %v5671_v43 = vmul.f32 %v9426_v12, %v5670_v28  ;;  %v3913_v57 = vmax.f32 %v3678_v32, 0.0 }
 0x6dc   : > { %v4381_v25 = vpop.f32.mrf.mxu1 }
 0x6dd   : > { %v9428_v23 = vpop.eup %9427  ;;  %v5672_v19 = vadd.f32 %v9426_v12, %v5671_v43  ;;  %v4012_v14 = vpack.c.bf16 %v3913_v57, %v3912_v55  ;;  %v8766_v60 = vmul.f32 -1.442695, %v4381_v25 }
 0x6de   : > { %v9430_v17 = vpop.eup %9429  ;;  %v5024_v34 = vadd.f32 1.0, %v9428_v23 }
 0x6df   : > { %v5676_v7 = vsel %vm5675_vm12, %v9426_v12, %v5672_v19  ;;  %v5684_v27 = vmul.f32 %v9430_v17, %v5023_v24  ;;  %9431 = vpow2.f32 %v8766_v60  ;;  %3720 = vmatmul.bf16.gmra.mxu3 %v10532_v30  ;;  %8690 = vmatmul.msk.bf16.gmra.mxu1 %vm2493_vm2, %v4012_v14  ;;  %vm5689_vm14 = vweird.f32 %v9430_v17 }
 0x6e0   : > { %v5681_v35 = vsel %vm5678_vm13, %v5680_v58, %v5676_v7  ;;  %9433 = vrcp.f32 %v5024_v34  ;;  %v5692_v12 = vand.u32 2147483647, %v5023_v24  ;;  %vm5690_vm0 = vmor %vm5688_vm15, %vm5689_vm14  ;;  %v5707_v25 = vand.u32 2147483647, %v5024_v34 }
 0x6e1   : > { %7071 = vst.msk [vmem:[%s11058_s11 + $0x128] sm:$0xff] %vm7033_vm6, %v5681_v35  ;;  %v5685_v5 = vsub.f32 1.0, %v5684_v27  ;;  %v5709_v23 = vand.u32 2147483648, %v5024_v34  ;;  %vm5703_vm4 = vweird.f32 %v5024_v34 }
 0x6e2   : > { %7712 = vst.msk [vmem:[%s11058_s11 + $0x128] sm:$0xff] %vm7674_vm7, %v10857_v0  ;;  %v3681_v40 = vpop.f32.mrf.mxu3  ;;  %vm5693_vm1 = vcmp.eq.f32.partialorder %v5692_v12, 8.507059e+37  ;;  %vm5708_vm8 = vcmp.eq.f32.partialorder %v5707_v25, 8.507059e+37 }
 0x6e3   : > { %v5686_v61 = vmul.f32 %v9430_v17, %v5685_v5  ;;  %v3914_v14 = vmax.f32 %v3681_v40, 0.0  ;;  %v5710_v18 = vor.u32 1.1754944e-38, %v5709_v23 }
 0x6e4   : > { %v4383_v38 = vpop.f32.mrf.mxu1 }
 0x6e5   : > { %v9432_v21 = vpop.eup %9431  ;;  %v5687_v30 = vadd.f32 %v9430_v17, %v5686_v61  ;;  %v8767_v28 = vmul.f32 -1.442695, %v4383_v38 }
 0x6e6   : > { %v9434_v56 = vpop.eup %9433  ;;  %v5025_v32 = vadd.f32 1.0, %v9432_v21 }
 0x6e7   : > { %v5691_v43 = vsel %vm5690_vm0, %v9430_v17, %v5687_v30  ;;  %v5699_v55 = vmul.f32 %v9434_v56, %v5024_v34  ;;  %9435 = vpow2.f32 %v8767_v28  ;;  %vm5704_vm3 = vweird.f32 %v9434_v56 }
 0x6e8   : > { %v5696_v0 = vsel %vm5693_vm1, %v5695_v15, %v5691_v43  ;;  %9437 = vrcp.f32 %v5025_v32  ;;  %vm5705_vm5 = vmor %vm5703_vm4, %vm5704_vm3  ;;  %v5724_v38 = vand.u32 2147483648, %v5025_v32  ;;  %v5722_v28 = vand.u32 2147483647, %v5025_v32 }
 0x6e9   : > { %7072 = vst.msk [vmem:[%s11058_s11 + $0x130] sm:$0xff] %vm7033_vm6, %v5696_v0  ;;  %v5700_v57 = vsub.f32 1.0, %v5699_v55  ;;  %vm5718_vm10 = vweird.f32 %v5025_v32 }
 0x6ea   : > { %7713 = vst.msk [vmem:[%s11058_s11 + $0x130] sm:$0xff] %vm7674_vm7, %v10878_v59  ;;  %v3683_v24 = vpop.f32.mrf.mxu3  ;;  %v5725_v0 = vor.u32 1.1754944e-38, %v5724_v38  ;;  %vm5723_vm12 = vcmp.eq.f32.partialorder %v5722_v28, 8.507059e+37 }
 0x6eb   : > { %v5701_v19 = vmul.f32 %v9434_v56, %v5700_v57  ;;  %v3915_v60 = vmax.f32 %v3683_v24, 0.0 }
 0x6ec   : > { %v4386_v58 = vpop.f32.mrf.mxu1 }
 0x6ed   : > { %v9436_v17 = vpop.eup %9435  ;;  %v5702_v7 = vadd.f32 %v9434_v56, %v5701_v19  ;;  %v4013_v27 = vpack.c.bf16 %v3915_v60, %v3914_v14  ;;  %v8768_v35 = vmul.f32 -1.442695, %v4386_v58 }
 0x6ee   : > { %v9438_v5 = vpop.eup %9437  ;;  %v5026_v61 = vadd.f32 1.0, %v9436_v17 }
 0x6ef   : > { %v5706_v59 = vsel %vm5705_vm5, %v9434_v56, %v5702_v7  ;;  %v5714_v12 = vmul.f32 %v9438_v5, %v5025_v32  ;;  %9439 = vpow2.f32 %v8768_v35  ;;  %3725 = vmatmul.bf16.gmra.mxu3 %v10549_v10  ;;  %8691 = vmatmul.msk.bf16.gmra.mxu1 %vm2493_vm2, %v4013_v27  ;;  %vm5719_vm9 = vweird.f32 %v9438_v5 }
 0x6f0   : > { %v5711_v40 = vsel %vm5708_vm8, %v5710_v18, %v5706_v59  ;;  %9441 = vrcp.f32 %v5026_v61  ;;  %vm5720_vm11 = vmor %vm5718_vm10, %vm5719_vm9  ;;  %v5737_v19 = vand.u32 2147483647, %v5026_v61  ;;  %v5739_v14 = vand.u32 2147483648, %v5026_v61 }
 0x6f1   : > { %7073 = vst.msk [vmem:[%s11058_s11 + $0x138] sm:$0xff] %vm7033_vm6, %v5711_v40  ;;  %v5715_v34 = vsub.f32 1.0, %v5714_v12  ;;  %vm5733_vm14 = vweird.f32 %v5026_v61 }
 0x6f2   : > { %7714 = vst.msk [vmem:[%s11058_s11 + $0x138] sm:$0xff] %vm7674_vm7, %v10859_v63  ;;  %v3686_v21 = vpop.f32.mrf.mxu3  ;;  %v5740_v12 = vor.u32 1.1754944e-38, %v5739_v14  ;;  %vm5738_vm0 = vcmp.eq.f32.partialorder %v5737_v19, 8.507059e+37 }
 0x6f3   : > { %v5716_v30 = vmul.f32 %v9438_v5, %v5715_v34  ;;  %v3916_v58 = vmax.f32 %v3686_v21, 0.0 }
 0x6f4   : > { %v4388_v56 = vpop.f32.mrf.mxu1 }
 0x6f5   : > { %v9440_v15 = vpop.eup %9439  ;;  %v5717_v10 = vadd.f32 %v9438_v5, %v5716_v30  ;;  %v8769_v43 = vmul.f32 -1.442695, %v4388_v56 }
 0x6f6   : > { %v9442_v55 = vpop.eup %9441  ;;  %v5027_v57 = vadd.f32 1.0, %v9440_v15 }
 0x6f7   : > { %v5721_v25 = vsel %vm5720_vm11, %v9438_v5, %v5717_v10  ;;  %v5729_v23 = vmul.f32 %v9442_v55, %v5026_v61  ;;  %9443 = vpow2.f32 %v8769_v43  ;;  %vm5734_vm13 = vweird.f32 %v9442_v55 }
 0x6f8   : > { %v5726_v63 = vsel %vm5723_vm12, %v5725_v0, %v5721_v25  ;;  %9445 = vrcp.f32 %v5027_v57  ;;  %vm5735_vm15 = vmor %vm5733_vm14, %vm5734_vm13  ;;  %v5754_v21 = vand.u32 2147483648, %v5027_v57  ;;  %v5752_v56 = vand.u32 2147483647, %v5027_v57 }
 0x6f9   : > { %7074 = vst.msk [vmem:[%s11058_s11 + $0x140] sm:$0xff] %vm7033_vm6, %v5726_v63  ;;  %v5730_v24 = vsub.f32 1.0, %v5729_v23  ;;  %vm5748_vm3 = vweird.f32 %v5027_v57 }
 0x6fa   : > { %7715 = vst.msk [vmem:[%s11058_s11 + $0x140] sm:$0xff] %vm7674_vm7, %v10867_v44  ;;  %v3688_v32 = vpop.f32.mrf.mxu3  ;;  %v5755_v0 = vor.u32 1.1754944e-38, %v5754_v21  ;;  %vm5753_vm5 = vcmp.eq.f32.partialorder %v5752_v56, 8.507059e+37 }
 0x6fb   : > { %v5731_v60 = vmul.f32 %v9442_v55, %v5730_v24  ;;  %v3917_v17 = vmax.f32 %v3688_v32, 0.0 }
 0x6fc   : > { %v4391_v7 = vpop.f32.mrf.mxu1 }
 0x6fd   : > { %v9444_v27 = vpop.eup %9443  ;;  %v5732_v35 = vadd.f32 %v9442_v55, %v5731_v60  ;;  %v4014_v5 = vpack.c.bf16 %v3917_v17, %v3916_v58  ;;  %v8770_v18 = vmul.f32 -1.442695, %v4391_v7 }
 0x6fe   : > { %v9446_v59 = vpop.eup %9445  ;;  %v5028_v40 = vadd.f32 1.0, %v9444_v27 }
 0x6ff   : > { %v5736_v44 = vsel %vm5735_vm15, %v9442_v55, %v5732_v35  ;;  %v5744_v34 = vmul.f32 %v9446_v59, %v5027_v57  ;;  %9447 = vpow2.f32 %v8770_v18  ;;  %3730 = vmatmul.bf16.gmra.mxu3 %v10572_v31  ;;  %8692 = vmatmul.msk.bf16.gmra.mxu1 %vm2493_vm2, %v4014_v5  ;;  %vm5749_vm1 = vweird.f32 %v9446_v59 }
 0x700   : > { %v5741_v38 = vsel %vm5738_vm0, %v5740_v12, %v5736_v44  ;;  %9449 = vrcp.f32 %v5028_v40  ;;  %vm5750_vm4 = vmor %vm5748_vm3, %vm5749_vm1  ;;  %v5767_v19 = vand.u32 2147483647, %v5028_v40  ;;  %v5769_v14 = vand.u32 2147483648, %v5028_v40 }
 0x701   : > { %7075 = vst.msk [vmem:[%s11058_s11 + $0x148] sm:$0xff] %vm7033_vm6, %v5741_v38  ;;  %v5745_v61 = vsub.f32 1.0, %v5744_v34  ;;  %vm5763_vm9 = vweird.f32 %v5028_v40 }
 0x702   : > { %7716 = vst.msk [vmem:[%s11058_s11 + $0x148] sm:$0xff] %vm7674_vm7, %v10888_v33  ;;  %v3691_v30 = vpop.f32.mrf.mxu3  ;;  %vm5768_vm11 = vcmp.eq.f32.partialorder %v5767_v19, 8.507059e+37 }
 0x703   : > { %v5746_v28 = vmul.f32 %v9446_v59, %v5745_v61  ;;  %v3918_v60 = vmax.f32 %v3691_v30, 0.0 }
 0x704   : > { %v4393_v15 = vpop.f32.mrf.mxu1 }
 0x705   : > { %v9448_v10 = vpop.eup %9447  ;;  %v5747_v31 = vadd.f32 %v9446_v59, %v5746_v28  ;;  %v8771_v43 = vmul.f32 -1.442695, %v4393_v15 }
 0x706   : > { %v9450_v55 = vpop.eup %9449  ;;  %v5029_v25 = vadd.f32 1.0, %v9448_v10 }
 0x707   : > { %v5751_v23 = vsel %vm5750_vm4, %v9446_v59, %v5747_v31  ;;  %v5759_v63 = vmul.f32 %v9450_v55, %v5028_v40  ;;  %9451 = vpow2.f32 %v8771_v43  ;;  %vm5764_vm8 = vweird.f32 %v9450_v55 }
 0x708   : > { %v5756_v33 = vsel %vm5753_vm5, %v5755_v0, %v5751_v23  ;;  %9453 = vrcp.f32 %v5029_v25  ;;  %vm5765_vm10 = vmor %vm5763_vm9, %vm5764_vm8  ;;  %v5770_v59 = vor.u32 1.1754944e-38, %v5769_v14  ;;  %v5784_v38 = vand.u32 2147483648, %v5029_v25 }
 0x709   : > { %7076 = vst.msk [vmem:[%s11058_s11 + $0x150] sm:$0xff] %vm7033_vm6, %v5756_v33  ;;  %v5760_v24 = vsub.f32 1.0, %v5759_v63  ;;  %v5782_v30 = vand.u32 2147483647, %v5029_v25  ;;  %vm5778_vm13 = vweird.f32 %v5029_v25 }
 0x70a   : > { %7717 = vst.msk [vmem:[%s11058_s11 + $0x150] sm:$0xff] %vm7674_vm7, %v10869_v2  ;;  %v3693_v57 = vpop.f32.mrf.mxu3  ;;  %v5785_v31 = vor.u32 1.1754944e-38, %v5784_v38 }
 0x70b   : > { %v5761_v32 = vmul.f32 %v9450_v55, %v5760_v24  ;;  %v3919_v58 = vmax.f32 %v3693_v57, 0.0  ;;  %vm5783_vm15 = vcmp.eq.f32.partialorder %v5782_v30, 8.507059e+37 }
 0x70c   : > { %v4396_v17 = vpop.f32.mrf.mxu1 }
 0x70d   : > { %v9452_v7 = vpop.eup %9451  ;;  %v5762_v27 = vadd.f32 %v9450_v55, %v5761_v32  ;;  %v4015_v35 = vpack.c.bf16 %v3919_v58, %v3918_v60  ;;  %v8772_v5 = vmul.f32 -1.442695, %v4396_v17 }
 0x70e   : > { %v9454_v18 = vpop.eup %9453  ;;  %v5030_v12 = vadd.f32 1.0, %v9452_v7 }
 0x70f   : > { %v5766_v2 = vsel %vm5765_vm10, %v9450_v55, %v5762_v27  ;;  %v5774_v44 = vmul.f32 %v9454_v18, %v5029_v25  ;;  %9455 = vpow2.f32 %v8772_v5  ;;  %3735 = vmatmul.bf16.gmra.mxu3 %v10593_v8  ;;  %8693 = vmatmul.msk.bf16.gmra.mxu1 %vm2493_vm2, %v4015_v35  ;;  %vm5779_vm12 = vweird.f32 %v9454_v18 }
 0x710   : > { %v5771_v34 = vsel %vm5768_vm11, %v5770_v59, %v5766_v2  ;;  %9457 = vrcp.f32 %v5030_v12  ;;  %vm5780_vm14 = vmor %vm5778_vm13, %vm5779_vm12  ;;  %v5797_v63 = vand.u32 2147483647, %v5030_v12  ;;  %v5799_v33 = vand.u32 2147483648, %v5030_v12 }
 0x711   : > { %7077 = vst.msk [vmem:[%s11058_s11 + $0x158] sm:$0xff] %vm7033_vm6, %v5771_v34  ;;  %v5775_v40 = vsub.f32 1.0, %v5774_v44  ;;  %vm5793_vm1 = vweird.f32 %v5030_v12 }
 0x712   : > { %7718 = vst.msk [vmem:[%s11058_s11 + $0x158] sm:$0xff] %vm7674_vm7, %v10880_v47  ;;  %v3696_v61 = vpop.f32.mrf.mxu3  ;;  %v5800_v27 = vor.u32 1.1754944e-38, %v5799_v33  ;;  %vm5798_vm4 = vcmp.eq.f32.partialorder %v5797_v63, 8.507059e+37 }
 0x713   : > { %v5776_v21 = vmul.f32 %v9454_v18, %v5775_v40  ;;  %v3920_v19 = vmax.f32 %v3696_v61, 0.0 }
 0x714   : > { %v4398_v28 = vpop.f32.mrf.mxu1 }
 0x715   : > { %v9456_v56 = vpop.eup %9455  ;;  %v5777_v8 = vadd.f32 %v9454_v18, %v5776_v21  ;;  %v8773_v15 = vmul.f32 -1.442695, %v4398_v28 }
 0x716   : > { %v9458_v10 = vpop.eup %9457  ;;  %v5031_v43 = vadd.f32 1.0, %v9456_v56 }
 0x717   : > { %v5781_v55 = vsel %vm5780_vm14, %v9454_v18, %v5777_v8  ;;  %v5789_v0 = vmul.f32 %v9458_v10, %v5030_v12  ;;  %9459 = vpow2.f32 %v8773_v15  ;;  %vm5794_vm0 = vweird.f32 %v9458_v10 }
 0x718   : > { %v5786_v47 = vsel %vm5783_vm15, %v5785_v31, %v5781_v55  ;;  %9461 = vrcp.f32 %v5031_v43  ;;  %vm5795_vm3 = vmor %vm5793_vm1, %vm5794_vm0  ;;  %v5814_v12 = vand.u32 2147483648, %v5031_v43  ;;  %v5812_v34 = vand.u32 2147483647, %v5031_v43 }
 0x719   : > { %7078 = vst.msk [vmem:[%s11058_s11 + $0x160] sm:$0xff] %vm7033_vm6, %v5786_v47  ;;  %v5790_v23 = vsub.f32 1.0, %v5789_v0  ;;  %vm5808_vm8 = vweird.f32 %v5031_v43 }
 0x71a   : > { %7719 = vst.msk [vmem:[%s11058_s11 + $0x160] sm:$0xff] %vm7674_vm7, %v10901_v51  ;;  %v3698_v25 = vpop.f32.mrf.mxu3  ;;  %v5815_v30 = vor.u32 1.1754944e-38, %v5814_v12  ;;  %vm5813_vm10 = vcmp.eq.f32.partialorder %v5812_v34, 8.507059e+37 }
 0x71b   : > { %v5791_v24 = vmul.f32 %v9458_v10, %v5790_v23  ;;  %v3921_v14 = vmax.f32 %v3698_v25, 0.0 }
 0x71c   : > { %v4401_v57 = vpop.f32.mrf.mxu1 }
 0x71d   : > { %v9460_v32 = vpop.eup %9459  ;;  %v5792_v60 = vadd.f32 %v9458_v10, %v5791_v24  ;;  %v4016_v58 = vpack.c.bf16 %v3921_v14, %v3920_v19  ;;  %v8774_v17 = vmul.f32 -1.442695, %v4401_v57 }
 0x71e   : > { %v9462_v7 = vpop.eup %9461  ;;  %v5032_v35 = vadd.f32 1.0, %v9460_v32 }
 0x71f   : > { %v5796_v51 = vsel %vm5795_vm3, %v9458_v10, %v5792_v60  ;;  %v5804_v5 = vmul.f32 %v9462_v7, %v5031_v43  ;;  %9463 = vpow2.f32 %v8774_v17  ;;  %3740 = vmatmul.bf16.gmra.mxu3 %v10614_v45  ;;  %8694 = vmatmul.msk.bf16.gmra.mxu1 %vm2493_vm2, %v4016_v58  ;;  %vm5809_vm5 = vweird.f32 %v9462_v7 }
 0x720   : > { %v5801_v18 = vsel %vm5798_vm4, %v5800_v27, %v5796_v51  ;;  %9465 = vrcp.f32 %v5032_v35  ;;  %vm5810_vm9 = vmor %vm5808_vm8, %vm5809_vm5  ;;  %v5827_v10 = vand.u32 2147483647, %v5032_v35  ;;  %v5829_v31 = vand.u32 2147483648, %v5032_v35 }
 0x721   : > { %7079 = vst.msk [vmem:[%s11058_s11 + $0x168] sm:$0xff] %vm7033_vm6, %v5801_v18  ;;  %v5805_v59 = vsub.f32 1.0, %v5804_v5  ;;  %vm5823_vm12 = vweird.f32 %v5032_v35 }
 0x722   : > { %7720 = vst.msk [vmem:[%s11058_s11 + $0x168] sm:$0xff] %vm7674_vm7, %v10882_v48  ;;  %v3701_v2 = vpop.f32.mrf.mxu3  ;;  %v5830_v14 = vor.u32 1.1754944e-38, %v5829_v31  ;;  %vm5828_vm14 = vcmp.eq.f32.partialorder %v5827_v10, 8.507059e+37 }
 0x723   : > { %v5806_v44 = vmul.f32 %v9462_v7, %v5805_v59  ;;  %v3922_v0 = vmax.f32 %v3701_v2, 0.0 }
 0x724   : > { %v4403_v40 = vpop.f32.mrf.mxu1 }
 0x725   : > { %v9464_v38 = vpop.eup %9463  ;;  %v5807_v45 = vadd.f32 %v9462_v7, %v5806_v44  ;;  %v8775_v61 = vmul.f32 -1.442695, %v4403_v40 }
 0x726   : > { %v9466_v21 = vpop.eup %9465  ;;  %v5033_v28 = vadd.f32 1.0, %v9464_v38 }
 0x727   : > { %v5811_v56 = vsel %vm5810_vm9, %v9462_v7, %v5807_v45  ;;  %v5819_v8 = vmul.f32 %v9466_v21, %v5032_v35  ;;  %9467 = vpow2.f32 %v8775_v61  ;;  %vm5824_vm11 = vweird.f32 %v9466_v21 }
 0x728   : > { %v5816_v48 = vsel %vm5813_vm10, %v5815_v30, %v5811_v56  ;;  %9469 = vrcp.f32 %v5033_v28  ;;  %vm5825_vm13 = vmor %vm5823_vm12, %vm5824_vm11  ;;  %v5844_v17 = vand.u32 2147483648, %v5033_v28  ;;  %v5842_v35 = vand.u32 2147483647, %v5033_v28 }
 0x729   : > { %7080 = vst.msk [vmem:[%s11058_s11 + $0x170] sm:$0xff] %vm7033_vm6, %v5816_v48  ;;  %v5820_v15 = vsub.f32 1.0, %v5819_v8  ;;  %vm5838_vm0 = vweird.f32 %v5033_v28 }
 0x72a   : > { %7721 = vst.msk [vmem:[%s11058_s11 + $0x170] sm:$0xff] %vm7674_vm7, %v10890_v9  ;;  %v3703_v43 = vpop.f32.mrf.mxu3  ;;  %v5845_v12 = vor.u32 1.1754944e-38, %v5844_v17  ;;  %vm5843_vm3 = vcmp.eq.f32.partialorder %v5842_v35, 8.507059e+37 }
 0x72b   : > { %v5821_v55 = vmul.f32 %v9466_v21, %v5820_v15  ;;  %v3923_v47 = vmax.f32 %v3703_v43, 0.0 }
 0x72c   : > { %v4406_v23 = vpop.f32.mrf.mxu1 }
 0x72d   : > { %v9468_v63 = vpop.eup %9467  ;;  %v5822_v33 = vadd.f32 %v9466_v21, %v5821_v55  ;;  %v4017_v25 = vpack.c.bf16 %v3923_v47, %v3922_v0  ;;  %v8776_v24 = vmul.f32 -1.442695, %v4406_v23 }
 0x72e   : > { %v9470_v19 = vpop.eup %9469  ;;  %v5034_v57 = vadd.f32 1.0, %v9468_v63 }
 0x72f   : > { %v5826_v9 = vsel %vm5825_vm13, %v9466_v21, %v5822_v33  ;;  %v5834_v32 = vmul.f32 %v9470_v19, %v5033_v28  ;;  %9471 = vpow2.f32 %v8776_v24  ;;  %3745 = vmatmul.bf16.gmra.mxu3 %v10630_v13  ;;  %8695 = vmatmul.msk.bf16.gmra.mxu1 %vm2493_vm2, %v4017_v25  ;;  %vm5839_vm15 = vweird.f32 %v9470_v19 }
 0x730   : > { %v5831_v60 = vsel %vm5828_vm14, %v5830_v14, %v5826_v9  ;;  %9473 = vrcp.f32 %v5034_v57  ;;  %vm5840_vm1 = vmor %vm5838_vm0, %vm5839_vm15  ;;  %v5857_v38 = vand.u32 2147483647, %v5034_v57  ;;  %v5859_v45 = vand.u32 2147483648, %v5034_v57 }
 0x731   : > { %7081 = vst.msk [vmem:[%s11058_s11 + $0x178] sm:$0xff] %vm7033_vm6, %v5831_v60  ;;  %v5835_v58 = vsub.f32 1.0, %v5834_v32  ;;  %vm5853_vm5 = vweird.f32 %v5034_v57 }
 0x732   : > { %7722 = vst.msk [vmem:[%s11058_s11 + $0x178] sm:$0xff] %vm7674_vm7, %v10911_v22  ;;  %v3706_v7 = vpop.f32.mrf.mxu3  ;;  %v5860_v43 = vor.u32 1.1754944e-38, %v5859_v45  ;;  %vm5858_vm9 = vcmp.eq.f32.partialorder %v5857_v38, 8.507059e+37 }
 0x733   : > { %v5836_v27 = vmul.f32 %v9470_v19, %v5835_v58  ;;  %v3924_v30 = vmax.f32 %v3706_v7, 0.0 }
 0x734   : > { %v4408_v51 = vpop.f32.mrf.mxu1 }
 0x735   : > { %v9472_v5 = vpop.eup %9471  ;;  %v5837_v13 = vadd.f32 %v9470_v19, %v5836_v27  ;;  %v8777_v18 = vmul.f32 -1.442695, %v4408_v51 }
 0x736   : > { %v9474_v59 = vpop.eup %9473  ;;  %v5035_v2 = vadd.f32 1.0, %v9472_v5 }
 0x737   : > { %v5841_v44 = vsel %vm5840_vm1, %v9470_v19, %v5837_v13  ;;  %v5849_v34 = vmul.f32 %v9474_v59, %v5034_v57  ;;  %9475 = vpow2.f32 %v8777_v18  ;;  %vm5854_vm4 = vweird.f32 %v9474_v59 }
 0x738   : > { %v5846_v22 = vsel %vm5843_vm3, %v5845_v12, %v5841_v44  ;;  %9477 = vrcp.f32 %v5035_v2  ;;  %vm5855_vm8 = vmor %vm5853_vm5, %vm5854_vm4  ;;  %v5874_v63 = vand.u32 2147483648, %v5035_v2  ;;  %v5872_v24 = vand.u32 2147483647, %v5035_v2 }
 0x739   : > { %7082 = vst.msk [vmem:[%s11058_s11 + $0x180] sm:$0xff] %vm7033_vm6, %v5846_v22  ;;  %v5850_v40 = vsub.f32 1.0, %v5849_v34  ;;  %vm5868_vm11 = vweird.f32 %v5035_v2 }
 0x73a   : > { %7723 = vst.msk [vmem:[%s11058_s11 + $0x180] sm:$0xff] %vm7674_vm7, %v10892_v62  ;;  %v3708_v61 = vpop.f32.mrf.mxu3  ;;  %v5875_v32 = vor.u32 1.1754944e-38, %v5874_v63  ;;  %vm5873_vm13 = vcmp.eq.f32.partialorder %v5872_v24, 8.507059e+37 }
 0x73b   : > { %v5851_v21 = vmul.f32 %v9474_v59, %v5850_v40  ;;  %v3925_v28 = vmax.f32 %v3708_v61, 0.0  ;;  %v12004_v61 = vld [vmem:[#allocation47_spill] sm:$0xff] }
 0x73c   : > { %v4411_v56 = vpop.f32.mrf.mxu1 }
 0x73d   : > { %v9476_v8 = vpop.eup %9475  ;;  %v5852_v48 = vadd.f32 %v9474_v59, %v5851_v21  ;;  %v4018_v15 = vpack.c.bf16 %v3925_v28, %v3924_v30  ;;  %v8778_v10 = vmul.f32 -1.442695, %v4411_v56  ;;  %v12005_v28 = vld [vmem:[#allocation7_spill] sm:$0xff] }
 0x73e   : > { %v9478_v31 = vpop.eup %9477  ;;  %v5036_v55 = vadd.f32 1.0, %v9476_v8 }
 0x73f   : > { %v5856_v62 = vsel %vm5855_vm8, %v9474_v59, %v5852_v48  ;;  %v5864_v0 = vmul.f32 %v9478_v31, %v5035_v2  ;;  %9479 = vpow2.f32 %v8778_v10  ;;  %3750 = vmatmul.bf16.gmra.mxu3 %v10651_v41  ;;  %8696 = vmatmul.msk.bf16.gmra.mxu1 %vm2493_vm2, %v4018_v15  ;;  %vm5869_vm10 = vweird.f32 %v9478_v31 }
 0x740   : > { %v5861_v47 = vsel %vm5858_vm9, %v5860_v43, %v5856_v62  ;;  %9481 = vrcp.f32 %v5036_v55  ;;  %vm5870_vm12 = vmor %vm5868_vm11, %vm5869_vm10  ;;  %v5887_v27 = vand.u32 2147483647, %v5036_v55  ;;  %v5889_v35 = vand.u32 2147483648, %v5036_v55 }
 0x741   : > { %7083 = vst.msk [vmem:[%s11058_s11 + $0x188] sm:$0xff] %vm7033_vm6, %v5861_v47  ;;  %v5865_v23 = vsub.f32 1.0, %v5864_v0  ;;  %vm5883_vm15 = vweird.f32 %v5036_v55 }
 0x742   : > { %7724 = vst.msk [vmem:[%s11058_s11 + $0x188] sm:$0xff] %vm7674_vm7, %v10903_v3  ;;  %v3711_v33 = vpop.f32.mrf.mxu3  ;;  %v5890_v40 = vor.u32 1.1754944e-38, %v5889_v35  ;;  %vm5888_vm1 = vcmp.eq.f32.partialorder %v5887_v27, 8.507059e+37 }
 0x743   : > { %v5866_v25 = vmul.f32 %v9478_v31, %v5865_v23  ;;  %v3926_v13 = vmax.f32 %v3711_v33, 0.0 }
 0x744   : > { %v4413_v19 = vpop.f32.mrf.mxu1 }
 0x745   : > { %v9480_v14 = vpop.eup %9479  ;;  %v5867_v41 = vadd.f32 %v9478_v31, %v5866_v25  ;;  %v8779_v57 = vmul.f32 -1.442695, %v4413_v19 }
 0x746   : > { %v9482_v9 = vpop.eup %9481  ;;  %v5037_v60 = vadd.f32 1.0, %v9480_v14 }
 0x747   : > { %v5871_v58 = vsel %vm5870_vm12, %v9478_v31, %v5867_v41  ;;  %v5879_v17 = vmul.f32 %v9482_v9, %v5036_v55  ;;  %9483 = vpow2.f32 %v8779_v57  ;;  %vm5884_vm14 = vweird.f32 %v9482_v9 }
 0x748   : > { %v5876_v3 = vsel %vm5873_vm13, %v5875_v32, %v5871_v58  ;;  %9485 = vrcp.f32 %v5037_v60  ;;  %vm5885_vm0 = vmor %vm5883_vm15, %vm5884_vm14  ;;  %v5904_v56 = vand.u32 2147483648, %v5037_v60  ;;  %v5902_v15 = vand.u32 2147483647, %v5037_v60 }
 0x749   : > { %7084 = vst.msk [vmem:[%s11058_s11 + $0x190] sm:$0xff] %vm7033_vm6, %v5876_v3  ;;  %v5880_v7 = vsub.f32 1.0, %v5879_v17  ;;  %vm5898_vm4 = vweird.f32 %v5037_v60 }
 0x74a   : > { %7725 = vst.msk [vmem:[%s11058_s11 + $0x190] sm:$0xff] %vm7674_vm7, %v10924_v29  ;;  %v3713_v51 = vpop.f32.mrf.mxu3  ;;  %v5905_v0 = vor.u32 1.1754944e-38, %v5904_v56  ;;  %vm5903_vm8 = vcmp.eq.f32.partialorder %v5902_v15, 8.507059e+37 }
 0x74b   : > { %v5881_v5 = vmul.f32 %v9482_v9, %v5880_v7  ;;  %v3927_v18 = vmax.f32 %v3713_v51, 0.0 }
 0x74c   : > { %v4416_v59 = vpop.f32.mrf.mxu1 }
 0x74d   : > { %v9484_v12 = vpop.eup %9483  ;;  %v5882_v2 = vadd.f32 %v9482_v9, %v5881_v5  ;;  %v4019_v44 = vpack.c.bf16 %v3927_v18, %v3926_v13  ;;  %v8780_v34 = vmul.f32 -1.442695, %v4416_v59  ;;  %v12006_v5 = vld [vmem:[#allocation48_spill] sm:$0xff]  ;;  %v12007_v59 = vld [vmem:[#allocation17_spill] sm:$0xff] }
 0x74e   : > { %v9486_v22 = vpop.eup %9485  ;;  %v5038_v38 = vadd.f32 1.0, %v9484_v12 }
 0x74f   : > { %v5886_v29 = vsel %vm5885_vm0, %v9482_v9, %v5882_v2  ;;  %v5894_v45 = vmul.f32 %v9486_v22, %v5037_v60  ;;  %9487 = vpow2.f32 %v8780_v34  ;;  %3755 = vmatmul.bf16.gmra.mxu3 %v12004_v61  ;;  %8697 = vmatmul.msk.bf16.gmra.mxu1 %vm2493_vm2, %v4019_v44  ;;  %vm5899_vm3 = vweird.f32 %v9486_v22 }
 0x750   : > { %v5891_v21 = vsel %vm5888_vm1, %v5890_v40, %v5886_v29  ;;  %9489 = vrcp.f32 %v5038_v38  ;;  %vm5900_vm5 = vmor %vm5898_vm4, %vm5899_vm3  ;;  %v5917_v24 = vand.u32 2147483647, %v5038_v38  ;;  %v5919_v19 = vand.u32 2147483648, %v5038_v38 }
 0x751   : > { %7085 = vst.msk [vmem:[%s11058_s11 + $0x198] sm:$0xff] %vm7033_vm6, %v5891_v21  ;;  %v5895_v30 = vsub.f32 1.0, %v5894_v45  ;;  %vm5913_vm10 = vweird.f32 %v5038_v38 }
 0x752   : > { %7726 = vst.msk [vmem:[%s11058_s11 + $0x198] sm:$0xff] %vm7674_vm7, %v12005_v28  ;;  %v3716_v8 = vpop.f32.mrf.mxu3  ;;  %v5920_v27 = vor.u32 1.1754944e-38, %v5919_v19  ;;  %vm5918_vm12 = vcmp.eq.f32.partialorder %v5917_v24, 8.507059e+37 }
 0x753   : > { %v5896_v48 = vmul.f32 %v9486_v22, %v5895_v30  ;;  %v3928_v57 = vmax.f32 %v3716_v8, 0.0 }
 0x754   : > { %v4418_v10 = vpop.f32.mrf.mxu1 }
 0x755   : > { %v9488_v31 = vpop.eup %9487  ;;  %v5897_v43 = vadd.f32 %v9486_v22, %v5896_v48  ;;  %v8781_v55 = vmul.f32 -1.442695, %v4418_v10  ;;  %v12008_v48 = vld [vmem:[#allocation13_spill] sm:$0xff] }
 0x756   : > { %v9490_v62 = vpop.eup %9489  ;;  %v5039_v47 = vadd.f32 1.0, %v9488_v31 }
 0x757   : > { %v5901_v23 = vsel %vm5900_vm5, %v9486_v22, %v5897_v43  ;;  %v5909_v63 = vmul.f32 %v9490_v62, %v5038_v38  ;;  %9491 = vpow2.f32 %v8781_v55  ;;  %vm5914_vm9 = vweird.f32 %v9490_v62 }
 0x758   : > { %v5906_v33 = vsel %vm5903_vm8, %v5905_v0, %v5901_v23  ;;  %9493 = vrcp.f32 %v5039_v47  ;;  %vm5915_vm11 = vmor %vm5913_vm10, %vm5914_vm9  ;;  %v5934_v12 = vand.u32 2147483648, %v5039_v47  ;;  %v5932_v34 = vand.u32 2147483647, %v5039_v47 }
 0x759   : > { %7086 = vst.msk [vmem:[%s11058_s11 + $0x1a0] sm:$0xff] %vm7033_vm6, %v5906_v33  ;;  %v5910_v25 = vsub.f32 1.0, %v5909_v63  ;;  %vm5928_vm14 = vweird.f32 %v5039_v47 }
 0x75a   : > { %7727 = vst.msk [vmem:[%s11058_s11 + $0x1a0] sm:$0xff] %vm7674_vm7, %v10913_v42  ;;  %v3718_v14 = vpop.f32.mrf.mxu3  ;;  %v5935_v61 = vor.u32 1.1754944e-38, %v5934_v12  ;;  %vm5933_vm0 = vcmp.eq.f32.partialorder %v5932_v34, 8.507059e+37 }
 0x75b   : > { %v5911_v41 = vmul.f32 %v9490_v62, %v5910_v25  ;;  %v3929_v9 = vmax.f32 %v3718_v14, 0.0 }
 0x75c   : > { %v4421_v32 = vpop.f32.mrf.mxu1 }
 0x75d   : > { %v9492_v60 = vpop.eup %9491  ;;  %v5912_v58 = vadd.f32 %v9490_v62, %v5911_v41  ;;  %v4020_v17 = vpack.c.bf16 %v3929_v9, %v3928_v57  ;;  %v8782_v3 = vmul.f32 -1.442695, %v4421_v32  ;;  %v12009_v57 = vld [vmem:[#allocation49_spill] sm:$0xff] }
 0x75e   : > { %v9494_v7 = vpop.eup %9493  ;;  %v5040_v35 = vadd.f32 1.0, %v9492_v60  ;;  %v12010_v60 = vld [vmem:[#allocation15_spill] sm:$0xff] }
 0x75f   : > { %v5916_v42 = vsel %vm5915_vm11, %v9490_v62, %v5912_v58  ;;  %v5924_v51 = vmul.f32 %v9494_v7, %v5039_v47  ;;  %9495 = vpow2.f32 %v8782_v3  ;;  %3760 = vmatmul.bf16.gmra.mxu3 %v12006_v5  ;;  %8698 = vmatmul.msk.bf16.gmra.mxu1 %vm2493_vm2, %v4020_v17  ;;  %vm5929_vm13 = vweird.f32 %v9494_v7 }
 0x760   : > { %v5921_v13 = vsel %vm5918_vm12, %v5920_v27, %v5916_v42  ;;  %9497 = vrcp.f32 %v5040_v35  ;;  %vm5930_vm15 = vmor %vm5928_vm14, %vm5929_vm13  ;;  %v5947_v15 = vand.u32 2147483647, %v5040_v35  ;;  %v5949_v10 = vand.u32 2147483648, %v5040_v35 }
 0x761   : > { %7087 = vst.msk [vmem:[%s11058_s11 + $0x1a8] sm:$0xff] %vm7033_vm6, %v5921_v13  ;;  %v5925_v18 = vsub.f32 1.0, %v5924_v51  ;;  %vm5943_vm3 = vweird.f32 %v5040_v35 }
 0x762   : > { %7728 = vst.msk [vmem:[%s11058_s11 + $0x1a8] sm:$0xff] %vm7674_vm7, %v12007_v59  ;;  %v3721_v2 = vpop.f32.mrf.mxu3  ;;  %v5950_v24 = vor.u32 1.1754944e-38, %v5949_v10  ;;  %vm5948_vm5 = vcmp.eq.f32.partialorder %v5947_v15, 8.507059e+37 }
 0x763   : > { %v5926_v44 = vmul.f32 %v9494_v7, %v5925_v18  ;;  %v3930_v55 = vmax.f32 %v3721_v2, 0.0 }
 0x764   : > { %v4423_v22 = vpop.f32.mrf.mxu1 }
 0x765   : > { %v9496_v40 = vpop.eup %9495  ;;  %v5927_v38 = vadd.f32 %v9494_v7, %v5926_v44  ;;  %v8783_v29 = vmul.f32 -1.442695, %v4423_v22 }
 0x766   : > { %v9498_v45 = vpop.eup %9497  ;;  %v5041_v21 = vadd.f32 1.0, %v9496_v40 }
 0x767   : > { %v5931_v30 = vsel %vm5930_vm15, %v9494_v7, %v5927_v38  ;;  %v5939_v28 = vmul.f32 %v9498_v45, %v5040_v35  ;;  %9499 = vpow2.f32 %v8783_v29  ;;  %vm5944_vm1 = vweird.f32 %v9498_v45 }
 0x768   : > { %v5936_v56 = vsel %vm5933_vm0, %v5935_v61, %v5931_v30  ;;  %9501 = vrcp.f32 %v5041_v21  ;;  %vm5945_vm4 = vmor %vm5943_vm3, %vm5944_vm1  ;;  %v5964_v58 = vand.u32 2147483648, %v5041_v21  ;;  %v5962_v7 = vand.u32 2147483647, %v5041_v21 }
 0x769   : > { %7088 = vst.msk [vmem:[%s11058_s11 + $0x1b0] sm:$0xff] %vm7033_vm6, %v5936_v56  ;;  %v5940_v8 = vsub.f32 1.0, %v5939_v28  ;;  %vm5958_vm9 = vweird.f32 %v5041_v21 }
 0x76a   : > { %7729 = vst.msk [vmem:[%s11058_s11 + $0x1b0] sm:$0xff] %vm7674_vm7, %v12008_v48  ;;  %v3723_v31 = vpop.f32.mrf.mxu3  ;;  %v5965_v13 = vor.u32 1.1754944e-38, %v5964_v58  ;;  %vm5963_vm11 = vcmp.eq.f32.partialorder %v5962_v7, 8.507059e+37 }
 0x76b   : > { %v5941_v43 = vmul.f32 %v9498_v45, %v5940_v8  ;;  %v3931_v62 = vmax.f32 %v3723_v31, 0.0  ;;  %v12011_v31 = vld [vmem:[#allocation50_spill] sm:$0xff] }
 0x76c   : > { %v4426_v0 = vpop.f32.mrf.mxu1 }
 0x76d   : > { %v9500_v47 = vpop.eup %9499  ;;  %v5942_v23 = vadd.f32 %v9498_v45, %v5941_v43  ;;  %v4021_v63 = vpack.c.bf16 %v3931_v62, %v3930_v55  ;;  %v8784_v33 = vmul.f32 -1.442695, %v4426_v0  ;;  %v12012_v62 = vld [vmem:[#allocation16_spill] sm:$0xff] }
 0x76e   : > { %v9502_v25 = vpop.eup %9501  ;;  %v5042_v19 = vadd.f32 1.0, %v9500_v47 }
 0x76f   : > { %v5946_v14 = vsel %vm5945_vm4, %v9498_v45, %v5942_v23  ;;  %v5954_v41 = vmul.f32 %v9502_v25, %v5041_v21  ;;  %9503 = vpow2.f32 %v8784_v33  ;;  %3765 = vmatmul.bf16.gmra.mxu3 %v12009_v57  ;;  %8699 = vmatmul.msk.bf16.gmra.mxu1 %vm2493_vm2, %v4021_v63  ;;  %vm5959_vm8 = vweird.f32 %v9502_v25 }
 0x770   : > { %v5951_v9 = vsel %vm5948_vm5, %v5950_v24, %v5946_v14  ;;  %9505 = vrcp.f32 %v5042_v19  ;;  %vm5960_vm10 = vmor %vm5958_vm9, %vm5959_vm8  ;;  %v5977_v34 = vand.u32 2147483647, %v5042_v19  ;;  %v5979_v22 = vand.u32 2147483648, %v5042_v19 }
 0x771   : > { %7089 = vst.msk [vmem:[%s11058_s11 + $0x1b8] sm:$0xff] %vm7033_vm6, %v5951_v9  ;;  %v5955_v32 = vsub.f32 1.0, %v5954_v41  ;;  %vm5973_vm13 = vweird.f32 %v5042_v19 }
 0x772   : > { %7730 = vst.msk [vmem:[%s11058_s11 + $0x1b8] sm:$0xff] %vm7674_vm7, %v12010_v60  ;;  %v3726_v17 = vpop.f32.mrf.mxu3  ;;  %v5980_v48 = vor.u32 1.1754944e-38, %v5979_v22  ;;  %vm5978_vm15 = vcmp.eq.f32.partialorder %v5977_v34, 8.507059e+37  ;;  %v12013_v22 = vld [vmem:[#allocation2_spill] sm:$0xff] }
 0x773   : > { %v5956_v3 = vmul.f32 %v9502_v25, %v5955_v32  ;;  %v3932_v29 = vmax.f32 %v3726_v17, 0.0 }
 0x774   : > { %v4428_v27 = vpop.f32.mrf.mxu1 }
 0x775   : > { %v9504_v35 = vpop.eup %9503  ;;  %v5957_v42 = vadd.f32 %v9502_v25, %v5956_v3  ;;  %v8785_v51 = vmul.f32 -1.442695, %v4428_v27 }
 0x776   : > { %v9506_v5 = vpop.eup %9505  ;;  %v5043_v18 = vadd.f32 1.0, %v9504_v35 }
 0x777   : > { %v5961_v59 = vsel %vm5960_vm10, %v9502_v25, %v5957_v42  ;;  %v5969_v12 = vmul.f32 %v9506_v5, %v5042_v19  ;;  %9507 = vpow2.f32 %v8785_v51  ;;  %vm5974_vm12 = vweird.f32 %v9506_v5 }
 0x778   : > { %v5966_v2 = vsel %vm5963_vm11, %v5965_v13, %v5961_v59  ;;  %9509 = vrcp.f32 %v5043_v18  ;;  %vm5975_vm14 = vmor %vm5973_vm13, %vm5974_vm12  ;;  %v5994_v0 = vand.u32 2147483648, %v5043_v18  ;;  %v5992_v63 = vand.u32 2147483647, %v5043_v18 }
 0x779   : > { %7090 = vst.msk [vmem:[%s11058_s11 + $0x1c0] sm:$0xff] %vm7033_vm6, %v5966_v2  ;;  %v5970_v44 = vsub.f32 1.0, %v5969_v12  ;;  %vm5988_vm1 = vweird.f32 %v5043_v18 }
 0x77a   : > { %7731 = vst.msk [vmem:[%s11058_s11 + $0x1c0] sm:$0xff] %vm7674_vm7, %v10947_v46  ;;  %v3728_v40 = vpop.f32.mrf.mxu3  ;;  %v5995_v41 = vor.u32 1.1754944e-38, %v5994_v0  ;;  %vm5993_vm4 = vcmp.eq.f32.partialorder %v5992_v63, 8.507059e+37  ;;  %v12015_v0 = vld [vmem:[#allocation18_spill] sm:$0xff] }
 0x77b   : > { %v5971_v38 = vmul.f32 %v9506_v5, %v5970_v44  ;;  %v3933_v45 = vmax.f32 %v3728_v40, 0.0 }
 0x77c   : > { %v4431_v61 = vpop.f32.mrf.mxu1 }
 0x77d   : > { %v9508_v21 = vpop.eup %9507  ;;  %v5972_v30 = vadd.f32 %v9506_v5, %v5971_v38  ;;  %v4022_v28 = vpack.c.bf16 %v3933_v45, %v3932_v29  ;;  %v8786_v56 = vmul.f32 -1.442695, %v4431_v61  ;;  %v12014_v29 = vld [vmem:[#allocation22_spill] sm:$0xff] }
 0x77e   : > { %v9510_v8 = vpop.eup %9509  ;;  %v5044_v15 = vadd.f32 1.0, %v9508_v21 }
 0x77f   : > { %v5976_v46 = vsel %vm5975_vm14, %v9506_v5, %v5972_v30  ;;  %v5984_v10 = vmul.f32 %v9510_v8, %v5043_v18  ;;  %9511 = vpow2.f32 %v8786_v56  ;;  %3770 = vmatmul.bf16.gmra.mxu3 %v12011_v31  ;;  %8700 = vmatmul.msk.bf16.gmra.mxu1 %vm2493_vm2, %v4022_v28  ;;  %vm5989_vm0 = vweird.f32 %v9510_v8 }
 0x780   : > { %v5981_v43 = vsel %vm5978_vm15, %v5980_v48, %v5976_v46  ;;  %9513 = vrcp.f32 %v5044_v15  ;;  %vm5990_vm3 = vmor %vm5988_vm1, %vm5989_vm0  ;;  %v6007_v17 = vand.u32 2147483647, %v5044_v15  ;;  %v6009_v3 = vand.u32 2147483648, %v5044_v15 }
 0x781   : > { %7091 = vst.msk [vmem:[%s11058_s11 + $0x1c8] sm:$0xff] %vm7033_vm6, %v5981_v43  ;;  %v5985_v55 = vsub.f32 1.0, %v5984_v10  ;;  %vm6003_vm8 = vweird.f32 %v5044_v15 }
 0x782   : > { %7732 = vst.msk [vmem:[%s11058_s11 + $0x1c8] sm:$0xff] %vm7674_vm7, %v12012_v62  ;;  %v3731_v47 = vpop.f32.mrf.mxu3  ;;  %v6010_v2 = vor.u32 1.1754944e-38, %v6009_v3  ;;  %vm6008_vm10 = vcmp.eq.f32.partialorder %v6007_v17, 8.507059e+37 }
 0x783   : > { %v5986_v23 = vmul.f32 %v9510_v8, %v5985_v55  ;;  %v3934_v35 = vmax.f32 %v3731_v47, 0.0 }
 0x784   : > { %v4433_v33 = vpop.f32.mrf.mxu1 }
 0x785   : > { %v9512_v25 = vpop.eup %9511  ;;  %v5987_v24 = vadd.f32 %v9510_v8, %v5986_v23  ;;  %v8787_v19 = vmul.f32 -1.442695, %v4433_v33 }
 0x786   : > { %v9514_v14 = vpop.eup %9513  ;;  %v5045_v57 = vadd.f32 1.0, %v9512_v25 }
 0x787   : > { %v5991_v9 = vsel %vm5990_vm3, %v9510_v8, %v5987_v24  ;;  %v5999_v32 = vmul.f32 %v9514_v14, %v5044_v15  ;;  %9515 = vpow2.f32 %v8787_v19  ;;  %vm6004_vm5 = vweird.f32 %v9514_v14 }
 0x788   : > { %v5996_v60 = vsel %vm5993_vm4, %v5995_v41, %v5991_v9  ;;  %9517 = vrcp.f32 %v5045_v57  ;;  %vm6005_vm9 = vmor %vm6003_vm8, %vm6004_vm5  ;;  %v6024_v45 = vand.u32 2147483648, %v5045_v57  ;;  %v6022_v30 = vand.u32 2147483647, %v5045_v57 }
 0x789   : > { %7092 = vst.msk [vmem:[%s11058_s11 + $0x1d0] sm:$0xff] %vm7033_vm6, %v5996_v60  ;;  %v6000_v58 = vsub.f32 1.0, %v5999_v32  ;;  %vm6018_vm12 = vweird.f32 %v5045_v57 }
 0x78a   : > { %7733 = vst.msk [vmem:[%s11058_s11 + $0x1d0] sm:$0xff] %vm7674_vm7, %v10936_v54  ;;  %v3733_v7 = vpop.f32.mrf.mxu3  ;;  %v6025_v46 = vor.u32 1.1754944e-38, %v6024_v45  ;;  %vm6023_vm14 = vcmp.eq.f32.partialorder %v6022_v30, 8.507059e+37 }
 0x78b   : > { %v6001_v27 = vmul.f32 %v9514_v14, %v6000_v58  ;;  %v3935_v42 = vmax.f32 %v3733_v7, 0.0  ;;  %v12016_v7 = vld [vmem:[#allocation8_spill] sm:$0xff] }
 0x78c   : > { %v4436_v51 = vpop.f32.mrf.mxu1 }
 0x78d   : > { %v9516_v5 = vpop.eup %9515  ;;  %v6002_v13 = vadd.f32 %v9514_v14, %v6001_v27  ;;  %v4023_v18 = vpack.c.bf16 %v3935_v42, %v3934_v35  ;;  %v8788_v59 = vmul.f32 -1.442695, %v4436_v51  ;;  %v12017_v42 = vld [vmem:[#allocation20_spill] sm:$0xff] }
 0x78e   : > { %v9518_v12 = vpop.eup %9517  ;;  %v5046_v44 = vadd.f32 1.0, %v9516_v5 }
 0x78f   : > { %v6006_v54 = vsel %vm6005_vm9, %v9514_v14, %v6002_v13  ;;  %v6014_v34 = vmul.f32 %v9518_v12, %v5045_v57  ;;  %9519 = vpow2.f32 %v8788_v59  ;;  %3775 = vmatmul.bf16.gmra.mxu3 %v12013_v22  ;;  %8701 = vmatmul.msk.bf16.gmra.mxu1 %vm2493_vm2, %v4023_v18  ;;  %vm6019_vm11 = vweird.f32 %v9518_v12 }
 0x790   : > { %v6011_v40 = vsel %vm6008_vm10, %v6010_v2, %v6006_v54  ;;  %9521 = vrcp.f32 %v5046_v44  ;;  %vm6020_vm13 = vmor %vm6018_vm12, %vm6019_vm11  ;;  %v6037_v47 = vand.u32 2147483647, %v5046_v44  ;;  %v6039_v23 = vand.u32 2147483648, %v5046_v44 }
 0x791   : > { %7093 = vst.msk [vmem:[%s11058_s11 + $0x1d8] sm:$0xff] %vm7033_vm6, %v6011_v40  ;;  %v6015_v38 = vsub.f32 1.0, %v6014_v34  ;;  %vm6033_vm0 = vweird.f32 %v5046_v44 }
 0x792   : > { %7734 = vst.msk [vmem:[%s11058_s11 + $0x1d8] sm:$0xff] %vm7674_vm7, %v12014_v29  ;;  %v3736_v61 = vpop.f32.mrf.mxu3  ;;  %v6040_v60 = vor.u32 1.1754944e-38, %v6039_v23  ;;  %vm6038_vm3 = vcmp.eq.f32.partialorder %v6037_v47, 8.507059e+37  ;;  %v12018_v47 = vld [vmem:[#allocation3_spill] sm:$0xff] }
 0x793   : > { %v6016_v21 = vmul.f32 %v9518_v12, %v6015_v38  ;;  %v3936_v25 = vmax.f32 %v3736_v61, 0.0 }
 0x794   : > { %v4438_v28 = vpop.f32.mrf.mxu1 }
 0x795   : > { %v9520_v56 = vpop.eup %9519  ;;  %v6017_v8 = vadd.f32 %v9518_v12, %v6016_v21  ;;  %v8789_v48 = vmul.f32 -1.442695, %v4438_v28 }
 0x796   : > { %v9522_v15 = vpop.eup %9521  ;;  %v5047_v10 = vadd.f32 1.0, %v9520_v56 }
 0x797   : > { %v6021_v31 = vsel %vm6020_vm13, %v9518_v12, %v6017_v8  ;;  %v6029_v43 = vmul.f32 %v9522_v15, %v5046_v44  ;;  %9523 = vpow2.f32 %v8789_v48  ;;  %vm6034_vm15 = vweird.f32 %v9522_v15 }
 0x798   : > { %v6026_v55 = vsel %vm6023_vm14, %v6025_v46, %v6021_v31  ;;  %9525 = vrcp.f32 %v5047_v10  ;;  %vm6035_vm1 = vmor %vm6033_vm0, %vm6034_vm15  ;;  %v6054_v51 = vand.u32 2147483648, %v5047_v10  ;;  %v6052_v18 = vand.u32 2147483647, %v5047_v10 }
 0x799   : > { %7094 = vst.msk [vmem:[%s11058_s11 + $0x1e0] sm:$0xff] %vm7033_vm6, %v6026_v55  ;;  %v6030_v62 = vsub.f32 1.0, %v6029_v43  ;;  %vm6048_vm5 = vweird.f32 %v5047_v10 }
 0x79a   : > { %7735 = vst.msk [vmem:[%s11058_s11 + $0x1e0] sm:$0xff] %vm7674_vm7, %v12015_v0  ;;  %v3738_v63 = vpop.f32.mrf.mxu3  ;;  %v6055_v34 = vor.u32 1.1754944e-38, %v6054_v51  ;;  %vm6053_vm9 = vcmp.eq.f32.partialorder %v6052_v18, 8.507059e+37 }
 0x79b   : > { %v6031_v33 = vmul.f32 %v9522_v15, %v6030_v62  ;;  %v3937_v24 = vmax.f32 %v3738_v63, 0.0 }
 0x79c   : > { %v4441_v19 = vpop.f32.mrf.mxu1 }
 0x79d   : > { %v9524_v14 = vpop.eup %9523  ;;  %v6032_v41 = vadd.f32 %v9522_v15, %v6031_v33  ;;  %v4024_v57 = vpack.c.bf16 %v3937_v24, %v3936_v25  ;;  %v8790_v9 = vmul.f32 -1.442695, %v4441_v19  ;;  %v12019_v33 = vld [vmem:[#allocation21_spill] sm:$0xff] }
 0x79e   : > { %v9526_v32 = vpop.eup %9525  ;;  %v5048_v58 = vadd.f32 1.0, %v9524_v14 }
 0x79f   : > { %v6036_v17 = vsel %vm6035_vm1, %v9522_v15, %v6032_v41  ;;  %v6044_v3 = vmul.f32 %v9526_v32, %v5047_v10  ;;  %9527 = vpow2.f32 %v8790_v9  ;;  %3780 = vmatmul.bf16.gmra.mxu3 %v12016_v7  ;;  %8702 = vmatmul.msk.bf16.gmra.mxu1 %vm2493_vm2, %v4024_v57  ;;  %vm6049_vm4 = vweird.f32 %v9526_v32 }
 0x7a0   : > { %v6041_v27 = vsel %vm6038_vm3, %v6040_v60, %v6036_v17  ;;  %9529 = vrcp.f32 %v5048_v58  ;;  %vm6050_vm8 = vmor %vm6048_vm5, %vm6049_vm4  ;;  %v6067_v61 = vand.u32 2147483647, %v5048_v58  ;;  %v6069_v21 = vand.u32 2147483648, %v5048_v58 }
 0x7a1   : > { %7095 = vst.msk [vmem:[%s11058_s11 + $0x1e8] sm:$0xff] %vm7033_vm6, %v6041_v27  ;;  %v6045_v35 = vsub.f32 1.0, %v6044_v3  ;;  %vm6063_vm11 = vweird.f32 %v5048_v58 }
 0x7a2   : > { %7736 = vst.msk [vmem:[%s11058_s11 + $0x1e8] sm:$0xff] %vm7674_vm7, %v12017_v42  ;;  %v3741_v5 = vpop.f32.mrf.mxu3  ;;  %v6070_v55 = vor.u32 1.1754944e-38, %v6069_v21  ;;  %vm6068_vm13 = vcmp.eq.f32.partialorder %v6067_v61, 8.507059e+37 }
 0x7a3   : > { %v6046_v13 = vmul.f32 %v9526_v32, %v6045_v35  ;;  %v3938_v56 = vmax.f32 %v3741_v5, 0.0 }
 0x7a4   : > { %v4443_v59 = vpop.f32.mrf.mxu1 }
 0x7a5   : > { %v9528_v12 = vpop.eup %9527  ;;  %v6047_v2 = vadd.f32 %v9526_v32, %v6046_v13  ;;  %v8791_v44 = vmul.f32 -1.442695, %v4443_v59 }
 0x7a6   : > { %v9530_v54 = vpop.eup %9529  ;;  %v5049_v22 = vadd.f32 1.0, %v9528_v12 }
 0x7a7   : > { %v6051_v40 = vsel %vm6050_vm8, %v9526_v32, %v6047_v2  ;;  %v6059_v38 = vmul.f32 %v9530_v54, %v5048_v58  ;;  %9531 = vpow2.f32 %v8791_v44  ;;  %vm6064_vm10 = vweird.f32 %v9530_v54 }
 0x7a8   : > { %v6056_v29 = vsel %vm6053_vm9, %v6055_v34, %v6051_v40  ;;  %9533 = vrcp.f32 %v5049_v22  ;;  %vm6065_vm12 = vmor %vm6063_vm11, %vm6064_vm10  ;;  %v6084_v25 = vand.u32 2147483648, %v5049_v22  ;;  %v6082_v14 = vand.u32 2147483647, %v5049_v22 }
 0x7a9   : > { %7096 = vst.msk [vmem:[%s11058_s11 + $0x1f0] sm:$0xff] %vm7033_vm6, %v6056_v29  ;;  %v6060_v45 = vsub.f32 1.0, %v6059_v38  ;;  %vm6078_vm15 = vweird.f32 %v5049_v22 }
 0x7aa   : > { %7737 = vst.msk [vmem:[%s11058_s11 + $0x1f0] sm:$0xff] %vm7674_vm7, %v10970_v16  ;;  %v3743_v30 = vpop.f32.mrf.mxu3  ;;  %v6085_v58 = vor.u32 1.1754944e-38, %v6084_v25  ;;  %vm6083_vm1 = vcmp.eq.f32.partialorder %v6082_v14, 8.507059e+37 }
 0x7ab   : > { %v6061_v28 = vmul.f32 %v9530_v54, %v6060_v45  ;;  %v3939_v8 = vmax.f32 %v3743_v30, 0.0  ;;  %v12020_v45 = vld [vmem:[#allocation9_spill] sm:$0xff]  ;;  %v12021_v30 = vld [vmem:[#allocation27_spill] sm:$0xff] }
 0x7ac   : > { %v4446_v48 = vpop.f32.mrf.mxu1 }
 0x7ad   : > { %v9532_v15 = vpop.eup %9531  ;;  %v6062_v46 = vadd.f32 %v9530_v54, %v6061_v28  ;;  %v4025_v10 = vpack.c.bf16 %v3939_v8, %v3938_v56  ;;  %v8792_v31 = vmul.f32 -1.442695, %v4446_v48 }
 0x7ae   : > { %v9534_v43 = vpop.eup %9533  ;;  %v5050_v62 = vadd.f32 1.0, %v9532_v15 }
 0x7af   : > { %v6066_v16 = vsel %vm6065_vm12, %v9530_v54, %v6062_v46  ;;  %v6074_v0 = vmul.f32 %v9534_v43, %v5049_v22  ;;  %9535 = vpow2.f32 %v8792_v31  ;;  %3785 = vmatmul.bf16.gmra.mxu3 %v12018_v47  ;;  %8703 = vmatmul.msk.bf16.gmra.mxu1 %vm2493_vm2, %v4025_v10  ;;  %vm6079_vm14 = vweird.f32 %v9534_v43 }
 0x7b0   : > { %v6071_v23 = vsel %vm6068_vm13, %v6070_v55, %v6066_v16  ;;  %9537 = vrcp.f32 %v5050_v62  ;;  %vm6080_vm0 = vmor %vm6078_vm15, %vm6079_vm14  ;;  %v6097_v42 = vand.u32 2147483647, %v5050_v62  ;;  %v6099_v51 = vand.u32 2147483648, %v5050_v62 }
 0x7b1   : > { %7097 = vst.msk [vmem:[%s11058_s11 + $0x1f8] sm:$0xff] %vm7033_vm6, %v6071_v23  ;;  %v6075_v63 = vsub.f32 1.0, %v6074_v0  ;;  %vm6093_vm4 = vweird.f32 %v5050_v62 }
 0x7b2   : > { %7738 = vst.msk [vmem:[%s11058_s11 + $0x1f8] sm:$0xff] %vm7674_vm7, %v12019_v33  ;;  %v3746_v24 = vpop.f32.mrf.mxu3  ;;  %v6100_v40 = vor.u32 1.1754944e-38, %v6099_v51  ;;  %vm6098_vm8 = vcmp.eq.f32.partialorder %v6097_v42, 8.507059e+37  ;;  %v12023_v42 = vld [vmem:[#allocation4_spill] sm:$0xff] }
 0x7b3   : > { %v6076_v19 = vmul.f32 %v9534_v43, %v6075_v63  ;;  %v3940_v18 = vmax.f32 %v3746_v24, 0.0  ;;  %v12022_v63 = vld [vmem:[#allocation23_spill] sm:$0xff] }
 0x7b4   : > { %v4448_v41 = vpop.f32.mrf.mxu1 }
 0x7b5   : > { %v9536_v57 = vpop.eup %9535  ;;  %v6077_v9 = vadd.f32 %v9534_v43, %v6076_v19  ;;  %v8793_v32 = vmul.f32 -1.442695, %v4448_v41 }
 0x7b6   : > { %v9538_v60 = vpop.eup %9537  ;;  %v5051_v17 = vadd.f32 1.0, %v9536_v57 }
 0x7b7   : > { %v6081_v3 = vsel %vm6080_vm0, %v9534_v43, %v6077_v9  ;;  %v6089_v7 = vmul.f32 %v9538_v60, %v5050_v62  ;;  %9539 = vpow2.f32 %v8793_v32  ;;  %vm6094_vm3 = vweird.f32 %v9538_v60 }
 0x7b8   : > { %v6086_v27 = vsel %vm6083_vm1, %v6085_v58, %v6081_v3  ;;  %9541 = vrcp.f32 %v5051_v17  ;;  %vm6095_vm5 = vmor %vm6093_vm4, %vm6094_vm3  ;;  %v6114_v28 = vand.u32 2147483648, %v5051_v17  ;;  %v6112_v48 = vand.u32 2147483647, %v5051_v17 }
 0x7b9   : > { %7098 = vst.msk [vmem:[%s11058_s11 + $0x200] sm:$0xff] %vm7033_vm6, %v6086_v27  ;;  %v6090_v35 = vsub.f32 1.0, %v6089_v7  ;;  %vm6108_vm10 = vweird.f32 %v5051_v17 }
 0x7ba   : > { %7739 = vst.msk [vmem:[%s11058_s11 + $0x200] sm:$0xff] %vm7674_vm7, %v10959_v11  ;;  %v3748_v5 = vpop.f32.mrf.mxu3  ;;  %v6115_v55 = vor.u32 1.1754944e-38, %v6114_v28  ;;  %vm6113_vm12 = vcmp.eq.f32.partialorder %v6112_v48, 8.507059e+37 }
 0x7bb   : > { %v6091_v13 = vmul.f32 %v9538_v60, %v6090_v35  ;;  %v3941_v59 = vmax.f32 %v3748_v5, 0.0 }
 0x7bc   : > { %v4451_v12 = vpop.f32.mrf.mxu1 }
 0x7bd   : > { %v9540_v2 = vpop.eup %9539  ;;  %v6092_v44 = vadd.f32 %v9538_v60, %v6091_v13  ;;  %v4026_v54 = vpack.c.bf16 %v3941_v59, %v3940_v18  ;;  %v8794_v34 = vmul.f32 -1.442695, %v4451_v12  ;;  %v12024_v13 = vld [vmem:[#allocation25_spill] sm:$0xff] }
 0x7be   : > { %v9542_v22 = vpop.eup %9541  ;;  %v5052_v38 = vadd.f32 1.0, %v9540_v2 }
 0x7bf   : > { %v6096_v11 = vsel %vm6095_vm5, %v9538_v60, %v6092_v44  ;;  %v6104_v29 = vmul.f32 %v9542_v22, %v5051_v17  ;;  %9543 = vpow2.f32 %v8794_v34  ;;  %3790 = vmatmul.bf16.gmra.mxu3 %v12020_v45  ;;  %8704 = vmatmul.msk.bf16.gmra.mxu1 %vm2493_vm2, %v4026_v54  ;;  %vm6109_vm9 = vweird.f32 %v9542_v22 }
 0x7c0   : > { %v6101_v61 = vsel %vm6098_vm8, %v6100_v40, %v6096_v11  ;;  %9545 = vrcp.f32 %v5052_v38  ;;  %vm6110_vm11 = vmor %vm6108_vm10, %vm6109_vm9  ;;  %v6127_v33 = vand.u32 2147483647, %v5052_v38  ;;  %v6129_v25 = vand.u32 2147483648, %v5052_v38 }
 0x7c1   : > { %7099 = vst.msk [vmem:[%s11058_s11 + $0x208] sm:$0xff] %vm7033_vm6, %v6101_v61  ;;  %v6105_v21 = vsub.f32 1.0, %v6104_v29  ;;  %vm6123_vm14 = vweird.f32 %v5052_v38 }
 0x7c2   : > { %7740 = vst.msk [vmem:[%s11058_s11 + $0x208] sm:$0xff] %vm7674_vm7, %v12021_v30  ;;  %v3751_v56 = vpop.f32.mrf.mxu3  ;;  %v6130_v3 = vor.u32 1.1754944e-38, %v6129_v25  ;;  %vm6128_vm0 = vcmp.eq.f32.partialorder %v6127_v33, 8.507059e+37  ;;  %v12026_v25 = vld [vmem:[#allocation26_spill] sm:$0xff] }
 0x7c3   : > { %v6106_v8 = vmul.f32 %v9542_v22, %v6105_v21  ;;  %v3942_v14 = vmax.f32 %v3751_v56, 0.0 }
 0x7c4   : > { %v4453_v15 = vpop.f32.mrf.mxu1 }
 0x7c5   : > { %v9544_v46 = vpop.eup %9543  ;;  %v6107_v10 = vadd.f32 %v9542_v22, %v6106_v8  ;;  %v8795_v31 = vmul.f32 -1.442695, %v4453_v15 }
 0x7c6   : > { %v9546_v43 = vpop.eup %9545  ;;  %v5053_v62 = vadd.f32 1.0, %v9544_v46 }
 0x7c7   : > { %v6111_v16 = vsel %vm6110_vm11, %v9542_v22, %v6107_v10  ;;  %v6119_v0 = vmul.f32 %v9546_v43, %v5052_v38  ;;  %9547 = vpow2.f32 %v8795_v31  ;;  %vm6124_vm13 = vweird.f32 %v9546_v43 }
 0x7c8   : > { %v6116_v47 = vsel %vm6113_vm12, %v6115_v55, %v6111_v16  ;;  %9549 = vrcp.f32 %v5053_v62  ;;  %vm6125_vm15 = vmor %vm6123_vm14, %vm6124_vm13  ;;  %v6144_v18 = vand.u32 2147483648, %v5053_v62  ;;  %v6142_v2 = vand.u32 2147483647, %v5053_v62 }
 0x7c9   : > { %7100 = vst.msk [vmem:[%s11058_s11 + $0x210] sm:$0xff] %vm7033_vm6, %v6116_v47  ;;  %v6120_v23 = vsub.f32 1.0, %v6119_v0  ;;  %vm6138_vm3 = vweird.f32 %v5053_v62 }
 0x7ca   : > { %7741 = vst.msk [vmem:[%s11058_s11 + $0x210] sm:$0xff] %vm7674_vm7, %v12022_v63  ;;  %v3753_v24 = vpop.f32.mrf.mxu3  ;;  %v6145_v38 = vor.u32 1.1754944e-38, %v6144_v18  ;;  %vm6143_vm5 = vcmp.eq.f32.partialorder %v6142_v2, 8.507059e+37 }
 0x7cb   : > { %v6121_v19 = vmul.f32 %v9546_v43, %v6120_v23  ;;  %v3943_v41 = vmax.f32 %v3753_v24, 0.0  ;;  %v12025_v23 = vld [vmem:[#allocation10_spill] sm:$0xff] }
 0x7cc   : > { %v4456_v57 = vpop.f32.mrf.mxu1 }
 0x7cd   : > { %v9548_v9 = vpop.eup %9547  ;;  %v6122_v32 = vadd.f32 %v9546_v43, %v6121_v19  ;;  %v4027_v60 = vpack.c.bf16 %v3943_v41, %v3942_v14  ;;  %v8796_v58 = vmul.f32 -1.442695, %v4456_v57 }
 0x7ce   : > { %v9550_v17 = vpop.eup %9549  ;;  %v5054_v7 = vadd.f32 1.0, %v9548_v9 }
 0x7cf   : > { %v6126_v27 = vsel %vm6125_vm15, %v9546_v43, %v6122_v32  ;;  %v6134_v35 = vmul.f32 %v9550_v17, %v5053_v62  ;;  %9551 = vpow2.f32 %v8796_v58  ;;  %3795 = vmatmul.bf16.gmra.mxu3 %v12023_v42  ;;  %8705 = vmatmul.msk.bf16.gmra.mxu1 %vm2493_vm2, %v4027_v60  ;;  %vm6139_vm1 = vweird.f32 %v9550_v17 }
 0x7d0   : > { %v6131_v51 = vsel %vm6128_vm0, %v6130_v3, %v6126_v27  ;;  %9553 = vrcp.f32 %v5054_v7  ;;  %vm6140_vm4 = vmor %vm6138_vm3, %vm6139_vm1  ;;  %v6157_v30 = vand.u32 2147483647, %v5054_v7  ;;  %v6159_v28 = vand.u32 2147483648, %v5054_v7 }
 0x7d1   : > { %7101 = vst.msk [vmem:[%s11058_s11 + $0x218] sm:$0xff] %vm7033_vm6, %v6131_v51  ;;  %v6135_v5 = vsub.f32 1.0, %v6134_v35  ;;  %vm6153_vm9 = vweird.f32 %v5054_v7 }
 0x7d2   : > { %7742 = vst.msk [vmem:[%s11058_s11 + $0x218] sm:$0xff] %vm7674_vm7, %v12024_v13  ;;  %v3756_v59 = vpop.f32.mrf.mxu3  ;;  %v6160_v16 = vor.u32 1.1754944e-38, %v6159_v28  ;;  %vm6158_vm11 = vcmp.eq.f32.partialorder %v6157_v30, 8.507059e+37 }
 0x7d3   : > { %v6136_v12 = vmul.f32 %v9550_v17, %v6135_v5  ;;  %v3944_v48 = vmax.f32 %v3756_v59, 0.0 }
 0x7d4   : > { %v4458_v44 = vpop.f32.mrf.mxu1 }
 0x7d5   : > { %v9552_v54 = vpop.eup %9551  ;;  %v6137_v34 = vadd.f32 %v9550_v17, %v6136_v12  ;;  %v8797_v22 = vmul.f32 -1.442695, %v4458_v44 }
 0x7d6   : > { %v9554_v40 = vpop.eup %9553  ;;  %v5055_v11 = vadd.f32 1.0, %v9552_v54 }
 0x7d7   : > { %v6141_v29 = vsel %vm6140_vm4, %v9550_v17, %v6137_v34  ;;  %v6149_v45 = vmul.f32 %v9554_v40, %v5054_v7  ;;  %9555 = vpow2.f32 %v8797_v22  ;;  %vm6154_vm8 = vweird.f32 %v9554_v40 }
 0x7d8   : > { %v6146_v61 = vsel %vm6143_vm5, %v6145_v38, %v6141_v29  ;;  %9557 = vrcp.f32 %v5055_v11  ;;  %vm6155_vm10 = vmor %vm6153_vm9, %vm6154_vm8  ;;  %v6174_v24 = vand.u32 2147483648, %v5055_v11  ;;  %v6172_v41 = vand.u32 2147483647, %v5055_v11 }
 0x7d9   : > { %7102 = vst.msk [vmem:[%s11058_s11 + $0x220] sm:$0xff] %vm7033_vm6, %v6146_v61  ;;  %v6150_v21 = vsub.f32 1.0, %v6149_v45  ;;  %vm6168_vm13 = vweird.f32 %v5055_v11  ;;  %v12027_v45 = vld [vmem:[#allocation5_spill] sm:$0xff] }
 0x7da   : > { %7743 = vst.msk [vmem:[%s11058_s11 + $0x220] sm:$0xff] %vm7674_vm7, %v10993_v53  ;;  %v3758_v56 = vpop.f32.mrf.mxu3  ;;  %v6175_v17 = vor.u32 1.1754944e-38, %v6174_v24  ;;  %vm6173_vm15 = vcmp.eq.f32.partialorder %v6172_v41, 8.507059e+37 }
 0x7db   : > { %v6151_v8 = vmul.f32 %v9554_v40, %v6150_v21  ;;  %v3945_v15 = vmax.f32 %v3758_v56, 0.0 }
 0x7dc   : > { %v4461_v46 = vpop.f32.mrf.mxu1 }
 0x7dd   : > { %v9556_v10 = vpop.eup %9555  ;;  %v6152_v31 = vadd.f32 %v9554_v40, %v6151_v8  ;;  %v4028_v43 = vpack.c.bf16 %v3945_v15, %v3944_v48  ;;  %v8798_v55 = vmul.f32 -1.442695, %v4461_v46 }
 0x7de   : > { %v9558_v62 = vpop.eup %9557  ;;  %v5056_v0 = vadd.f32 1.0, %v9556_v10 }
 0x7df   : > { %v6156_v53 = vsel %vm6155_vm10, %v9554_v40, %v6152_v31  ;;  %v6164_v47 = vmul.f32 %v9558_v62, %v5055_v11  ;;  %9559 = vpow2.f32 %v8798_v55  ;;  %3800 = vmatmul.bf16.gmra.mxu3 %v12025_v23  ;;  %8706 = vmatmul.msk.bf16.gmra.mxu1 %vm2493_vm2, %v4028_v43  ;;  %vm6169_vm12 = vweird.f32 %v9558_v62 }
 0x7e0   : > { %v6161_v63 = vsel %vm6158_vm11, %v6160_v16, %v6156_v53  ;;  %9561 = vrcp.f32 %v5056_v0  ;;  %vm6170_vm14 = vmor %vm6168_vm13, %vm6169_vm12  ;;  %v6187_v51 = vand.u32 2147483647, %v5056_v0  ;;  %v6189_v5 = vand.u32 2147483648, %v5056_v0  ;;  %v12028_v53 = vld [vmem:[#allocation28_spill] sm:$0xff] }
 0x7e1   : > { %7103 = vst.msk [vmem:[%s11058_s11 + $0x228] sm:$0xff] %vm7033_vm6, %v6161_v63  ;;  %v6165_v33 = vsub.f32 1.0, %v6164_v47  ;;  %vm6183_vm1 = vweird.f32 %v5056_v0 }
 0x7e2   : > { %7744 = vst.msk [vmem:[%s11058_s11 + $0x228] sm:$0xff] %vm7674_vm7, %v12026_v25  ;;  %v3761_v19 = vpop.f32.mrf.mxu3  ;;  %v6190_v38 = vor.u32 1.1754944e-38, %v6189_v5  ;;  %vm6188_vm4 = vcmp.eq.f32.partialorder %v6187_v51, 8.507059e+37 }
 0x7e3   : > { %v6166_v14 = vmul.f32 %v9558_v62, %v6165_v33  ;;  %v3946_v59 = vmax.f32 %v3761_v19, 0.0 }
 0x7e4   : > { %v4463_v57 = vpop.f32.mrf.mxu1 }
 0x7e5   : > { %v9560_v9 = vpop.eup %9559  ;;  %v6167_v32 = vadd.f32 %v9558_v62, %v6166_v14  ;;  %v8799_v60 = vmul.f32 -1.442695, %v4463_v57 }
 0x7e6   : > { %v9562_v58 = vpop.eup %9561  ;;  %v5057_v3 = vadd.f32 1.0, %v9560_v9 }
 0x7e7   : > { %v6171_v7 = vsel %vm6170_vm14, %v9558_v62, %v6167_v32  ;;  %v6179_v27 = vmul.f32 %v9562_v58, %v5056_v0  ;;  %9563 = vpow2.f32 %v8799_v60  ;;  %vm6184_vm0 = vweird.f32 %v9562_v58 }
 0x7e8   : > { %v6176_v35 = vsel %vm6173_vm15, %v6175_v17, %v6171_v7  ;;  %9565 = vrcp.f32 %v5057_v3  ;;  %vm6185_vm3 = vmor %vm6183_vm1, %vm6184_vm0  ;;  %v6204_v30 = vand.u32 2147483648, %v5057_v3  ;;  %v6202_v8 = vand.u32 2147483647, %v5057_v3  ;;  %v12029_v7 = vld [vmem:[#allocation11_spill] sm:$0xff] }
 0x7e9   : > { %7104 = vst.msk [vmem:[%s11058_s11 + $0x230] sm:$0xff] %vm7033_vm6, %v6176_v35  ;;  %v6180_v42 = vsub.f32 1.0, %v6179_v27  ;;  %vm6198_vm8 = vweird.f32 %v5057_v3 }
 0x7ea   : > { %7745 = vst.msk [vmem:[%s11058_s11 + $0x230] sm:$0xff] %vm7674_vm7, %v10982_v37  ;;  %v3763_v13 = vpop.f32.mrf.mxu3  ;;  %v6205_v43 = vor.u32 1.1754944e-38, %v6204_v30  ;;  %vm6203_vm10 = vcmp.eq.f32.partialorder %v6202_v8, 8.507059e+37 }
 0x7eb   : > { %v6181_v18 = vmul.f32 %v9562_v58, %v6180_v42  ;;  %v3947_v12 = vmax.f32 %v3763_v13, 0.0  ;;  %v12030_v42 = vld [vmem:[#allocation30_spill] sm:$0xff] }
 0x7ec   : > { %v4466_v2 = vpop.f32.mrf.mxu1 }
 0x7ed   : > { %v9564_v44 = vpop.eup %9563  ;;  %v6182_v54 = vadd.f32 %v9562_v58, %v6181_v18  ;;  %v4029_v34 = vpack.c.bf16 %v3947_v12, %v3946_v59  ;;  %v8800_v22 = vmul.f32 -1.442695, %v4466_v2 }
 0x7ee   : > { %v9566_v40 = vpop.eup %9565  ;;  %v5058_v11 = vadd.f32 1.0, %v9564_v44 }
 0x7ef   : > { %v6186_v37 = vsel %vm6185_vm3, %v9562_v58, %v6182_v54  ;;  %v6194_v29 = vmul.f32 %v9566_v40, %v5057_v3  ;;  %9567 = vpow2.f32 %v8800_v22  ;;  %3805 = vmatmul.bf16.gmra.mxu3 %v12027_v45  ;;  %8707 = vmatmul.msk.bf16.gmra.mxu1 %vm2493_vm2, %v4029_v34  ;;  %vm6199_vm5 = vweird.f32 %v9566_v40 }
 0x7f0   : > { %v6191_v61 = vsel %vm6188_vm4, %v6190_v38, %v6186_v37  ;;  %9569 = vrcp.f32 %v5058_v11  ;;  %vm6200_vm9 = vmor %vm6198_vm8, %vm6199_vm5  ;;  %v6217_v47 = vand.u32 2147483647, %v5058_v11  ;;  %v6219_v23 = vand.u32 2147483648, %v5058_v11 }
 0x7f1   : > { %7105 = vst.msk [vmem:[%s11058_s11 + $0x238] sm:$0xff] %vm7033_vm6, %v6191_v61  ;;  %v6195_v21 = vsub.f32 1.0, %v6194_v29  ;;  %vm6213_vm12 = vweird.f32 %v5058_v11  ;;  %v12031_v29 = vld [vmem:[#allocation35_spill] sm:$0xff] }
 0x7f2   : > { %7746 = vst.msk [vmem:[%s11058_s11 + $0x238] sm:$0xff] %vm7674_vm7, %v11003_v52  ;;  %v3766_v28 = vpop.f32.mrf.mxu3  ;;  %v6220_v60 = vor.u32 1.1754944e-38, %v6219_v23  ;;  %vm6218_vm14 = vcmp.eq.f32.partialorder %v6217_v47, 8.507059e+37  ;;  %v12033_v47 = vld [vmem:[#allocation31_spill] sm:$0xff] }
 0x7f3   : > { %v6196_v56 = vmul.f32 %v9566_v40, %v6195_v21  ;;  %v3948_v25 = vmax.f32 %v3766_v28, 0.0 }
 0x7f4   : > { %v4468_v48 = vpop.f32.mrf.mxu1 }
 0x7f5   : > { %v9568_v15 = vpop.eup %9567  ;;  %v6197_v46 = vadd.f32 %v9566_v40, %v6196_v56  ;;  %v8801_v10 = vmul.f32 -1.442695, %v4468_v48 }
 0x7f6   : > { %v9570_v31 = vpop.eup %9569  ;;  %v5059_v55 = vadd.f32 1.0, %v9568_v15 }
 0x7f7   : > { %v6201_v62 = vsel %vm6200_vm9, %v9566_v40, %v6197_v46  ;;  %v6209_v16 = vmul.f32 %v9570_v31, %v5058_v11  ;;  %9571 = vpow2.f32 %v8801_v10  ;;  %vm6214_vm11 = vweird.f32 %v9570_v31 }
 0x7f8   : > { %v6206_v52 = vsel %vm6203_vm10, %v6205_v43, %v6201_v62  ;;  %9573 = vrcp.f32 %v5059_v55  ;;  %vm6215_vm13 = vmor %vm6213_vm12, %vm6214_vm11  ;;  %v6234_v51 = vand.u32 2147483648, %v5059_v55  ;;  %v6232_v18 = vand.u32 2147483647, %v5059_v55 }
 0x7f9   : > { %7106 = vst.msk [vmem:[%s11058_s11 + $0x240] sm:$0xff] %vm7033_vm6, %v6206_v52  ;;  %v6210_v0 = vsub.f32 1.0, %v6209_v16  ;;  %vm6228_vm0 = vweird.f32 %v5059_v55  ;;  %v12032_v52 = vld [vmem:[#allocation6_spill] sm:$0xff] }
 0x7fa   : > { %7747 = vst.msk [vmem:[%s11058_s11 + $0x240] sm:$0xff] %vm7674_vm7, %v12028_v53  ;;  %v3768_v63 = vpop.f32.mrf.mxu3  ;;  %v6235_v34 = vor.u32 1.1754944e-38, %v6234_v51  ;;  %vm6233_vm3 = vcmp.eq.f32.partialorder %v6232_v18, 8.507059e+37 }
 0x7fb   : > { %v6211_v33 = vmul.f32 %v9570_v31, %v6210_v0  ;;  %v3949_v24 = vmax.f32 %v3768_v63, 0.0 }
 0x7fc   : > { %v4471_v19 = vpop.f32.mrf.mxu1 }
 0x7fd   : > { %v9572_v14 = vpop.eup %9571  ;;  %v6212_v41 = vadd.f32 %v9570_v31, %v6211_v33  ;;  %v4030_v57 = vpack.c.bf16 %v3949_v24, %v3948_v25  ;;  %v8802_v9 = vmul.f32 -1.442695, %v4471_v19 }
 0x7fe   : > { %v9574_v32 = vpop.eup %9573  ;;  %v5060_v58 = vadd.f32 1.0, %v9572_v14 }
 0x7ff   : > { %v6216_v17 = vsel %vm6215_vm13, %v9570_v31, %v6212_v41  ;;  %v6224_v3 = vmul.f32 %v9574_v32, %v5059_v55  ;;  %9575 = vpow2.f32 %v8802_v9  ;;  %3810 = vmatmul.bf16.gmra.mxu3 %v12029_v7  ;;  %8708 = vmatmul.msk.bf16.gmra.mxu1 %vm2493_vm2, %v4030_v57  ;;  %vm6229_vm15 = vweird.f32 %v9574_v32  ;;  %v12034_v7 = vld [vmem:[#allocation32_spill] sm:$0xff] }
 0x800   : > { %v6221_v27 = vsel %vm6218_vm14, %v6220_v60, %v6216_v17  ;;  %9577 = vrcp.f32 %v5060_v58  ;;  %vm6230_vm1 = vmor %vm6228_vm0, %vm6229_vm15  ;;  %v6247_v45 = vand.u32 2147483647, %v5060_v58  ;;  %v6249_v61 = vand.u32 2147483648, %v5060_v58 }
 0x801   : > { %7107 = vst.msk [vmem:[%s11058_s11 + $0x248] sm:$0xff] %vm7033_vm6, %v6221_v27  ;;  %v6225_v35 = vsub.f32 1.0, %v6224_v3  ;;  %vm6243_vm5 = vweird.f32 %v5060_v58 }
 0x802   : > { %7748 = vst.msk [vmem:[%s11058_s11 + $0x248] sm:$0xff] %vm7674_vm7, %v12030_v42  ;;  %v3771_v5 = vpop.f32.mrf.mxu3  ;;  %v6250_v43 = vor.u32 1.1754944e-38, %v6249_v61  ;;  %vm6248_vm9 = vcmp.eq.f32.partialorder %v6247_v45, 8.507059e+37  ;;  %v12036_v45 = vld [vmem:[#allocation52_spill] sm:$0xff] }
 0x803   : > { %v6226_v13 = vmul.f32 %v9574_v32, %v6225_v35  ;;  %v3950_v28 = vmax.f32 %v3771_v5, 0.0 }
 0x804   : > { %v4473_v59 = vpop.f32.mrf.mxu1 }
 0x805   : > { %v9576_v12 = vpop.eup %9575  ;;  %v6227_v2 = vadd.f32 %v9574_v32, %v6226_v13  ;;  %v8803_v44 = vmul.f32 -1.442695, %v4473_v59 }
 0x806   : > { %v9578_v54 = vpop.eup %9577  ;;  %v5061_v22 = vadd.f32 1.0, %v9576_v12 }
 0x807   : > { %v6231_v40 = vsel %vm6230_vm1, %v9574_v32, %v6227_v2  ;;  %v6239_v38 = vmul.f32 %v9578_v54, %v5060_v58  ;;  %9579 = vpow2.f32 %v8803_v44  ;;  %vm6244_vm4 = vweird.f32 %v9578_v54 }
 0x808   : > { %v6236_v11 = vsel %vm6233_vm3, %v6235_v34, %v6231_v40  ;;  %9581 = vrcp.f32 %v5061_v22  ;;  %vm6245_vm8 = vmor %vm6243_vm5, %vm6244_vm4  ;;  %v6264_v23 = vand.u32 2147483648, %v5061_v22  ;;  %v6262_v25 = vand.u32 2147483647, %v5061_v22 }
 0x809   : > { %7108 = vst.msk [vmem:[%s11058_s11 + $0x250] sm:$0xff] %vm7033_vm6, %v6236_v11  ;;  %v6240_v37 = vsub.f32 1.0, %v6239_v38  ;;  %vm6258_vm11 = vweird.f32 %v5061_v22  ;;  %v12035_v11 = vld [vmem:[#allocation12_spill] sm:$0xff] }
 0x80a   : > { %7749 = vst.msk [vmem:[%s11058_s11 + $0x250] sm:$0xff] %vm7674_vm7, %v12031_v29  ;;  %v3773_v21 = vpop.f32.mrf.mxu3  ;;  %v6265_v9 = vor.u32 1.1754944e-38, %v6264_v23  ;;  %vm6263_vm13 = vcmp.eq.f32.partialorder %v6262_v25, 8.507059e+37 }
 0x80b   : > { %v6241_v30 = vmul.f32 %v9578_v54, %v6240_v37  ;;  %v3951_v56 = vmax.f32 %v3773_v21, 0.0 }
 0x80c   : > { %v4476_v8 = vpop.f32.mrf.mxu1 }
 0x80d   : > { %v9580_v48 = vpop.eup %9579  ;;  %v6242_v15 = vadd.f32 %v9578_v54, %v6241_v30  ;;  %v4031_v46 = vpack.c.bf16 %v3951_v56, %v3950_v28  ;;  %v8804_v10 = vmul.f32 -1.442695, %v4476_v8 }
 0x80e   : > { %v9582_v31 = vpop.eup %9581  ;;  %v5062_v55 = vadd.f32 1.0, %v9580_v48 }
 0x80f   : > { %v6246_v62 = vsel %vm6245_vm8, %v9578_v54, %v6242_v15  ;;  %v6254_v16 = vmul.f32 %v9582_v31, %v5061_v22  ;;  %9583 = vpow2.f32 %v8804_v10  ;;  %3815 = vmatmul.bf16.gmra.mxu3 %v12032_v52  ;;  %8709 = vmatmul.msk.bf16.gmra.mxu1 %vm2493_vm2, %v4031_v46  ;;  %vm6259_vm10 = vweird.f32 %v9582_v31  ;;  %v12037_v52 = vld [vmem:[#allocation33_spill] sm:$0xff] }
 0x810   : > { %v6251_v0 = vsel %vm6248_vm9, %v6250_v43, %v6246_v62  ;;  %9585 = vrcp.f32 %v5062_v55  ;;  %vm6260_vm12 = vmor %vm6258_vm11, %vm6259_vm10  ;;  %v6277_v27 = vand.u32 2147483647, %v5062_v55  ;;  %v6279_v35 = vand.u32 2147483648, %v5062_v55 }
 0x811   : > { %7109 = vst.msk [vmem:[%s11058_s11 + $0x258] sm:$0xff] %vm7033_vm6, %v6251_v0  ;;  %v6255_v53 = vsub.f32 1.0, %v6254_v16  ;;  %vm6273_vm15 = vweird.f32 %v5062_v55 }
 0x812   : > { %7750 = vst.msk [vmem:[%s11058_s11 + $0x258] sm:$0xff] %vm7674_vm7, %v12033_v47  ;;  %v3776_v63 = vpop.f32.mrf.mxu3  ;;  %v6280_v34 = vor.u32 1.1754944e-38, %v6279_v35  ;;  %vm6278_vm1 = vcmp.eq.f32.partialorder %v6277_v27, 8.507059e+37  ;;  %v12039_v27 = vld [vmem:[#allocation36_spill] sm:$0xff] }
 0x813   : > { %v6256_v33 = vmul.f32 %v9582_v31, %v6255_v53  ;;  %v3952_v5 = vmax.f32 %v3776_v63, 0.0 }
 0x814   : > { %v4478_v24 = vpop.f32.mrf.mxu1 }
 0x815   : > { %v9584_v19 = vpop.eup %9583  ;;  %v6257_v14 = vadd.f32 %v9582_v31, %v6256_v33  ;;  %v8805_v41 = vmul.f32 -1.442695, %v4478_v24 }
 0x816   : > { %v9586_v57 = vpop.eup %9585  ;;  %v5063_v32 = vadd.f32 1.0, %v9584_v19 }
 0x817   : > { %v6261_v60 = vsel %vm6260_vm12, %v9582_v31, %v6257_v14  ;;  %v6269_v58 = vmul.f32 %v9586_v57, %v5062_v55  ;;  %9587 = vpow2.f32 %v8805_v41  ;;  %vm6274_vm14 = vweird.f32 %v9586_v57 }
 0x818   : > { %v6266_v17 = vsel %vm6263_vm13, %v6265_v9, %v6261_v60  ;;  %9589 = vrcp.f32 %v5063_v32  ;;  %vm6275_vm0 = vmor %vm6273_vm15, %vm6274_vm14  ;;  %v6294_v61 = vand.u32 2147483648, %v5063_v32  ;;  %v6292_v28 = vand.u32 2147483647, %v5063_v32 }
 0x819   : > { %7110 = vst.msk [vmem:[%s11058_s11 + $0x260] sm:$0xff] %vm7033_vm6, %v6266_v17  ;;  %v6270_v3 = vsub.f32 1.0, %v6269_v58  ;;  %vm6288_vm4 = vweird.f32 %v5063_v32  ;;  %v12038_v17 = vld [vmem:[#allocation14_spill] sm:$0xff] }
 0x81a   : > { %7751 = vst.msk [vmem:[%s11058_s11 + $0x260] sm:$0xff] %vm7674_vm7, %v12034_v7  ;;  %v3778_v42 = vpop.f32.mrf.mxu3  ;;  %v6295_v10 = vor.u32 1.1754944e-38, %v6294_v61  ;;  %vm6293_vm8 = vcmp.eq.f32.partialorder %v6292_v28, 8.507059e+37 }
 0x81b   : > { %v6271_v51 = vmul.f32 %v9586_v57, %v6270_v3  ;;  %v3953_v13 = vmax.f32 %v3778_v42, 0.0 }
 0x81c   : > { %v4481_v18 = vpop.f32.mrf.mxu1 }
 0x81d   : > { %v9588_v59 = vpop.eup %9587  ;;  %v6272_v12 = vadd.f32 %v9586_v57, %v6271_v51  ;;  %v4032_v2 = vpack.c.bf16 %v3953_v13, %v3952_v5  ;;  %v8806_v44 = vmul.f32 -1.442695, %v4481_v18 }
 0x81e   : > { %v9590_v54 = vpop.eup %9589  ;;  %v5064_v22 = vadd.f32 1.0, %v9588_v59 }
 0x81f   : > { %v6276_v40 = vsel %vm6275_vm0, %v9586_v57, %v6272_v12  ;;  %v6284_v38 = vmul.f32 %v9590_v54, %v5063_v32  ;;  %9591 = vpow2.f32 %v8806_v44  ;;  %3820 = vmatmul.bf16.gmra.mxu3 %v12035_v11  ;;  %8710 = vmatmul.msk.bf16.gmra.mxu1 %vm2493_vm2, %v4032_v2  ;;  %vm6289_vm3 = vweird.f32 %v9590_v54  ;;  %v12040_v11 = vld [vmem:[#allocation55_spill] sm:$0xff] }
 0x820   : > { %v6281_v37 = vsel %vm6278_vm1, %v6280_v34, %v6276_v40  ;;  %9593 = vrcp.f32 %v5064_v22  ;;  %vm6290_vm5 = vmor %vm6288_vm4, %vm6289_vm3  ;;  %v6307_v0 = vand.u32 2147483647, %v5064_v22  ;;  %v6309_v53 = vand.u32 2147483648, %v5064_v22 }
 0x821   : > { %7111 = vst.msk [vmem:[%s11058_s11 + $0x268] sm:$0xff] %vm7033_vm6, %v6281_v37  ;;  %v6285_v29 = vsub.f32 1.0, %v6284_v38  ;;  %vm6303_vm10 = vweird.f32 %v5064_v22 }
 0x822   : > { %7752 = vst.msk [vmem:[%s11058_s11 + $0x268] sm:$0xff] %vm7674_vm7, %v12036_v45  ;;  %v3781_v21 = vpop.f32.mrf.mxu3  ;;  %v6310_v9 = vor.u32 1.1754944e-38, %v6309_v53  ;;  %vm6308_vm12 = vcmp.eq.f32.partialorder %v6307_v0, 8.507059e+37  ;;  %v12042_v0 = vld [vmem:[#allocation51_spill] sm:$0xff] }
 0x823   : > { %v6286_v30 = vmul.f32 %v9590_v54, %v6285_v29  ;;  %v3954_v63 = vmax.f32 %v3781_v21, 0.0 }
 0x824   : > { %v4483_v56 = vpop.f32.mrf.mxu1 }
 0x825   : > { %v9592_v8 = vpop.eup %9591  ;;  %v6287_v48 = vadd.f32 %v9590_v54, %v6286_v30  ;;  %v8807_v15 = vmul.f32 -1.442695, %v4483_v56 }
 0x826   : > { %v9594_v46 = vpop.eup %9593  ;;  %v5065_v31 = vadd.f32 1.0, %v9592_v8 }
 0x827   : > { %v6291_v43 = vsel %vm6290_vm5, %v9590_v54, %v6287_v48  ;;  %v6299_v55 = vmul.f32 %v9594_v46, %v5064_v22  ;;  %9595 = vpow2.f32 %v8807_v15  ;;  %vm6304_vm9 = vweird.f32 %v9594_v46 }
 0x828   : > { %v6296_v62 = vsel %vm6293_vm8, %v6295_v10, %v6291_v43  ;;  %9597 = vrcp.f32 %v5065_v31  ;;  %vm6305_vm11 = vmor %vm6303_vm10, %vm6304_vm9  ;;  %v6324_v35 = vand.u32 2147483648, %v5065_v31  ;;  %v6322_v5 = vand.u32 2147483647, %v5065_v31 }
 0x829   : > { %7112 = vst.msk [vmem:[%s11058_s11 + $0x270] sm:$0xff] %vm7033_vm6, %v6296_v62  ;;  %v6300_v16 = vsub.f32 1.0, %v6299_v55  ;;  %vm6318_vm14 = vweird.f32 %v5065_v31  ;;  %v12041_v62 = vld [vmem:[#allocation19_spill] sm:$0xff] }
 0x82a   : > { %7753 = vst.msk [vmem:[%s11058_s11 + $0x270] sm:$0xff] %vm7674_vm7, %v12037_v52  ;;  %v3783_v47 = vpop.f32.mrf.mxu3  ;;  %v6325_v44 = vor.u32 1.1754944e-38, %v6324_v35  ;;  %vm6323_vm0 = vcmp.eq.f32.partialorder %v6322_v5, 8.507059e+37 }
 0x82b   : > { %v6301_v23 = vmul.f32 %v9594_v46, %v6300_v16  ;;  %v3955_v33 = vmax.f32 %v3783_v47, 0.0 }
 0x82c   : > { %v4486_v25 = vpop.f32.mrf.mxu1 }
 0x82d   : > { %v9596_v24 = vpop.eup %9595  ;;  %v6302_v19 = vadd.f32 %v9594_v46, %v6301_v23  ;;  %v4033_v14 = vpack.c.bf16 %v3955_v33, %v3954_v63  ;;  %v8808_v41 = vmul.f32 -1.442695, %v4486_v25 }
 0x82e   : > { %v9598_v57 = vpop.eup %9597  ;;  %v5066_v32 = vadd.f32 1.0, %v9596_v24 }
 0x82f   : > { %v6306_v60 = vsel %vm6305_vm11, %v9594_v46, %v6302_v19  ;;  %v6314_v58 = vmul.f32 %v9598_v57, %v5065_v31  ;;  %9599 = vpow2.f32 %v8808_v41  ;;  %3825 = vmatmul.bf16.gmra.mxu3 %v12038_v17  ;;  %8711 = vmatmul.msk.bf16.gmra.mxu1 %vm2493_vm2, %v4033_v14  ;;  %vm6319_vm13 = vweird.f32 %v9598_v57  ;;  %v12043_v17 = vld [vmem:[#allocation53_spill] sm:$0xff] }
 0x830   : > { %v6311_v3 = vsel %vm6308_vm12, %v6310_v9, %v6306_v60  ;;  %9601 = vrcp.f32 %v5066_v32  ;;  %vm6320_vm15 = vmor %vm6318_vm14, %vm6319_vm13  ;;  %v6337_v37 = vand.u32 2147483647, %v5066_v32  ;;  %v6339_v29 = vand.u32 2147483648, %v5066_v32 }
 0x831   : > { %7113 = vst.msk [vmem:[%s11058_s11 + $0x278] sm:$0xff] %vm7033_vm6, %v6311_v3  ;;  %v6315_v7 = vsub.f32 1.0, %v6314_v58  ;;  %vm6333_vm3 = vweird.f32 %v5066_v32 }
 0x832   : > { %7754 = vst.msk [vmem:[%s11058_s11 + $0x278] sm:$0xff] %vm7674_vm7, %v12039_v27  ;;  %v3786_v42 = vpop.f32.mrf.mxu3  ;;  %v6340_v10 = vor.u32 1.1754944e-38, %v6339_v29  ;;  %vm6338_vm5 = vcmp.eq.f32.partialorder %v6337_v37, 8.507059e+37  ;;  %v12045_v37 = vld [vmem:[#allocation58_spill] sm:$0xff] }
 0x833   : > { %v6316_v51 = vmul.f32 %v9598_v57, %v6315_v7  ;;  %v3956_v21 = vmax.f32 %v3786_v42, 0.0 }
 0x834   : > { %v4488_v13 = vpop.f32.mrf.mxu1 }
 0x835   : > { %v9600_v18 = vpop.eup %9599  ;;  %v6317_v59 = vadd.f32 %v9598_v57, %v6316_v51  ;;  %v8809_v12 = vmul.f32 -1.442695, %v4488_v13 }
 0x836   : > { %v9602_v2 = vpop.eup %9601  ;;  %v5067_v54 = vadd.f32 1.0, %v9600_v18 }
 0x837   : > { %v6321_v34 = vsel %vm6320_vm15, %v9598_v57, %v6317_v59  ;;  %v6329_v22 = vmul.f32 %v9602_v2, %v5066_v32  ;;  %9603 = vpow2.f32 %v8809_v12  ;;  %vm6334_vm1 = vweird.f32 %v9602_v2 }
 0x838   : > { %v6326_v40 = vsel %vm6323_vm0, %v6325_v44, %v6321_v34  ;;  %9605 = vrcp.f32 %v5067_v54  ;;  %vm6335_vm4 = vmor %vm6333_vm3, %vm6334_vm1  ;;  %v6354_v53 = vand.u32 2147483648, %v5067_v54  ;;  %v6352_v63 = vand.u32 2147483647, %v5067_v54 }
 0x839   : > { %7114 = vst.msk [vmem:[%s11058_s11 + $0x280] sm:$0xff] %vm7033_vm6, %v6326_v40  ;;  %v6330_v38 = vsub.f32 1.0, %v6329_v22  ;;  %vm6348_vm9 = vweird.f32 %v5067_v54  ;;  %v12044_v40 = vld [vmem:[#allocation24_spill] sm:$0xff] }
 0x83a   : > { %7755 = vst.msk [vmem:[%s11058_s11 + $0x280] sm:$0xff] %vm7674_vm7, %v12040_v11  ;;  %v3788_v45 = vpop.f32.mrf.mxu3  ;;  %v6355_v41 = vor.u32 1.1754944e-38, %v6354_v53  ;;  %vm6353_vm11 = vcmp.eq.f32.partialorder %v6352_v63, 8.507059e+37 }
 0x83b   : > { %v6331_v61 = vmul.f32 %v9602_v2, %v6330_v38  ;;  %v3957_v30 = vmax.f32 %v3788_v45, 0.0 }
 0x83c   : > { %v4491_v28 = vpop.f32.mrf.mxu1 }
 0x83d   : > { %v9604_v56 = vpop.eup %9603  ;;  %v6332_v8 = vadd.f32 %v9602_v2, %v6331_v61  ;;  %v4034_v48 = vpack.c.bf16 %v3957_v30, %v3956_v21  ;;  %v8810_v15 = vmul.f32 -1.442695, %v4491_v28 }
 0x83e   : > { %v9606_v46 = vpop.eup %9605  ;;  %v5068_v31 = vadd.f32 1.0, %v9604_v56 }
 0x83f   : > { %v6336_v43 = vsel %vm6335_vm4, %v9602_v2, %v6332_v8  ;;  %v6344_v55 = vmul.f32 %v9606_v46, %v5067_v54  ;;  %9607 = vpow2.f32 %v8810_v15  ;;  %3830 = vmatmul.bf16.gmra.mxu3 %v12041_v62  ;;  %8712 = vmatmul.msk.bf16.gmra.mxu1 %vm2493_vm2, %v4034_v48  ;;  %vm6349_vm8 = vweird.f32 %v9606_v46  ;;  %v12046_v62 = vld [vmem:[#allocation54_spill] sm:$0xff] }
 0x840   : > { %v6341_v16 = vsel %vm6338_vm5, %v6340_v10, %v6336_v43  ;;  %9609 = vrcp.f32 %v5068_v31  ;;  %vm6350_vm10 = vmor %vm6348_vm9, %vm6349_vm8  ;;  %v6367_v3 = vand.u32 2147483647, %v5068_v31  ;;  %v6369_v7 = vand.u32 2147483648, %v5068_v31 }
 0x841   : > { %7115 = vst.msk [vmem:[%s11058_s11 + $0x288] sm:$0xff] %vm7033_vm6, %v6341_v16  ;;  %v6345_v52 = vsub.f32 1.0, %v6344_v55  ;;  %vm6363_vm13 = vweird.f32 %v5068_v31 }
 0x842   : > { %7756 = vst.msk [vmem:[%s11058_s11 + $0x288] sm:$0xff] %vm7674_vm7, %v12042_v0  ;;  %v3791_v47 = vpop.f32.mrf.mxu3  ;;  %v6370_v44 = vor.u32 1.1754944e-38, %v6369_v7  ;;  %vm6368_vm15 = vcmp.eq.f32.partialorder %v6367_v3, 8.507059e+37  ;;  %v12048_v3 = vld [vmem:[#allocation56_spill] sm:$0xff] }
 0x843   : > { %v6346_v23 = vmul.f32 %v9606_v46, %v6345_v52  ;;  %v3958_v42 = vmax.f32 %v3791_v47, 0.0 }
 0x844   : > { %v4493_v33 = vpop.f32.mrf.mxu1 }
 0x845   : > { %v9608_v25 = vpop.eup %9607  ;;  %v6347_v24 = vadd.f32 %v9606_v46, %v6346_v23  ;;  %v8811_v19 = vmul.f32 -1.442695, %v4493_v33 }
 0x846   : > { %v9610_v14 = vpop.eup %9609  ;;  %v5069_v57 = vadd.f32 1.0, %v9608_v25 }
 0x847   : > { %v6351_v9 = vsel %vm6350_vm10, %v9606_v46, %v6347_v24  ;;  %v6359_v32 = vmul.f32 %v9610_v14, %v5068_v31  ;;  %9611 = vpow2.f32 %v8811_v19  ;;  %vm6364_vm12 = vweird.f32 %v9610_v14 }
 0x848   : > { %v6356_v60 = vsel %vm6353_vm11, %v6355_v41, %v6351_v9  ;;  %9613 = vrcp.f32 %v5069_v57  ;;  %vm6365_vm14 = vmor %vm6363_vm13, %vm6364_vm12  ;;  %v6384_v29 = vand.u32 2147483648, %v5069_v57  ;;  %v6382_v21 = vand.u32 2147483647, %v5069_v57 }
 0x849   : > { %7116 = vst.msk [vmem:[%s11058_s11 + $0x290] sm:$0xff] %vm7033_vm6, %v6356_v60  ;;  %v6360_v58 = vsub.f32 1.0, %v6359_v32  ;;  %vm6378_vm1 = vweird.f32 %v5069_v57  ;;  %v12047_v60 = vld [vmem:[#allocation29_spill] sm:$0xff] }
 0x84a   : > { %7757 = vst.msk [vmem:[%s11058_s11 + $0x290] sm:$0xff] %vm7674_vm7, %v12043_v17  ;;  %v3793_v27 = vpop.f32.mrf.mxu3  ;;  %v6385_v15 = vor.u32 1.1754944e-38, %v6384_v29  ;;  %vm6383_vm4 = vcmp.eq.f32.partialorder %v6382_v21, 8.507059e+37 }
 0x84b   : > { %v6361_v35 = vmul.f32 %v9610_v14, %v6360_v58  ;;  %v3959_v51 = vmax.f32 %v3793_v27, 0.0 }
 0x84c   : > { %v4496_v5 = vpop.f32.mrf.mxu1 }
 0x84d   : > { %v9612_v13 = vpop.eup %9611  ;;  %v6362_v18 = vadd.f32 %v9610_v14, %v6361_v35  ;;  %v4035_v59 = vpack.c.bf16 %v3959_v51, %v3958_v42  ;;  %v8812_v12 = vmul.f32 -1.442695, %v4496_v5 }
 0x84e   : > { %v9614_v2 = vpop.eup %9613  ;;  %v5070_v54 = vadd.f32 1.0, %v9612_v13 }
 0x84f   : > { %v6366_v34 = vsel %vm6365_vm14, %v9610_v14, %v6362_v18  ;;  %v6374_v22 = vmul.f32 %v9614_v2, %v5069_v57  ;;  %9615 = vpow2.f32 %v8812_v12  ;;  %3835 = vmatmul.bf16.gmra.mxu3 %v12044_v40  ;;  %8713 = vmatmul.msk.bf16.gmra.mxu1 %vm2493_vm2, %v4035_v59  ;;  %vm6379_vm0 = vweird.f32 %v9614_v2  ;;  %v12049_v40 = vld [vmem:[#allocation38_spill] sm:$0xff] }
 0x850   : > { %v6371_v38 = vsel %vm6368_vm15, %v6370_v44, %v6366_v34  ;;  %9617 = vrcp.f32 %v5070_v54  ;;  %vm6380_vm3 = vmor %vm6378_vm1, %vm6379_vm0  ;;  %v6397_v16 = vand.u32 2147483647, %v5070_v54  ;;  %v6399_v52 = vand.u32 2147483648, %v5070_v54 }
 0x851   : > { %7117 = vst.msk [vmem:[%s11058_s11 + $0x298] sm:$0xff] %vm7033_vm6, %v6371_v38  ;;  %v6375_v11 = vsub.f32 1.0, %v6374_v22  ;;  %vm6393_vm8 = vweird.f32 %v5070_v54 }
 0x852   : > { %7758 = vst.msk [vmem:[%s11058_s11 + $0x298] sm:$0xff] %vm7674_vm7, %v12045_v37  ;;  %v3796_v45 = vpop.f32.mrf.mxu3  ;;  %v6400_v41 = vor.u32 1.1754944e-38, %v6399_v52  ;;  %vm6398_vm10 = vcmp.eq.f32.partialorder %v6397_v16, 8.507059e+37  ;;  %v12051_v16 = vld [vmem:[#allocation57_spill] sm:$0xff] }
 0x853   : > { %v6376_v61 = vmul.f32 %v9614_v2, %v6375_v11  ;;  %v3960_v47 = vmax.f32 %v3796_v45, 0.0 }
 0x854   : > { %v4498_v30 = vpop.f32.mrf.mxu1 }
 0x855   : > { %v9616_v28 = vpop.eup %9615  ;;  %v6377_v56 = vadd.f32 %v9614_v2, %v6376_v61  ;;  %v8813_v8 = vmul.f32 -1.442695, %v4498_v30 }
 0x856   : > { %v9618_v48 = vpop.eup %9617  ;;  %v5071_v46 = vadd.f32 1.0, %v9616_v28 }
 0x857   : > { %v6381_v10 = vsel %vm6380_vm3, %v9614_v2, %v6377_v56  ;;  %v6389_v31 = vmul.f32 %v9618_v48, %v5070_v54  ;;  %9619 = vpow2.f32 %v8813_v8  ;;  %vm6394_vm5 = vweird.f32 %v9618_v48 }
 0x858   : > { %v6386_v43 = vsel %vm6383_vm4, %v6385_v15, %v6381_v10  ;;  %9621 = vrcp.f32 %v5071_v46  ;;  %vm6395_vm9 = vmor %vm6393_vm8, %vm6394_vm5  ;;  %v6414_v7 = vand.u32 2147483648, %v5071_v46  ;;  %v6412_v42 = vand.u32 2147483647, %v5071_v46 }
 0x859   : > { %7118 = vst.msk [vmem:[%s11058_s11 + $0x2a0] sm:$0xff] %vm7033_vm6, %v6386_v43  ;;  %v6390_v55 = vsub.f32 1.0, %v6389_v31  ;;  %vm6408_vm12 = vweird.f32 %v5071_v46  ;;  %v12050_v43 = vld [vmem:[#allocation34_spill] sm:$0xff] }
 0x85a   : > { %7759 = vst.msk [vmem:[%s11058_s11 + $0x2a0] sm:$0xff] %vm7674_vm7, %v12046_v62  ;;  %v3798_v0 = vpop.f32.mrf.mxu3  ;;  %v6415_v12 = vor.u32 1.1754944e-38, %v6414_v7  ;;  %vm6413_vm14 = vcmp.eq.f32.partialorder %v6412_v42, 8.507059e+37 }
 0x85b   : > { %v6391_v53 = vmul.f32 %v9618_v48, %v6390_v55  ;;  %v3961_v23 = vmax.f32 %v3798_v0, 0.0 }
 0x85c   : > { %v4501_v63 = vpop.f32.mrf.mxu1 }
 0x85d   : > { %v9620_v33 = vpop.eup %9619  ;;  %v6392_v25 = vadd.f32 %v9618_v48, %v6391_v53  ;;  %v4036_v24 = vpack.c.bf16 %v3961_v23, %v3960_v47  ;;  %v8814_v19 = vmul.f32 -1.442695, %v4501_v63 }
 0x85e   : > { %v9622_v14 = vpop.eup %9621  ;;  %v5072_v57 = vadd.f32 1.0, %v9620_v33 }
 0x85f   : > { %v6396_v9 = vsel %vm6395_vm9, %v9618_v48, %v6392_v25  ;;  %v6404_v32 = vmul.f32 %v9622_v14, %v5071_v46  ;;  %9623 = vpow2.f32 %v8814_v19  ;;  %3840 = vmatmul.bf16.gmra.mxu3 %v12047_v60  ;;  %8714 = vmatmul.msk.bf16.gmra.mxu1 %vm2493_vm2, %v4036_v24  ;;  %vm6409_vm11 = vweird.f32 %v9622_v14  ;;  %v12052_v60 = vld [vmem:[#allocation59_spill] sm:$0xff] }
 0x860   : > { %v6401_v58 = vsel %vm6398_vm10, %v6400_v41, %v6396_v9  ;;  %9625 = vrcp.f32 %v5072_v57  ;;  %vm6410_vm13 = vmor %vm6408_vm12, %vm6409_vm11  ;;  %v6427_v38 = vand.u32 2147483647, %v5072_v57  ;;  %v6429_v11 = vand.u32 2147483648, %v5072_v57 }
 0x861   : > { %7119 = vst.msk [vmem:[%s11058_s11 + $0x2a8] sm:$0xff] %vm7033_vm6, %v6401_v58  ;;  %v6405_v17 = vsub.f32 1.0, %v6404_v32  ;;  %vm6423_vm0 = vweird.f32 %v5072_v57 }
 0x862   : > { %7760 = vst.msk [vmem:[%s11058_s11 + $0x2a8] sm:$0xff] %vm7674_vm7, %v12048_v3  ;;  %v3801_v27 = vpop.f32.mrf.mxu3  ;;  %v6430_v15 = vor.u32 1.1754944e-38, %v6429_v11  ;;  %vm6428_vm3 = vcmp.eq.f32.partialorder %v6427_v38, 8.507059e+37  ;;  %v12054_v38 = vld [vmem:[#allocation62_spill] sm:$0xff] }
 0x863   : > { %v6406_v35 = vmul.f32 %v9622_v14, %v6405_v17  ;;  %v3962_v45 = vmax.f32 %v3801_v27, 0.0 }
 0x864   : > { %v4503_v51 = vpop.f32.mrf.mxu1 }
 0x865   : > { %v9624_v5 = vpop.eup %9623  ;;  %v6407_v13 = vadd.f32 %v9622_v14, %v6406_v35  ;;  %v8815_v18 = vmul.f32 -1.442695, %v4503_v51 }
 0x866   : > { %v9626_v59 = vpop.eup %9625  ;;  %v5073_v2 = vadd.f32 1.0, %v9624_v5 }
 0x867   : > { %v6411_v44 = vsel %vm6410_vm13, %v9622_v14, %v6407_v13  ;;  %v6419_v54 = vmul.f32 %v9626_v59, %v5072_v57  ;;  %9627 = vpow2.f32 %v8815_v18  ;;  %vm6424_vm15 = vweird.f32 %v9626_v59 }
 0x868   : > { %v6416_v34 = vsel %vm6413_vm14, %v6415_v12, %v6411_v44  ;;  %9629 = vrcp.f32 %v5073_v2  ;;  %vm6425_vm1 = vmor %vm6423_vm0, %vm6424_vm15  ;;  %v6444_v52 = vand.u32 2147483648, %v5073_v2  ;;  %v6442_v47 = vand.u32 2147483647, %v5073_v2 }
 0x869   : > { %7120 = vst.msk [vmem:[%s11058_s11 + $0x2b0] sm:$0xff] %vm7033_vm6, %v6416_v34  ;;  %v6420_v22 = vsub.f32 1.0, %v6419_v54  ;;  %vm6438_vm5 = vweird.f32 %v5073_v2  ;;  %v12053_v34 = vld [vmem:[#allocation37_spill] sm:$0xff] }
 0x86a   : > { %7761 = vst.msk [vmem:[%s11058_s11 + $0x2b0] sm:$0xff] %vm7674_vm7, %v12049_v40  ;;  %v3803_v37 = vpop.f32.mrf.mxu3  ;;  %v6445_v19 = vor.u32 1.1754944e-38, %v6444_v52  ;;  %vm6443_vm9 = vcmp.eq.f32.partialorder %v6442_v47, 8.507059e+37 }
 0x86b   : > { %v6421_v29 = vmul.f32 %v9626_v59, %v6420_v22  ;;  %v3963_v61 = vmax.f32 %v3803_v37, 0.0 }
 0x86c   : > { %v4506_v21 = vpop.f32.mrf.mxu1 }
 0x86d   : > { %v9628_v30 = vpop.eup %9627  ;;  %v6422_v28 = vadd.f32 %v9626_v59, %v6421_v29  ;;  %v4037_v56 = vpack.c.bf16 %v3963_v61, %v3962_v45  ;;  %v8816_v8 = vmul.f32 -1.442695, %v4506_v21 }
 0x86e   : > { %v9630_v48 = vpop.eup %9629  ;;  %v5074_v46 = vadd.f32 1.0, %v9628_v30 }
 0x86f   : > { %v6426_v10 = vsel %vm6425_vm1, %v9626_v59, %v6422_v28  ;;  %v6434_v31 = vmul.f32 %v9630_v48, %v5073_v2  ;;  %9631 = vpow2.f32 %v8816_v8  ;;  %3845 = vmatmul.bf16.gmra.mxu3 %v12050_v43  ;;  %8715 = vmatmul.msk.bf16.gmra.mxu1 %vm2493_vm2, %v4037_v56  ;;  %vm6439_vm4 = vweird.f32 %v9630_v48  ;;  %v12055_v43 = vld [vmem:[#allocation60_spill] sm:$0xff] }
 0x870   : > { %v6431_v55 = vsel %vm6428_vm3, %v6430_v15, %v6426_v10  ;;  %9633 = vrcp.f32 %v5074_v46  ;;  %vm6440_vm8 = vmor %vm6438_vm5, %vm6439_vm4  ;;  %v6457_v58 = vand.u32 2147483647, %v5074_v46  ;;  %v6459_v17 = vand.u32 2147483648, %v5074_v46 }
 0x871   : > { %7121 = vst.msk [vmem:[%s11058_s11 + $0x2b8] sm:$0xff] %vm7033_vm6, %v6431_v55  ;;  %v6435_v62 = vsub.f32 1.0, %v6434_v31  ;;  %vm6453_vm11 = vweird.f32 %v5074_v46 }
 0x872   : > { %7762 = vst.msk [vmem:[%s11058_s11 + $0x2b8] sm:$0xff] %vm7674_vm7, %v12051_v16  ;;  %v3806_v0 = vpop.f32.mrf.mxu3  ;;  %v6460_v12 = vor.u32 1.1754944e-38, %v6459_v17  ;;  %vm6458_vm13 = vcmp.eq.f32.partialorder %v6457_v58, 8.507059e+37 }
 0x873   : > { %v6436_v53 = vmul.f32 %v9630_v48, %v6435_v62  ;;  %v3964_v27 = vmax.f32 %v3806_v0, 0.0 }
 0x874   : > { %v4508_v23 = vpop.f32.mrf.mxu1 }
 0x875   : > { %v9632_v63 = vpop.eup %9631  ;;  %v6437_v33 = vadd.f32 %v9630_v48, %v6436_v53  ;;  %v8817_v25 = vmul.f32 -1.442695, %v4508_v23 }
 0x876   : > { %v9634_v24 = vpop.eup %9633  ;;  %v5075_v14 = vadd.f32 1.0, %v9632_v63 }
 0x877   : > { %v6441_v41 = vsel %vm6440_vm8, %v9630_v48, %v6437_v33  ;;  %v6449_v57 = vmul.f32 %v9634_v24, %v5074_v46  ;;  %9635 = vpow2.f32 %v8817_v25  ;;  %vm6454_vm10 = vweird.f32 %v9634_v24 }
 0x878   : > { %v6446_v9 = vsel %vm6443_vm9, %v6445_v19, %v6441_v41  ;;  %9637 = vrcp.f32 %v5075_v14  ;;  %vm6455_vm12 = vmor %vm6453_vm11, %vm6454_vm10  ;;  %v6474_v11 = vand.u32 2147483648, %v5075_v14  ;;  %v6472_v45 = vand.u32 2147483647, %v5075_v14 }
 0x879   : > { %7122 = vst.msk [vmem:[%s11058_s11 + $0x2c0] sm:$0xff] %vm7033_vm6, %v6446_v9  ;;  %v6450_v32 = vsub.f32 1.0, %v6449_v57  ;;  %vm6468_vm15 = vweird.f32 %v5075_v14 }
 0x87a   : > { %7763 = vst.msk [vmem:[%s11058_s11 + $0x2c0] sm:$0xff] %vm7674_vm7, %v12052_v60  ;;  %v3808_v3 = vpop.f32.mrf.mxu3  ;;  %v6475_v8 = vor.u32 1.1754944e-38, %v6474_v11  ;;  %vm6473_vm1 = vcmp.eq.f32.partialorder %v6472_v45, 8.507059e+37  ;;  %v12056_v60 = vld [vmem:[#allocation61_spill] sm:$0xff] }
 0x87b   : > { %v6451_v7 = vmul.f32 %v9634_v24, %v6450_v32  ;;  %v3965_v35 = vmax.f32 %v3808_v3, 0.0 }
 0x87c   : > { %v4511_v42 = vpop.f32.mrf.mxu1 }
 0x87d   : > { %v9636_v51 = vpop.eup %9635  ;;  %v6452_v5 = vadd.f32 %v9634_v24, %v6451_v7  ;;  %v4038_v13 = vpack.c.bf16 %v3965_v35, %v3964_v27  ;;  %v8818_v18 = vmul.f32 -1.442695, %v4511_v42 }
 0x87e   : > { %v9638_v59 = vpop.eup %9637  ;;  %v5076_v2 = vadd.f32 1.0, %v9636_v51 }
 0x87f   : > { %v6456_v44 = vsel %vm6455_vm12, %v9634_v24, %v6452_v5  ;;  %v6464_v54 = vmul.f32 %v9638_v59, %v5075_v14  ;;  %9639 = vpow2.f32 %v8818_v18  ;;  %3850 = vmatmul.bf16.gmra.mxu3 %v12053_v34  ;;  %8716 = vmatmul.msk.bf16.gmra.mxu1 %vm2493_vm2, %v4038_v13  ;;  %vm6469_vm14 = vweird.f32 %v9638_v59 }
 0x880   : > { %v6461_v22 = vsel %vm6458_vm13, %v6460_v12, %v6456_v44  ;;  %9641 = vrcp.f32 %v5076_v2  ;;  %vm6470_vm0 = vmor %vm6468_vm15, %vm6469_vm14  ;;  %v6487_v55 = vand.u32 2147483647, %v5076_v2  ;;  %v6489_v62 = vand.u32 2147483648, %v5076_v2 }
 0x881   : > { %7123 = vst.msk [vmem:[%s11058_s11 + $0x2c8] sm:$0xff] %vm7033_vm6, %v6461_v22  ;;  %v6465_v40 = vsub.f32 1.0, %v6464_v54  ;;  %vm6483_vm4 = vweird.f32 %v5076_v2  ;;  %v12057_v54 = vld [vmem:[#allocation39_spill] sm:$0xff] }
 0x882   : > { %7764 = vst.msk [vmem:[%s11058_s11 + $0x2c8] sm:$0xff] %vm7674_vm7, %v12054_v38  ;;  %v3811_v37 = vpop.f32.mrf.mxu3  ;;  %v6490_v19 = vor.u32 1.1754944e-38, %v6489_v62  ;;  %vm6488_vm8 = vcmp.eq.f32.partialorder %v6487_v55, 8.507059e+37 }
 0x883   : > { %v6466_v29 = vmul.f32 %v9638_v59, %v6465_v40  ;;  %v3966_v0 = vmax.f32 %v3811_v37, 0.0 }
 0x884   : > { %v4513_v61 = vpop.f32.mrf.mxu1 }
 0x885   : > { %v9640_v21 = vpop.eup %9639  ;;  %v6467_v30 = vadd.f32 %v9638_v59, %v6466_v29  ;;  %v8819_v28 = vmul.f32 -1.442695, %v4513_v61 }
 0x886   : > { %v9642_v56 = vpop.eup %9641  ;;  %v5077_v48 = vadd.f32 1.0, %v9640_v21 }
 0x887   : > { %v6471_v15 = vsel %vm6470_vm0, %v9638_v59, %v6467_v30  ;;  %v6479_v46 = vmul.f32 %v9642_v56, %v5076_v2  ;;  %9643 = vpow2.f32 %v8819_v28  ;;  %vm6484_vm3 = vweird.f32 %v9642_v56 }
 0x888   : > { %v6476_v10 = vsel %vm6473_vm1, %v6475_v8, %v6471_v15  ;;  %9645 = vrcp.f32 %v5077_v48  ;;  %vm6485_vm5 = vmor %vm6483_vm4, %vm6484_vm3  ;;  %v6504_v58 = vand.u32 2147483648, %v5077_v48  ;;  %v6502_v7 = vand.u32 2147483647, %v5077_v48 }
 0x889   : > { %7124 = vst.msk [vmem:[%s11058_s11 + $0x2d0] sm:$0xff] %vm7033_vm6, %v6476_v10  ;;  %v6480_v31 = vsub.f32 1.0, %v6479_v46  ;;  %vm6498_vm10 = vweird.f32 %v5077_v48 }
 0x88a   : > { %7765 = vst.msk [vmem:[%s11058_s11 + $0x2d0] sm:$0xff] %vm7674_vm7, %v12055_v43  ;;  %v3813_v16 = vpop.f32.mrf.mxu3  ;;  %v6505_v13 = vor.u32 1.1754944e-38, %v6504_v58  ;;  %vm6503_vm12 = vcmp.eq.f32.partialorder %v6502_v7, 8.507059e+37 }
 0x88b   : > { %v6481_v52 = vmul.f32 %v9642_v56, %v6480_v31  ;;  %v3967_v53 = vmax.f32 %v3813_v16, 0.0 }
 0x88c   : > { %v4516_v47 = vpop.f32.mrf.mxu1 }
 0x88d   : > { %v9644_v23 = vpop.eup %9643  ;;  %v6482_v63 = vadd.f32 %v9642_v56, %v6481_v52  ;;  %v4039_v33 = vpack.c.bf16 %v3967_v53, %v3966_v0  ;;  %v8820_v25 = vmul.f32 -1.442695, %v4516_v47 }
 0x88e   : > { %v9646_v24 = vpop.eup %9645  ;;  %v5078_v14 = vadd.f32 1.0, %v9644_v23 }
 0x88f   : > { %v6486_v41 = vsel %vm6485_vm5, %v9642_v56, %v6482_v63  ;;  %v6494_v57 = vmul.f32 %v9646_v24, %v5077_v48  ;;  %9647 = vpow2.f32 %v8820_v25  ;;  %8717 = vmatmul.msk.bf16.gmra.mxu1 %vm2493_vm2, %v4039_v33  ;;  %vm6499_vm9 = vweird.f32 %v9646_v24 }
 0x890   : > { %v6491_v9 = vsel %vm6488_vm8, %v6490_v19, %v6486_v41  ;;  %9649 = vrcp.f32 %v5078_v14  ;;  %vm6500_vm11 = vmor %vm6498_vm10, %vm6499_vm9  ;;  %v6517_v34 = vand.u32 2147483647, %v5078_v14  ;;  %v6519_v22 = vand.u32 2147483648, %v5078_v14  ;;  %v12058_v19 = vld [vmem:[#allocation63_spill] sm:$0xff] }
 0x891   : > { %7125 = vst.msk [vmem:[%s11058_s11 + $0x2d8] sm:$0xff] %vm7033_vm6, %v6491_v9  ;;  %v6495_v32 = vsub.f32 1.0, %v6494_v57  ;;  %vm6513_vm14 = vweird.f32 %v5078_v14 }
 0x892   : > { %7766 = vst.msk [vmem:[%s11058_s11 + $0x2d8] sm:$0xff] %vm7674_vm7, %v12056_v60  ;;  %v3816_v17 = vpop.f32.mrf.mxu3  ;;  %v6520_v56 = vor.u32 1.1754944e-38, %v6519_v22  ;;  %vm6518_vm0 = vcmp.eq.f32.partialorder %v6517_v34, 8.507059e+37 }
 0x893   : > { %v6496_v3 = vmul.f32 %v9646_v24, %v6495_v32  ;;  %v3968_v11 = vmax.f32 %v3816_v17, 0.0 }
 0x894   : > { %v4518_v27 = vpop.f32.mrf.mxu1 }
 0x895   : > { %v9648_v35 = vpop.eup %9647  ;;  %v6497_v42 = vadd.f32 %v9646_v24, %v6496_v3  ;;  %v8821_v51 = vmul.f32 -1.442695, %v4518_v27 }
 0x896   : > { %v9650_v5 = vpop.eup %9649  ;;  %v5079_v18 = vadd.f32 1.0, %v9648_v35 }
 0x897   : > { %v6501_v59 = vsel %vm6500_vm11, %v9646_v24, %v6497_v42  ;;  %v6509_v12 = vmul.f32 %v9650_v5, %v5078_v14  ;;  %9651 = vpow2.f32 %v8821_v51  ;;  %vm6514_vm13 = vweird.f32 %v9650_v5 }
 0x898   : > { %v6506_v2 = vsel %vm6503_vm12, %v6505_v13, %v6501_v59  ;;  %9653 = vrcp.f32 %v5079_v18  ;;  %vm6515_vm15 = vmor %vm6513_vm14, %vm6514_vm13  ;;  %v6534_v31 = vand.u32 2147483648, %v5079_v18  ;;  %v6532_v62 = vand.u32 2147483647, %v5079_v18 }
 0x899   : > { %7126 = vst.msk [vmem:[%s11058_s11 + $0x2e0] sm:$0xff] %vm7033_vm6, %v6506_v2  ;;  %v6510_v44 = vsub.f32 1.0, %v6509_v12  ;;  %vm6528_vm3 = vweird.f32 %v5079_v18  ;;  %v12059_v12 = vld [vmem:[#allocation64_spill] sm:$0xff] }
 0x89a   : > { %7767 = vst.msk [vmem:[%s11058_s11 + $0x2e0] sm:$0xff] %vm7674_vm7, %v12057_v54  ;;  %v3818_v40 = vpop.f32.mrf.mxu3  ;;  %v6535_v23 = vor.u32 1.1754944e-38, %v6534_v31  ;;  %vm6533_vm5 = vcmp.eq.f32.partialorder %v6532_v62, 8.507059e+37 }
 0x89b   : > { %v6511_v38 = vmul.f32 %v9650_v5, %v6510_v44  ;;  %v3969_v37 = vmax.f32 %v3818_v40, 0.0 }
 0x89c   : > { %v4521_v29 = vpop.f32.mrf.mxu1 }
 0x89d   : > { %v9652_v45 = vpop.eup %9651  ;;  %v6512_v61 = vadd.f32 %v9650_v5, %v6511_v38  ;;  %v4040_v21 = vpack.c.bf16 %v3969_v37, %v3968_v11  ;;  %v8822_v30 = vmul.f32 -1.442695, %v4521_v29 }
 0x89e   : > { %v9654_v28 = vpop.eup %9653  ;;  %v5080_v8 = vadd.f32 1.0, %v9652_v45 }
 0x89f   : > { %v6516_v48 = vsel %vm6515_vm15, %v9650_v5, %v6512_v61  ;;  %v6524_v15 = vmul.f32 %v9654_v28, %v5079_v18  ;;  %9655 = vpow2.f32 %v8822_v30  ;;  %8718 = vmatmul.msk.bf16.gmra.mxu1 %vm2493_vm2, %v4040_v21  ;;  %vm6529_vm1 = vweird.f32 %v9654_v28 }
 0x8a0   : > { %v6521_v46 = vsel %vm6518_vm0, %v6520_v56, %v6516_v48  ;;  %9657 = vrcp.f32 %v5080_v8  ;;  %vm6530_vm4 = vmor %vm6528_vm3, %vm6529_vm1  ;;  %v6547_v14 = vand.u32 2147483647, %v5080_v8  ;;  %v6549_v41 = vand.u32 2147483648, %v5080_v8  ;;  %v12060_v56 = vld [vmem:[#allocation40_spill] sm:$0xff] }
 0x8a1   : > { %7127 = vst.msk [vmem:[%s11058_s11 + $0x2e8] sm:$0xff] %vm7033_vm6, %v6521_v46  ;;  %v6525_v10 = vsub.f32 1.0, %v6524_v15  ;;  %vm6543_vm9 = vweird.f32 %v5080_v8 }
 0x8a2   : > { %7768 = vst.msk [vmem:[%s11058_s11 + $0x2e8] sm:$0xff] %vm7674_vm7, %v11088_v26  ;;  %v3821_v43 = vpop.f32.mrf.mxu3  ;;  %v6550_v42 = vor.u32 1.1754944e-38, %v6549_v41  ;;  %vm6548_vm11 = vcmp.eq.f32.partialorder %v6547_v14, 8.507059e+37 }
 0x8a3   : > { %v6526_v55 = vmul.f32 %v9654_v28, %v6525_v10  ;;  %v3970_v32 = vmax.f32 %v3821_v43, 0.0 }
 0x8a4   : > { %v4523_v16 = vpop.f32.mrf.mxu1 }
 0x8a5   : > { %v9656_v52 = vpop.eup %9655  ;;  %v6527_v0 = vadd.f32 %v9654_v28, %v6526_v55  ;;  %v8823_v53 = vmul.f32 -1.442695, %v4523_v16 }
 0x8a6   : > { %v9658_v47 = vpop.eup %9657  ;;  %v5081_v63 = vadd.f32 1.0, %v9656_v52 }
 0x8a7   : > { %v6531_v33 = vsel %vm6530_vm4, %v9654_v28, %v6527_v0  ;;  %v6539_v25 = vmul.f32 %v9658_v47, %v5080_v8  ;;  %9659 = vpow2.f32 %v8823_v53  ;;  %vm6544_vm8 = vweird.f32 %v9658_v47 }
 0x8a8   : > { %v6536_v26 = vsel %vm6533_vm5, %v6535_v23, %v6531_v33  ;;  %9661 = vrcp.f32 %v5081_v63  ;;  %vm6545_vm10 = vmor %vm6543_vm9, %vm6544_vm8  ;;  %v6564_v2 = vand.u32 2147483648, %v5081_v63  ;;  %v6562_v34 = vand.u32 2147483647, %v5081_v63 }
 0x8a9   : > { %7128 = vst.msk [vmem:[%s11058_s11 + $0x2f0] sm:$0xff] %vm7033_vm6, %v6536_v26  ;;  %v6540_v24 = vsub.f32 1.0, %v6539_v25  ;;  %vm6558_vm13 = vweird.f32 %v5081_v63  ;;  %v12061_v26 = vld [vmem:[#allocation41_spill] sm:$0xff] }
 0x8aa   : > { %7769 = vst.msk [vmem:[%s11058_s11 + $0x2f0] sm:$0xff] %vm7674_vm7, %v12058_v19  ;;  %v3823_v57 = vpop.f32.mrf.mxu3  ;;  %v6565_v29 = vor.u32 1.1754944e-38, %v6564_v2  ;;  %vm6563_vm15 = vcmp.eq.f32.partialorder %v6562_v34, 8.507059e+37 }
 0x8ab   : > { %v6541_v9 = vmul.f32 %v9658_v47, %v6540_v24  ;;  %v3971_v60 = vmax.f32 %v3823_v57, 0.0 }
 0x8ac   : > { %v4526_v58 = vpop.f32.mrf.mxu1 }
 0x8ad   : > { %v9660_v17 = vpop.eup %9659  ;;  %v6542_v3 = vadd.f32 %v9658_v47, %v6541_v9  ;;  %v4041_v7 = vpack.c.bf16 %v3971_v60, %v3970_v32  ;;  %v8824_v27 = vmul.f32 -1.442695, %v4526_v58 }
 0x8ae   : > { %v9662_v35 = vpop.eup %9661  ;;  %v5082_v51 = vadd.f32 1.0, %v9660_v17 }
 0x8af   : > { %v6546_v5 = vsel %vm6545_vm10, %v9658_v47, %v6542_v3  ;;  %v6554_v13 = vmul.f32 %v9662_v35, %v5081_v63  ;;  %9663 = vpow2.f32 %v8824_v27  ;;  %8719 = vmatmul.msk.bf16.gmra.mxu1 %vm2493_vm2, %v4041_v7  ;;  %vm6559_vm12 = vweird.f32 %v9662_v35 }
 0x8b0   : > { %v6551_v18 = vsel %vm6548_vm11, %v6550_v42, %v6546_v5  ;;  %9665 = vrcp.f32 %v5082_v51  ;;  %vm6560_vm14 = vmor %vm6558_vm13, %vm6559_vm12  ;;  %v6577_v8 = vand.u32 2147483647, %v5082_v51  ;;  %v6579_v48 = vand.u32 2147483648, %v5082_v51 }
 0x8b1   : > { %7129 = vst.msk [vmem:[%s11058_s11 + $0x2f8] sm:$0xff] %vm7033_vm6, %v6551_v18  ;;  %v6555_v59 = vsub.f32 1.0, %v6554_v13  ;;  %vm6573_vm1 = vweird.f32 %v5082_v51 }
 0x8b2   : > { %7770 = vst.msk [vmem:[%s11058_s11 + $0x2f8] sm:$0xff] %vm7674_vm7, %v12059_v12  ;;  %v3826_v44 = vpop.f32.mrf.mxu3  ;;  %v6580_v53 = vor.u32 1.1754944e-38, %v6579_v48  ;;  %vm6578_vm4 = vcmp.eq.f32.partialorder %v6577_v8, 8.507059e+37 }
 0x8b3   : > { %v6556_v54 = vmul.f32 %v9662_v35, %v6555_v59  ;;  %v3972_v10 = vmax.f32 %v3826_v44, 0.0 }
 0x8b4   : > { %v4528_v22 = vpop.f32.mrf.mxu1 }
 0x8b5   : > { %v9664_v40 = vpop.eup %9663  ;;  %v6557_v38 = vadd.f32 %v9662_v35, %v6556_v54  ;;  %v8825_v11 = vmul.f32 -1.442695, %v4528_v22 }
 0x8b6   : > { %v9666_v37 = vpop.eup %9665  ;;  %v5083_v45 = vadd.f32 1.0, %v9664_v40 }
 0x8b7   : > { %v6561_v61 = vsel %vm6560_vm14, %v9662_v35, %v6557_v38  ;;  %v6569_v21 = vmul.f32 %v9666_v37, %v5082_v51  ;;  %9667 = vpow2.f32 %v8825_v11  ;;  %vm6574_vm0 = vweird.f32 %v9666_v37  ;;  %v12062_v51 = vld [vmem:[#allocation42_spill] sm:$0xff] }
 0x8b8   : > { %v6566_v30 = vsel %vm6563_vm15, %v6565_v29, %v6561_v61  ;;  %9669 = vrcp.f32 %v5083_v45  ;;  %vm6575_vm3 = vmor %vm6573_vm1, %vm6574_vm0  ;;  %v6594_v24 = vand.u32 2147483648, %v5083_v45  ;;  %v6592_v41 = vand.u32 2147483647, %v5083_v45 }
 0x8b9   : > { %7130 = vst.msk [vmem:[%s11058_s11 + $0x300] sm:$0xff] %vm7033_vm6, %v6566_v30  ;;  %v6570_v28 = vsub.f32 1.0, %v6569_v21  ;;  %vm6588_vm8 = vweird.f32 %v5083_v45  ;;  %v12063_v30 = vld [vmem:[#allocation65_spill] sm:$0xff] }
 0x8ba   : > { %7771 = vst.msk [vmem:[%s11058_s11 + $0x300] sm:$0xff] %vm7674_vm7, %v12060_v56  ;;  %v3828_v15 = vpop.f32.mrf.mxu3  ;;  %v6595_v17 = vor.u32 1.1754944e-38, %v6594_v24  ;;  %vm6593_vm10 = vcmp.eq.f32.partialorder %v6592_v41, 8.507059e+37 }
 0x8bb   : > { %v6571_v46 = vmul.f32 %v9666_v37, %v6570_v28  ;;  %v3973_v31 = vmax.f32 %v3828_v15, 0.0 }
 0x8bc   : > { %v4531_v43 = vpop.f32.mrf.mxu1 }
 0x8bd   : > { %v9668_v55 = vpop.eup %9667  ;;  %v6572_v62 = vadd.f32 %v9666_v37, %v6571_v46  ;;  %v4042_v16 = vpack.c.bf16 %v3973_v31, %v3972_v10  ;;  %v8826_v52 = vmul.f32 -1.442695, %v4531_v43 }
 0x8be   : > { %v9670_v0 = vpop.eup %9669  ;;  %v5084_v47 = vadd.f32 1.0, %v9668_v55 }
 0x8bf   : > { %v6576_v23 = vsel %vm6575_vm3, %v9666_v37, %v6572_v62  ;;  %v6584_v63 = vmul.f32 %v9670_v0, %v5083_v45  ;;  %9671 = vpow2.f32 %v8826_v52  ;;  %8720 = vmatmul.msk.bf16.gmra.mxu1 %vm2493_vm2, %v4042_v16  ;;  %vm6589_vm5 = vweird.f32 %v9670_v0 }
 0x8c0   : > { %v6581_v33 = vsel %vm6578_vm4, %v6580_v53, %v6576_v23  ;;  %9673 = vrcp.f32 %v5084_v47  ;;  %vm6590_vm9 = vmor %vm6588_vm8, %vm6589_vm5  ;;  %v6607_v5 = vand.u32 2147483647, %v5084_v47  ;;  %v6609_v13 = vand.u32 2147483648, %v5084_v47 }
 0x8c1   : > { %7131 = vst.msk [vmem:[%s11058_s11 + $0x308] sm:$0xff] %vm7033_vm6, %v6581_v33  ;;  %v6585_v25 = vsub.f32 1.0, %v6584_v63  ;;  %vm6603_vm12 = vweird.f32 %v5084_v47 }
 0x8c2   : > { %7772 = vst.msk [vmem:[%s11058_s11 + $0x308] sm:$0xff] %vm7674_vm7, %v12061_v26  ;;  %v3831_v19 = vpop.f32.mrf.mxu3  ;;  %v6610_v11 = vor.u32 1.1754944e-38, %v6609_v13  ;;  %vm6608_vm14 = vcmp.eq.f32.partialorder %v6607_v5, 8.507059e+37 }
 0x8c3   : > { %v6586_v14 = vmul.f32 %v9670_v0, %v6585_v25  ;;  %v3974_v12 = vmax.f32 %v3831_v19, 0.0 }
 0x8c4   : > { %v4533_v57 = vpop.f32.mrf.mxu1 }
 0x8c5   : > { %v9672_v9 = vpop.eup %9671  ;;  %v6587_v32 = vadd.f32 %v9670_v0, %v6586_v14  ;;  %v8827_v60 = vmul.f32 -1.442695, %v4533_v57 }
 0x8c6   : > { %v9674_v58 = vpop.eup %9673  ;;  %v5085_v3 = vadd.f32 1.0, %v9672_v9 }
 0x8c7   : > { %v6591_v7 = vsel %vm6590_vm9, %v9670_v0, %v6587_v32  ;;  %v6599_v27 = vmul.f32 %v9674_v58, %v5084_v47  ;;  %9675 = vpow2.f32 %v8827_v60  ;;  %vm6604_vm11 = vweird.f32 %v9674_v58  ;;  %v12064_v47 = vld [vmem:[#allocation43_spill] sm:$0xff] }
 0x8c8   : > { %v6596_v35 = vsel %vm6593_vm10, %v6595_v17, %v6591_v7  ;;  %9677 = vrcp.f32 %v5085_v3  ;;  %vm6605_vm13 = vmor %vm6603_vm12, %vm6604_vm11  ;;  %v6624_v28 = vand.u32 2147483648, %v5085_v3  ;;  %v6622_v48 = vand.u32 2147483647, %v5085_v3 }
 0x8c9   : > { %7132 = vst.msk [vmem:[%s11058_s11 + $0x310] sm:$0xff] %vm7033_vm6, %v6596_v35  ;;  %v6600_v42 = vsub.f32 1.0, %v6599_v27  ;;  %vm6618_vm0 = vweird.f32 %v5085_v3  ;;  %v12065_v35 = vld [vmem:[#allocation66_spill] sm:$0xff] }
 0x8ca   : > { %7773 = vst.msk [vmem:[%s11058_s11 + $0x310] sm:$0xff] %vm7674_vm7, %v12062_v51  ;;  %v3833_v18 = vpop.f32.mrf.mxu3  ;;  %v6625_v55 = vor.u32 1.1754944e-38, %v6624_v28  ;;  %vm6623_vm3 = vcmp.eq.f32.partialorder %v6622_v48, 8.507059e+37 }
 0x8cb   : > { %v6601_v59 = vmul.f32 %v9674_v58, %v6600_v42  ;;  %v3975_v2 = vmax.f32 %v3833_v18, 0.0 }
 0x8cc   : > { %v4536_v44 = vpop.f32.mrf.mxu1 }
 0x8cd   : > { %v9676_v54 = vpop.eup %9675  ;;  %v6602_v34 = vadd.f32 %v9674_v58, %v6601_v59  ;;  %v4043_v22 = vpack.c.bf16 %v3975_v2, %v3974_v12  ;;  %v8828_v40 = vmul.f32 -1.442695, %v4536_v44 }
 0x8ce   : > { %v9678_v38 = vpop.eup %9677  ;;  %v5086_v37 = vadd.f32 1.0, %v9676_v54 }
 0x8cf   : > { %v6606_v29 = vsel %vm6605_vm13, %v9674_v58, %v6602_v34  ;;  %v6614_v45 = vmul.f32 %v9678_v38, %v5085_v3  ;;  %9679 = vpow2.f32 %v8828_v40  ;;  %8721 = vmatmul.msk.bf16.gmra.mxu1 %vm2493_vm2, %v4043_v22  ;;  %vm6619_vm15 = vweird.f32 %v9678_v38 }
 0x8d0   : > { %v6611_v61 = vsel %vm6608_vm14, %v6610_v11, %v6606_v29  ;;  %9681 = vrcp.f32 %v5086_v37  ;;  %vm6620_vm1 = vmor %vm6618_vm0, %vm6619_vm15  ;;  %v6637_v23 = vand.u32 2147483647, %v5086_v37  ;;  %v6639_v63 = vand.u32 2147483648, %v5086_v37 }
 0x8d1   : > { %7133 = vst.msk [vmem:[%s11058_s11 + $0x318] sm:$0xff] %vm7033_vm6, %v6611_v61  ;;  %v6615_v21 = vsub.f32 1.0, %v6614_v45  ;;  %vm6633_vm5 = vweird.f32 %v5086_v37 }
 0x8d2   : > { %7774 = vst.msk [vmem:[%s11058_s11 + $0x318] sm:$0xff] %vm7674_vm7, %v12063_v30  ;;  %v3836_v56 = vpop.f32.mrf.mxu3  ;;  %v6640_v60 = vor.u32 1.1754944e-38, %v6639_v63  ;;  %vm6638_vm9 = vcmp.eq.f32.partialorder %v6637_v23, 8.507059e+37 }
 0x8d3   : > { %v6616_v8 = vmul.f32 %v9678_v38, %v6615_v21  ;;  %v3976_v26 = vmax.f32 %v3836_v56, 0.0 }
 0x8d4   : > { %v4538_v15 = vpop.f32.mrf.mxu1 }
 0x8d5   : > { %v9680_v46 = vpop.eup %9679  ;;  %v6617_v10 = vadd.f32 %v9678_v38, %v6616_v8  ;;  %v8829_v31 = vmul.f32 -1.442695, %v4538_v15 }
 0x8d6   : > { %v9682_v43 = vpop.eup %9681  ;;  %v5087_v62 = vadd.f32 1.0, %v9680_v46 }
 0x8d7   : > { %v6621_v16 = vsel %vm6620_vm1, %v9678_v38, %v6617_v10  ;;  %v6629_v52 = vmul.f32 %v9682_v43, %v5086_v37  ;;  %9683 = vpow2.f32 %v8829_v31  ;;  %vm6634_vm4 = vweird.f32 %v9682_v43 }
 0x8d8   : > { %v6626_v0 = vsel %vm6623_vm3, %v6625_v55, %v6621_v16  ;;  %9685 = vrcp.f32 %v5087_v62  ;;  %vm6635_vm8 = vmor %vm6633_vm5, %vm6634_vm4  ;;  %v6654_v42 = vand.u32 2147483648, %v5087_v62  ;;  %v6652_v13 = vand.u32 2147483647, %v5087_v62  ;;  %v12066_v16 = vld [vmem:[#allocation67_spill] sm:$0xff] }
 0x8d9   : > { %7134 = vst.msk [vmem:[%s11058_s11 + $0x320] sm:$0xff] %vm7033_vm6, %v6626_v0  ;;  %v6630_v53 = vsub.f32 1.0, %v6629_v52  ;;  %vm6648_vm11 = vweird.f32 %v5087_v62 }
 0x8da   : > { %7775 = vst.msk [vmem:[%s11058_s11 + $0x320] sm:$0xff] %vm7674_vm7, %v12064_v47  ;;  %v3838_v33 = vpop.f32.mrf.mxu3  ;;  %v6655_v54 = vor.u32 1.1754944e-38, %v6654_v42  ;;  %vm6653_vm13 = vcmp.eq.f32.partialorder %v6652_v13, 8.507059e+37 }
 0x8db   : > { %v6631_v25 = vmul.f32 %v9682_v43, %v6630_v53  ;;  %v3977_v24 = vmax.f32 %v3838_v33, 0.0 }
 0x8dc   : > { %v4541_v19 = vpop.f32.mrf.mxu1 }
 0x8dd   : > { %v9684_v14 = vpop.eup %9683  ;;  %v6632_v41 = vadd.f32 %v9682_v43, %v6631_v25  ;;  %v4044_v57 = vpack.c.bf16 %v3977_v24, %v3976_v26  ;;  %v8830_v9 = vmul.f32 -1.442695, %v4541_v19 }
 0x8de   : > { %v9686_v32 = vpop.eup %9685  ;;  %v5088_v58 = vadd.f32 1.0, %v9684_v14 }
 0x8df   : > { %v6636_v17 = vsel %vm6635_vm8, %v9682_v43, %v6632_v41  ;;  %v6644_v3 = vmul.f32 %v9686_v32, %v5087_v62  ;;  %9687 = vpow2.f32 %v8830_v9  ;;  %8722 = vmatmul.msk.bf16.gmra.mxu1 %vm2493_vm2, %v4044_v57  ;;  %vm6649_vm10 = vweird.f32 %v9686_v32 }
 0x8e0   : > { %v6641_v7 = vsel %vm6638_vm9, %v6640_v60, %v6636_v17  ;;  %9689 = vrcp.f32 %v5088_v58  ;;  %vm6650_vm12 = vmor %vm6648_vm11, %vm6649_vm10  ;;  %v6667_v37 = vand.u32 2147483647, %v5088_v58  ;;  %v6669_v29 = vand.u32 2147483648, %v5088_v58 }
 0x8e1   : > { %7135 = vst.msk [vmem:[%s11058_s11 + $0x328] sm:$0xff] %vm7033_vm6, %v6641_v7  ;;  %v6645_v27 = vsub.f32 1.0, %v6644_v3  ;;  %vm6663_vm15 = vweird.f32 %v5088_v58 }
 0x8e2   : > { %7776 = vst.msk [vmem:[%s11058_s11 + $0x328] sm:$0xff] %vm7674_vm7, %v12065_v35  ;;  %v3841_v51 = vpop.f32.mrf.mxu3  ;;  %v6670_v10 = vor.u32 1.1754944e-38, %v6669_v29  ;;  %vm6668_vm1 = vcmp.eq.f32.partialorder %v6667_v37, 8.507059e+37 }
 0x8e3   : > { %v6646_v5 = vmul.f32 %v9686_v32, %v6645_v27  ;;  %v3978_v21 = vmax.f32 %v3841_v51, 0.0 }
 0x8e4   : > { %v4543_v18 = vpop.f32.mrf.mxu1 }
 0x8e5   : > { %v9688_v59 = vpop.eup %9687  ;;  %v6647_v12 = vadd.f32 %v9686_v32, %v6646_v5  ;;  %v8831_v2 = vmul.f32 -1.442695, %v4543_v18 }
 0x8e6   : > { %v9690_v44 = vpop.eup %9689  ;;  %v5089_v34 = vadd.f32 1.0, %v9688_v59 }
 0x8e7   : > { %v6651_v22 = vsel %vm6650_vm12, %v9686_v32, %v6647_v12  ;;  %v6659_v40 = vmul.f32 %v9690_v44, %v5088_v58  ;;  %9691 = vpow2.f32 %v8831_v2  ;;  %vm6664_vm14 = vweird.f32 %v9690_v44  ;;  %v12067_v32 = vld [vmem:[#allocation44_spill] sm:$0xff] }
 0x8e8   : > { %v6656_v38 = vsel %vm6653_vm13, %v6655_v54, %v6651_v22  ;;  %9693 = vrcp.f32 %v5089_v34  ;;  %vm6665_vm0 = vmor %vm6663_vm15, %vm6664_vm14  ;;  %v6684_v52 = vand.u32 2147483648, %v5089_v34  ;;  %v6682_v47 = vand.u32 2147483647, %v5089_v34  ;;  %v12068_v22 = vld [vmem:[#allocation68_spill] sm:$0xff] }
 0x8e9   : > { %7136 = vst.msk [vmem:[%s11058_s11 + $0x330] sm:$0xff] %vm7033_vm6, %v6656_v38  ;;  %v6660_v11 = vsub.f32 1.0, %v6659_v40  ;;  %vm6678_vm4 = vweird.f32 %v5089_v34 }
 0x8ea   : > { %7777 = vst.msk [vmem:[%s11058_s11 + $0x330] sm:$0xff] %vm7674_vm7, %v11138_v6  ;;  %v3843_v45 = vpop.f32.mrf.mxu3  ;;  %v6685_v24 = vor.u32 1.1754944e-38, %v6684_v52  ;;  %vm6683_vm8 = vcmp.eq.f32.partialorder %v6682_v47, 8.507059e+37 }
 0x8eb   : > { %v6661_v61 = vmul.f32 %v9690_v44, %v6660_v11  ;;  %v3979_v30 = vmax.f32 %v3843_v45, 0.0 }
 0x8ec   : > { %v4546_v28 = vpop.f32.mrf.mxu1 }
 0x8ed   : > { %v9692_v56 = vpop.eup %9691  ;;  %v6662_v8 = vadd.f32 %v9690_v44, %v6661_v61  ;;  %v4045_v48 = vpack.c.bf16 %v3979_v30, %v3978_v21  ;;  %v8832_v15 = vmul.f32 -1.442695, %v4546_v28 }
 0x8ee   : > { %v9694_v46 = vpop.eup %9693  ;;  %v5090_v31 = vadd.f32 1.0, %v9692_v56 }
 0x8ef   : > { %v6666_v6 = vsel %vm6665_vm0, %v9690_v44, %v6662_v8  ;;  %v6674_v43 = vmul.f32 %v9694_v46, %v5089_v34  ;;  %9695 = vpow2.f32 %v8832_v15  ;;  %8723 = vmatmul.msk.bf16.gmra.mxu1 %vm2493_vm2, %v4045_v48  ;;  %vm6679_vm3 = vweird.f32 %v9694_v46 }
 0x8f0   : > { %v6671_v55 = vsel %vm6668_vm1, %v6670_v10, %v6666_v6  ;;  %9697 = vrcp.f32 %v5090_v31  ;;  %vm6680_vm5 = vmor %vm6678_vm4, %vm6679_vm3  ;;  %v6697_v60 = vand.u32 2147483647, %v5090_v31  ;;  %v6699_v58 = vand.u32 2147483648, %v5090_v31 }
 0x8f1   : > { %7137 = vst.msk [vmem:[%s11058_s11 + $0x338] sm:$0xff] %vm7033_vm6, %v6671_v55  ;;  %v6675_v62 = vsub.f32 1.0, %v6674_v43  ;;  %vm6693_vm10 = vweird.f32 %v5090_v31 }
 0x8f2   : > { %7778 = vst.msk [vmem:[%s11058_s11 + $0x338] sm:$0xff] %vm7674_vm7, %v12066_v16  ;;  %v3846_v0 = vpop.f32.mrf.mxu3  ;;  %v6700_v59 = vor.u32 1.1754944e-38, %v6699_v58  ;;  %vm6698_vm12 = vcmp.eq.f32.partialorder %v6697_v60, 8.507059e+37 }
 0x8f3   : > { %v6676_v53 = vmul.f32 %v9694_v46, %v6675_v62  ;;  %v3980_v7 = vmax.f32 %v3846_v0, 0.0 }
 0x8f4   : > { %v4548_v23 = vpop.f32.mrf.mxu1 }
 0x8f5   : > { %v9696_v63 = vpop.eup %9695  ;;  %v6677_v33 = vadd.f32 %v9694_v46, %v6676_v53  ;;  %v8833_v25 = vmul.f32 -1.442695, %v4548_v23 }
 0x8f6   : > { %v9698_v26 = vpop.eup %9697  ;;  %v5091_v19 = vadd.f32 1.0, %v9696_v63 }
 0x8f7   : > { %v6681_v14 = vsel %vm6680_vm5, %v9694_v46, %v6677_v33  ;;  %v6689_v41 = vmul.f32 %v9698_v26, %v5090_v31  ;;  %9699 = vpow2.f32 %v8833_v25  ;;  %vm6694_vm9 = vweird.f32 %v9698_v26 }
 0x8f8   : > { %v6686_v57 = vsel %vm6683_vm8, %v6685_v24, %v6681_v14  ;;  %9701 = vrcp.f32 %v5091_v19  ;;  %vm6695_vm11 = vmor %vm6693_vm10, %vm6694_vm9  ;;  %v6714_v40 = vand.u32 2147483648, %v5091_v19  ;;  %v6712_v37 = vand.u32 2147483647, %v5091_v19 }
 0x8f9   : > { %7138 = vst.msk [vmem:[%s11058_s11 + $0x340] sm:$0xff] %vm7033_vm6, %v6686_v57  ;;  %v6690_v9 = vsub.f32 1.0, %v6689_v41  ;;  %vm6708_vm14 = vweird.f32 %v5091_v19 }
 0x8fa   : > { %7779 = vst.msk [vmem:[%s11058_s11 + $0x340] sm:$0xff] %vm7674_vm7, %v12067_v32  ;;  %v3848_v17 = vpop.f32.mrf.mxu3  ;;  %v6715_v28 = vor.u32 1.1754944e-38, %v6714_v40  ;;  %vm6713_vm0 = vcmp.eq.f32.partialorder %v6712_v37, 8.507059e+37 }
 0x8fb   : > { %v6691_v3 = vmul.f32 %v9698_v26, %v6690_v9  ;;  %v3981_v27 = vmax.f32 %v3848_v17, 0.0 }
 0x8fc   : > { %v4551_v35 = vpop.f32.mrf.mxu1 }
 0x8fd   : > { %v9700_v42 = vpop.eup %9699  ;;  %v6692_v51 = vadd.f32 %v9698_v26, %v6691_v3  ;;  %v4046_v5 = vpack.c.bf16 %v3981_v27, %v3980_v7  ;;  %v8834_v13 = vmul.f32 -1.442695, %v4551_v35 }
 0x8fe   : > { %v9702_v18 = vpop.eup %9701  ;;  %v5092_v12 = vadd.f32 1.0, %v9700_v42 }
 0x8ff   : > { %v6696_v2 = vsel %vm6695_vm11, %v9698_v26, %v6692_v51  ;;  %v6704_v44 = vmul.f32 %v9702_v18, %v5091_v19  ;;  %9703 = vpow2.f32 %v8834_v13  ;;  %8724 = vmatmul.msk.bf16.gmra.mxu1 %vm2493_vm2, %v4046_v5  ;;  %vm6709_vm13 = vweird.f32 %v9702_v18  ;;  %v12069_v19 = vld [vmem:[#allocation69_spill] sm:$0xff] }
 0x900   : > { %v6701_v54 = vsel %vm6698_vm12, %v6700_v59, %v6696_v2  ;;  %9705 = vrcp.f32 %v5092_v12  ;;  %vm6710_vm15 = vmor %vm6708_vm14, %vm6709_vm13  ;;  %v6727_v10 = vand.u32 2147483647, %v5092_v12  ;;  %v6729_v31 = vand.u32 2147483648, %v5092_v12  ;;  %v12070_v5 = vld [vmem:[#allocation45_spill] sm:$0xff] }
 0x901   : > { %7139 = vst.msk [vmem:[%s11058_s11 + $0x348] sm:$0xff] %vm7033_vm6, %v6701_v54  ;;  %v6705_v34 = vsub.f32 1.0, %v6704_v44  ;;  %vm6723_vm3 = vweird.f32 %v5092_v12 }
 0x902   : > { %7780 = vst.msk [vmem:[%s11058_s11 + $0x348] sm:$0xff] %vm7674_vm7, %v12068_v22  ;;  %v3851_v38 = vpop.f32.mrf.mxu3  ;;  %v6730_v63 = vor.u32 1.1754944e-38, %v6729_v31  ;;  %vm6728_vm5 = vcmp.eq.f32.partialorder %v6727_v10, 8.507059e+37 }
 0x903   : > { %v6706_v11 = vmul.f32 %v9702_v18, %v6705_v34  ;;  %v3982_v55 = vmax.f32 %v3851_v38, 0.0 }
 0x904   : > { %v4553_v29 = vpop.f32.mrf.mxu1 }
 0x905   : > { %v9704_v45 = vpop.eup %9703  ;;  %v6707_v61 = vadd.f32 %v9702_v18, %v6706_v11  ;;  %v8835_v21 = vmul.f32 -1.442695, %v4553_v29 }
 0x906   : > { %v9706_v30 = vpop.eup %9705  ;;  %v5093_v56 = vadd.f32 1.0, %v9704_v45  ;;  %v12071_v45 = vld [vmem:[#allocation70_spill] sm:$0xff] }
 0x907   : > { %v6711_v8 = vsel %vm6710_vm15, %v9702_v18, %v6707_v61  ;;  %v6719_v48 = vmul.f32 %v9706_v30, %v5092_v12  ;;  %9707 = vpow2.f32 %v8835_v21  ;;  %vm6724_vm1 = vweird.f32 %v9706_v30 }
 0x908   : > { %v6716_v15 = vsel %vm6713_vm0, %v6715_v28, %v6711_v8  ;;  %9709 = vrcp.f32 %v5093_v56  ;;  %vm6725_vm4 = vmor %vm6723_vm3, %vm6724_vm1  ;;  %v6744_v14 = vand.u32 2147483648, %v5093_v56  ;;  %v6742_v57 = vand.u32 2147483647, %v5093_v56 }
 0x909   : > { %7140 = vst.msk [vmem:[%s11058_s11 + $0x350] sm:$0xff] %vm7033_vm6, %v6716_v15  ;;  %v6720_v46 = vsub.f32 1.0, %v6719_v48  ;;  %vm6738_vm9 = vweird.f32 %v5093_v56 }
 0x90a   : > { %7781 = vst.msk [vmem:[%s11058_s11 + $0x350] sm:$0xff] %vm7674_vm7, %v11166_v4  ;;  %v3853_v6 = vpop.f32.mrf.mxu3  ;;  %v6745_v3 = vor.u32 1.1754944e-38, %v6744_v14  ;;  %vm6743_vm10 = vcmp.eq.f32.partialorder %v6742_v57, 8.507059e+37 }
 0x90b   : > { %v6721_v43 = vmul.f32 %v9706_v30, %v6720_v46  ;;  %v3983_v62 = vmax.f32 %v3853_v6, 0.0 }
 0x90c   : > { %v4556_v16 = vpop.f32.mrf.mxu1 }
 0x90d   : > { %v9708_v52 = vpop.eup %9707  ;;  %v6722_v0 = vadd.f32 %v9706_v30, %v6721_v43  ;;  %v4047_v53 = vpack.c.bf16 %v3983_v62, %v3982_v55  ;;  %v8836_v47 = vmul.f32 -1.442695, %v4556_v16 }
 0x90e   : > { %v9710_v23 = vpop.eup %9709  ;;  %v5094_v33 = vadd.f32 1.0, %v9708_v52 }
 0x90f   : > { %v6726_v4 = vsel %vm6725_vm4, %v9706_v30, %v6722_v0  ;;  %v6734_v25 = vmul.f32 %v9710_v23, %v5093_v56  ;;  %9711 = vpow2.f32 %v8836_v47  ;;  %8725 = vmatmul.msk.bf16.gmra.mxu1 %vm2493_vm2, %v4047_v53  ;;  %vm6739_vm8 = vweird.f32 %v9710_v23 }
 0x910   : > { %v6731_v26 = vsel %vm6728_vm5, %v6730_v63, %v6726_v4  ;;  %9713 = vrcp.f32 %v5094_v33  ;;  %vm6740_vm2 = vmor %vm6738_vm9, %vm6739_vm8  ;;  %v6759_v13 = vand.u32 2147483648, %v5094_v33  ;;  %v6757_v59 = vand.u32 2147483647, %v5094_v33 }
 0x911   : > { %7141 = vst.msk [vmem:[%s11058_s11 + $0x358] sm:$0xff] %vm7033_vm6, %v6731_v26  ;;  %v6735_v24 = vsub.f32 1.0, %v6734_v25  ;;  %vm6753_vm12 = vweird.f32 %v5094_v33 }
 0x912   : > { %7782 = vst.msk [vmem:[%s11058_s11 + $0x358] sm:$0xff] %vm7674_vm7, %v12069_v19  ;;  %v6760_v22 = vor.u32 1.1754944e-38, %v6759_v13  ;;  %vm6758_vm14 = vcmp.eq.f32.partialorder %v6757_v59, 8.507059e+37  ;;  %v12072_v19 = vld [vmem:[#allocation71_spill] sm:$0xff] }
 0x913   : > { %v6736_v41 = vmul.f32 %v9710_v23, %v6735_v24 }
 0x914   : > { %v4558_v9 = vpop.f32.mrf.mxu1 }
 0x915   : > { %v9712_v32 = vpop.eup %9711  ;;  %v6737_v60 = vadd.f32 %v9710_v23, %v6736_v41  ;;  %v8837_v58 = vmul.f32 -1.442695, %v4558_v9 }
 0x916   : > { %v9714_v17 = vpop.eup %9713  ;;  %v5095_v7 = vadd.f32 1.0, %v9712_v32 }
 0x917   : > { %v6741_v27 = vsel %vm6740_vm2, %v9710_v23, %v6737_v60  ;;  %v6749_v35 = vmul.f32 %v9714_v17, %v5094_v33  ;;  %9715 = vpow2.f32 %v8837_v58  ;;  %vm6754_vm11 = vweird.f32 %v9714_v17 }
 0x918   : > { %v6746_v42 = vsel %vm6743_vm10, %v6745_v3, %v6741_v27  ;;  %9717 = vrcp.f32 %v5095_v7  ;;  %vm6755_vm13 = vmor %vm6753_vm12, %vm6754_vm11  ;;  %v6774_v61 = vand.u32 2147483648, %v5095_v7  ;;  %v6772_v30 = vand.u32 2147483647, %v5095_v7 }
 0x919   : > { %7142 = vst.msk [vmem:[%s11058_s11 + $0x360] sm:$0xff] %vm7033_vm6, %v6746_v42  ;;  %v6750_v51 = vsub.f32 1.0, %v6749_v35  ;;  %vm6768_vm0 = vweird.f32 %v5095_v7 }
 0x91a   : > { %7783 = vst.msk [vmem:[%s11058_s11 + $0x360] sm:$0xff] %vm7674_vm7, %v12070_v5  ;;  %v6775_v46 = vor.u32 1.1754944e-38, %v6774_v61  ;;  %vm6773_vm3 = vcmp.eq.f32.partialorder %v6772_v30, 8.507059e+37 }
 0x91b   : > { %v6751_v18 = vmul.f32 %v9714_v17, %v6750_v51 }
 0x91c   : > { %v4561_v12 = vpop.f32.mrf.mxu1 }
 0x91d   : > { %v9716_v2 = vpop.eup %9715  ;;  %v6752_v44 = vadd.f32 %v9714_v17, %v6751_v18  ;;  %v8838_v54 = vmul.f32 -1.442695, %v4561_v12 }
 0x91e   : > { %v9718_v34 = vpop.eup %9717  ;;  %v5096_v40 = vadd.f32 1.0, %v9716_v2 }
 0x91f   : > { %v6756_v38 = vsel %vm6755_vm13, %v9714_v17, %v6752_v44  ;;  %v6764_v11 = vmul.f32 %v9718_v34, %v5095_v7  ;;  %9719 = vpow2.f32 %v8838_v54  ;;  %vm6769_vm15 = vweird.f32 %v9718_v34 }
 0x920   : > { %v6761_v37 = vsel %vm6758_vm14, %v6760_v22, %v6756_v38  ;;  %9721 = vrcp.f32 %v5096_v40  ;;  %vm6770_vm1 = vmor %vm6768_vm0, %vm6769_vm15  ;;  %v6789_v62 = vand.u32 2147483648, %v5096_v40  ;;  %v6787_v52 = vand.u32 2147483647, %v5096_v40 }
 0x921   : > { %7143 = vst.msk [vmem:[%s11058_s11 + $0x368] sm:$0xff] %vm7033_vm6, %v6761_v37  ;;  %v6765_v29 = vsub.f32 1.0, %v6764_v11  ;;  %vm6783_vm5 = vweird.f32 %v5096_v40  ;;  %v12073_v37 = vld [vmem:[#allocation72_spill] sm:$0xff] }
 0x922   : > { %7784 = vst.msk [vmem:[%s11058_s11 + $0x368] sm:$0xff] %vm7674_vm7, %v12071_v45  ;;  %v6790_v33 = vor.u32 1.1754944e-38, %v6789_v62  ;;  %vm6788_vm9 = vcmp.eq.f32.partialorder %v6787_v52, 8.507059e+37 }
 0x923   : > { %v6766_v21 = vmul.f32 %v9718_v34, %v6765_v29 }
 0x924   : > { %v4563_v28 = vpop.f32.mrf.mxu1 }
 0x925   : > { %v9720_v56 = vpop.eup %9719  ;;  %v6767_v8 = vadd.f32 %v9718_v34, %v6766_v21  ;;  %v8839_v48 = vmul.f32 -1.442695, %v4563_v28 }
 0x926   : > { %v9722_v15 = vpop.eup %9721  ;;  %v5097_v10 = vadd.f32 1.0, %v9720_v56 }
 0x927   : > { %v6771_v31 = vsel %vm6770_vm1, %v9718_v34, %v6767_v8  ;;  %v6779_v6 = vmul.f32 %v9722_v15, %v5096_v40  ;;  %9723 = vpow2.f32 %v8839_v48  ;;  %vm6784_vm4 = vweird.f32 %v9722_v15 }
 0x928   : > { %v6776_v43 = vsel %vm6773_vm3, %v6775_v46, %v6771_v31  ;;  %9725 = vrcp.f32 %v5097_v10  ;;  %vm6785_vm8 = vmor %vm6783_vm5, %vm6784_vm4  ;;  %v6804_v14 = vand.u32 2147483648, %v5097_v10  ;;  %v6802_v57 = vand.u32 2147483647, %v5097_v10 }
 0x929   : > { %7144 = vst.msk [vmem:[%s11058_s11 + $0x370] sm:$0xff] %vm7033_vm6, %v6776_v43  ;;  %v6780_v55 = vsub.f32 1.0, %v6779_v6  ;;  %vm6798_vm10 = vweird.f32 %v5097_v10 }
 0x92a   : > { %7785 = vst.msk [vmem:[%s11058_s11 + $0x370] sm:$0xff] %vm7674_vm7, %v11194_v1  ;;  %v6805_v3 = vor.u32 1.1754944e-38, %v6804_v14  ;;  %vm6803_vm12 = vcmp.eq.f32.partialorder %v6802_v57, 8.507059e+37 }
 0x92b   : > { %v6781_v16 = vmul.f32 %v9722_v15, %v6780_v55 }
 0x92c   : > { %v4566_v0 = vpop.f32.mrf.mxu1 }
 0x92d   : > { %v9724_v53 = vpop.eup %9723  ;;  %v6782_v47 = vadd.f32 %v9722_v15, %v6781_v16  ;;  %v8840_v23 = vmul.f32 -1.442695, %v4566_v0 }
 0x92e   : > { %v9726_v63 = vpop.eup %9725  ;;  %v5098_v4 = vadd.f32 1.0, %v9724_v53 }
 0x92f   : > { %v6786_v25 = vsel %vm6785_vm8, %v9722_v15, %v6782_v47  ;;  %v6794_v26 = vmul.f32 %v9726_v63, %v5097_v10  ;;  %9727 = vpow2.f32 %v8840_v23  ;;  %vm6799_vm2 = vweird.f32 %v9726_v63 }
 0x930   : > { %v6791_v1 = vsel %vm6788_vm9, %v6790_v33, %v6786_v25  ;;  %9729 = vrcp.f32 %v5098_v4  ;;  %vm6800_vm11 = vmor %vm6798_vm10, %vm6799_vm2  ;;  %v6819_v5 = vand.u32 2147483648, %v5098_v4  ;;  %v6817_v18 = vand.u32 2147483647, %v5098_v4 }
 0x931   : > { %7145 = vst.msk [vmem:[%s11058_s11 + $0x378] sm:$0xff] %vm7033_vm6, %v6791_v1  ;;  %v6795_v24 = vsub.f32 1.0, %v6794_v26  ;;  %vm6813_vm14 = vweird.f32 %v5098_v4  ;;  %v12074_v26 = vld [vmem:[#allocation73_spill] sm:$0xff] }
 0x932   : > { %7786 = vst.msk [vmem:[%s11058_s11 + $0x378] sm:$0xff] %vm7674_vm7, %v12072_v19  ;;  %v6820_v34 = vor.u32 1.1754944e-38, %v6819_v5  ;;  %vm6818_vm0 = vcmp.eq.f32.partialorder %v6817_v18, 8.507059e+37 }
 0x933   : > { %v6796_v41 = vmul.f32 %v9726_v63, %v6795_v24 }
 0x934   : > { %v4568_v9 = vpop.f32.mrf.mxu1 }
 0x935   : > { %v9728_v32 = vpop.eup %9727  ;;  %v6797_v60 = vadd.f32 %v9726_v63, %v6796_v41  ;;  %v8841_v58 = vmul.f32 -1.442695, %v4568_v9 }
 0x936   : > { %v9730_v17 = vpop.eup %9729  ;;  %v5099_v7 = vadd.f32 1.0, %v9728_v32 }
 0x937   : > { %v6801_v27 = vsel %vm6800_vm11, %v9726_v63, %v6797_v60  ;;  %v6809_v35 = vmul.f32 %v9730_v17, %v5098_v4  ;;  %9731 = vpow2.f32 %v8841_v58  ;;  %vm6814_vm13 = vweird.f32 %v9730_v17 }
 0x938   : > { %v6806_v42 = vsel %vm6803_vm12, %v6805_v3, %v6801_v27  ;;  %9733 = vrcp.f32 %v5099_v7  ;;  %vm6815_vm15 = vmor %vm6813_vm14, %vm6814_vm13  ;;  %v6834_v29 = vand.u32 2147483648, %v5099_v7  ;;  %v6832_v61 = vand.u32 2147483647, %v5099_v7 }
 0x939   : > { %7146 = vst.msk [vmem:[%s11058_s11 + $0x380] sm:$0xff] %vm7033_vm6, %v6806_v42  ;;  %v6810_v51 = vsub.f32 1.0, %v6809_v35  ;;  %vm6828_vm3 = vweird.f32 %v5099_v7  ;;  %v12075_v35 = vld [vmem:[#allocation46_spill] sm:$0xff] }
 0x93a   : > { %7787 = vst.msk [vmem:[%s11058_s11 + $0x380] sm:$0xff] %vm7674_vm7, %v11208_v39  ;;  %v6835_v48 = vor.u32 1.1754944e-38, %v6834_v29  ;;  %vm6833_vm5 = vcmp.eq.f32.partialorder %v6832_v61, 8.507059e+37 }
 0x93b   : > { %v6811_v13 = vmul.f32 %v9730_v17, %v6810_v51 }
 0x93c   : > { %v4571_v59 = vpop.f32.mrf.mxu1 }
 0x93d   : > { %v9732_v12 = vpop.eup %9731  ;;  %v6812_v2 = vadd.f32 %v9730_v17, %v6811_v13  ;;  %v8842_v44 = vmul.f32 -1.442695, %v4571_v59 }
 0x93e   : > { %v9734_v54 = vpop.eup %9733  ;;  %v5100_v22 = vadd.f32 1.0, %v9732_v12 }
 0x93f   : > { %v6816_v40 = vsel %vm6815_vm15, %v9730_v17, %v6812_v2  ;;  %v6824_v38 = vmul.f32 %v9734_v54, %v5099_v7  ;;  %9735 = vpow2.f32 %v8842_v44  ;;  %vm6829_vm1 = vweird.f32 %v9734_v54 }
 0x940   : > { %v6821_v39 = vsel %vm6818_vm0, %v6820_v34, %v6816_v40  ;;  %9737 = vrcp.f32 %v5100_v22  ;;  %vm6830_vm4 = vmor %vm6828_vm3, %vm6829_vm1  ;;  %v6849_v43 = vand.u32 2147483648, %v5100_v22  ;;  %v6847_v62 = vand.u32 2147483647, %v5100_v22 }
 0x941   : > { %7147 = vst.msk [vmem:[%s11058_s11 + $0x388] sm:$0xff] %vm7033_vm6, %v6821_v39  ;;  %v6825_v11 = vsub.f32 1.0, %v6824_v38  ;;  %vm6843_vm9 = vweird.f32 %v5100_v22  ;;  %v12076_v39 = vld [vmem:[#allocation74_spill] sm:$0xff] }
 0x942   : > { %7788 = vst.msk [vmem:[%s11058_s11 + $0x388] sm:$0xff] %vm7674_vm7, %v12073_v37  ;;  %v6850_v23 = vor.u32 1.1754944e-38, %v6849_v43  ;;  %vm6848_vm10 = vcmp.eq.f32.partialorder %v6847_v62, 8.507059e+37 }
 0x943   : > { %v6826_v45 = vmul.f32 %v9734_v54, %v6825_v11 }
 0x944   : > { %v4573_v21 = vpop.f32.mrf.mxu1 }
 0x945   : > { %v9736_v30 = vpop.eup %9735  ;;  %v6827_v28 = vadd.f32 %v9734_v54, %v6826_v45  ;;  %v8843_v56 = vmul.f32 -1.442695, %v4573_v21 }
 0x946   : > { %v9738_v8 = vpop.eup %9737  ;;  %v5101_v15 = vadd.f32 1.0, %v9736_v30 }
 0x947   : > { %v6831_v46 = vsel %vm6830_vm4, %v9734_v54, %v6827_v28  ;;  %v6839_v10 = vmul.f32 %v9738_v8, %v5100_v22  ;;  %9739 = vpow2.f32 %v8843_v56  ;;  %vm6844_vm8 = vweird.f32 %v9738_v8 }
 0x948   : > { %v6836_v31 = vsel %vm6833_vm5, %v6835_v48, %v6831_v46  ;;  %9741 = vrcp.f32 %v5101_v15  ;;  %vm6845_vm2 = vmor %vm6843_vm9, %vm6844_vm8  ;;  %v6864_v1 = vand.u32 2147483648, %v5101_v15  ;;  %v6862_v19 = vand.u32 2147483647, %v5101_v15 }
 0x949   : > { %7148 = vst.msk [vmem:[%s11058_s11 + $0x390] sm:$0xff] %vm7033_vm6, %v6836_v31  ;;  %v6840_v6 = vsub.f32 1.0, %v6839_v10  ;;  %vm6858_vm12 = vweird.f32 %v5101_v15 }
 0x94a   : > { %7789 = vst.msk [vmem:[%s11058_s11 + $0x390] sm:$0xff] %vm7674_vm7, %v11222_v36  ;;  %v6865_v60 = vor.u32 1.1754944e-38, %v6864_v1  ;;  %vm6863_vm14 = vcmp.eq.f32.partialorder %v6862_v19, 8.507059e+37 }
 0x94b   : > { %v6841_v55 = vmul.f32 %v9738_v8, %v6840_v6 }
 0x94c   : > { %v4576_v16 = vpop.f32.mrf.mxu1 }
 0x94d   : > { %v9740_v52 = vpop.eup %9739  ;;  %v6842_v0 = vadd.f32 %v9738_v8, %v6841_v55  ;;  %v8844_v53 = vmul.f32 -1.442695, %v4576_v16 }
 0x94e   : > { %v9742_v47 = vpop.eup %9741  ;;  %v5102_v63 = vadd.f32 1.0, %v9740_v52 }
 0x94f   : > { %v6846_v33 = vsel %vm6845_vm2, %v9738_v8, %v6842_v0  ;;  %v6854_v4 = vmul.f32 %v9742_v47, %v5101_v15  ;;  %9743 = vpow2.f32 %v8844_v53  ;;  %vm6859_vm11 = vweird.f32 %v9742_v47 }
 0x950   : > { %v6851_v36 = vsel %vm6848_vm10, %v6850_v23, %v6846_v33  ;;  %9745 = vrcp.f32 %v5102_v63  ;;  %vm6860_vm13 = vmor %vm6858_vm12, %vm6859_vm11  ;;  %v6879_v42 = vand.u32 2147483648, %v5102_v63  ;;  %v6877_v5 = vand.u32 2147483647, %v5102_v63 }
 0x951   : > { %7149 = vst.msk [vmem:[%s11058_s11 + $0x398] sm:$0xff] %vm7033_vm6, %v6851_v36  ;;  %v6855_v25 = vsub.f32 1.0, %v6854_v4  ;;  %vm6873_vm0 = vweird.f32 %v5102_v63  ;;  %v12077_v4 = vld [vmem:[#allocation75_spill] sm:$0xff] }
 0x952   : > { %7790 = vst.msk [vmem:[%s11058_s11 + $0x398] sm:$0xff] %vm7674_vm7, %v12074_v26  ;;  %v6880_v44 = vor.u32 1.1754944e-38, %v6879_v42  ;;  %vm6878_vm3 = vcmp.eq.f32.partialorder %v6877_v5, 8.507059e+37 }
 0x953   : > { %v6856_v24 = vmul.f32 %v9742_v47, %v6855_v25 }
 0x954   : > { %v4578_v14 = vpop.f32.mrf.mxu1 }
 0x955   : > { %v9744_v41 = vpop.eup %9743  ;;  %v6857_v57 = vadd.f32 %v9742_v47, %v6856_v24  ;;  %v8845_v9 = vmul.f32 -1.442695, %v4578_v14 }
 0x956   : > { %v9746_v32 = vpop.eup %9745  ;;  %v5103_v58 = vadd.f32 1.0, %v9744_v41 }
 0x957   : > { %v6861_v17 = vsel %vm6860_vm13, %v9742_v47, %v6857_v57  ;;  %v6869_v3 = vmul.f32 %v9746_v32, %v5102_v63  ;;  %9747 = vpow2.f32 %v8845_v9  ;;  %vm6874_vm15 = vweird.f32 %v9746_v32 }
 0x958   : > { %v6866_v7 = vsel %vm6863_vm14, %v6865_v60, %v6861_v17  ;;  %9749 = vrcp.f32 %v5103_v58  ;;  %vm6875_vm1 = vmor %vm6873_vm0, %vm6874_vm15  ;;  %v6894_v11 = vand.u32 2147483648, %v5103_v58  ;;  %v6892_v29 = vand.u32 2147483647, %v5103_v58 }
 0x959   : > { %7150 = vst.msk [vmem:[%s11058_s11 + $0x3a0] sm:$0xff] %vm7033_vm6, %v6866_v7  ;;  %v6870_v27 = vsub.f32 1.0, %v6869_v3  ;;  %vm6888_vm5 = vweird.f32 %v5103_v58 }
 0x95a   : > { %7791 = vst.msk [vmem:[%s11058_s11 + $0x3a0] sm:$0xff] %vm7674_vm7, %v12075_v35  ;;  %v6895_v56 = vor.u32 1.1754944e-38, %v6894_v11  ;;  %vm6893_vm9 = vcmp.eq.f32.partialorder %v6892_v29, 8.507059e+37 }
 0x95b   : > { %v6871_v51 = vmul.f32 %v9746_v32, %v6870_v27 }
 0x95c   : > { %v4581_v13 = vpop.f32.mrf.mxu1 }
 0x95d   : > { %v9748_v18 = vpop.eup %9747  ;;  %v6872_v59 = vadd.f32 %v9746_v32, %v6871_v51  ;;  %v8846_v12 = vmul.f32 -1.442695, %v4581_v13 }
 0x95e   : > { %v9750_v2 = vpop.eup %9749  ;;  %v5104_v54 = vadd.f32 1.0, %v9748_v18 }
 0x95f   : > { %v6876_v34 = vsel %vm6875_vm1, %v9746_v32, %v6872_v59  ;;  %v6884_v22 = vmul.f32 %v9750_v2, %v5103_v58  ;;  %9751 = vpow2.f32 %v8846_v12  ;;  %vm6889_vm4 = vweird.f32 %v9750_v2 }
 0x960   : > { %v6881_v40 = vsel %vm6878_vm3, %v6880_v44, %v6876_v34  ;;  %9753 = vrcp.f32 %v5104_v54  ;;  %vm6890_vm8 = vmor %vm6888_vm5, %vm6889_vm4  ;;  %v6909_v31 = vand.u32 2147483648, %v5104_v54  ;;  %v6907_v43 = vand.u32 2147483647, %v5104_v54 }
 0x961   : > { %7151 = vst.msk [vmem:[%s11058_s11 + $0x3a8] sm:$0xff] %vm7033_vm6, %v6881_v40  ;;  %v6885_v38 = vsub.f32 1.0, %v6884_v22  ;;  %vm6903_vm10 = vweird.f32 %v5104_v54 }
 0x962   : > { %7792 = vst.msk [vmem:[%s11058_s11 + $0x3a8] sm:$0xff] %vm7674_vm7, %v12076_v39  ;;  %v6910_v53 = vor.u32 1.1754944e-38, %v6909_v31  ;;  %vm6908_vm12 = vcmp.eq.f32.partialorder %v6907_v43, 8.507059e+37 }
 0x963   : > { %v6886_v37 = vmul.f32 %v9750_v2, %v6885_v38 }
 0x964   : > { %v4583_v45 = vpop.f32.mrf.mxu1 }
 0x965   : > { %v9752_v61 = vpop.eup %9751  ;;  %v6887_v21 = vadd.f32 %v9750_v2, %v6886_v37  ;;  %v8847_v30 = vmul.f32 -1.442695, %v4583_v45 }
 0x966   : > { %v9754_v28 = vpop.eup %9753  ;;  %v5105_v8 = vadd.f32 1.0, %v9752_v61 }
 0x967   : > { %v6891_v48 = vsel %vm6890_vm8, %v9750_v2, %v6887_v21  ;;  %v6899_v15 = vmul.f32 %v9754_v28, %v5104_v54  ;;  %9755 = vpow2.f32 %v8847_v30  ;;  %vm6904_vm2 = vweird.f32 %v9754_v28  ;;  %v12078_v54 = vld [vmem:[#allocation76_spill] sm:$0xff] }
 0x968   : > { %v6896_v46 = vsel %vm6893_vm9, %v6895_v56, %v6891_v48  ;;  %9757 = vrcp.f32 %v5105_v8  ;;  %vm6905_vm11 = vmor %vm6903_vm10, %vm6904_vm2  ;;  %v6924_v36 = vand.u32 2147483648, %v5105_v8  ;;  %v6922_v26 = vand.u32 2147483647, %v5105_v8 }
 0x969   : > { %7152 = vst.msk [vmem:[%s11058_s11 + $0x3b0] sm:$0xff] %vm7033_vm6, %v6896_v46  ;;  %v6900_v10 = vsub.f32 1.0, %v6899_v15  ;;  %vm6918_vm14 = vweird.f32 %v5105_v8 }
 0x96a   : > { %7793 = vst.msk [vmem:[%s11058_s11 + $0x3b0] sm:$0xff] %vm7674_vm7, %v11250_v20  ;;  %v6925_v57 = vor.u32 1.1754944e-38, %v6924_v36  ;;  %vm6923_vm0 = vcmp.eq.f32.partialorder %v6922_v26, 8.507059e+37 }
 0x96b   : > { %v6901_v6 = vmul.f32 %v9754_v28, %v6900_v10 }
 0x96c   : > { %v4586_v55 = vpop.f32.mrf.mxu1 }
 0x96d   : > { %v9756_v62 = vpop.eup %9755  ;;  %v6902_v16 = vadd.f32 %v9754_v28, %v6901_v6  ;;  %v8848_v52 = vmul.f32 -1.442695, %v4586_v55 }
 0x96e   : > { %v9758_v0 = vpop.eup %9757  ;;  %v5106_v47 = vadd.f32 1.0, %v9756_v62 }
 0x96f   : > { %v6906_v23 = vsel %vm6905_vm11, %v9754_v28, %v6902_v16  ;;  %v6914_v63 = vmul.f32 %v9758_v0, %v5105_v8  ;;  %9759 = vpow2.f32 %v8848_v52  ;;  %vm6919_vm13 = vweird.f32 %v9758_v0 }
 0x970   : > { %v6911_v20 = vsel %vm6908_vm12, %v6910_v53, %v6906_v23  ;;  %9761 = vrcp.f32 %v5106_v47  ;;  %vm6920_vm15 = vmor %vm6918_vm14, %vm6919_vm13  ;;  %v6939_v3 = vand.u32 2147483648, %v5106_v47  ;;  %v6937_v27 = vand.u32 2147483647, %v5106_v47  ;;  %v12079_v53 = vld [vmem:[#allocation77_spill] sm:$0xff] }
 0x971   : > { %7153 = vst.msk [vmem:[%s11058_s11 + $0x3b8] sm:$0xff] %vm7033_vm6, %v6911_v20  ;;  %v6915_v33 = vsub.f32 1.0, %v6914_v63  ;;  %vm6933_vm3 = vweird.f32 %v5106_v47 }
 0x972   : > { %7794 = vst.msk [vmem:[%s11058_s11 + $0x3b8] sm:$0xff] %vm7674_vm7, %v12077_v4  ;;  %v6940_v18 = vor.u32 1.1754944e-38, %v6939_v3  ;;  %vm6938_vm5 = vcmp.eq.f32.partialorder %v6937_v27, 8.507059e+37 }
 0x973   : > { %v6916_v25 = vmul.f32 %v9758_v0, %v6915_v33 }
 0x974   : > { %v4588_v1 = vpop.f32.mrf.mxu1 }
 0x975   : > { %v9760_v24 = vpop.eup %9759  ;;  %v6917_v19 = vadd.f32 %v9758_v0, %v6916_v25  ;;  %v8849_v14 = vmul.f32 -1.442695, %v4588_v1 }
 0x976   : > { %v9762_v41 = vpop.eup %9761  ;;  %v5107_v9 = vadd.f32 1.0, %v9760_v24 }
 0x977   : > { %v6921_v32 = vsel %vm6920_vm15, %v9758_v0, %v6917_v19  ;;  %v6929_v60 = vmul.f32 %v9762_v41, %v5106_v47  ;;  %9763 = vpow2.f32 %v8849_v14  ;;  %vm6934_vm1 = vweird.f32 %v9762_v41 }
 0x978   : > { %v6926_v58 = vsel %vm6923_vm0, %v6925_v57, %v6921_v32  ;;  %9765 = vrcp.f32 %v5107_v9  ;;  %vm6935_vm4 = vmor %vm6933_vm3, %vm6934_vm1  ;;  %v6954_v34 = vand.u32 2147483648, %v5107_v9  ;;  %v6952_v40 = vand.u32 2147483647, %v5107_v9 }
 0x979   : > { %7154 = vst.msk [vmem:[%s11058_s11 + $0x3c0] sm:$0xff] %vm7033_vm6, %v6926_v58  ;;  %v6930_v17 = vsub.f32 1.0, %v6929_v60  ;;  %vm6948_vm9 = vweird.f32 %v5107_v9 }
 0x97a   : > { %7795 = vst.msk [vmem:[%s11058_s11 + $0x3c0] sm:$0xff] %vm7674_vm7, %v11264_v50  ;;  %v6955_v45 = vor.u32 1.1754944e-38, %v6954_v34  ;;  %vm6953_vm10 = vcmp.eq.f32.partialorder %v6952_v40, 8.507059e+37  ;;  %v7543_v40 = vpop.permute.xlu0 %7542 }
 0x97b   : > { %v6931_v7 = vmul.f32 %v9762_v41, %v6930_v17 }
 0x97c   : > { %v4591_v35 = vpop.f32.mrf.mxu1 }
 0x97d   : > { %v9764_v42 = vpop.eup %9763  ;;  %v6932_v51 = vadd.f32 %v9762_v41, %v6931_v7  ;;  %v8850_v5 = vmul.f32 -1.442695, %v4591_v35 }
 0x97e   : > { %v9766_v13 = vpop.eup %9765  ;;  %v5108_v59 = vadd.f32 1.0, %v9764_v42 }
 0x97f   : > { %v6936_v12 = vsel %vm6935_vm4, %v9762_v41, %v6932_v51  ;;  %v6944_v2 = vmul.f32 %v9766_v13, %v5107_v9  ;;  %9767 = vpow2.f32 %v8850_v5  ;;  %vm6949_vm8 = vweird.f32 %v9766_v13  ;;  %v7539_v41 = vpop.permute.xlu1 %7538  ;;  %v7541_v5 = vpop.permute.xlu2 %7540 }
 0x980   : > { %v6941_v50 = vsel %vm6938_vm5, %v6940_v18, %v6936_v12  ;;  %9769 = vrcp.f32 %v5108_v59  ;;  %vm6950_vm2 = vmor %vm6948_vm9, %vm6949_vm8  ;;  %v6969_v8 = vand.u32 2147483648, %v5108_v59  ;;  %v6967_v15 = vand.u32 2147483647, %v5108_v59 }
 0x981   : > { %7155 = vst.msk [vmem:[%s11058_s11 + $0x3c8] sm:$0xff] %vm7033_vm6, %v6941_v50  ;;  %v6945_v44 = vsub.f32 1.0, %v6944_v2  ;;  %vm6963_vm12 = vweird.f32 %v5108_v59 }
 0x982   : > { %7796 = vst.msk [vmem:[%s11058_s11 + $0x3c8] sm:$0xff] %vm7674_vm7, %v12078_v54  ;;  %v6970_v55 = vor.u32 1.1754944e-38, %v6969_v8  ;;  %vm6968_vm14 = vcmp.eq.f32.partialorder %v6967_v15, 8.507059e+37 }
 0x983   : > { %v6946_v22 = vmul.f32 %v9766_v13, %v6945_v44 }
 0x984   : > { %v4593_v38 = vpop.f32.mrf.mxu1 }
 0x985   : > { %v9768_v39 = vpop.eup %9767  ;;  %v6947_v11 = vadd.f32 %v9766_v13, %v6946_v22  ;;  %v8851_v37 = vmul.f32 -1.442695, %v4593_v38 }
 0x986   : > { %v9770_v29 = vpop.eup %9769  ;;  %v5109_v61 = vadd.f32 1.0, %v9768_v39 }
 0x987   : > { %v6951_v21 = vsel %vm6950_vm2, %v9766_v13, %v6947_v11  ;;  %v6959_v30 = vmul.f32 %v9770_v29, %v5108_v59  ;;  %9771 = vpow2.f32 %v8851_v37  ;;  %vm6964_vm11 = vweird.f32 %v9770_v29 }
 0x988   : > { %v6956_v28 = vsel %vm6953_vm10, %v6955_v45, %v6951_v21  ;;  %9773 = vrcp.f32 %v5109_v61  ;;  %vm6965_vm13 = vmor %vm6963_vm12, %vm6964_vm11  ;;  %v6984_v47 = vand.u32 2147483648, %v5109_v61  ;;  %v6982_v63 = vand.u32 2147483647, %v5109_v61 }
 0x989   : > { %7156 = vst.msk [vmem:[%s11058_s11 + $0x3d0] sm:$0xff] %vm7033_vm6, %v6956_v28  ;;  %v6960_v56 = vsub.f32 1.0, %v6959_v30  ;;  %vm6978_vm0 = vweird.f32 %v5109_v61  ;;  %v7545_v30 = vpop.permute.xlu1 %7544 }
 0x98a   : > { %7797 = vst.msk [vmem:[%s11058_s11 + $0x3d0] sm:$0xff] %vm7674_vm7, %v11278_v49  ;;  %v6985_v26 = vor.u32 1.1754944e-38, %v6984_v47  ;;  %vm6983_vm3 = vcmp.eq.f32.partialorder %v6982_v63, 8.507059e+37 }
 0x98b   : > { %v6961_v48 = vmul.f32 %v9770_v29, %v6960_v56 }
 0x98c   : > { %v4596_v46 = vpop.f32.mrf.mxu1 }
 0x98d   : > { %v9772_v10 = vpop.eup %9771  ;;  %v6962_v31 = vadd.f32 %v9770_v29, %v6961_v48  ;;  %v8852_v6 = vmul.f32 -1.442695, %v4596_v46 }
 0x98e   : > { %v9774_v43 = vpop.eup %9773  ;;  %v5110_v62 = vadd.f32 1.0, %v9772_v10 }
 0x98f   : > { %v6966_v16 = vsel %vm6965_vm13, %v9770_v29, %v6962_v31  ;;  %v6974_v52 = vmul.f32 %v9774_v43, %v5109_v61  ;;  %9775 = vpow2.f32 %v8852_v6  ;;  %vm6979_vm15 = vweird.f32 %v9774_v43 }
 0x990   : > { %v6971_v49 = vsel %vm6968_vm14, %v6970_v55, %v6966_v16  ;;  %9777 = vrcp.f32 %v5110_v62  ;;  %vm6980_vm1 = vmor %vm6978_vm0, %vm6979_vm15  ;;  %v6999_v9 = vand.u32 2147483648, %v5110_v62  ;;  %v6997_v60 = vand.u32 2147483647, %v5110_v62 }
 0x991   : > { %7157 = vst.msk [vmem:[%s11058_s11 + $0x3d8] sm:$0xff] %vm7033_vm6, %v6971_v49  ;;  %v6975_v0 = vsub.f32 1.0, %v6974_v52  ;;  %vm6993_vm5 = vweird.f32 %v5110_v62 }
 0x992   : > { %7798 = vst.msk [vmem:[%s11058_s11 + $0x3d8] sm:$0xff] %vm7674_vm7, %v12079_v53  ;;  %v7000_v7 = vor.u32 1.1754944e-38, %v6999_v9  ;;  %vm6998_vm9 = vcmp.eq.f32.partialorder %v6997_v60, 8.507059e+37 }
 0x993   : > { %v6976_v23 = vmul.f32 %v9774_v43, %v6975_v0 }
 0x994   : > { %v4598_v20 = vpop.f32.mrf.mxu1 }
 0x995   : > { %v9776_v33 = vpop.eup %9775  ;;  %v6977_v4 = vadd.f32 %v9774_v43, %v6976_v23  ;;  %v8853_v36 = vmul.f32 -1.442695, %v4598_v20 }
 0x996   : > { %v9778_v25 = vpop.eup %9777  ;;  %v5111_v1 = vadd.f32 1.0, %v9776_v33 }
 0x997   : > { %v6981_v24 = vsel %vm6980_vm1, %v9774_v43, %v6977_v4  ;;  %v6989_v19 = vmul.f32 %v9778_v25, %v5110_v62  ;;  %9779 = vpow2.f32 %v8853_v36  ;;  %vm6994_vm4 = vweird.f32 %v9778_v25 }
 0x998   : > { %v6986_v14 = vsel %vm6983_vm3, %v6985_v26, %v6981_v24  ;;  %9781 = vrcp.f32 %v5111_v1  ;;  %vm6995_vm8 = vmor %vm6993_vm5, %vm6994_vm4  ;;  %v7014_v18 = vand.u32 2147483648, %v5111_v1  ;;  %v7012_v12 = vand.u32 2147483647, %v5111_v1 }
 0x999   : > { %7158 = vst.msk [vmem:[%s11058_s11 + $0x3e0] sm:$0xff] %vm7033_vm6, %v6986_v14  ;;  %v6990_v57 = vsub.f32 1.0, %v6989_v19  ;;  %vm7008_vm10 = vweird.f32 %v5111_v1 }
 0x99a   : > { %7799 = vst.msk [vmem:[%s11058_s11 + $0x3e0] sm:$0xff] %vm7674_vm7, %v7539_v41  ;;  %v7015_v44 = vor.u32 1.1754944e-38, %v7014_v18  ;;  %vm7013_vm12 = vcmp.eq.f32.partialorder %v7012_v12, 8.507059e+37 }
 0x99b   : > { %v6991_v32 = vmul.f32 %v9778_v25, %v6990_v57 }
 0x99d   : > { %v9780_v58 = vpop.eup %9779  ;;  %v6992_v17 = vadd.f32 %v9778_v25, %v6991_v32 }
 0x99e   : > { %v9782_v3 = vpop.eup %9781  ;;  %v5112_v27 = vadd.f32 1.0, %v9780_v58 }
 0x99f   : > { %v6996_v35 = vsel %vm6995_vm8, %v9778_v25, %v6992_v17  ;;  %v7004_v42 = vmul.f32 %v9782_v3, %v5111_v1  ;;  %vm7009_vm2 = vweird.f32 %v9782_v3 }
 0x9a0   : > { %v7001_v51 = vsel %vm6998_vm9, %v7000_v7, %v6996_v35  ;;  %9783 = vrcp.f32 %v5112_v27  ;;  %vm7010_vm11 = vmor %vm7008_vm10, %vm7009_vm2  ;;  %v7029_v39 = vand.u32 2147483648, %v5112_v27  ;;  %v7027_v37 = vand.u32 2147483647, %v5112_v27 }
 0x9a1   : > { %7159 = vst.msk [vmem:[%s11058_s11 + $0x3e8] sm:$0xff] %vm7033_vm6, %v7001_v51  ;;  %v7005_v13 = vsub.f32 1.0, %v7004_v42  ;;  %vm7023_vm14 = vweird.f32 %v5112_v27 }
 0x9a2   : > { %7800 = vst.msk [vmem:[%s11058_s11 + $0x3e8] sm:$0xff] %vm7674_vm7, %v7541_v5  ;;  %v7030_v45 = vor.u32 1.1754944e-38, %v7029_v39  ;;  %vm7028_vm0 = vcmp.eq.f32.partialorder %v7027_v37, 8.507059e+37 }
 0x9a3   : > { %v7006_v59 = vmul.f32 %v9782_v3, %v7005_v13 }
 0x9a5   : > { %v7007_v2 = vadd.f32 %v9782_v3, %v7006_v59 }
 0x9a6   : > { %v9784_v50 = vpop.eup %9783 }
 0x9a7   : > { %v7011_v54 = vsel %vm7010_vm11, %v9782_v3, %v7007_v2  ;;  %v7019_v34 = vmul.f32 %v9784_v50, %v5112_v27  ;;  %vm7024_vm13 = vweird.f32 %v9784_v50 }
 0x9a8   : > { %v7016_v22 = vsel %vm7013_vm12, %v7015_v44, %v7011_v54  ;;  %vm7025_vm15 = vmor %vm7023_vm14, %vm7024_vm13 }
 0x9a9   : > { %7160 = vst.msk [vmem:[%s11058_s11 + $0x3f0] sm:$0xff] %vm7033_vm6, %v7016_v22  ;;  %v7020_v38 = vsub.f32 1.0, %v7019_v34 }
 0x9aa   : > { %7801 = vst.msk [vmem:[%s11058_s11 + $0x3f0] sm:$0xff] %vm7674_vm7, %v7543_v40 }
 0x9ab   : > { %v7021_v11 = vmul.f32 %v9784_v50, %v7020_v38 }
 0x9ad   : > { %v7022_v29 = vadd.f32 %v9784_v50, %v7021_v11 }
 0x9af   : > { %v7026_v61 = vsel %vm7025_vm15, %v9784_v50, %v7022_v29 }
 0x9b0   : > { %v7031_v21 = vsel %vm7028_vm0, %v7030_v45, %v7026_v61 }
 0x9b1   : > { %7161 = vst.msk [vmem:[%s11058_s11 + $0x3f8] sm:$0xff] %vm7033_vm6, %v7031_v21 }
 0x9b2   : > { %7802 = vst.msk [vmem:[%s11058_s11 + $0x3f8] sm:$0xff] %vm7674_vm7, %v7545_v30 }
 0x9b3 PF: > { %s17_s24 = sadd.s32 1, %s9791_s24  }
 0x9b4   : > { %p14_p4 = scmp.ge.s32.totalorder %s17_s24, 4  }
 0x9b6   :  { %16 = sbr.rel (!%p14_p4) target bundleno = 1 (0x1), region = 81 }

</bundles_post_ra>
